<compile_context>
chip_gen: v5e
topology: v5e:2x2
jax: 0.10.0
libtpu: 0.0.40
codegen_flags: <defaults>
</compile_context>

<pallas_src>
import functools

import jax
import jax.numpy as jnp
from jax.experimental import pallas as pl
from jax.experimental.pallas import tpu as pltpu

LANE = 128        # lane width; channels padded once to a multiple of this
MXU_TILE = 256    # preferred K/N tile on v6e/v7x (2x(256x256) MXU)
_TAPS3 = tuple((i, j) for i in range(3) for j in range(3))


def _round_up(x, m):
    return ((x + m - 1) // m) * m


def _tile(c):
    """Largest MXU-matched tile (<= MXU_TILE) dividing padded channel count c."""
    return MXU_TILE if c % MXU_TILE == 0 else LANE


def _vmem_limit(est_bytes):
    # per-layer VMEM cap from actual block bytes: 2x headroom, floor 32 MiB,
    # cap below the 128 MiB physical of v5e/v6e.
    return int(min(max(2 * est_bytes, 32 * 1024 * 1024), 100 * 1024 * 1024))


# ----------------------------------------------------------------------------
# Generic fused direct-convolution kernel (stride-2 darknet conv, 1x1 convs)
# ----------------------------------------------------------------------------
def _conv_kernel(x_ref, w_ref, sc_ref, sh_ref, o_ref, acc_ref, *, taps, out_hw, act):
    ho, wo = out_hw
    k = pl.program_id(2)  # Cin-tile reduction axis (innermost, "arbitrary")

    @pl.when(k == 0)
    def _():
        acc_ref[...] = jnp.zeros_like(acc_ref)

    for i, (dh, dw) in enumerate(taps):
        # unit-stride shifted window of the VMEM-resident input block
        xs = x_ref[0, pl.ds(dh, ho), pl.ds(dw, wo), :]            # (ho, wo, tk) bf16
        # incremental scratch accumulation: keeps vreg pressure low
        acc_ref[...] += jnp.dot(xs.reshape(ho * wo, -1), w_ref[i],
                                preferred_element_type=jnp.float32)

    @pl.when(k == pl.num_programs(2) - 1)
    def _():
        a = acc_ref[...] * sc_ref[...] + sh_ref[...]              # folded BN / bias (f32)
        if act == "leaky":
            a = jnp.maximum(a, 0.1 * a)                           # LeakyReLU(0.1)
        elif act == "sigmoid":
            # sigmoid(x) = 0.5*(tanh(x/2)+1): one EUP op, exact [0,1]
            a = 0.5 * (jnp.tanh(0.5 * a) + 1.0)
        o_ref[0] = a.astype(o_ref.dtype)


def conv_taps(x, w_taps, scale, shift, taps, out_hw, act="none"):
    """x: (N, Hs, Ws, Cp_in) bf16 (spatially prepared).  w_taps: (T, Cp_in, Cp_out)
    bf16.  scale/shift: (1, Cp_out) f32.  Returns (N, Ho, Wo, Cp_out) bf16."""
    n, hs, ws, cin = x.shape
    nt, _, cout = w_taps.shape
    assert nt == len(taps)
    ho, wo = out_hw
    tk, tn = _tile(cin), _tile(cout)
    assert cin % tk == 0 and cout % tn == 0, (cin, cout)

    est = (2 * hs * ws * tk * 2 + 2 * nt * tk * tn * 2
           + 2 * ho * wo * tn * 2 + ho * wo * tn * 4)

    out = pl.pallas_call(
        functools.partial(_conv_kernel, taps=tuple(taps), out_hw=(ho, wo), act=act),
        out_shape=jax.ShapeDtypeStruct((n, ho * wo, cout), jnp.bfloat16),
        grid=(n, cout // tn, cin // tk),
        in_specs=[
            pl.BlockSpec((1, hs, ws, tk), lambda b, j, k: (b, 0, 0, k)),
            pl.BlockSpec((nt, tk, tn), lambda b, j, k: (0, k, j)),
            pl.BlockSpec((1, tn), lambda b, j, k: (0, j)),
            pl.BlockSpec((1, tn), lambda b, j, k: (0, j)),
        ],
        out_specs=pl.BlockSpec((1, ho * wo, tn), lambda b, j, k: (b, 0, j)),
        scratch_shapes=[pltpu.VMEM((ho * wo, tn), jnp.float32)],
        compiler_params=pltpu.CompilerParams(
            dimension_semantics=("parallel", "parallel", "arbitrary"),
            vmem_limit_bytes=_vmem_limit(est)),
    )(x, w_taps, scale, shift)
    return out.reshape(n, ho, wo, cout)


def conv2d(x, w_taps, scale, shift, *, ksize, stride=1, pad=0, act="none"):
    n, h, w, _ = x.shape
    kh, kw = ksize
    if pad:
        x = jnp.pad(x, ((0, 0), (pad, pad), (pad, pad), (0, 0)))
    hp, wp = h + 2 * pad, w + 2 * pad
    ho = (hp - kh) // stride + 1
    wo = (wp - kw) // stride + 1
    if stride == 1:
        taps = [(i, j) for i in range(kh) for j in range(kw)]
        xin = x
    elif stride == 2:
        # space-to-depth phase stack: every stride-2 tap becomes a unit-stride
        # read of one parity phase (phases stacked along H).
        hh, wh = (hp + 1) // 2, (wp + 1) // 2
        phases = []
        for ph in (0, 1):
            for pw in (0, 1):
                p = x[:, ph::2, pw::2, :]
                p = jnp.pad(p, ((0, 0), (0, hh - p.shape[1]),
                                (0, wh - p.shape[2]), (0, 0)))
                phases.append(p)
        xin = jnp.concatenate(phases, axis=1)                     # (N, 4*hh, wh, C)
        taps = [(((i % 2) * 2 + (j % 2)) * hh + i // 2, j // 2)
                for i in range(kh) for j in range(kw)]
    else:
        raise NotImplementedError("stride must be 1 or 2")
    return conv_taps(xin, w_taps, scale, shift, taps, (ho, wo), act=act)


# ----------------------------------------------------------------------------
# Fused DarknetResidual block: 1x1 + BN + leaky -> 3x3 + BN + leaky -> + x
# (mid activation and 3x3 halo live entirely in VMEM)
# ----------------------------------------------------------------------------
def _res_block_kernel(x_ref, w1_ref, s1_ref, h1_ref, w2_ref, s2_ref, h2_ref,
                      o_ref, hpad_ref, acc_ref):
    _, h, w, cp = x_ref.shape
    mid = hpad_ref.shape[-1]
    tmid = _tile(mid)
    tco = acc_ref.shape[-1]
    x2d = x_ref[0].reshape(h * w, cp)                             # bf16

    # 1x1 bottleneck conv + BN + LeakyReLU, written straight into the zero-
    # padded VMEM halo buffer (one mid-channel tile at a time).
    hpad_ref[...] = jnp.zeros_like(hpad_ref)
    for m0 in range(0, mid, tmid):
        a1 = jnp.dot(x2d, w1_ref[0, :, m0:m0 + tmid],
                     preferred_element_type=jnp.float32)
        a1 = a1 * s1_ref[:, m0:m0 + tmid] + h1_ref[:, m0:m0 + tmid]
        a1 = jnp.maximum(a1, 0.1 * a1)
        hpad_ref[1:1 + h, 1:1 + w, m0:m0 + tmid] = (
            a1.astype(hpad_ref.dtype).reshape(h, w, tmid))

    # 3x3 conv over the halo buffer, one Cout tile at a time, per-tap
    # accumulation into an f32 VMEM scratch.
    for c0 in range(0, cp, tco):
        first = True
        for m0 in range(0, mid, tmid):
            for t, (dh, dw) in enumerate(_TAPS3):
                xs = hpad_ref[dh:dh + h, dw:dw + w, m0:m0 + tmid]
                d = jnp.dot(xs.reshape(h * w, tmid),
                            w2_ref[t, m0:m0 + tmid, c0:c0 + tco],
                            preferred_element_type=jnp.float32)
                if first:
                    acc_ref[...] = d
                    first = False
                else:
                    acc_ref[...] += d
        a2 = acc_ref[...] * s2_ref[:, c0:c0 + tco] + h2_ref[:, c0:c0 + tco]
        a2 = jnp.maximum(a2, 0.1 * a2)                            # LeakyReLU(0.1)
        a2 = a2 + x2d[:, c0:c0 + tco].astype(jnp.float32)         # residual (post-act)
        o_ref[0, :, c0:c0 + tco] = a2.astype(o_ref.dtype)


def residual_block(x, rb):
    n, h, w, cp = x.shape
    mid = rb["w1"].shape[-1]
    tco = _tile(cp)
    est = (4 * h * w * cp * 2                         # x block + out block (bf16, dbl-buffered)
           + 2 * (cp * mid + 9 * mid * cp) * 2        # weights (bf16, dbl-buffered)
           + (h + 2) * (w + 2) * mid * 2              # halo scratch (bf16)
           + h * w * tco * 4)                         # f32 accumulator tile
    # grid=(n,) keeps the 1x1 result in VMEM without recomputation per Cout
    # tile; batch is the parallel (megacore) axis.
    out = pl.pallas_call(
        _res_block_kernel,
        out_shape=jax.ShapeDtypeStruct((n, h * w, cp), jnp.bfloat16),
        grid=(n,),
        in_specs=[
            pl.BlockSpec((1, h, w, cp), lambda b: (b, 0, 0, 0)),
            pl.BlockSpec((1, cp, mid), lambda b: (0, 0, 0)),
            pl.BlockSpec((1, mid), lambda b: (0, 0)),
            pl.BlockSpec((1, mid), lambda b: (0, 0)),
            pl.BlockSpec((9, mid, cp), lambda b: (0, 0, 0)),
            pl.BlockSpec((1, cp), lambda b: (0, 0)),
            pl.BlockSpec((1, cp), lambda b: (0, 0)),
        ],
        out_specs=pl.BlockSpec((1, h * w, cp), lambda b: (b, 0, 0)),
        scratch_shapes=[pltpu.VMEM((h + 2, w + 2, mid), jnp.bfloat16),
                        pltpu.VMEM((h * w, tco), jnp.float32)],
        compiler_params=pltpu.CompilerParams(
            dimension_semantics=("parallel",),
            vmem_limit_bytes=_vmem_limit(est)),
    )(x, rb["w1"], rb["s1"], rb["h1"], rb["w2"], rb["s2"], rb["h2"])
    return out.reshape(n, h, w, cp)


# ----------------------------------------------------------------------------
# Fused ConvTranspose2d(k=3, s=2, p=1), output exactly 2Hx2W (output_size arg):
# 4-phase subpixel decomposition, all phases in ONE kernel (x read once).
# tap entries: (phase index, row offset, col offset) into the (H+1, W+1)
# zero-padded input; weight row t of the packed (9, Cin, Cout) tensor matches.
# ----------------------------------------------------------------------------
_CT_TAPS = ((0, 0, 0),
            (1, 0, 0), (1, 0, 1),
            (2, 0, 0), (2, 1, 0),
            (3, 0, 0), (3, 0, 1), (3, 1, 0), (3, 1, 1))
_CT_W_IDX = ((1, 1),
             (1, 2), (1, 0),
             (2, 1), (0, 1),
             (2, 2), (2, 0), (0, 2), (0, 0))


def _convtrans_kernel(x_ref, w_ref, b_ref, o_ref, xpad_ref, acc_ref):
    _, h, w, _ = x_ref.shape
    k = pl.program_id(2)  # Cin-tile reduction axis

    @pl.when(k == 0)
    def _():
        acc_ref[...] = jnp.zeros_like(acc_ref)

    # (H+1, W+1) zero-padded view of the input tile, built in VMEM (no HBM pad)
    xpad_ref[...] = jnp.zeros_like(xpad_ref)
    xpad_ref[0:h, 0:w, :] = x_ref[0]

    for t, (p, dh, dw) in enumerate(_CT_TAPS):
        xs = xpad_ref[pl.ds(dh, h), pl.ds(dw, w), :]
        acc_ref[p] += jnp.dot(xs.reshape(h * w, -1), w_ref[t],
                              preferred_element_type=jnp.float32)

    @pl.when(k == pl.num_programs(2) - 1)
    def _():
        o_ref[0] = (acc_ref[...] + b_ref[...]).astype(o_ref.dtype)


def conv_transpose2d(x, w_all, bias):
    n, h, w, cin = x.shape
    cout = w_all.shape[-1]
    tk, tn = _tile(cin), _tile(cout)
    est = (2 * h * w * tk * 2 + 2 * 9 * tk * tn * 2 + 2 * 4 * h * w * tn * 2
           + 4 * h * w * tn * 4 + (h + 1) * (w + 1) * tk * 2)
    out = pl.pallas_call(
        _convtrans_kernel,
        out_shape=jax.ShapeDtypeStruct((n, 4, h * w, cout), jnp.bfloat16),
        grid=(n, cout // tn, cin // tk),
        in_specs=[
            pl.BlockSpec((1, h, w, tk), lambda b, j, k: (b, 0, 0, k)),
            pl.BlockSpec((9, tk, tn), lambda b, j, k: (0, k, j)),
            pl.BlockSpec((1, tn), lambda b, j, k: (0, j)),
        ],
        out_specs=pl.BlockSpec((1, 4, h * w, tn), lambda b, j, k: (b, 0, 0, j)),
        scratch_shapes=[pltpu.VMEM((h + 1, w + 1, tk), jnp.bfloat16),
                        pltpu.VMEM((4, h * w, tn), jnp.float32)],
        compiler_params=pltpu.CompilerParams(
            dimension_semantics=("parallel", "parallel", "arbitrary"),
            vmem_limit_bytes=_vmem_limit(est)),
    )(x, w_all, bias)
    # interleave the 4 parity phases -> (N, 2H, 2W, Cout): single XLA relayout
    y = out.reshape(n, 2, 2, h, w, cout)
    y = jnp.transpose(y, (0, 3, 1, 4, 2, 5)).reshape(n, 2 * h, 2 * w, cout)
    return y


# ----------------------------------------------------------------------------
# Parameters: PyTorch-layout init + one-time conversion to kernel layout
# ----------------------------------------------------------------------------
def init_params(key, channels, blocks, output_classes):
    keys = iter(jax.random.split(key, 256))
    eps = 1e-5

    def conv_w(shape):
        return 0.1 * jax.random.normal(next(keys), shape, jnp.float32)

    def small_b(shape):
        return 0.01 * jax.random.normal(next(keys), shape, jnp.float32)

    def bn_scale(c):   # gamma=1, running_var=1  (eval-mode fold)
        return jnp.full((c,), 1.0 / jnp.sqrt(1.0 + eps), jnp.float32)

    def bn_shift(c):   # beta=0, running_mean=0
        return jnp.zeros((c,), jnp.float32)

    p_blocks = []
    for i in range(1, len(channels)):
        cin, cout = channels[i - 1], channels[i]
        blk = {"dark_w": conv_w((cout, cin, 3, 3)),
               "dark_s": bn_scale(cout), "dark_h": bn_shift(cout), "res": []}
        for _ in range(blocks[i - 1]):
            mid = cout // 2
            blk["res"].append({
                "w1": conv_w((mid, cout, 1, 1)), "s1": bn_scale(mid), "h1": bn_shift(mid),
                "w2": conv_w((cout, mid, 3, 3)), "s2": bn_scale(cout), "h2": bn_shift(cout)})
        p_blocks.append(blk)

    p_skips, p_trans = [], []
    for i in range(1, len(channels)):
        c = channels[i]
        p_skips.append({"w": conv_w((c, 2 * c, 1, 1)), "b": small_b((c,))})
        p_trans.append({"w": conv_w((c, channels[i - 1], 3, 3)),
                        "b": small_b((channels[i - 1],))})

    p_last = {"w": conv_w((output_classes, channels[0], 1, 1)),
              "b": small_b((output_classes,))}
    return {"blocks": p_blocks, "skips": p_skips, "trans": p_trans, "last": p_last}


def prep_conv_w(w_oihw, cp_in, cp_out):
    co, ci, kh, kw = w_oihw.shape
    wt = jnp.transpose(w_oihw, (2, 3, 1, 0)).reshape(kh * kw, ci, co)
    wt = jnp.pad(wt, ((0, 0), (0, cp_in - ci), (0, cp_out - co)))
    return wt.astype(jnp.bfloat16)


def prep_skip_w(w_oihw, c_real, cp_half, cp_out):
    # 1x1 conv over concat([encoder (lane-padded), decoder (lane-padded)])
    co = w_oihw.shape[0]
    w2d = w_oihw[:, :, 0, 0]                        # (Cout, 2*c_real)
    wa = jnp.transpose(w2d[:, :c_real])             # encoder half
    wb = jnp.transpose(w2d[:, c_real:])             # decoder half
    wa = jnp.pad(wa, ((0, cp_half - c_real), (0, cp_out - co)))
    wb = jnp.pad(wb, ((0, cp_half - c_real), (0, cp_out - co)))
    return jnp.concatenate([wa, wb], axis=0)[None].astype(jnp.bfloat16)


def prep_convtrans_w(w_iohw, cp_in, cp_out):
    ci, co = w_iohw.shape[0], w_iohw.shape[1]
    wt = jnp.stack([w_iohw[:, :, kh, kw] for kh, kw in _CT_W_IDX], axis=0)
    wt = jnp.pad(wt, ((0, 0), (0, cp_in - ci), (0, cp_out - co)))
    return wt.astype(jnp.bfloat16)


def prep_vec(v, cp):
    return jnp.pad(v, (0, cp - v.shape[0])).reshape(1, cp).astype(jnp.float32)


def prepare_params(params, channels, output_classes):
    prep = {"blocks": [], "skips": [], "trans": []}
    for idx, blk in enumerate(params["blocks"]):
        cin, cout = channels[idx], channels[idx + 1]
        cpi, cpo = _round_up(cin, LANE), _round_up(cout, LANE)
        pb = {"dark_w": prep_conv_w(blk["dark_w"], cpi, cpo),
              "dark_s": prep_vec(blk["dark_s"], cpo),
              "dark_h": prep_vec(blk["dark_h"], cpo), "res": []}
        for rb in blk["res"]:
            cpm = _round_up(cout // 2, LANE)
            pb["res"].append({
                "w1": prep_conv_w(rb["w1"], cpo, cpm),
                "s1": prep_vec(rb["s1"], cpm), "h1": prep_vec(rb["h1"], cpm),
                "w2": prep_conv_w(rb["w2"], cpm, cpo),
                "s2": prep_vec(rb["s2"], cpo), "h2": prep_vec(rb["h2"], cpo)})
        prep["blocks"].append(pb)

    for idx in range(len(channels) - 1):
        c_enc = channels[idx + 1]
        cpo = _round_up(c_enc, LANE)
        cpo_up = _round_up(channels[idx], LANE)
        sk = params["skips"][idx]
        prep["skips"].append({"w": prep_skip_w(sk["w"], c_enc, cpo, cpo),
                              "b": prep_vec(sk["b"], cpo),
                              "ones": jnp.ones((1, cpo), jnp.float32)})
        ct = params["trans"][idx]
        prep["trans"].append({"w": prep_convtrans_w(ct["w"], cpo, cpo_up),
                              "b": prep_vec(ct["b"], cpo_up)})

    lc = params["last"]
    cpl = _round_up(output_classes, LANE)
    prep["last"] = {"w": prep_conv_w(lc["w"], _round_up(channels[0], LANE), cpl),
                    "b": prep_vec(lc["b"], cpl),
                    "ones": jnp.ones((1, cpl), jnp.float32)}
    return prep


# ----------------------------------------------------------------------------
# Forward pass
# ----------------------------------------------------------------------------
def udarknet_forward(x_nchw, prep, *, output_classes):
    n, c, h, w = x_nchw.shape
    cp0 = _round_up(c, LANE)
    # NCHW -> NHWC, bf16, channel-pad ONCE; padded layout kept end-to-end.
    x = jnp.transpose(x_nchw, (0, 2, 3, 1)).astype(jnp.bfloat16)
    x = jnp.pad(x, ((0, 0), (0, 0), (0, 0), (0, cp0 - c)))

    conv_outputs = []
    for blk in prep["blocks"]:
        # DarknetBlock: 3x3 stride-2 conv + folded BN + LeakyReLU(0.1)
        x = conv2d(x, blk["dark_w"], blk["dark_s"], blk["dark_h"],
                   ksize=(3, 3), stride=2, pad=1, act="leaky")
        for rb in blk["res"]:
            # fused DarknetResidual: 1x1 + 3x3 + residual in one kernel
            x = residual_block(x, rb)
        conv_outputs.append(x)

    for i in range(len(prep["blocks"]) - 1, -1, -1):
        # SkipConnection: channel concat (already lane-padded) + 1x1 conv (bias)
        xc = jnp.concatenate([conv_outputs[i], x], axis=-1)
        sk = prep["skips"][i]
        x = conv2d(xc, sk["w"], sk["ones"], sk["b"], ksize=(1, 1), act="none")
        # ConvTranspose(k=3, s=2, p=1, output_size=2Hx2W), fused 4-phase kernel
        ct = prep["trans"][i]
        x = conv_transpose2d(x, ct["w"], ct["b"])

    lc = prep["last"]
    x = conv2d(x, lc["w"], lc["ones"], lc["b"], ksize=(1, 1), act="sigmoid")
    x = x[..., :output_classes].astype(jnp.float32)      # unpad only at the head
    return jnp.transpose(x, (0, 3, 1, 2))                # NHWC -> NCHW


if __name__ == "__main__":
    channels = [4, 8, 16]
    blocks = [1, 1]
    output_classes = 3

    key = jax.random.PRNGKey(0)
    kx, kp = jax.random.split(key)
    x = jax.random.normal(kx, (2, 4, 16, 16), jnp.float32)   # NCHW, like PyTorch
    params = init_params(kp, channels, blocks, output_classes)
    prep = prepare_params(params, channels, output_classes)

    fwd = jax.jit(functools.partial(udarknet_forward, output_classes=output_classes))
    out = jax.block_until_ready(fwd(x, prep))

    assert out.shape == (2, output_classes, 16, 16), out.shape
    assert bool(jnp.all(jnp.isfinite(out)))
    assert bool(jnp.all((out >= 0.0) & (out <= 1.0)))        # sigmoid output range
    print("KERNEL_OK")
</pallas_src>

<mosaic_0001>
module attributes {stable_mosaic.version = 11 : i64} {
  func.func @_conv_kernel(%arg0: i32, %arg1: i32, %arg2: i32, %arg3: memref<1x36x9x128xbf16, #tpu.memory_space<vmem>>, %arg4: memref<9x128x128xbf16, #tpu.memory_space<vmem>>, %arg5: memref<1x128xf32, #tpu.memory_space<vmem>>, %arg6: memref<1x128xf32, #tpu.memory_space<vmem>>, %arg7: memref<1x64x128xbf16, #tpu.memory_space<vmem>>, %arg8: memref<64x128xf32, #tpu.memory_space<vmem>>) attributes {dimension_semantics = [#tpu.dimension_semantics<parallel>, #tpu.dimension_semantics<parallel>, #tpu.dimension_semantics<arbitrary>], iteration_bounds = array<i64: 2, 1, 1>, scalar_prefetch = 0 : i64, scratch_operands = 1 : i64, tpu.core_type = #tpu.core_type<tc>, window_params = [{transform_indices = @transform_0, window_bounds = array<i64: 1, 36, 9, 128>}, {transform_indices = @transform_1, window_bounds = array<i64: 9, 128, 128>}, {transform_indices = @transform_2, window_bounds = array<i64: 1, 128>}, {transform_indices = @transform_3, window_bounds = array<i64: 1, 128>}, {transform_indices = @transform_4, window_bounds = array<i64: 1, 64, 128>}]} {
    %c0_i32 = arith.constant 0 : i32
    %0 = arith.cmpi eq, %arg2, %c0_i32 : i32
    %1 = arith.extui %0 : i1 to i32
    %c0_i32_0 = arith.constant 0 : i32
    %2 = arith.cmpi ne, %1, %c0_i32_0 : i32
    scf.if %2 {
      %cst_97 = arith.constant 0.000000e+00 : f32
      %87 = vector.broadcast %cst_97 : f32 to vector<64x128xf32>
      %c0_98 = arith.constant 0 : index
      %c0_99 = arith.constant 0 : index
      %88 = vector.load %arg8[%c0_98, %c0_99] : memref<64x128xf32, #tpu.memory_space<vmem>>, vector<64x128xf32>
      tpu.vector_store %arg8[%c0_98, %c0_99], %87 {strides = array<i32>} : memref<64x128xf32, #tpu.memory_space<vmem>>, vector<64x128xf32>,
    } else {
    }
    %c0 = arith.constant 0 : index
    %c0_1 = arith.constant 0 : index
    %c0_2 = arith.constant 0 : index
    %c0_3 = arith.constant 0 : index
    %3 = vector.load %arg3[%c0, %c0_1, %c0_2, %c0_3] : memref<1x36x9x128xbf16, #tpu.memory_space<vmem>>, vector<1x8x8x128xbf16>
    %4 = vector.shape_cast %3 : vector<1x8x8x128xbf16> to vector<8x8x128xbf16>
    %c0_4 = arith.constant 0 : index
    %c0_5 = arith.constant 0 : index
    %5 = vector.load %arg8[%c0_4, %c0_5] : memref<64x128xf32, #tpu.memory_space<vmem>>, vector<64x128xf32>
    %6 = vector.shape_cast %4 : vector<8x8x128xbf16> to vector<64x128xbf16>
    %c0_6 = arith.constant 0 : index
    %c0_7 = arith.constant 0 : index
    %c0_8 = arith.constant 0 : index
    %7 = vector.load %arg4[%c0_6, %c0_7, %c0_8] : memref<9x128x128xbf16, #tpu.memory_space<vmem>>, vector<1x128x128xbf16>
    %8 = vector.shape_cast %7 : vector<1x128x128xbf16> to vector<128x128xbf16>
    %cst = arith.constant dense<0.000000e+00> : vector<64x128xf32>
    %9 = tpu.matmul %6, %8, %cst {dimension_numbers = #tpu.dot_dimension_numbers<[1], [0], [0], [1], [0, 0, 1, 1], [], []>} : vector<64x128xbf16>, vector<128x128xbf16>, vector<64x128xf32> -> vector<64x128xf32>
    %10 = arith.addf %5, %9 : vector<64x128xf32>
    %c0_9 = arith.constant 0 : index
    %c0_10 = arith.constant 0 : index
    %11 = vector.load %arg8[%c0_9, %c0_10] : memref<64x128xf32, #tpu.memory_space<vmem>>, vector<64x128xf32>
    tpu.vector_store %arg8[%c0_9, %c0_10], %10 {strides = array<i32>} : memref<64x128xf32, #tpu.memory_space<vmem>>, vector<64x128xf32>,
    %c0_11 = arith.constant 0 : index
    %c9 = arith.constant 9 : index
    %c0_12 = arith.constant 0 : index
    %c0_13 = arith.constant 0 : index
    %12 = vector.load %arg3[%c0_11, %c9, %c0_12, %c0_13] : memref<1x36x9x128xbf16, #tpu.memory_space<vmem>>, vector<1x8x8x128xbf16>
    %13 = vector.shape_cast %12 : vector<1x8x8x128xbf16> to vector<8x8x128xbf16>
    %c0_14 = arith.constant 0 : index
    %c0_15 = arith.constant 0 : index
    %14 = vector.load %arg8[%c0_14, %c0_15] : memref<64x128xf32, #tpu.memory_space<vmem>>, vector<64x128xf32>
    %15 = vector.shape_cast %13 : vector<8x8x128xbf16> to vector<64x128xbf16>
    %c1 = arith.constant 1 : index
    %c0_16 = arith.constant 0 : index
    %c0_17 = arith.constant 0 : index
    %16 = vector.load %arg4[%c1, %c0_16, %c0_17] : memref<9x128x128xbf16, #tpu.memory_space<vmem>>, vector<1x128x128xbf16>
    %17 = vector.shape_cast %16 : vector<1x128x128xbf16> to vector<128x128xbf16>
    %cst_18 = arith.constant dense<0.000000e+00> : vector<64x128xf32>
    %18 = tpu.matmul %15, %17, %cst_18 {dimension_numbers = #tpu.dot_dimension_numbers<[1], [0], [0], [1], [0, 0, 1, 1], [], []>} : vector<64x128xbf16>, vector<128x128xbf16>, vector<64x128xf32> -> vector<64x128xf32>
    %19 = arith.addf %14, %18 : vector<64x128xf32>
    %c0_19 = arith.constant 0 : index
    %c0_20 = arith.constant 0 : index
    %20 = vector.load %arg8[%c0_19, %c0_20] : memref<64x128xf32, #tpu.memory_space<vmem>>, vector<64x128xf32>
    tpu.vector_store %arg8[%c0_19, %c0_20], %19 {strides = array<i32>} : memref<64x128xf32, #tpu.memory_space<vmem>>, vector<64x128xf32>,
    %c0_21 = arith.constant 0 : index
    %c0_22 = arith.constant 0 : index
    %c1_23 = arith.constant 1 : index
    %c0_24 = arith.constant 0 : index
    %21 = vector.load %arg3[%c0_21, %c0_22, %c1_23, %c0_24] : memref<1x36x9x128xbf16, #tpu.memory_space<vmem>>, vector<1x8x8x128xbf16>
    %22 = vector.shape_cast %21 : vector<1x8x8x128xbf16> to vector<8x8x128xbf16>
    %c0_25 = arith.constant 0 : index
    %c0_26 = arith.constant 0 : index
    %23 = vector.load %arg8[%c0_25, %c0_26] : memref<64x128xf32, #tpu.memory_space<vmem>>, vector<64x128xf32>
    %24 = vector.shape_cast %22 : vector<8x8x128xbf16> to vector<64x128xbf16>
    %c2 = arith.constant 2 : index
    %c0_27 = arith.constant 0 : index
    %c0_28 = arith.constant 0 : index
    %25 = vector.load %arg4[%c2, %c0_27, %c0_28] : memref<9x128x128xbf16, #tpu.memory_space<vmem>>, vector<1x128x128xbf16>
    %26 = vector.shape_cast %25 : vector<1x128x128xbf16> to vector<128x128xbf16>
    %cst_29 = arith.constant dense<0.000000e+00> : vector<64x128xf32>
    %27 = tpu.matmul %24, %26, %cst_29 {dimension_numbers = #tpu.dot_dimension_numbers<[1], [0], [0], [1], [0, 0, 1, 1], [], []>} : vector<64x128xbf16>, vector<128x128xbf16>, vector<64x128xf32> -> vector<64x128xf32>
    %28 = arith.addf %23, %27 : vector<64x128xf32>
    %c0_30 = arith.constant 0 : index
    %c0_31 = arith.constant 0 : index
    %29 = vector.load %arg8[%c0_30, %c0_31] : memref<64x128xf32, #tpu.memory_space<vmem>>, vector<64x128xf32>
    tpu.vector_store %arg8[%c0_30, %c0_31], %28 {strides = array<i32>} : memref<64x128xf32, #tpu.memory_space<vmem>>, vector<64x128xf32>,
    %c0_32 = arith.constant 0 : index
    %c18 = arith.constant 18 : index
    %c0_33 = arith.constant 0 : index
    %c0_34 = arith.constant 0 : index
    %30 = vector.load %arg3[%c0_32, %c18, %c0_33, %c0_34] : memref<1x36x9x128xbf16, #tpu.memory_space<vmem>>, vector<1x8x8x128xbf16>
    %31 = vector.shape_cast %30 : vector<1x8x8x128xbf16> to vector<8x8x128xbf16>
    %c0_35 = arith.constant 0 : index
    %c0_36 = arith.constant 0 : index
    %32 = vector.load %arg8[%c0_35, %c0_36] : memref<64x128xf32, #tpu.memory_space<vmem>>, vector<64x128xf32>
    %33 = vector.shape_cast %31 : vector<8x8x128xbf16> to vector<64x128xbf16>
    %c3 = arith.constant 3 : index
    %c0_37 = arith.constant 0 : index
    %c0_38 = arith.constant 0 : index
    %34 = vector.load %arg4[%c3, %c0_37, %c0_38] : memref<9x128x128xbf16, #tpu.memory_space<vmem>>, vector<1x128x128xbf16>
    %35 = vector.shape_cast %34 : vector<1x128x128xbf16> to vector<128x128xbf16>
    %cst_39 = arith.constant dense<0.000000e+00> : vector<64x128xf32>
    %36 = tpu.matmul %33, %35, %cst_39 {dimension_numbers = #tpu.dot_dimension_numbers<[1], [0], [0], [1], [0, 0, 1, 1], [], []>} : vector<64x128xbf16>, vector<128x128xbf16>, vector<64x128xf32> -> vector<64x128xf32>
    %37 = arith.addf %32, %36 : vector<64x128xf32>
    %c0_40 = arith.constant 0 : index
    %c0_41 = arith.constant 0 : index
    %38 = vector.load %arg8[%c0_40, %c0_41] : memref<64x128xf32, #tpu.memory_space<vmem>>, vector<64x128xf32>
    tpu.vector_store %arg8[%c0_40, %c0_41], %37 {strides = array<i32>} : memref<64x128xf32, #tpu.memory_space<vmem>>, vector<64x128xf32>,
    %c0_42 = arith.constant 0 : index
    %c27 = arith.constant 27 : index
    %c0_43 = arith.constant 0 : index
    %c0_44 = arith.constant 0 : index
    %39 = vector.load %arg3[%c0_42, %c27, %c0_43, %c0_44] : memref<1x36x9x128xbf16, #tpu.memory_space<vmem>>, vector<1x8x8x128xbf16>
    %40 = vector.shape_cast %39 : vector<1x8x8x128xbf16> to vector<8x8x128xbf16>
    %c0_45 = arith.constant 0 : index
    %c0_46 = arith.constant 0 : index
    %41 = vector.load %arg8[%c0_45, %c0_46] : memref<64x128xf32, #tpu.memory_space<vmem>>, vector<64x128xf32>
    %42 = vector.shape_cast %40 : vector<8x8x128xbf16> to vector<64x128xbf16>
    %c4 = arith.constant 4 : index
    %c0_47 = arith.constant 0 : index
    %c0_48 = arith.constant 0 : index
    %43 = vector.load %arg4[%c4, %c0_47, %c0_48] : memref<9x128x128xbf16, #tpu.memory_space<vmem>>, vector<1x128x128xbf16>
    %44 = vector.shape_cast %43 : vector<1x128x128xbf16> to vector<128x128xbf16>
    %cst_49 = arith.constant dense<0.000000e+00> : vector<64x128xf32>
    %45 = tpu.matmul %42, %44, %cst_49 {dimension_numbers = #tpu.dot_dimension_numbers<[1], [0], [0], [1], [0, 0, 1, 1], [], []>} : vector<64x128xbf16>, vector<128x128xbf16>, vector<64x128xf32> -> vector<64x128xf32>
    %46 = arith.addf %41, %45 : vector<64x128xf32>
    %c0_50 = arith.constant 0 : index
    %c0_51 = arith.constant 0 : index
    %47 = vector.load %arg8[%c0_50, %c0_51] : memref<64x128xf32, #tpu.memory_space<vmem>>, vector<64x128xf32>
    tpu.vector_store %arg8[%c0_50, %c0_51], %46 {strides = array<i32>} : memref<64x128xf32, #tpu.memory_space<vmem>>, vector<64x128xf32>,
    %c0_52 = arith.constant 0 : index
    %c18_53 = arith.constant 18 : index
    %c1_54 = arith.constant 1 : index
    %c0_55 = arith.constant 0 : index
    %48 = vector.load %arg3[%c0_52, %c18_53, %c1_54, %c0_55] : memref<1x36x9x128xbf16, #tpu.memory_space<vmem>>, vector<1x8x8x128xbf16>
    %49 = vector.shape_cast %48 : vector<1x8x8x128xbf16> to vector<8x8x128xbf16>
    %c0_56 = arith.constant 0 : index
    %c0_57 = arith.constant 0 : index
    %50 = vector.load %arg8[%c0_56, %c0_57] : memref<64x128xf32, #tpu.memory_space<vmem>>, vector<64x128xf32>
    %51 = vector.shape_cast %49 : vector<8x8x128xbf16> to vector<64x128xbf16>
    %c5 = arith.constant 5 : index
    %c0_58 = arith.constant 0 : index
    %c0_59 = arith.constant 0 : index
    %52 = vector.load %arg4[%c5, %c0_58, %c0_59] : memref<9x128x128xbf16, #tpu.memory_space<vmem>>, vector<1x128x128xbf16>
    %53 = vector.shape_cast %52 : vector<1x128x128xbf16> to vector<128x128xbf16>
    %cst_60 = arith.constant dense<0.000000e+00> : vector<64x128xf32>
    %54 = tpu.matmul %51, %53, %cst_60 {dimension_numbers = #tpu.dot_dimension_numbers<[1], [0], [0], [1], [0, 0, 1, 1], [], []>} : vector<64x128xbf16>, vector<128x128xbf16>, vector<64x128xf32> -> vector<64x128xf32>
    %55 = arith.addf %50, %54 : vector<64x128xf32>
    %c0_61 = arith.constant 0 : index
    %c0_62 = arith.constant 0 : index
    %56 = vector.load %arg8[%c0_61, %c0_62] : memref<64x128xf32, #tpu.memory_space<vmem>>, vector<64x128xf32>
    tpu.vector_store %arg8[%c0_61, %c0_62], %55 {strides = array<i32>} : memref<64x128xf32, #tpu.memory_space<vmem>>, vector<64x128xf32>,
    %c0_63 = arith.constant 0 : index
    %c1_64 = arith.constant 1 : index
    %c0_65 = arith.constant 0 : index
    %c0_66 = arith.constant 0 : index
    %57 = vector.load %arg3[%c0_63, %c1_64, %c0_65, %c0_66] : memref<1x36x9x128xbf16, #tpu.memory_space<vmem>>, vector<1x8x8x128xbf16>
    %58 = vector.shape_cast %57 : vector<1x8x8x128xbf16> to vector<8x8x128xbf16>
    %c0_67 = arith.constant 0 : index
    %c0_68 = arith.constant 0 : index
    %59 = vector.load %arg8[%c0_67, %c0_68] : memref<64x128xf32, #tpu.memory_space<vmem>>, vector<64x128xf32>
    %60 = vector.shape_cast %58 : vector<8x8x128xbf16> to vector<64x128xbf16>
    %c6 = arith.constant 6 : index
    %c0_69 = arith.constant 0 : index
    %c0_70 = arith.constant 0 : index
    %61 = vector.load %arg4[%c6, %c0_69, %c0_70] : memref<9x128x128xbf16, #tpu.memory_space<vmem>>, vector<1x128x128xbf16>
    %62 = vector.shape_cast %61 : vector<1x128x128xbf16> to vector<128x128xbf16>
    %cst_71 = arith.constant dense<0.000000e+00> : vector<64x128xf32>
    %63 = tpu.matmul %60, %62, %cst_71 {dimension_numbers = #tpu.dot_dimension_numbers<[1], [0], [0], [1], [0, 0, 1, 1], [], []>} : vector<64x128xbf16>, vector<128x128xbf16>, vector<64x128xf32> -> vector<64x128xf32>
    %64 = arith.addf %59, %63 : vector<64x128xf32>
    %c0_72 = arith.constant 0 : index
    %c0_73 = arith.constant 0 : index
    %65 = vector.load %arg8[%c0_72, %c0_73] : memref<64x128xf32, #tpu.memory_space<vmem>>, vector<64x128xf32>
    tpu.vector_store %arg8[%c0_72, %c0_73], %64 {strides = array<i32>} : memref<64x128xf32, #tpu.memory_space<vmem>>, vector<64x128xf32>,
    %c0_74 = arith.constant 0 : index
    %c10 = arith.constant 10 : index
    %c0_75 = arith.constant 0 : index
    %c0_76 = arith.constant 0 : index
    %66 = vector.load %arg3[%c0_74, %c10, %c0_75, %c0_76] : memref<1x36x9x128xbf16, #tpu.memory_space<vmem>>, vector<1x8x8x128xbf16>
    %67 = vector.shape_cast %66 : vector<1x8x8x128xbf16> to vector<8x8x128xbf16>
    %c0_77 = arith.constant 0 : index
    %c0_78 = arith.constant 0 : index
    %68 = vector.load %arg8[%c0_77, %c0_78] : memref<64x128xf32, #tpu.memory_space<vmem>>, vector<64x128xf32>
    %69 = vector.shape_cast %67 : vector<8x8x128xbf16> to vector<64x128xbf16>
    %c7 = arith.constant 7 : index
    %c0_79 = arith.constant 0 : index
    %c0_80 = arith.constant 0 : index
    %70 = vector.load %arg4[%c7, %c0_79, %c0_80] : memref<9x128x128xbf16, #tpu.memory_space<vmem>>, vector<1x128x128xbf16>
    %71 = vector.shape_cast %70 : vector<1x128x128xbf16> to vector<128x128xbf16>
    %cst_81 = arith.constant dense<0.000000e+00> : vector<64x128xf32>
    %72 = tpu.matmul %69, %71, %cst_81 {dimension_numbers = #tpu.dot_dimension_numbers<[1], [0], [0], [1], [0, 0, 1, 1], [], []>} : vector<64x128xbf16>, vector<128x128xbf16>, vector<64x128xf32> -> vector<64x128xf32>
    %73 = arith.addf %68, %72 : vector<64x128xf32>
    %c0_82 = arith.constant 0 : index
    %c0_83 = arith.constant 0 : index
    %74 = vector.load %arg8[%c0_82, %c0_83] : memref<64x128xf32, #tpu.memory_space<vmem>>, vector<64x128xf32>
    tpu.vector_store %arg8[%c0_82, %c0_83], %73 {strides = array<i32>} : memref<64x128xf32, #tpu.memory_space<vmem>>, vector<64x128xf32>,
    %c0_84 = arith.constant 0 : index
    %c1_85 = arith.constant 1 : index
    %c1_86 = arith.constant 1 : index
    %c0_87 = arith.constant 0 : index
    %75 = vector.load %arg3[%c0_84, %c1_85, %c1_86, %c0_87] : memref<1x36x9x128xbf16, #tpu.memory_space<vmem>>, vector<1x8x8x128xbf16>
    %76 = vector.shape_cast %75 : vector<1x8x8x128xbf16> to vector<8x8x128xbf16>
    %c0_88 = arith.constant 0 : index
    %c0_89 = arith.constant 0 : index
    %77 = vector.load %arg8[%c0_88, %c0_89] : memref<64x128xf32, #tpu.memory_space<vmem>>, vector<64x128xf32>
    %78 = vector.shape_cast %76 : vector<8x8x128xbf16> to vector<64x128xbf16>
    %c8 = arith.constant 8 : index
    %c0_90 = arith.constant 0 : index
    %c0_91 = arith.constant 0 : index
    %79 = vector.load %arg4[%c8, %c0_90, %c0_91] : memref<9x128x128xbf16, #tpu.memory_space<vmem>>, vector<1x128x128xbf16>
    %80 = vector.shape_cast %79 : vector<1x128x128xbf16> to vector<128x128xbf16>
    %cst_92 = arith.constant dense<0.000000e+00> : vector<64x128xf32>
    %81 = tpu.matmul %78, %80, %cst_92 {dimension_numbers = #tpu.dot_dimension_numbers<[1], [0], [0], [1], [0, 0, 1, 1], [], []>} : vector<64x128xbf16>, vector<128x128xbf16>, vector<64x128xf32> -> vector<64x128xf32>
    %82 = arith.addf %77, %81 : vector<64x128xf32>
    %c0_93 = arith.constant 0 : index
    %c0_94 = arith.constant 0 : index
    %83 = vector.load %arg8[%c0_93, %c0_94] : memref<64x128xf32, #tpu.memory_space<vmem>>, vector<64x128xf32>
    tpu.vector_store %arg8[%c0_93, %c0_94], %82 {strides = array<i32>} : memref<64x128xf32, #tpu.memory_space<vmem>>, vector<64x128xf32>,
    %c0_i32_95 = arith.constant 0 : i32
    %84 = arith.cmpi eq, %arg2, %c0_i32_95 : i32
    %85 = arith.extui %84 : i1 to i32
    %c0_i32_96 = arith.constant 0 : i32
    %86 = arith.cmpi ne, %85, %c0_i32_96 : i32
    scf.if %86 {
      %c0_97 = arith.constant 0 : index
      %c0_98 = arith.constant 0 : index
      %87 = vector.load %arg8[%c0_97, %c0_98] : memref<64x128xf32, #tpu.memory_space<vmem>>, vector<64x128xf32>
      %c0_99 = arith.constant 0 : index
      %c0_100 = arith.constant 0 : index
      %88 = vector.load %arg5[%c0_99, %c0_100] : memref<1x128xf32, #tpu.memory_space<vmem>>, vector<1x128xf32>
      %89 = vector.broadcast %88 : vector<1x128xf32> to vector<64x128xf32>
      %90 = arith.mulf %87, %89 : vector<64x128xf32>
      %c0_101 = arith.constant 0 : index
      %c0_102 = arith.constant 0 : index
      %91 = vector.load %arg6[%c0_101, %c0_102] : memref<1x128xf32, #tpu.memory_space<vmem>>, vector<1x128xf32>
      %92 = vector.broadcast %91 : vector<1x128xf32> to vector<64x128xf32>
      %93 = arith.addf %90, %92 : vector<64x128xf32>
      %cst_103 = arith.constant 1.000000e-01 : f32
      %94 = vector.broadcast %cst_103 : f32 to vector<64x128xf32>
      %95 = arith.mulf %94, %93 : vector<64x128xf32>
      %96 = arith.maximumf %93, %95 : vector<64x128xf32>
      %97 = arith.truncf %96 : vector<64x128xf32> to vector<64x128xbf16>
      %c0_104 = arith.constant 0 : index
      %c0_105 = arith.constant 0 : index
      %c0_106 = arith.constant 0 : index
      %98 = vector.load %arg7[%c0_104, %c0_105, %c0_106] : memref<1x64x128xbf16, #tpu.memory_space<vmem>>, vector<1x64x128xbf16>
      %99 = vector.shape_cast %98 : vector<1x64x128xbf16> to vector<64x128xbf16>
      %100 = vector.shape_cast %97 : vector<64x128xbf16> to vector<1x64x128xbf16>
      tpu.vector_store %arg7[%c0_104, %c0_105, %c0_106], %100 {strides = array<i32>} : memref<1x64x128xbf16, #tpu.memory_space<vmem>>, vector<1x64x128xbf16>,
    } else {
    }
    return
  }
  func.func @transform_0(%arg0: i32, %arg1: i32, %arg2: i32) -> (i32, i32, i32, i32) {
    %c0_i32 = arith.constant 0 : i32
    %c0_i32_0 = arith.constant 0 : i32
    %c0_i32_1 = arith.constant 0 : i32
    return %arg0, %c0_i32, %c0_i32_0, %arg2 : i32, i32, i32, i32
  }
  func.func @transform_1(%arg0: i32, %arg1: i32, %arg2: i32) -> (i32, i32, i32) {
    %c0_i32 = arith.constant 0 : i32
    %c0_i32_0 = arith.constant 0 : i32
    return %c0_i32, %arg2, %arg1 : i32, i32, i32
  }
  func.func @transform_2(%arg0: i32, %arg1: i32, %arg2: i32) -> (i32, i32) {
    %c0_i32 = arith.constant 0 : i32
    %c0_i32_0 = arith.constant 0 : i32
    return %c0_i32, %arg1 : i32, i32
  }
  func.func @transform_3(%arg0: i32, %arg1: i32, %arg2: i32) -> (i32, i32) {
    %c0_i32 = arith.constant 0 : i32
    %c0_i32_0 = arith.constant 0 : i32
    return %c0_i32, %arg1 : i32, i32
  }
  func.func @transform_4(%arg0: i32, %arg1: i32, %arg2: i32) -> (i32, i32, i32) {
    %c0_i32 = arith.constant 0 : i32
    %c0_i32_0 = arith.constant 0 : i32
    return %arg0, %c0_i32, %arg1 : i32, i32, i32
  }
}

module attributes {stable_mosaic.version = 11 : i64} {
  func.func @_res_block_kernel(%arg0: i32, %arg1: memref<1x8x8x128xbf16, #tpu.memory_space<vmem>>, %arg2: memref<1x128x128xbf16, #tpu.memory_space<vmem>>, %arg3: memref<1x128xf32, #tpu.memory_space<vmem>>, %arg4: memref<1x128xf32, #tpu.memory_space<vmem>>, %arg5: memref<9x128x128xbf16, #tpu.memory_space<vmem>>, %arg6: memref<1x128xf32, #tpu.memory_space<vmem>>, %arg7: memref<1x128xf32, #tpu.memory_space<vmem>>, %arg8: memref<1x64x128xbf16, #tpu.memory_space<vmem>>, %arg9: memref<10x10x128xbf16, #tpu.memory_space<vmem>>, %arg10: memref<64x128xf32, #tpu.memory_space<vmem>>) attributes {dimension_semantics = [#tpu.dimension_semantics<parallel>], iteration_bounds = array<i64: 2>, scalar_prefetch = 0 : i64, scratch_operands = 2 : i64, tpu.core_type = #tpu.core_type<tc>, window_params = [{transform_indices = @transform_0, window_bounds = array<i64: 1, 8, 8, 128>}, {pipeline_mode = #tpu.pipeline_mode<synchronous>, transform_indices = @transform_1, window_bounds = array<i64: 1, 128, 128>}, {pipeline_mode = #tpu.pipeline_mode<synchronous>, transform_indices = @transform_2, window_bounds = array<i64: 1, 128>}, {pipeline_mode = #tpu.pipeline_mode<synchronous>, transform_indices = @transform_3, window_bounds = array<i64: 1, 128>}, {pipeline_mode = #tpu.pipeline_mode<synchronous>, transform_indices = @transform_4, window_bounds = array<i64: 9, 128, 128>}, {pipeline_mode = #tpu.pipeline_mode<synchronous>, transform_indices = @transform_5, window_bounds = array<i64: 1, 128>}, {pipeline_mode = #tpu.pipeline_mode<synchronous>, transform_indices = @transform_6, window_bounds = array<i64: 1, 128>}, {transform_indices = @transform_7, window_bounds = array<i64: 1, 64, 128>}]} {
    %c0 = arith.constant 0 : index
    %c0_0 = arith.constant 0 : index
    %c0_1 = arith.constant 0 : index
    %c0_2 = arith.constant 0 : index
    %0 = vector.load %arg1[%c0, %c0_0, %c0_1, %c0_2] : memref<1x8x8x128xbf16, #tpu.memory_space<vmem>>, vector<1x8x8x128xbf16>
    %1 = vector.shape_cast %0 : vector<1x8x8x128xbf16> to vector<8x8x128xbf16>
    %2 = vector.shape_cast %1 : vector<8x8x128xbf16> to vector<64x128xbf16>
    %cst = arith.constant 0.000000e+00 : bf16
    %3 = vector.broadcast %cst : bf16 to vector<10x10x128xbf16>
    %c0_3 = arith.constant 0 : index
    %c0_4 = arith.constant 0 : index
    %c0_5 = arith.constant 0 : index
    %4 = vector.load %arg9[%c0_3, %c0_4, %c0_5] : memref<10x10x128xbf16, #tpu.memory_space<vmem>>, vector<10x10x128xbf16>
    tpu.vector_store %arg9[%c0_3, %c0_4, %c0_5], %3 {strides = array<i32>} : memref<10x10x128xbf16, #tpu.memory_space<vmem>>, vector<10x10x128xbf16>,
    %c0_6 = arith.constant 0 : index
    %c0_7 = arith.constant 0 : index
    %c0_8 = arith.constant 0 : index
    %5 = vector.load %arg2[%c0_6, %c0_7, %c0_8] : memref<1x128x128xbf16, #tpu.memory_space<vmem>>, vector<1x128x128xbf16>
    %6 = vector.shape_cast %5 : vector<1x128x128xbf16> to vector<128x128xbf16>
    %cst_9 = arith.constant dense<0.000000e+00> : vector<64x128xf32>
    %7 = tpu.matmul %2, %6, %cst_9 {dimension_numbers = #tpu.dot_dimension_numbers<[1], [0], [0], [1], [0, 0, 1, 1], [], []>} : vector<64x128xbf16>, vector<128x128xbf16>, vector<64x128xf32> -> vector<64x128xf32>
    %c0_10 = arith.constant 0 : index
    %c0_11 = arith.constant 0 : index
    %8 = vector.load %arg3[%c0_10, %c0_11] : memref<1x128xf32, #tpu.memory_space<vmem>>, vector<1x128xf32>
    %9 = vector.broadcast %8 : vector<1x128xf32> to vector<64x128xf32>
    %10 = arith.mulf %7, %9 : vector<64x128xf32>
    %c0_12 = arith.constant 0 : index
    %c0_13 = arith.constant 0 : index
    %11 = vector.load %arg4[%c0_12, %c0_13] : memref<1x128xf32, #tpu.memory_space<vmem>>, vector<1x128xf32>
    %12 = vector.broadcast %11 : vector<1x128xf32> to vector<64x128xf32>
    %13 = arith.addf %10, %12 : vector<64x128xf32>
    %cst_14 = arith.constant 1.000000e-01 : f32
    %14 = vector.broadcast %cst_14 : f32 to vector<64x128xf32>
    %15 = arith.mulf %14, %13 : vector<64x128xf32>
    %16 = arith.maximumf %13, %15 : vector<64x128xf32>
    %17 = arith.truncf %16 : vector<64x128xf32> to vector<64x128xbf16>
    %18 = vector.shape_cast %17 : vector<64x128xbf16> to vector<8x8x128xbf16>
    %c1 = arith.constant 1 : index
    %c1_15 = arith.constant 1 : index
    %c0_16 = arith.constant 0 : index
    %19 = vector.load %arg9[%c1, %c1_15, %c0_16] : memref<10x10x128xbf16, #tpu.memory_space<vmem>>, vector<8x8x128xbf16>
    tpu.vector_store %arg9[%c1, %c1_15, %c0_16], %18 {strides = array<i32>} : memref<10x10x128xbf16, #tpu.memory_space<vmem>>, vector<8x8x128xbf16>,
    %c0_17 = arith.constant 0 : index
    %c0_18 = arith.constant 0 : index
    %c0_19 = arith.constant 0 : index
    %20 = vector.load %arg9[%c0_17, %c0_18, %c0_19] : memref<10x10x128xbf16, #tpu.memory_space<vmem>>, vector<8x8x128xbf16>
    %21 = vector.shape_cast %20 : vector<8x8x128xbf16> to vector<64x128xbf16>
    %c0_20 = arith.constant 0 : index
    %c0_21 = arith.constant 0 : index
    %c0_22 = arith.constant 0 : index
    %22 = vector.load %arg5[%c0_20, %c0_21, %c0_22] : memref<9x128x128xbf16, #tpu.memory_space<vmem>>, vector<1x128x128xbf16>
    %23 = vector.shape_cast %22 : vector<1x128x128xbf16> to vector<128x128xbf16>
    %cst_23 = arith.constant dense<0.000000e+00> : vector<64x128xf32>
    %24 = tpu.matmul %21, %23, %cst_23 {dimension_numbers = #tpu.dot_dimension_numbers<[1], [0], [0], [1], [0, 0, 1, 1], [], []>} : vector<64x128xbf16>, vector<128x128xbf16>, vector<64x128xf32> -> vector<64x128xf32>
    %c0_24 = arith.constant 0 : index
    %c0_25 = arith.constant 0 : index
    %25 = vector.load %arg10[%c0_24, %c0_25] : memref<64x128xf32, #tpu.memory_space<vmem>>, vector<64x128xf32>
    tpu.vector_store %arg10[%c0_24, %c0_25], %24 {strides = array<i32>} : memref<64x128xf32, #tpu.memory_space<vmem>>, vector<64x128xf32>,
    %c0_26 = arith.constant 0 : index
    %c1_27 = arith.constant 1 : index
    %c0_28 = arith.constant 0 : index
    %26 = vector.load %arg9[%c0_26, %c1_27, %c0_28] : memref<10x10x128xbf16, #tpu.memory_space<vmem>>, vector<8x8x128xbf16>
    %27 = vector.shape_cast %26 : vector<8x8x128xbf16> to vector<64x128xbf16>
    %c1_29 = arith.constant 1 : index
    %c0_30 = arith.constant 0 : index
    %c0_31 = arith.constant 0 : index
    %28 = vector.load %arg5[%c1_29, %c0_30, %c0_31] : memref<9x128x128xbf16, #tpu.memory_space<vmem>>, vector<1x128x128xbf16>
    %29 = vector.shape_cast %28 : vector<1x128x128xbf16> to vector<128x128xbf16>
    %cst_32 = arith.constant dense<0.000000e+00> : vector<64x128xf32>
    %30 = tpu.matmul %27, %29, %cst_32 {dimension_numbers = #tpu.dot_dimension_numbers<[1], [0], [0], [1], [0, 0, 1, 1], [], []>} : vector<64x128xbf16>, vector<128x128xbf16>, vector<64x128xf32> -> vector<64x128xf32>
    %c0_33 = arith.constant 0 : index
    %c0_34 = arith.constant 0 : index
    %31 = vector.load %arg10[%c0_33, %c0_34] : memref<64x128xf32, #tpu.memory_space<vmem>>, vector<64x128xf32>
    %32 = arith.addf %31, %30 : vector<64x128xf32>
    %c0_35 = arith.constant 0 : index
    %c0_36 = arith.constant 0 : index
    %33 = vector.load %arg10[%c0_35, %c0_36] : memref<64x128xf32, #tpu.memory_space<vmem>>, vector<64x128xf32>
    tpu.vector_store %arg10[%c0_35, %c0_36], %32 {strides = array<i32>} : memref<64x128xf32, #tpu.memory_space<vmem>>, vector<64x128xf32>,
    %c0_37 = arith.constant 0 : index
    %c2 = arith.constant 2 : index
    %c0_38 = arith.constant 0 : index
    %34 = vector.load %arg9[%c0_37, %c2, %c0_38] : memref<10x10x128xbf16, #tpu.memory_space<vmem>>, vector<8x8x128xbf16>
    %35 = vector.shape_cast %34 : vector<8x8x128xbf16> to vector<64x128xbf16>
    %c2_39 = arith.constant 2 : index
    %c0_40 = arith.constant 0 : index
    %c0_41 = arith.constant 0 : index
    %36 = vector.load %arg5[%c2_39, %c0_40, %c0_41] : memref<9x128x128xbf16, #tpu.memory_space<vmem>>, vector<1x128x128xbf16>
    %37 = vector.shape_cast %36 : vector<1x128x128xbf16> to vector<128x128xbf16>
    %cst_42 = arith.constant dense<0.000000e+00> : vector<64x128xf32>
    %38 = tpu.matmul %35, %37, %cst_42 {dimension_numbers = #tpu.dot_dimension_numbers<[1], [0], [0], [1], [0, 0, 1, 1], [], []>} : vector<64x128xbf16>, vector<128x128xbf16>, vector<64x128xf32> -> vector<64x128xf32>
    %c0_43 = arith.constant 0 : index
    %c0_44 = arith.constant 0 : index
    %39 = vector.load %arg10[%c0_43, %c0_44] : memref<64x128xf32, #tpu.memory_space<vmem>>, vector<64x128xf32>
    %40 = arith.addf %39, %38 : vector<64x128xf32>
    %c0_45 = arith.constant 0 : index
    %c0_46 = arith.constant 0 : index
    %41 = vector.load %arg10[%c0_45, %c0_46] : memref<64x128xf32, #tpu.memory_space<vmem>>, vector<64x128xf32>
    tpu.vector_store %arg10[%c0_45, %c0_46], %40 {strides = array<i32>} : memref<64x128xf32, #tpu.memory_space<vmem>>, vector<64x128xf32>,
    %c1_47 = arith.constant 1 : index
    %c0_48 = arith.constant 0 : index
    %c0_49 = arith.constant 0 : index
    %42 = vector.load %arg9[%c1_47, %c0_48, %c0_49] : memref<10x10x128xbf16, #tpu.memory_space<vmem>>, vector<8x8x128xbf16>
    %43 = vector.shape_cast %42 : vector<8x8x128xbf16> to vector<64x128xbf16>
    %c3 = arith.constant 3 : index
    %c0_50 = arith.constant 0 : index
    %c0_51 = arith.constant 0 : index
    %44 = vector.load %arg5[%c3, %c0_50, %c0_51] : memref<9x128x128xbf16, #tpu.memory_space<vmem>>, vector<1x128x128xbf16>
    %45 = vector.shape_cast %44 : vector<1x128x128xbf16> to vector<128x128xbf16>
    %cst_52 = arith.constant dense<0.000000e+00> : vector<64x128xf32>
    %46 = tpu.matmul %43, %45, %cst_52 {dimension_numbers = #tpu.dot_dimension_numbers<[1], [0], [0], [1], [0, 0, 1, 1], [], []>} : vector<64x128xbf16>, vector<128x128xbf16>, vector<64x128xf32> -> vector<64x128xf32>
    %c0_53 = arith.constant 0 : index
    %c0_54 = arith.constant 0 : index
    %47 = vector.load %arg10[%c0_53, %c0_54] : memref<64x128xf32, #tpu.memory_space<vmem>>, vector<64x128xf32>
    %48 = arith.addf %47, %46 : vector<64x128xf32>
    %c0_55 = arith.constant 0 : index
    %c0_56 = arith.constant 0 : index
    %49 = vector.load %arg10[%c0_55, %c0_56] : memref<64x128xf32, #tpu.memory_space<vmem>>, vector<64x128xf32>
    tpu.vector_store %arg10[%c0_55, %c0_56], %48 {strides = array<i32>} : memref<64x128xf32, #tpu.memory_space<vmem>>, vector<64x128xf32>,
    %c1_57 = arith.constant 1 : index
    %c1_58 = arith.constant 1 : index
    %c0_59 = arith.constant 0 : index
    %50 = vector.load %arg9[%c1_57, %c1_58, %c0_59] : memref<10x10x128xbf16, #tpu.memory_space<vmem>>, vector<8x8x128xbf16>
    %51 = vector.shape_cast %50 : vector<8x8x128xbf16> to vector<64x128xbf16>
    %c4 = arith.constant 4 : index
    %c0_60 = arith.constant 0 : index
    %c0_61 = arith.constant 0 : index
    %52 = vector.load %arg5[%c4, %c0_60, %c0_61] : memref<9x128x128xbf16, #tpu.memory_space<vmem>>, vector<1x128x128xbf16>
    %53 = vector.shape_cast %52 : vector<1x128x128xbf16> to vector<128x128xbf16>
    %cst_62 = arith.constant dense<0.000000e+00> : vector<64x128xf32>
    %54 = tpu.matmul %51, %53, %cst_62 {dimension_numbers = #tpu.dot_dimension_numbers<[1], [0], [0], [1], [0, 0, 1, 1], [], []>} : vector<64x128xbf16>, vector<128x128xbf16>, vector<64x128xf32> -> vector<64x128xf32>
    %c0_63 = arith.constant 0 : index
    %c0_64 = arith.constant 0 : index
    %55 = vector.load %arg10[%c0_63, %c0_64] : memref<64x128xf32, #tpu.memory_space<vmem>>, vector<64x128xf32>
    %56 = arith.addf %55, %54 : vector<64x128xf32>
    %c0_65 = arith.constant 0 : index
    %c0_66 = arith.constant 0 : index
    %57 = vector.load %arg10[%c0_65, %c0_66] : memref<64x128xf32, #tpu.memory_space<vmem>>, vector<64x128xf32>
    tpu.vector_store %arg10[%c0_65, %c0_66], %56 {strides = array<i32>} : memref<64x128xf32, #tpu.memory_space<vmem>>, vector<64x128xf32>,
    %c1_67 = arith.constant 1 : index
    %c2_68 = arith.constant 2 : index
    %c0_69 = arith.constant 0 : index
    %58 = vector.load %arg9[%c1_67, %c2_68, %c0_69] : memref<10x10x128xbf16, #tpu.memory_space<vmem>>, vector<8x8x128xbf16>
    %59 = vector.shape_cast %58 : vector<8x8x128xbf16> to vector<64x128xbf16>
    %c5 = arith.constant 5 : index
    %c0_70 = arith.constant 0 : index
    %c0_71 = arith.constant 0 : index
    %60 = vector.load %arg5[%c5, %c0_70, %c0_71] : memref<9x128x128xbf16, #tpu.memory_space<vmem>>, vector<1x128x128xbf16>
    %61 = vector.shape_cast %60 : vector<1x128x128xbf16> to vector<128x128xbf16>
    %cst_72 = arith.constant dense<0.000000e+00> : vector<64x128xf32>
    %62 = tpu.matmul %59, %61, %cst_72 {dimension_numbers = #tpu.dot_dimension_numbers<[1], [0], [0], [1], [0, 0, 1, 1], [], []>} : vector<64x128xbf16>, vector<128x128xbf16>, vector<64x128xf32> -> vector<64x128xf32>
    %c0_73 = arith.constant 0 : index
    %c0_74 = arith.constant 0 : index
    %63 = vector.load %arg10[%c0_73, %c0_74] : memref<64x128xf32, #tpu.memory_space<vmem>>, vector<64x128xf32>
    %64 = arith.addf %63, %62 : vector<64x128xf32>
    %c0_75 = arith.constant 0 : index
    %c0_76 = arith.constant 0 : index
    %65 = vector.load %arg10[%c0_75, %c0_76] : memref<64x128xf32, #tpu.memory_space<vmem>>, vector<64x128xf32>
    tpu.vector_store %arg10[%c0_75, %c0_76], %64 {strides = array<i32>} : memref<64x128xf32, #tpu.memory_space<vmem>>, vector<64x128xf32>,
    %c2_77 = arith.constant 2 : index
    %c0_78 = arith.constant 0 : index
    %c0_79 = arith.constant 0 : index
    %66 = vector.load %arg9[%c2_77, %c0_78, %c0_79] : memref<10x10x128xbf16, #tpu.memory_space<vmem>>, vector<8x8x128xbf16>
    %67 = vector.shape_cast %66 : vector<8x8x128xbf16> to vector<64x128xbf16>
    %c6 = arith.constant 6 : index
    %c0_80 = arith.constant 0 : index
    %c0_81 = arith.constant 0 : index
    %68 = vector.load %arg5[%c6, %c0_80, %c0_81] : memref<9x128x128xbf16, #tpu.memory_space<vmem>>, vector<1x128x128xbf16>
    %69 = vector.shape_cast %68 : vector<1x128x128xbf16> to vector<128x128xbf16>
    %cst_82 = arith.constant dense<0.000000e+00> : vector<64x128xf32>
    %70 = tpu.matmul %67, %69, %cst_82 {dimension_numbers = #tpu.dot_dimension_numbers<[1], [0], [0], [1], [0, 0, 1, 1], [], []>} : vector<64x128xbf16>, vector<128x128xbf16>, vector<64x128xf32> -> vector<64x128xf32>
    %c0_83 = arith.constant 0 : index
    %c0_84 = arith.constant 0 : index
    %71 = vector.load %arg10[%c0_83, %c0_84] : memref<64x128xf32, #tpu.memory_space<vmem>>, vector<64x128xf32>
    %72 = arith.addf %71, %70 : vector<64x128xf32>
    %c0_85 = arith.constant 0 : index
    %c0_86 = arith.constant 0 : index
    %73 = vector.load %arg10[%c0_85, %c0_86] : memref<64x128xf32, #tpu.memory_space<vmem>>, vector<64x128xf32>
    tpu.vector_store %arg10[%c0_85, %c0_86], %72 {strides = array<i32>} : memref<64x128xf32, #tpu.memory_space<vmem>>, vector<64x128xf32>,
    %c2_87 = arith.constant 2 : index
    %c1_88 = arith.constant 1 : index
    %c0_89 = arith.constant 0 : index
    %74 = vector.load %arg9[%c2_87, %c1_88, %c0_89] : memref<10x10x128xbf16, #tpu.memory_space<vmem>>, vector<8x8x128xbf16>
    %75 = vector.shape_cast %74 : vector<8x8x128xbf16> to vector<64x128xbf16>
    %c7 = arith.constant 7 : index
    %c0_90 = arith.constant 0 : index
    %c0_91 = arith.constant 0 : index
    %76 = vector.load %arg5[%c7, %c0_90, %c0_91] : memref<9x128x128xbf16, #tpu.memory_space<vmem>>, vector<1x128x128xbf16>
    %77 = vector.shape_cast %76 : vector<1x128x128xbf16> to vector<128x128xbf16>
    %cst_92 = arith.constant dense<0.000000e+00> : vector<64x128xf32>
    %78 = tpu.matmul %75, %77, %cst_92 {dimension_numbers = #tpu.dot_dimension_numbers<[1], [0], [0], [1], [0, 0, 1, 1], [], []>} : vector<64x128xbf16>, vector<128x128xbf16>, vector<64x128xf32> -> vector<64x128xf32>
    %c0_93 = arith.constant 0 : index
    %c0_94 = arith.constant 0 : index
    %79 = vector.load %arg10[%c0_93, %c0_94] : memref<64x128xf32, #tpu.memory_space<vmem>>, vector<64x128xf32>
    %80 = arith.addf %79, %78 : vector<64x128xf32>
    %c0_95 = arith.constant 0 : index
    %c0_96 = arith.constant 0 : index
    %81 = vector.load %arg10[%c0_95, %c0_96] : memref<64x128xf32, #tpu.memory_space<vmem>>, vector<64x128xf32>
    tpu.vector_store %arg10[%c0_95, %c0_96], %80 {strides = array<i32>} : memref<64x128xf32, #tpu.memory_space<vmem>>, vector<64x128xf32>,
    %c2_97 = arith.constant 2 : index
    %c2_98 = arith.constant 2 : index
    %c0_99 = arith.constant 0 : index
    %82 = vector.load %arg9[%c2_97, %c2_98, %c0_99] : memref<10x10x128xbf16, #tpu.memory_space<vmem>>, vector<8x8x128xbf16>
    %83 = vector.shape_cast %82 : vector<8x8x128xbf16> to vector<64x128xbf16>
    %c8 = arith.constant 8 : index
    %c0_100 = arith.constant 0 : index
    %c0_101 = arith.constant 0 : index
    %84 = vector.load %arg5[%c8, %c0_100, %c0_101] : memref<9x128x128xbf16, #tpu.memory_space<vmem>>, vector<1x128x128xbf16>
    %85 = vector.shape_cast %84 : vector<1x128x128xbf16> to vector<128x128xbf16>
    %cst_102 = arith.constant dense<0.000000e+00> : vector<64x128xf32>
    %86 = tpu.matmul %83, %85, %cst_102 {dimension_numbers = #tpu.dot_dimension_numbers<[1], [0], [0], [1], [0, 0, 1, 1], [], []>} : vector<64x128xbf16>, vector<128x128xbf16>, vector<64x128xf32> -> vector<64x128xf32>
    %c0_103 = arith.constant 0 : index
    %c0_104 = arith.constant 0 : index
    %87 = vector.load %arg10[%c0_103, %c0_104] : memref<64x128xf32, #tpu.memory_space<vmem>>, vector<64x128xf32>
    %88 = arith.addf %87, %86 : vector<64x128xf32>
    %c0_105 = arith.constant 0 : index
    %c0_106 = arith.constant 0 : index
    %89 = vector.load %arg10[%c0_105, %c0_106] : memref<64x128xf32, #tpu.memory_space<vmem>>, vector<64x128xf32>
    tpu.vector_store %arg10[%c0_105, %c0_106], %88 {strides = array<i32>} : memref<64x128xf32, #tpu.memory_space<vmem>>, vector<64x128xf32>,
    %c0_107 = arith.constant 0 : index
    %c0_108 = arith.constant 0 : index
    %90 = vector.load %arg10[%c0_107, %c0_108] : memref<64x128xf32, #tpu.memory_space<vmem>>, vector<64x128xf32>
    %c0_109 = arith.constant 0 : index
    %c0_110 = arith.constant 0 : index
    %91 = vector.load %arg6[%c0_109, %c0_110] : memref<1x128xf32, #tpu.memory_space<vmem>>, vector<1x128xf32>
    %92 = vector.broadcast %91 : vector<1x128xf32> to vector<64x128xf32>
    %93 = arith.mulf %90, %92 : vector<64x128xf32>
    %c0_111 = arith.constant 0 : index
    %c0_112 = arith.constant 0 : index
    %94 = vector.load %arg7[%c0_111, %c0_112] : memref<1x128xf32, #tpu.memory_space<vmem>>, vector<1x128xf32>
    %95 = vector.broadcast %94 : vector<1x128xf32> to vector<64x128xf32>
    %96 = arith.addf %93, %95 : vector<64x128xf32>
    %cst_113 = arith.constant 1.000000e-01 : f32
    %97 = vector.broadcast %cst_113 : f32 to vector<64x128xf32>
    %98 = arith.mulf %97, %96 : vector<64x128xf32>
    %99 = arith.maximumf %96, %98 : vector<64x128xf32>
    %100 = arith.extf %2 : vector<64x128xbf16> to vector<64x128xf32>
    %101 = arith.addf %99, %100 : vector<64x128xf32>
    %102 = arith.truncf %101 : vector<64x128xf32> to vector<64x128xbf16>
    %c0_114 = arith.constant 0 : index
    %c0_115 = arith.constant 0 : index
    %c0_116 = arith.constant 0 : index
    %103 = vector.load %arg8[%c0_114, %c0_115, %c0_116] : memref<1x64x128xbf16, #tpu.memory_space<vmem>>, vector<1x64x128xbf16>
    %104 = vector.shape_cast %103 : vector<1x64x128xbf16> to vector<64x128xbf16>
    %105 = vector.shape_cast %102 : vector<64x128xbf16> to vector<1x64x128xbf16>
    tpu.vector_store %arg8[%c0_114, %c0_115, %c0_116], %105 {strides = array<i32>} : memref<1x64x128xbf16, #tpu.memory_space<vmem>>, vector<1x64x128xbf16>,
    return
  }
  func.func @transform_0(%arg0: i32) -> (i32, i32, i32, i32) {
    %c0_i32 = arith.constant 0 : i32
    %c0_i32_0 = arith.constant 0 : i32
    %c0_i32_1 = arith.constant 0 : i32
    %c0_i32_2 = arith.constant 0 : i32
    return %arg0, %c0_i32, %c0_i32_0, %c0_i32_1 : i32, i32, i32, i32
  }
  func.func @transform_1(%arg0: i32) -> (i32, i32, i32) {
    %c0_i32 = arith.constant 0 : i32
    %c0_i32_0 = arith.constant 0 : i32
    %c0_i32_1 = arith.constant 0 : i32
    %c0_i32_2 = arith.constant 0 : i32
    return %c0_i32, %c0_i32_0, %c0_i32_1 : i32, i32, i32
  }
  func.func @transform_2(%arg0: i32) -> (i32, i32) {
    %c0_i32 = arith.constant 0 : i32
    %c0_i32_0 = arith.constant 0 : i32
    %c0_i32_1 = arith.constant 0 : i32
    return %c0_i32, %c0_i32_0 : i32, i32
  }
  func.func @transform_3(%arg0: i32) -> (i32, i32) {
    %c0_i32 = arith.constant 0 : i32
    %c0_i32_0 = arith.constant 0 : i32
    %c0_i32_1 = arith.constant 0 : i32
    return %c0_i32, %c0_i32_0 : i32, i32
  }
  func.func @transform_4(%arg0: i32) -> (i32, i32, i32) {
    %c0_i32 = arith.constant 0 : i32
    %c0_i32_0 = arith.constant 0 : i32
    %c0_i32_1 = arith.constant 0 : i32
    %c0_i32_2 = arith.constant 0 : i32
    return %c0_i32, %c0_i32_0, %c0_i32_1 : i32, i32, i32
  }
  func.func @transform_5(%arg0: i32) -> (i32, i32) {
    %c0_i32 = arith.constant 0 : i32
    %c0_i32_0 = arith.constant 0 : i32
    %c0_i32_1 = arith.constant 0 : i32
    return %c0_i32, %c0_i32_0 : i32, i32
  }
  func.func @transform_6(%arg0: i32) -> (i32, i32) {
    %c0_i32 = arith.constant 0 : i32
    %c0_i32_0 = arith.constant 0 : i32
    %c0_i32_1 = arith.constant 0 : i32
    return %c0_i32, %c0_i32_0 : i32, i32
  }
  func.func @transform_7(%arg0: i32) -> (i32, i32, i32) {
    %c0_i32 = arith.constant 0 : i32
    %c0_i32_0 = arith.constant 0 : i32
    %c0_i32_1 = arith.constant 0 : i32
    return %arg0, %c0_i32, %c0_i32_0 : i32, i32, i32
  }
}

module attributes {stable_mosaic.version = 11 : i64} {
  func.func @_conv_kernel(%arg0: i32, %arg1: i32, %arg2: i32, %arg3: memref<1x20x5x128xbf16, #tpu.memory_space<vmem>>, %arg4: memref<9x128x128xbf16, #tpu.memory_space<vmem>>, %arg5: memref<1x128xf32, #tpu.memory_space<vmem>>, %arg6: memref<1x128xf32, #tpu.memory_space<vmem>>, %arg7: memref<1x16x128xbf16, #tpu.memory_space<vmem>>, %arg8: memref<16x128xf32, #tpu.memory_space<vmem>>) attributes {dimension_semantics = [#tpu.dimension_semantics<parallel>, #tpu.dimension_semantics<parallel>, #tpu.dimension_semantics<arbitrary>], iteration_bounds = array<i64: 2, 1, 1>, scalar_prefetch = 0 : i64, scratch_operands = 1 : i64, tpu.core_type = #tpu.core_type<tc>, window_params = [{transform_indices = @transform_0, window_bounds = array<i64: 1, 20, 5, 128>}, {transform_indices = @transform_1, window_bounds = array<i64: 9, 128, 128>}, {transform_indices = @transform_2, window_bounds = array<i64: 1, 128>}, {transform_indices = @transform_3, window_bounds = array<i64: 1, 128>}, {transform_indices = @transform_4, window_bounds = array<i64: 1, 16, 128>}]} {
    %c0_i32 = arith.constant 0 : i32
    %0 = arith.cmpi eq, %arg2, %c0_i32 : i32
    %1 = arith.extui %0 : i1 to i32
    %c0_i32_0 = arith.constant 0 : i32
    %2 = arith.cmpi ne, %1, %c0_i32_0 : i32
    scf.if %2 {
      %cst_99 = arith.constant 0.000000e+00 : f32
      %87 = vector.broadcast %cst_99 : f32 to vector<16x128xf32>
      %c0_100 = arith.constant 0 : index
      %c0_101 = arith.constant 0 : index
      %88 = vector.load %arg8[%c0_100, %c0_101] : memref<16x128xf32, #tpu.memory_space<vmem>>, vector<16x128xf32>
      tpu.vector_store %arg8[%c0_100, %c0_101], %87 {strides = array<i32>} : memref<16x128xf32, #tpu.memory_space<vmem>>, vector<16x128xf32>,
    } else {
    }
    %c0 = arith.constant 0 : index
    %c0_1 = arith.constant 0 : index
    %c0_2 = arith.constant 0 : index
    %c0_3 = arith.constant 0 : index
    %3 = vector.load %arg3[%c0, %c0_1, %c0_2, %c0_3] : memref<1x20x5x128xbf16, #tpu.memory_space<vmem>>, vector<1x4x4x128xbf16>
    %4 = vector.shape_cast %3 : vector<1x4x4x128xbf16> to vector<4x4x128xbf16>
    %c0_4 = arith.constant 0 : index
    %c0_5 = arith.constant 0 : index
    %5 = vector.load %arg8[%c0_4, %c0_5] : memref<16x128xf32, #tpu.memory_space<vmem>>, vector<16x128xf32>
    %6 = vector.shape_cast %4 : vector<4x4x128xbf16> to vector<16x128xbf16>
    %c0_6 = arith.constant 0 : index
    %c0_7 = arith.constant 0 : index
    %c0_8 = arith.constant 0 : index
    %7 = vector.load %arg4[%c0_6, %c0_7, %c0_8] : memref<9x128x128xbf16, #tpu.memory_space<vmem>>, vector<1x128x128xbf16>
    %8 = vector.shape_cast %7 : vector<1x128x128xbf16> to vector<128x128xbf16>
    %cst = arith.constant dense<0.000000e+00> : vector<16x128xf32>
    %9 = tpu.matmul %6, %8, %cst {dimension_numbers = #tpu.dot_dimension_numbers<[1], [0], [0], [1], [0, 0, 1, 1], [], []>} : vector<16x128xbf16>, vector<128x128xbf16>, vector<16x128xf32> -> vector<16x128xf32>
    %10 = arith.addf %5, %9 : vector<16x128xf32>
    %c0_9 = arith.constant 0 : index
    %c0_10 = arith.constant 0 : index
    %11 = vector.load %arg8[%c0_9, %c0_10] : memref<16x128xf32, #tpu.memory_space<vmem>>, vector<16x128xf32>
    tpu.vector_store %arg8[%c0_9, %c0_10], %10 {strides = array<i32>} : memref<16x128xf32, #tpu.memory_space<vmem>>, vector<16x128xf32>,
    %c0_11 = arith.constant 0 : index
    %c5 = arith.constant 5 : index
    %c0_12 = arith.constant 0 : index
    %c0_13 = arith.constant 0 : index
    %12 = vector.load %arg3[%c0_11, %c5, %c0_12, %c0_13] : memref<1x20x5x128xbf16, #tpu.memory_space<vmem>>, vector<1x4x4x128xbf16>
    %13 = vector.shape_cast %12 : vector<1x4x4x128xbf16> to vector<4x4x128xbf16>
    %c0_14 = arith.constant 0 : index
    %c0_15 = arith.constant 0 : index
    %14 = vector.load %arg8[%c0_14, %c0_15] : memref<16x128xf32, #tpu.memory_space<vmem>>, vector<16x128xf32>
    %15 = vector.shape_cast %13 : vector<4x4x128xbf16> to vector<16x128xbf16>
    %c1 = arith.constant 1 : index
    %c0_16 = arith.constant 0 : index
    %c0_17 = arith.constant 0 : index
    %16 = vector.load %arg4[%c1, %c0_16, %c0_17] : memref<9x128x128xbf16, #tpu.memory_space<vmem>>, vector<1x128x128xbf16>
    %17 = vector.shape_cast %16 : vector<1x128x128xbf16> to vector<128x128xbf16>
    %cst_18 = arith.constant dense<0.000000e+00> : vector<16x128xf32>
    %18 = tpu.matmul %15, %17, %cst_18 {dimension_numbers = #tpu.dot_dimension_numbers<[1], [0], [0], [1], [0, 0, 1, 1], [], []>} : vector<16x128xbf16>, vector<128x128xbf16>, vector<16x128xf32> -> vector<16x128xf32>
    %19 = arith.addf %14, %18 : vector<16x128xf32>
    %c0_19 = arith.constant 0 : index
    %c0_20 = arith.constant 0 : index
    %20 = vector.load %arg8[%c0_19, %c0_20] : memref<16x128xf32, #tpu.memory_space<vmem>>, vector<16x128xf32>
    tpu.vector_store %arg8[%c0_19, %c0_20], %19 {strides = array<i32>} : memref<16x128xf32, #tpu.memory_space<vmem>>, vector<16x128xf32>,
    %c0_21 = arith.constant 0 : index
    %c0_22 = arith.constant 0 : index
    %c1_23 = arith.constant 1 : index
    %c0_24 = arith.constant 0 : index
    %21 = vector.load %arg3[%c0_21, %c0_22, %c1_23, %c0_24] : memref<1x20x5x128xbf16, #tpu.memory_space<vmem>>, vector<1x4x4x128xbf16>
    %22 = vector.shape_cast %21 : vector<1x4x4x128xbf16> to vector<4x4x128xbf16>
    %c0_25 = arith.constant 0 : index
    %c0_26 = arith.constant 0 : index
    %23 = vector.load %arg8[%c0_25, %c0_26] : memref<16x128xf32, #tpu.memory_space<vmem>>, vector<16x128xf32>
    %24 = vector.shape_cast %22 : vector<4x4x128xbf16> to vector<16x128xbf16>
    %c2 = arith.constant 2 : index
    %c0_27 = arith.constant 0 : index
    %c0_28 = arith.constant 0 : index
    %25 = vector.load %arg4[%c2, %c0_27, %c0_28] : memref<9x128x128xbf16, #tpu.memory_space<vmem>>, vector<1x128x128xbf16>
    %26 = vector.shape_cast %25 : vector<1x128x128xbf16> to vector<128x128xbf16>
    %cst_29 = arith.constant dense<0.000000e+00> : vector<16x128xf32>
    %27 = tpu.matmul %24, %26, %cst_29 {dimension_numbers = #tpu.dot_dimension_numbers<[1], [0], [0], [1], [0, 0, 1, 1], [], []>} : vector<16x128xbf16>, vector<128x128xbf16>, vector<16x128xf32> -> vector<16x128xf32>
    %28 = arith.addf %23, %27 : vector<16x128xf32>
    %c0_30 = arith.constant 0 : index
    %c0_31 = arith.constant 0 : index
    %29 = vector.load %arg8[%c0_30, %c0_31] : memref<16x128xf32, #tpu.memory_space<vmem>>, vector<16x128xf32>
    tpu.vector_store %arg8[%c0_30, %c0_31], %28 {strides = array<i32>} : memref<16x128xf32, #tpu.memory_space<vmem>>, vector<16x128xf32>,
    %c0_32 = arith.constant 0 : index
    %c10 = arith.constant 10 : index
    %c0_33 = arith.constant 0 : index
    %c0_34 = arith.constant 0 : index
    %30 = vector.load %arg3[%c0_32, %c10, %c0_33, %c0_34] : memref<1x20x5x128xbf16, #tpu.memory_space<vmem>>, vector<1x4x4x128xbf16>
    %31 = vector.shape_cast %30 : vector<1x4x4x128xbf16> to vector<4x4x128xbf16>
    %c0_35 = arith.constant 0 : index
    %c0_36 = arith.constant 0 : index
    %32 = vector.load %arg8[%c0_35, %c0_36] : memref<16x128xf32, #tpu.memory_space<vmem>>, vector<16x128xf32>
    %33 = vector.shape_cast %31 : vector<4x4x128xbf16> to vector<16x128xbf16>
    %c3 = arith.constant 3 : index
    %c0_37 = arith.constant 0 : index
    %c0_38 = arith.constant 0 : index
    %34 = vector.load %arg4[%c3, %c0_37, %c0_38] : memref<9x128x128xbf16, #tpu.memory_space<vmem>>, vector<1x128x128xbf16>
    %35 = vector.shape_cast %34 : vector<1x128x128xbf16> to vector<128x128xbf16>
    %cst_39 = arith.constant dense<0.000000e+00> : vector<16x128xf32>
    %36 = tpu.matmul %33, %35, %cst_39 {dimension_numbers = #tpu.dot_dimension_numbers<[1], [0], [0], [1], [0, 0, 1, 1], [], []>} : vector<16x128xbf16>, vector<128x128xbf16>, vector<16x128xf32> -> vector<16x128xf32>
    %37 = arith.addf %32, %36 : vector<16x128xf32>
    %c0_40 = arith.constant 0 : index
    %c0_41 = arith.constant 0 : index
    %38 = vector.load %arg8[%c0_40, %c0_41] : memref<16x128xf32, #tpu.memory_space<vmem>>, vector<16x128xf32>
    tpu.vector_store %arg8[%c0_40, %c0_41], %37 {strides = array<i32>} : memref<16x128xf32, #tpu.memory_space<vmem>>, vector<16x128xf32>,
    %c0_42 = arith.constant 0 : index
    %c15 = arith.constant 15 : index
    %c0_43 = arith.constant 0 : index
    %c0_44 = arith.constant 0 : index
    %39 = vector.load %arg3[%c0_42, %c15, %c0_43, %c0_44] : memref<1x20x5x128xbf16, #tpu.memory_space<vmem>>, vector<1x4x4x128xbf16>
    %40 = vector.shape_cast %39 : vector<1x4x4x128xbf16> to vector<4x4x128xbf16>
    %c0_45 = arith.constant 0 : index
    %c0_46 = arith.constant 0 : index
    %41 = vector.load %arg8[%c0_45, %c0_46] : memref<16x128xf32, #tpu.memory_space<vmem>>, vector<16x128xf32>
    %42 = vector.shape_cast %40 : vector<4x4x128xbf16> to vector<16x128xbf16>
    %c4 = arith.constant 4 : index
    %c0_47 = arith.constant 0 : index
    %c0_48 = arith.constant 0 : index
    %43 = vector.load %arg4[%c4, %c0_47, %c0_48] : memref<9x128x128xbf16, #tpu.memory_space<vmem>>, vector<1x128x128xbf16>
    %44 = vector.shape_cast %43 : vector<1x128x128xbf16> to vector<128x128xbf16>
    %cst_49 = arith.constant dense<0.000000e+00> : vector<16x128xf32>
    %45 = tpu.matmul %42, %44, %cst_49 {dimension_numbers = #tpu.dot_dimension_numbers<[1], [0], [0], [1], [0, 0, 1, 1], [], []>} : vector<16x128xbf16>, vector<128x128xbf16>, vector<16x128xf32> -> vector<16x128xf32>
    %46 = arith.addf %41, %45 : vector<16x128xf32>
    %c0_50 = arith.constant 0 : index
    %c0_51 = arith.constant 0 : index
    %47 = vector.load %arg8[%c0_50, %c0_51] : memref<16x128xf32, #tpu.memory_space<vmem>>, vector<16x128xf32>
    tpu.vector_store %arg8[%c0_50, %c0_51], %46 {strides = array<i32>} : memref<16x128xf32, #tpu.memory_space<vmem>>, vector<16x128xf32>,
    %c0_52 = arith.constant 0 : index
    %c10_53 = arith.constant 10 : index
    %c1_54 = arith.constant 1 : index
    %c0_55 = arith.constant 0 : index
    %48 = vector.load %arg3[%c0_52, %c10_53, %c1_54, %c0_55] : memref<1x20x5x128xbf16, #tpu.memory_space<vmem>>, vector<1x4x4x128xbf16>
    %49 = vector.shape_cast %48 : vector<1x4x4x128xbf16> to vector<4x4x128xbf16>
    %c0_56 = arith.constant 0 : index
    %c0_57 = arith.constant 0 : index
    %50 = vector.load %arg8[%c0_56, %c0_57] : memref<16x128xf32, #tpu.memory_space<vmem>>, vector<16x128xf32>
    %51 = vector.shape_cast %49 : vector<4x4x128xbf16> to vector<16x128xbf16>
    %c5_58 = arith.constant 5 : index
    %c0_59 = arith.constant 0 : index
    %c0_60 = arith.constant 0 : index
    %52 = vector.load %arg4[%c5_58, %c0_59, %c0_60] : memref<9x128x128xbf16, #tpu.memory_space<vmem>>, vector<1x128x128xbf16>
    %53 = vector.shape_cast %52 : vector<1x128x128xbf16> to vector<128x128xbf16>
    %cst_61 = arith.constant dense<0.000000e+00> : vector<16x128xf32>
    %54 = tpu.matmul %51, %53, %cst_61 {dimension_numbers = #tpu.dot_dimension_numbers<[1], [0], [0], [1], [0, 0, 1, 1], [], []>} : vector<16x128xbf16>, vector<128x128xbf16>, vector<16x128xf32> -> vector<16x128xf32>
    %55 = arith.addf %50, %54 : vector<16x128xf32>
    %c0_62 = arith.constant 0 : index
    %c0_63 = arith.constant 0 : index
    %56 = vector.load %arg8[%c0_62, %c0_63] : memref<16x128xf32, #tpu.memory_space<vmem>>, vector<16x128xf32>
    tpu.vector_store %arg8[%c0_62, %c0_63], %55 {strides = array<i32>} : memref<16x128xf32, #tpu.memory_space<vmem>>, vector<16x128xf32>,
    %c0_64 = arith.constant 0 : index
    %c1_65 = arith.constant 1 : index
    %c0_66 = arith.constant 0 : index
    %c0_67 = arith.constant 0 : index
    %57 = vector.load %arg3[%c0_64, %c1_65, %c0_66, %c0_67] : memref<1x20x5x128xbf16, #tpu.memory_space<vmem>>, vector<1x4x4x128xbf16>
    %58 = vector.shape_cast %57 : vector<1x4x4x128xbf16> to vector<4x4x128xbf16>
    %c0_68 = arith.constant 0 : index
    %c0_69 = arith.constant 0 : index
    %59 = vector.load %arg8[%c0_68, %c0_69] : memref<16x128xf32, #tpu.memory_space<vmem>>, vector<16x128xf32>
    %60 = vector.shape_cast %58 : vector<4x4x128xbf16> to vector<16x128xbf16>
    %c6 = arith.constant 6 : index
    %c0_70 = arith.constant 0 : index
    %c0_71 = arith.constant 0 : index
    %61 = vector.load %arg4[%c6, %c0_70, %c0_71] : memref<9x128x128xbf16, #tpu.memory_space<vmem>>, vector<1x128x128xbf16>
    %62 = vector.shape_cast %61 : vector<1x128x128xbf16> to vector<128x128xbf16>
    %cst_72 = arith.constant dense<0.000000e+00> : vector<16x128xf32>
    %63 = tpu.matmul %60, %62, %cst_72 {dimension_numbers = #tpu.dot_dimension_numbers<[1], [0], [0], [1], [0, 0, 1, 1], [], []>} : vector<16x128xbf16>, vector<128x128xbf16>, vector<16x128xf32> -> vector<16x128xf32>
    %64 = arith.addf %59, %63 : vector<16x128xf32>
    %c0_73 = arith.constant 0 : index
    %c0_74 = arith.constant 0 : index
    %65 = vector.load %arg8[%c0_73, %c0_74] : memref<16x128xf32, #tpu.memory_space<vmem>>, vector<16x128xf32>
    tpu.vector_store %arg8[%c0_73, %c0_74], %64 {strides = array<i32>} : memref<16x128xf32, #tpu.memory_space<vmem>>, vector<16x128xf32>,
    %c0_75 = arith.constant 0 : index
    %c6_76 = arith.constant 6 : index
    %c0_77 = arith.constant 0 : index
    %c0_78 = arith.constant 0 : index
    %66 = vector.load %arg3[%c0_75, %c6_76, %c0_77, %c0_78] : memref<1x20x5x128xbf16, #tpu.memory_space<vmem>>, vector<1x4x4x128xbf16>
    %67 = vector.shape_cast %66 : vector<1x4x4x128xbf16> to vector<4x4x128xbf16>
    %c0_79 = arith.constant 0 : index
    %c0_80 = arith.constant 0 : index
    %68 = vector.load %arg8[%c0_79, %c0_80] : memref<16x128xf32, #tpu.memory_space<vmem>>, vector<16x128xf32>
    %69 = vector.shape_cast %67 : vector<4x4x128xbf16> to vector<16x128xbf16>
    %c7 = arith.constant 7 : index
    %c0_81 = arith.constant 0 : index
    %c0_82 = arith.constant 0 : index
    %70 = vector.load %arg4[%c7, %c0_81, %c0_82] : memref<9x128x128xbf16, #tpu.memory_space<vmem>>, vector<1x128x128xbf16>
    %71 = vector.shape_cast %70 : vector<1x128x128xbf16> to vector<128x128xbf16>
    %cst_83 = arith.constant dense<0.000000e+00> : vector<16x128xf32>
    %72 = tpu.matmul %69, %71, %cst_83 {dimension_numbers = #tpu.dot_dimension_numbers<[1], [0], [0], [1], [0, 0, 1, 1], [], []>} : vector<16x128xbf16>, vector<128x128xbf16>, vector<16x128xf32> -> vector<16x128xf32>
    %73 = arith.addf %68, %72 : vector<16x128xf32>
    %c0_84 = arith.constant 0 : index
    %c0_85 = arith.constant 0 : index
    %74 = vector.load %arg8[%c0_84, %c0_85] : memref<16x128xf32, #tpu.memory_space<vmem>>, vector<16x128xf32>
    tpu.vector_store %arg8[%c0_84, %c0_85], %73 {strides = array<i32>} : memref<16x128xf32, #tpu.memory_space<vmem>>, vector<16x128xf32>,
    %c0_86 = arith.constant 0 : index
    %c1_87 = arith.constant 1 : index
    %c1_88 = arith.constant 1 : index
    %c0_89 = arith.constant 0 : index
    %75 = vector.load %arg3[%c0_86, %c1_87, %c1_88, %c0_89] : memref<1x20x5x128xbf16, #tpu.memory_space<vmem>>, vector<1x4x4x128xbf16>
    %76 = vector.shape_cast %75 : vector<1x4x4x128xbf16> to vector<4x4x128xbf16>
    %c0_90 = arith.constant 0 : index
    %c0_91 = arith.constant 0 : index
    %77 = vector.load %arg8[%c0_90, %c0_91] : memref<16x128xf32, #tpu.memory_space<vmem>>, vector<16x128xf32>
    %78 = vector.shape_cast %76 : vector<4x4x128xbf16> to vector<16x128xbf16>
    %c8 = arith.constant 8 : index
    %c0_92 = arith.constant 0 : index
    %c0_93 = arith.constant 0 : index
    %79 = vector.load %arg4[%c8, %c0_92, %c0_93] : memref<9x128x128xbf16, #tpu.memory_space<vmem>>, vector<1x128x128xbf16>
    %80 = vector.shape_cast %79 : vector<1x128x128xbf16> to vector<128x128xbf16>
    %cst_94 = arith.constant dense<0.000000e+00> : vector<16x128xf32>
    %81 = tpu.matmul %78, %80, %cst_94 {dimension_numbers = #tpu.dot_dimension_numbers<[1], [0], [0], [1], [0, 0, 1, 1], [], []>} : vector<16x128xbf16>, vector<128x128xbf16>, vector<16x128xf32> -> vector<16x128xf32>
    %82 = arith.addf %77, %81 : vector<16x128xf32>
    %c0_95 = arith.constant 0 : index
    %c0_96 = arith.constant 0 : index
    %83 = vector.load %arg8[%c0_95, %c0_96] : memref<16x128xf32, #tpu.memory_space<vmem>>, vector<16x128xf32>
    tpu.vector_store %arg8[%c0_95, %c0_96], %82 {strides = array<i32>} : memref<16x128xf32, #tpu.memory_space<vmem>>, vector<16x128xf32>,
    %c0_i32_97 = arith.constant 0 : i32
    %84 = arith.cmpi eq, %arg2, %c0_i32_97 : i32
    %85 = arith.extui %84 : i1 to i32
    %c0_i32_98 = arith.constant 0 : i32
    %86 = arith.cmpi ne, %85, %c0_i32_98 : i32
    scf.if %86 {
      %c0_99 = arith.constant 0 : index
      %c0_100 = arith.constant 0 : index
      %87 = vector.load %arg8[%c0_99, %c0_100] : memref<16x128xf32, #tpu.memory_space<vmem>>, vector<16x128xf32>
      %c0_101 = arith.constant 0 : index
      %c0_102 = arith.constant 0 : index
      %88 = vector.load %arg5[%c0_101, %c0_102] : memref<1x128xf32, #tpu.memory_space<vmem>>, vector<1x128xf32>
      %89 = vector.broadcast %88 : vector<1x128xf32> to vector<16x128xf32>
      %90 = arith.mulf %87, %89 : vector<16x128xf32>
      %c0_103 = arith.constant 0 : index
      %c0_104 = arith.constant 0 : index
      %91 = vector.load %arg6[%c0_103, %c0_104] : memref<1x128xf32, #tpu.memory_space<vmem>>, vector<1x128xf32>
      %92 = vector.broadcast %91 : vector<1x128xf32> to vector<16x128xf32>
      %93 = arith.addf %90, %92 : vector<16x128xf32>
      %cst_105 = arith.constant 1.000000e-01 : f32
      %94 = vector.broadcast %cst_105 : f32 to vector<16x128xf32>
      %95 = arith.mulf %94, %93 : vector<16x128xf32>
      %96 = arith.maximumf %93, %95 : vector<16x128xf32>
      %97 = arith.truncf %96 : vector<16x128xf32> to vector<16x128xbf16>
      %c0_106 = arith.constant 0 : index
      %c0_107 = arith.constant 0 : index
      %c0_108 = arith.constant 0 : index
      %98 = vector.load %arg7[%c0_106, %c0_107, %c0_108] : memref<1x16x128xbf16, #tpu.memory_space<vmem>>, vector<1x16x128xbf16>
      %99 = vector.shape_cast %98 : vector<1x16x128xbf16> to vector<16x128xbf16>
      %100 = vector.shape_cast %97 : vector<16x128xbf16> to vector<1x16x128xbf16>
      tpu.vector_store %arg7[%c0_106, %c0_107, %c0_108], %100 {strides = array<i32>} : memref<1x16x128xbf16, #tpu.memory_space<vmem>>, vector<1x16x128xbf16>,
    } else {
    }
    return
  }
  func.func @transform_0(%arg0: i32, %arg1: i32, %arg2: i32) -> (i32, i32, i32, i32) {
    %c0_i32 = arith.constant 0 : i32
    %c0_i32_0 = arith.constant 0 : i32
    %c0_i32_1 = arith.constant 0 : i32
    return %arg0, %c0_i32, %c0_i32_0, %arg2 : i32, i32, i32, i32
  }
  func.func @transform_1(%arg0: i32, %arg1: i32, %arg2: i32) -> (i32, i32, i32) {
    %c0_i32 = arith.constant 0 : i32
    %c0_i32_0 = arith.constant 0 : i32
    return %c0_i32, %arg2, %arg1 : i32, i32, i32
  }
  func.func @transform_2(%arg0: i32, %arg1: i32, %arg2: i32) -> (i32, i32) {
    %c0_i32 = arith.constant 0 : i32
    %c0_i32_0 = arith.constant 0 : i32
    return %c0_i32, %arg1 : i32, i32
  }
  func.func @transform_3(%arg0: i32, %arg1: i32, %arg2: i32) -> (i32, i32) {
    %c0_i32 = arith.constant 0 : i32
    %c0_i32_0 = arith.constant 0 : i32
    return %c0_i32, %arg1 : i32, i32
  }
  func.func @transform_4(%arg0: i32, %arg1: i32, %arg2: i32) -> (i32, i32, i32) {
    %c0_i32 = arith.constant 0 : i32
    %c0_i32_0 = arith.constant 0 : i32
    return %arg0, %c0_i32, %arg1 : i32, i32, i32
  }
}

module attributes {stable_mosaic.version = 11 : i64} {
  func.func @_res_block_kernel(%arg0: i32, %arg1: memref<1x4x4x128xbf16, #tpu.memory_space<vmem>>, %arg2: memref<1x128x128xbf16, #tpu.memory_space<vmem>>, %arg3: memref<1x128xf32, #tpu.memory_space<vmem>>, %arg4: memref<1x128xf32, #tpu.memory_space<vmem>>, %arg5: memref<9x128x128xbf16, #tpu.memory_space<vmem>>, %arg6: memref<1x128xf32, #tpu.memory_space<vmem>>, %arg7: memref<1x128xf32, #tpu.memory_space<vmem>>, %arg8: memref<1x16x128xbf16, #tpu.memory_space<vmem>>, %arg9: memref<6x6x128xbf16, #tpu.memory_space<vmem>>, %arg10: memref<16x128xf32, #tpu.memory_space<vmem>>) attributes {dimension_semantics = [#tpu.dimension_semantics<parallel>], iteration_bounds = array<i64: 2>, scalar_prefetch = 0 : i64, scratch_operands = 2 : i64, tpu.core_type = #tpu.core_type<tc>, window_params = [{transform_indices = @transform_0, window_bounds = array<i64: 1, 4, 4, 128>}, {pipeline_mode = #tpu.pipeline_mode<synchronous>, transform_indices = @transform_1, window_bounds = array<i64: 1, 128, 128>}, {pipeline_mode = #tpu.pipeline_mode<synchronous>, transform_indices = @transform_2, window_bounds = array<i64: 1, 128>}, {pipeline_mode = #tpu.pipeline_mode<synchronous>, transform_indices = @transform_3, window_bounds = array<i64: 1, 128>}, {pipeline_mode = #tpu.pipeline_mode<synchronous>, transform_indices = @transform_4, window_bounds = array<i64: 9, 128, 128>}, {pipeline_mode = #tpu.pipeline_mode<synchronous>, transform_indices = @transform_5, window_bounds = array<i64: 1, 128>}, {pipeline_mode = #tpu.pipeline_mode<synchronous>, transform_indices = @transform_6, window_bounds = array<i64: 1, 128>}, {transform_indices = @transform_7, window_bounds = array<i64: 1, 16, 128>}]} {
    %c0 = arith.constant 0 : index
    %c0_0 = arith.constant 0 : index
    %c0_1 = arith.constant 0 : index
    %c0_2 = arith.constant 0 : index
    %0 = vector.load %arg1[%c0, %c0_0, %c0_1, %c0_2] : memref<1x4x4x128xbf16, #tpu.memory_space<vmem>>, vector<1x4x4x128xbf16>
    %1 = vector.shape_cast %0 : vector<1x4x4x128xbf16> to vector<4x4x128xbf16>
    %2 = vector.shape_cast %1 : vector<4x4x128xbf16> to vector<16x128xbf16>
    %cst = arith.constant 0.000000e+00 : bf16
    %3 = vector.broadcast %cst : bf16 to vector<6x6x128xbf16>
    %c0_3 = arith.constant 0 : index
    %c0_4 = arith.constant 0 : index
    %c0_5 = arith.constant 0 : index
    %4 = vector.load %arg9[%c0_3, %c0_4, %c0_5] : memref<6x6x128xbf16, #tpu.memory_space<vmem>>, vector<6x6x128xbf16>
    tpu.vector_store %arg9[%c0_3, %c0_4, %c0_5], %3 {strides = array<i32>} : memref<6x6x128xbf16, #tpu.memory_space<vmem>>, vector<6x6x128xbf16>,
    %c0_6 = arith.constant 0 : index
    %c0_7 = arith.constant 0 : index
    %c0_8 = arith.constant 0 : index
    %5 = vector.load %arg2[%c0_6, %c0_7, %c0_8] : memref<1x128x128xbf16, #tpu.memory_space<vmem>>, vector<1x128x128xbf16>
    %6 = vector.shape_cast %5 : vector<1x128x128xbf16> to vector<128x128xbf16>
    %cst_9 = arith.constant dense<0.000000e+00> : vector<16x128xf32>
    %7 = tpu.matmul %2, %6, %cst_9 {dimension_numbers = #tpu.dot_dimension_numbers<[1], [0], [0], [1], [0, 0, 1, 1], [], []>} : vector<16x128xbf16>, vector<128x128xbf16>, vector<16x128xf32> -> vector<16x128xf32>
    %c0_10 = arith.constant 0 : index
    %c0_11 = arith.constant 0 : index
    %8 = vector.load %arg3[%c0_10, %c0_11] : memref<1x128xf32, #tpu.memory_space<vmem>>, vector<1x128xf32>
    %9 = vector.broadcast %8 : vector<1x128xf32> to vector<16x128xf32>
    %10 = arith.mulf %7, %9 : vector<16x128xf32>
    %c0_12 = arith.constant 0 : index
    %c0_13 = arith.constant 0 : index
    %11 = vector.load %arg4[%c0_12, %c0_13] : memref<1x128xf32, #tpu.memory_space<vmem>>, vector<1x128xf32>
    %12 = vector.broadcast %11 : vector<1x128xf32> to vector<16x128xf32>
    %13 = arith.addf %10, %12 : vector<16x128xf32>
    %cst_14 = arith.constant 1.000000e-01 : f32
    %14 = vector.broadcast %cst_14 : f32 to vector<16x128xf32>
    %15 = arith.mulf %14, %13 : vector<16x128xf32>
    %16 = arith.maximumf %13, %15 : vector<16x128xf32>
    %17 = arith.truncf %16 : vector<16x128xf32> to vector<16x128xbf16>
    %18 = vector.shape_cast %17 : vector<16x128xbf16> to vector<4x4x128xbf16>
    %c1 = arith.constant 1 : index
    %c1_15 = arith.constant 1 : index
    %c0_16 = arith.constant 0 : index
    %19 = vector.load %arg9[%c1, %c1_15, %c0_16] : memref<6x6x128xbf16, #tpu.memory_space<vmem>>, vector<4x4x128xbf16>
    tpu.vector_store %arg9[%c1, %c1_15, %c0_16], %18 {strides = array<i32>} : memref<6x6x128xbf16, #tpu.memory_space<vmem>>, vector<4x4x128xbf16>,
    %c0_17 = arith.constant 0 : index
    %c0_18 = arith.constant 0 : index
    %c0_19 = arith.constant 0 : index
    %20 = vector.load %arg9[%c0_17, %c0_18, %c0_19] : memref<6x6x128xbf16, #tpu.memory_space<vmem>>, vector<4x4x128xbf16>
    %21 = vector.shape_cast %20 : vector<4x4x128xbf16> to vector<16x128xbf16>
    %c0_20 = arith.constant 0 : index
    %c0_21 = arith.constant 0 : index
    %c0_22 = arith.constant 0 : index
    %22 = vector.load %arg5[%c0_20, %c0_21, %c0_22] : memref<9x128x128xbf16, #tpu.memory_space<vmem>>, vector<1x128x128xbf16>
    %23 = vector.shape_cast %22 : vector<1x128x128xbf16> to vector<128x128xbf16>
    %cst_23 = arith.constant dense<0.000000e+00> : vector<16x128xf32>
    %24 = tpu.matmul %21, %23, %cst_23 {dimension_numbers = #tpu.dot_dimension_numbers<[1], [0], [0], [1], [0, 0, 1, 1], [], []>} : vector<16x128xbf16>, vector<128x128xbf16>, vector<16x128xf32> -> vector<16x128xf32>
    %c0_24 = arith.constant 0 : index
    %c0_25 = arith.constant 0 : index
    %25 = vector.load %arg10[%c0_24, %c0_25] : memref<16x128xf32, #tpu.memory_space<vmem>>, vector<16x128xf32>
    tpu.vector_store %arg10[%c0_24, %c0_25], %24 {strides = array<i32>} : memref<16x128xf32, #tpu.memory_space<vmem>>, vector<16x128xf32>,
    %c0_26 = arith.constant 0 : index
    %c1_27 = arith.constant 1 : index
    %c0_28 = arith.constant 0 : index
    %26 = vector.load %arg9[%c0_26, %c1_27, %c0_28] : memref<6x6x128xbf16, #tpu.memory_space<vmem>>, vector<4x4x128xbf16>
    %27 = vector.shape_cast %26 : vector<4x4x128xbf16> to vector<16x128xbf16>
    %c1_29 = arith.constant 1 : index
    %c0_30 = arith.constant 0 : index
    %c0_31 = arith.constant 0 : index
    %28 = vector.load %arg5[%c1_29, %c0_30, %c0_31] : memref<9x128x128xbf16, #tpu.memory_space<vmem>>, vector<1x128x128xbf16>
    %29 = vector.shape_cast %28 : vector<1x128x128xbf16> to vector<128x128xbf16>
    %cst_32 = arith.constant dense<0.000000e+00> : vector<16x128xf32>
    %30 = tpu.matmul %27, %29, %cst_32 {dimension_numbers = #tpu.dot_dimension_numbers<[1], [0], [0], [1], [0, 0, 1, 1], [], []>} : vector<16x128xbf16>, vector<128x128xbf16>, vector<16x128xf32> -> vector<16x128xf32>
    %c0_33 = arith.constant 0 : index
    %c0_34 = arith.constant 0 : index
    %31 = vector.load %arg10[%c0_33, %c0_34] : memref<16x128xf32, #tpu.memory_space<vmem>>, vector<16x128xf32>
    %32 = arith.addf %31, %30 : vector<16x128xf32>
    %c0_35 = arith.constant 0 : index
    %c0_36 = arith.constant 0 : index
    %33 = vector.load %arg10[%c0_35, %c0_36] : memref<16x128xf32, #tpu.memory_space<vmem>>, vector<16x128xf32>
    tpu.vector_store %arg10[%c0_35, %c0_36], %32 {strides = array<i32>} : memref<16x128xf32, #tpu.memory_space<vmem>>, vector<16x128xf32>,
    %c0_37 = arith.constant 0 : index
    %c2 = arith.constant 2 : index
    %c0_38 = arith.constant 0 : index
    %34 = vector.load %arg9[%c0_37, %c2, %c0_38] : memref<6x6x128xbf16, #tpu.memory_space<vmem>>, vector<4x4x128xbf16>
    %35 = vector.shape_cast %34 : vector<4x4x128xbf16> to vector<16x128xbf16>
    %c2_39 = arith.constant 2 : index
    %c0_40 = arith.constant 0 : index
    %c0_41 = arith.constant 0 : index
    %36 = vector.load %arg5[%c2_39, %c0_40, %c0_41] : memref<9x128x128xbf16, #tpu.memory_space<vmem>>, vector<1x128x128xbf16>
    %37 = vector.shape_cast %36 : vector<1x128x128xbf16> to vector<128x128xbf16>
    %cst_42 = arith.constant dense<0.000000e+00> : vector<16x128xf32>
    %38 = tpu.matmul %35, %37, %cst_42 {dimension_numbers = #tpu.dot_dimension_numbers<[1], [0], [0], [1], [0, 0, 1, 1], [], []>} : vector<16x128xbf16>, vector<128x128xbf16>, vector<16x128xf32> -> vector<16x128xf32>
    %c0_43 = arith.constant 0 : index
    %c0_44 = arith.constant 0 : index
    %39 = vector.load %arg10[%c0_43, %c0_44] : memref<16x128xf32, #tpu.memory_space<vmem>>, vector<16x128xf32>
    %40 = arith.addf %39, %38 : vector<16x128xf32>
    %c0_45 = arith.constant 0 : index
    %c0_46 = arith.constant 0 : index
    %41 = vector.load %arg10[%c0_45, %c0_46] : memref<16x128xf32, #tpu.memory_space<vmem>>, vector<16x128xf32>
    tpu.vector_store %arg10[%c0_45, %c0_46], %40 {strides = array<i32>} : memref<16x128xf32, #tpu.memory_space<vmem>>, vector<16x128xf32>,
    %c1_47 = arith.constant 1 : index
    %c0_48 = arith.constant 0 : index
    %c0_49 = arith.constant 0 : index
    %42 = vector.load %arg9[%c1_47, %c0_48, %c0_49] : memref<6x6x128xbf16, #tpu.memory_space<vmem>>, vector<4x4x128xbf16>
    %43 = vector.shape_cast %42 : vector<4x4x128xbf16> to vector<16x128xbf16>
    %c3 = arith.constant 3 : index
    %c0_50 = arith.constant 0 : index
    %c0_51 = arith.constant 0 : index
    %44 = vector.load %arg5[%c3, %c0_50, %c0_51] : memref<9x128x128xbf16, #tpu.memory_space<vmem>>, vector<1x128x128xbf16>
    %45 = vector.shape_cast %44 : vector<1x128x128xbf16> to vector<128x128xbf16>
    %cst_52 = arith.constant dense<0.000000e+00> : vector<16x128xf32>
    %46 = tpu.matmul %43, %45, %cst_52 {dimension_numbers = #tpu.dot_dimension_numbers<[1], [0], [0], [1], [0, 0, 1, 1], [], []>} : vector<16x128xbf16>, vector<128x128xbf16>, vector<16x128xf32> -> vector<16x128xf32>
    %c0_53 = arith.constant 0 : index
    %c0_54 = arith.constant 0 : index
    %47 = vector.load %arg10[%c0_53, %c0_54] : memref<16x128xf32, #tpu.memory_space<vmem>>, vector<16x128xf32>
    %48 = arith.addf %47, %46 : vector<16x128xf32>
    %c0_55 = arith.constant 0 : index
    %c0_56 = arith.constant 0 : index
    %49 = vector.load %arg10[%c0_55, %c0_56] : memref<16x128xf32, #tpu.memory_space<vmem>>, vector<16x128xf32>
    tpu.vector_store %arg10[%c0_55, %c0_56], %48 {strides = array<i32>} : memref<16x128xf32, #tpu.memory_space<vmem>>, vector<16x128xf32>,
    %c1_57 = arith.constant 1 : index
    %c1_58 = arith.constant 1 : index
    %c0_59 = arith.constant 0 : index
    %50 = vector.load %arg9[%c1_57, %c1_58, %c0_59] : memref<6x6x128xbf16, #tpu.memory_space<vmem>>, vector<4x4x128xbf16>
    %51 = vector.shape_cast %50 : vector<4x4x128xbf16> to vector<16x128xbf16>
    %c4 = arith.constant 4 : index
    %c0_60 = arith.constant 0 : index
    %c0_61 = arith.constant 0 : index
    %52 = vector.load %arg5[%c4, %c0_60, %c0_61] : memref<9x128x128xbf16, #tpu.memory_space<vmem>>, vector<1x128x128xbf16>
    %53 = vector.shape_cast %52 : vector<1x128x128xbf16> to vector<128x128xbf16>
    %cst_62 = arith.constant dense<0.000000e+00> : vector<16x128xf32>
    %54 = tpu.matmul %51, %53, %cst_62 {dimension_numbers = #tpu.dot_dimension_numbers<[1], [0], [0], [1], [0, 0, 1, 1], [], []>} : vector<16x128xbf16>, vector<128x128xbf16>, vector<16x128xf32> -> vector<16x128xf32>
    %c0_63 = arith.constant 0 : index
    %c0_64 = arith.constant 0 : index
    %55 = vector.load %arg10[%c0_63, %c0_64] : memref<16x128xf32, #tpu.memory_space<vmem>>, vector<16x128xf32>
    %56 = arith.addf %55, %54 : vector<16x128xf32>
    %c0_65 = arith.constant 0 : index
    %c0_66 = arith.constant 0 : index
    %57 = vector.load %arg10[%c0_65, %c0_66] : memref<16x128xf32, #tpu.memory_space<vmem>>, vector<16x128xf32>
    tpu.vector_store %arg10[%c0_65, %c0_66], %56 {strides = array<i32>} : memref<16x128xf32, #tpu.memory_space<vmem>>, vector<16x128xf32>,
    %c1_67 = arith.constant 1 : index
    %c2_68 = arith.constant 2 : index
    %c0_69 = arith.constant 0 : index
    %58 = vector.load %arg9[%c1_67, %c2_68, %c0_69] : memref<6x6x128xbf16, #tpu.memory_space<vmem>>, vector<4x4x128xbf16>
    %59 = vector.shape_cast %58 : vector<4x4x128xbf16> to vector<16x128xbf16>
    %c5 = arith.constant 5 : index
    %c0_70 = arith.constant 0 : index
    %c0_71 = arith.constant 0 : index
    %60 = vector.load %arg5[%c5, %c0_70, %c0_71] : memref<9x128x128xbf16, #tpu.memory_space<vmem>>, vector<1x128x128xbf16>
    %61 = vector.shape_cast %60 : vector<1x128x128xbf16> to vector<128x128xbf16>
    %cst_72 = arith.constant dense<0.000000e+00> : vector<16x128xf32>
    %62 = tpu.matmul %59, %61, %cst_72 {dimension_numbers = #tpu.dot_dimension_numbers<[1], [0], [0], [1], [0, 0, 1, 1], [], []>} : vector<16x128xbf16>, vector<128x128xbf16>, vector<16x128xf32> -> vector<16x128xf32>
    %c0_73 = arith.constant 0 : index
    %c0_74 = arith.constant 0 : index
    %63 = vector.load %arg10[%c0_73, %c0_74] : memref<16x128xf32, #tpu.memory_space<vmem>>, vector<16x128xf32>
    %64 = arith.addf %63, %62 : vector<16x128xf32>
    %c0_75 = arith.constant 0 : index
    %c0_76 = arith.constant 0 : index
    %65 = vector.load %arg10[%c0_75, %c0_76] : memref<16x128xf32, #tpu.memory_space<vmem>>, vector<16x128xf32>
    tpu.vector_store %arg10[%c0_75, %c0_76], %64 {strides = array<i32>} : memref<16x128xf32, #tpu.memory_space<vmem>>, vector<16x128xf32>,
    %c2_77 = arith.constant 2 : index
    %c0_78 = arith.constant 0 : index
    %c0_79 = arith.constant 0 : index
    %66 = vector.load %arg9[%c2_77, %c0_78, %c0_79] : memref<6x6x128xbf16, #tpu.memory_space<vmem>>, vector<4x4x128xbf16>
    %67 = vector.shape_cast %66 : vector<4x4x128xbf16> to vector<16x128xbf16>
    %c6 = arith.constant 6 : index
    %c0_80 = arith.constant 0 : index
    %c0_81 = arith.constant 0 : index
    %68 = vector.load %arg5[%c6, %c0_80, %c0_81] : memref<9x128x128xbf16, #tpu.memory_space<vmem>>, vector<1x128x128xbf16>
    %69 = vector.shape_cast %68 : vector<1x128x128xbf16> to vector<128x128xbf16>
    %cst_82 = arith.constant dense<0.000000e+00> : vector<16x128xf32>
    %70 = tpu.matmul %67, %69, %cst_82 {dimension_numbers = #tpu.dot_dimension_numbers<[1], [0], [0], [1], [0, 0, 1, 1], [], []>} : vector<16x128xbf16>, vector<128x128xbf16>, vector<16x128xf32> -> vector<16x128xf32>
    %c0_83 = arith.constant 0 : index
    %c0_84 = arith.constant 0 : index
    %71 = vector.load %arg10[%c0_83, %c0_84] : memref<16x128xf32, #tpu.memory_space<vmem>>, vector<16x128xf32>
    %72 = arith.addf %71, %70 : vector<16x128xf32>
    %c0_85 = arith.constant 0 : index
    %c0_86 = arith.constant 0 : index
    %73 = vector.load %arg10[%c0_85, %c0_86] : memref<16x128xf32, #tpu.memory_space<vmem>>, vector<16x128xf32>
    tpu.vector_store %arg10[%c0_85, %c0_86], %72 {strides = array<i32>} : memref<16x128xf32, #tpu.memory_space<vmem>>, vector<16x128xf32>,
    %c2_87 = arith.constant 2 : index
    %c1_88 = arith.constant 1 : index
    %c0_89 = arith.constant 0 : index
    %74 = vector.load %arg9[%c2_87, %c1_88, %c0_89] : memref<6x6x128xbf16, #tpu.memory_space<vmem>>, vector<4x4x128xbf16>
    %75 = vector.shape_cast %74 : vector<4x4x128xbf16> to vector<16x128xbf16>
    %c7 = arith.constant 7 : index
    %c0_90 = arith.constant 0 : index
    %c0_91 = arith.constant 0 : index
    %76 = vector.load %arg5[%c7, %c0_90, %c0_91] : memref<9x128x128xbf16, #tpu.memory_space<vmem>>, vector<1x128x128xbf16>
    %77 = vector.shape_cast %76 : vector<1x128x128xbf16> to vector<128x128xbf16>
    %cst_92 = arith.constant dense<0.000000e+00> : vector<16x128xf32>
    %78 = tpu.matmul %75, %77, %cst_92 {dimension_numbers = #tpu.dot_dimension_numbers<[1], [0], [0], [1], [0, 0, 1, 1], [], []>} : vector<16x128xbf16>, vector<128x128xbf16>, vector<16x128xf32> -> vector<16x128xf32>
    %c0_93 = arith.constant 0 : index
    %c0_94 = arith.constant 0 : index
    %79 = vector.load %arg10[%c0_93, %c0_94] : memref<16x128xf32, #tpu.memory_space<vmem>>, vector<16x128xf32>
    %80 = arith.addf %79, %78 : vector<16x128xf32>
    %c0_95 = arith.constant 0 : index
    %c0_96 = arith.constant 0 : index
    %81 = vector.load %arg10[%c0_95, %c0_96] : memref<16x128xf32, #tpu.memory_space<vmem>>, vector<16x128xf32>
    tpu.vector_store %arg10[%c0_95, %c0_96], %80 {strides = array<i32>} : memref<16x128xf32, #tpu.memory_space<vmem>>, vector<16x128xf32>,
    %c2_97 = arith.constant 2 : index
    %c2_98 = arith.constant 2 : index
    %c0_99 = arith.constant 0 : index
    %82 = vector.load %arg9[%c2_97, %c2_98, %c0_99] : memref<6x6x128xbf16, #tpu.memory_space<vmem>>, vector<4x4x128xbf16>
    %83 = vector.shape_cast %82 : vector<4x4x128xbf16> to vector<16x128xbf16>
    %c8 = arith.constant 8 : index
    %c0_100 = arith.constant 0 : index
    %c0_101 = arith.constant 0 : index
    %84 = vector.load %arg5[%c8, %c0_100, %c0_101] : memref<9x128x128xbf16, #tpu.memory_space<vmem>>, vector<1x128x128xbf16>
    %85 = vector.shape_cast %84 : vector<1x128x128xbf16> to vector<128x128xbf16>
    %cst_102 = arith.constant dense<0.000000e+00> : vector<16x128xf32>
    %86 = tpu.matmul %83, %85, %cst_102 {dimension_numbers = #tpu.dot_dimension_numbers<[1], [0], [0], [1], [0, 0, 1, 1], [], []>} : vector<16x128xbf16>, vector<128x128xbf16>, vector<16x128xf32> -> vector<16x128xf32>
    %c0_103 = arith.constant 0 : index
    %c0_104 = arith.constant 0 : index
    %87 = vector.load %arg10[%c0_103, %c0_104] : memref<16x128xf32, #tpu.memory_space<vmem>>, vector<16x128xf32>
    %88 = arith.addf %87, %86 : vector<16x128xf32>
    %c0_105 = arith.constant 0 : index
    %c0_106 = arith.constant 0 : index
    %89 = vector.load %arg10[%c0_105, %c0_106] : memref<16x128xf32, #tpu.memory_space<vmem>>, vector<16x128xf32>
    tpu.vector_store %arg10[%c0_105, %c0_106], %88 {strides = array<i32>} : memref<16x128xf32, #tpu.memory_space<vmem>>, vector<16x128xf32>,
    %c0_107 = arith.constant 0 : index
    %c0_108 = arith.constant 0 : index
    %90 = vector.load %arg10[%c0_107, %c0_108] : memref<16x128xf32, #tpu.memory_space<vmem>>, vector<16x128xf32>
    %c0_109 = arith.constant 0 : index
    %c0_110 = arith.constant 0 : index
    %91 = vector.load %arg6[%c0_109, %c0_110] : memref<1x128xf32, #tpu.memory_space<vmem>>, vector<1x128xf32>
    %92 = vector.broadcast %91 : vector<1x128xf32> to vector<16x128xf32>
    %93 = arith.mulf %90, %92 : vector<16x128xf32>
    %c0_111 = arith.constant 0 : index
    %c0_112 = arith.constant 0 : index
    %94 = vector.load %arg7[%c0_111, %c0_112] : memref<1x128xf32, #tpu.memory_space<vmem>>, vector<1x128xf32>
    %95 = vector.broadcast %94 : vector<1x128xf32> to vector<16x128xf32>
    %96 = arith.addf %93, %95 : vector<16x128xf32>
    %cst_113 = arith.constant 1.000000e-01 : f32
    %97 = vector.broadcast %cst_113 : f32 to vector<16x128xf32>
    %98 = arith.mulf %97, %96 : vector<16x128xf32>
    %99 = arith.maximumf %96, %98 : vector<16x128xf32>
    %100 = arith.extf %2 : vector<16x128xbf16> to vector<16x128xf32>
    %101 = arith.addf %99, %100 : vector<16x128xf32>
    %102 = arith.truncf %101 : vector<16x128xf32> to vector<16x128xbf16>
    %c0_114 = arith.constant 0 : index
    %c0_115 = arith.constant 0 : index
    %c0_116 = arith.constant 0 : index
    %103 = vector.load %arg8[%c0_114, %c0_115, %c0_116] : memref<1x16x128xbf16, #tpu.memory_space<vmem>>, vector<1x16x128xbf16>
    %104 = vector.shape_cast %103 : vector<1x16x128xbf16> to vector<16x128xbf16>
    %105 = vector.shape_cast %102 : vector<16x128xbf16> to vector<1x16x128xbf16>
    tpu.vector_store %arg8[%c0_114, %c0_115, %c0_116], %105 {strides = array<i32>} : memref<1x16x128xbf16, #tpu.memory_space<vmem>>, vector<1x16x128xbf16>,
    return
  }
  func.func @transform_0(%arg0: i32) -> (i32, i32, i32, i32) {
    %c0_i32 = arith.constant 0 : i32
    %c0_i32_0 = arith.constant 0 : i32
    %c0_i32_1 = arith.constant 0 : i32
    %c0_i32_2 = arith.constant 0 : i32
    return %arg0, %c0_i32, %c0_i32_0, %c0_i32_1 : i32, i32, i32, i32
  }
  func.func @transform_1(%arg0: i32) -> (i32, i32, i32) {
    %c0_i32 = arith.constant 0 : i32
    %c0_i32_0 = arith.constant 0 : i32
    %c0_i32_1 = arith.constant 0 : i32
    %c0_i32_2 = arith.constant 0 : i32
    return %c0_i32, %c0_i32_0, %c0_i32_1 : i32, i32, i32
  }
  func.func @transform_2(%arg0: i32) -> (i32, i32) {
    %c0_i32 = arith.constant 0 : i32
    %c0_i32_0 = arith.constant 0 : i32
    %c0_i32_1 = arith.constant 0 : i32
    return %c0_i32, %c0_i32_0 : i32, i32
  }
  func.func @transform_3(%arg0: i32) -> (i32, i32) {
    %c0_i32 = arith.constant 0 : i32
    %c0_i32_0 = arith.constant 0 : i32
    %c0_i32_1 = arith.constant 0 : i32
    return %c0_i32, %c0_i32_0 : i32, i32
  }
  func.func @transform_4(%arg0: i32) -> (i32, i32, i32) {
    %c0_i32 = arith.constant 0 : i32
    %c0_i32_0 = arith.constant 0 : i32
    %c0_i32_1 = arith.constant 0 : i32
    %c0_i32_2 = arith.constant 0 : i32
    return %c0_i32, %c0_i32_0, %c0_i32_1 : i32, i32, i32
  }
  func.func @transform_5(%arg0: i32) -> (i32, i32) {
    %c0_i32 = arith.constant 0 : i32
    %c0_i32_0 = arith.constant 0 : i32
    %c0_i32_1 = arith.constant 0 : i32
    return %c0_i32, %c0_i32_0 : i32, i32
  }
  func.func @transform_6(%arg0: i32) -> (i32, i32) {
    %c0_i32 = arith.constant 0 : i32
    %c0_i32_0 = arith.constant 0 : i32
    %c0_i32_1 = arith.constant 0 : i32
    return %c0_i32, %c0_i32_0 : i32, i32
  }
  func.func @transform_7(%arg0: i32) -> (i32, i32, i32) {
    %c0_i32 = arith.constant 0 : i32
    %c0_i32_0 = arith.constant 0 : i32
    %c0_i32_1 = arith.constant 0 : i32
    return %arg0, %c0_i32, %c0_i32_0 : i32, i32, i32
  }
}

module attributes {stable_mosaic.version = 11 : i64} {
  func.func @_conv_kernel(%arg0: i32, %arg1: i32, %arg2: i32, %arg3: memref<1x4x4x256xbf16, #tpu.memory_space<vmem>>, %arg4: memref<1x256x128xbf16, #tpu.memory_space<vmem>>, %arg5: memref<1x128xf32, #tpu.memory_space<vmem>>, %arg6: memref<1x128xf32, #tpu.memory_space<vmem>>, %arg7: memref<1x16x128xbf16, #tpu.memory_space<vmem>>, %arg8: memref<16x128xf32, #tpu.memory_space<vmem>>) attributes {dimension_semantics = [#tpu.dimension_semantics<parallel>, #tpu.dimension_semantics<parallel>, #tpu.dimension_semantics<arbitrary>], iteration_bounds = array<i64: 2, 1, 1>, scalar_prefetch = 0 : i64, scratch_operands = 1 : i64, tpu.core_type = #tpu.core_type<tc>, window_params = [{transform_indices = @transform_0, window_bounds = array<i64: 1, 4, 4, 256>}, {transform_indices = @transform_1, window_bounds = array<i64: 1, 256, 128>}, {transform_indices = @transform_2, window_bounds = array<i64: 1, 128>}, {transform_indices = @transform_3, window_bounds = array<i64: 1, 128>}, {transform_indices = @transform_4, window_bounds = array<i64: 1, 16, 128>}]} {
    %c0_i32 = arith.constant 0 : i32
    %0 = arith.cmpi eq, %arg2, %c0_i32 : i32
    %1 = arith.extui %0 : i1 to i32
    %c0_i32_0 = arith.constant 0 : i32
    %2 = arith.cmpi ne, %1, %c0_i32_0 : i32
    scf.if %2 {
      %cst_13 = arith.constant 0.000000e+00 : f32
      %15 = vector.broadcast %cst_13 : f32 to vector<16x128xf32>
      %c0_14 = arith.constant 0 : index
      %c0_15 = arith.constant 0 : index
      %16 = vector.load %arg8[%c0_14, %c0_15] : memref<16x128xf32, #tpu.memory_space<vmem>>, vector<16x128xf32>
      tpu.vector_store %arg8[%c0_14, %c0_15], %15 {strides = array<i32>} : memref<16x128xf32, #tpu.memory_space<vmem>>, vector<16x128xf32>,
    } else {
    }
    %c0 = arith.constant 0 : index
    %c0_1 = arith.constant 0 : index
    %c0_2 = arith.constant 0 : index
    %c0_3 = arith.constant 0 : index
    %3 = vector.load %arg3[%c0, %c0_1, %c0_2, %c0_3] : memref<1x4x4x256xbf16, #tpu.memory_space<vmem>>, vector<1x4x4x256xbf16>
    %4 = vector.shape_cast %3 : vector<1x4x4x256xbf16> to vector<4x4x256xbf16>
    %c0_4 = arith.constant 0 : index
    %c0_5 = arith.constant 0 : index
    %5 = vector.load %arg8[%c0_4, %c0_5] : memref<16x128xf32, #tpu.memory_space<vmem>>, vector<16x128xf32>
    %6 = vector.shape_cast %4 : vector<4x4x256xbf16> to vector<16x256xbf16>
    %c0_6 = arith.constant 0 : index
    %c0_7 = arith.constant 0 : index
    %c0_8 = arith.constant 0 : index
    %7 = vector.load %arg4[%c0_6, %c0_7, %c0_8] : memref<1x256x128xbf16, #tpu.memory_space<vmem>>, vector<1x256x128xbf16>
    %8 = vector.shape_cast %7 : vector<1x256x128xbf16> to vector<256x128xbf16>
    %cst = arith.constant dense<0.000000e+00> : vector<16x128xf32>
    %9 = tpu.matmul %6, %8, %cst {dimension_numbers = #tpu.dot_dimension_numbers<[1], [0], [0], [1], [0, 0, 1, 1], [], []>} : vector<16x256xbf16>, vector<256x128xbf16>, vector<16x128xf32> -> vector<16x128xf32>
    %10 = arith.addf %5, %9 : vector<16x128xf32>
    %c0_9 = arith.constant 0 : index
    %c0_10 = arith.constant 0 : index
    %11 = vector.load %arg8[%c0_9, %c0_10] : memref<16x128xf32, #tpu.memory_space<vmem>>, vector<16x128xf32>
    tpu.vector_store %arg8[%c0_9, %c0_10], %10 {strides = array<i32>} : memref<16x128xf32, #tpu.memory_space<vmem>>, vector<16x128xf32>,
    %c0_i32_11 = arith.constant 0 : i32
    %12 = arith.cmpi eq, %arg2, %c0_i32_11 : i32
    %13 = arith.extui %12 : i1 to i32
    %c0_i32_12 = arith.constant 0 : i32
    %14 = arith.cmpi ne, %13, %c0_i32_12 : i32
    scf.if %14 {
      %c0_13 = arith.constant 0 : index
      %c0_14 = arith.constant 0 : index
      %15 = vector.load %arg8[%c0_13, %c0_14] : memref<16x128xf32, #tpu.memory_space<vmem>>, vector<16x128xf32>
      %c0_15 = arith.constant 0 : index
      %c0_16 = arith.constant 0 : index
      %16 = vector.load %arg5[%c0_15, %c0_16] : memref<1x128xf32, #tpu.memory_space<vmem>>, vector<1x128xf32>
      %17 = vector.broadcast %16 : vector<1x128xf32> to vector<16x128xf32>
      %18 = arith.mulf %15, %17 : vector<16x128xf32>
      %c0_17 = arith.constant 0 : index
      %c0_18 = arith.constant 0 : index
      %19 = vector.load %arg6[%c0_17, %c0_18] : memref<1x128xf32, #tpu.memory_space<vmem>>, vector<1x128xf32>
      %20 = vector.broadcast %19 : vector<1x128xf32> to vector<16x128xf32>
      %21 = arith.addf %18, %20 : vector<16x128xf32>
      %22 = arith.truncf %21 : vector<16x128xf32> to vector<16x128xbf16>
      %c0_19 = arith.constant 0 : index
      %c0_20 = arith.constant 0 : index
      %c0_21 = arith.constant 0 : index
      %23 = vector.load %arg7[%c0_19, %c0_20, %c0_21] : memref<1x16x128xbf16, #tpu.memory_space<vmem>>, vector<1x16x128xbf16>
      %24 = vector.shape_cast %23 : vector<1x16x128xbf16> to vector<16x128xbf16>
      %25 = vector.shape_cast %22 : vector<16x128xbf16> to vector<1x16x128xbf16>
      tpu.vector_store %arg7[%c0_19, %c0_20, %c0_21], %25 {strides = array<i32>} : memref<1x16x128xbf16, #tpu.memory_space<vmem>>, vector<1x16x128xbf16>,
    } else {
    }
    return
  }
  func.func @transform_0(%arg0: i32, %arg1: i32, %arg2: i32) -> (i32, i32, i32, i32) {
    %c0_i32 = arith.constant 0 : i32
    %c0_i32_0 = arith.constant 0 : i32
    %c0_i32_1 = arith.constant 0 : i32
    return %arg0, %c0_i32, %c0_i32_0, %arg2 : i32, i32, i32, i32
  }
  func.func @transform_1(%arg0: i32, %arg1: i32, %arg2: i32) -> (i32, i32, i32) {
    %c0_i32 = arith.constant 0 : i32
    %c0_i32_0 = arith.constant 0 : i32
    return %c0_i32, %arg2, %arg1 : i32, i32, i32
  }
  func.func @transform_2(%arg0: i32, %arg1: i32, %arg2: i32) -> (i32, i32) {
    %c0_i32 = arith.constant 0 : i32
    %c0_i32_0 = arith.constant 0 : i32
    return %c0_i32, %arg1 : i32, i32
  }
  func.func @transform_3(%arg0: i32, %arg1: i32, %arg2: i32) -> (i32, i32) {
    %c0_i32 = arith.constant 0 : i32
    %c0_i32_0 = arith.constant 0 : i32
    return %c0_i32, %arg1 : i32, i32
  }
  func.func @transform_4(%arg0: i32, %arg1: i32, %arg2: i32) -> (i32, i32, i32) {
    %c0_i32 = arith.constant 0 : i32
    %c0_i32_0 = arith.constant 0 : i32
    return %arg0, %c0_i32, %arg1 : i32, i32, i32
  }
}

module attributes {stable_mosaic.version = 11 : i64} {
  func.func @_convtrans_kernel(%arg0: i32, %arg1: i32, %arg2: i32, %arg3: memref<1x4x4x128xbf16, #tpu.memory_space<vmem>>, %arg4: memref<9x128x128xbf16, #tpu.memory_space<vmem>>, %arg5: memref<1x128xf32, #tpu.memory_space<vmem>>, %arg6: memref<1x4x16x128xbf16, #tpu.memory_space<vmem>>, %arg7: memref<5x5x128xbf16, #tpu.memory_space<vmem>>, %arg8: memref<4x16x128xf32, #tpu.memory_space<vmem>>) attributes {dimension_semantics = [#tpu.dimension_semantics<parallel>, #tpu.dimension_semantics<parallel>, #tpu.dimension_semantics<arbitrary>], iteration_bounds = array<i64: 2, 1, 1>, scalar_prefetch = 0 : i64, scratch_operands = 2 : i64, tpu.core_type = #tpu.core_type<tc>, window_params = [{transform_indices = @transform_0, window_bounds = array<i64: 1, 4, 4, 128>}, {transform_indices = @transform_1, window_bounds = array<i64: 9, 128, 128>}, {transform_indices = @transform_2, window_bounds = array<i64: 1, 128>}, {transform_indices = @transform_3, window_bounds = array<i64: 1, 4, 16, 128>}]} {
    %c0_i32 = arith.constant 0 : i32
    %0 = arith.cmpi eq, %arg2, %c0_i32 : i32
    %1 = arith.extui %0 : i1 to i32
    %c0_i32_0 = arith.constant 0 : i32
    %2 = arith.cmpi ne, %1, %c0_i32_0 : i32
    scf.if %2 {
      %cst_121 = arith.constant 0.000000e+00 : f32
      %110 = vector.broadcast %cst_121 : f32 to vector<4x16x128xf32>
      %c0_122 = arith.constant 0 : index
      %c0_123 = arith.constant 0 : index
      %c0_124 = arith.constant 0 : index
      %111 = vector.load %arg8[%c0_122, %c0_123, %c0_124] : memref<4x16x128xf32, #tpu.memory_space<vmem>>, vector<4x16x128xf32>
      tpu.vector_store %arg8[%c0_122, %c0_123, %c0_124], %110 {strides = array<i32>} : memref<4x16x128xf32, #tpu.memory_space<vmem>>, vector<4x16x128xf32>,
    } else {
    }
    %cst = arith.constant 0.000000e+00 : bf16
    %3 = vector.broadcast %cst : bf16 to vector<5x5x128xbf16>
    %c0 = arith.constant 0 : index
    %c0_1 = arith.constant 0 : index
    %c0_2 = arith.constant 0 : index
    %4 = vector.load %arg7[%c0, %c0_1, %c0_2] : memref<5x5x128xbf16, #tpu.memory_space<vmem>>, vector<5x5x128xbf16>
    tpu.vector_store %arg7[%c0, %c0_1, %c0_2], %3 {strides = array<i32>} : memref<5x5x128xbf16, #tpu.memory_space<vmem>>, vector<5x5x128xbf16>,
    %c0_3 = arith.constant 0 : index
    %c0_4 = arith.constant 0 : index
    %c0_5 = arith.constant 0 : index
    %c0_6 = arith.constant 0 : index
    %5 = vector.load %arg3[%c0_3, %c0_4, %c0_5, %c0_6] : memref<1x4x4x128xbf16, #tpu.memory_space<vmem>>, vector<1x4x4x128xbf16>
    %6 = vector.shape_cast %5 : vector<1x4x4x128xbf16> to vector<4x4x128xbf16>
    %c0_7 = arith.constant 0 : index
    %c0_8 = arith.constant 0 : index
    %c0_9 = arith.constant 0 : index
    %7 = vector.load %arg7[%c0_7, %c0_8, %c0_9] : memref<5x5x128xbf16, #tpu.memory_space<vmem>>, vector<4x4x128xbf16>
    tpu.vector_store %arg7[%c0_7, %c0_8, %c0_9], %6 {strides = array<i32>} : memref<5x5x128xbf16, #tpu.memory_space<vmem>>, vector<4x4x128xbf16>,
    %c0_10 = arith.constant 0 : index
    %c0_11 = arith.constant 0 : index
    %c0_12 = arith.constant 0 : index
    %8 = vector.load %arg7[%c0_10, %c0_11, %c0_12] : memref<5x5x128xbf16, #tpu.memory_space<vmem>>, vector<4x4x128xbf16>
    %c0_13 = arith.constant 0 : index
    %c0_14 = arith.constant 0 : index
    %c0_15 = arith.constant 0 : index
    %9 = vector.load %arg8[%c0_13, %c0_14, %c0_15] : memref<4x16x128xf32, #tpu.memory_space<vmem>>, vector<1x16x128xf32>
    %10 = vector.shape_cast %9 : vector<1x16x128xf32> to vector<16x128xf32>
    %11 = vector.shape_cast %8 : vector<4x4x128xbf16> to vector<16x128xbf16>
    %c0_16 = arith.constant 0 : index
    %c0_17 = arith.constant 0 : index
    %c0_18 = arith.constant 0 : index
    %12 = vector.load %arg4[%c0_16, %c0_17, %c0_18] : memref<9x128x128xbf16, #tpu.memory_space<vmem>>, vector<1x128x128xbf16>
    %13 = vector.shape_cast %12 : vector<1x128x128xbf16> to vector<128x128xbf16>
    %cst_19 = arith.constant dense<0.000000e+00> : vector<16x128xf32>
    %14 = tpu.matmul %11, %13, %cst_19 {dimension_numbers = #tpu.dot_dimension_numbers<[1], [0], [0], [1], [0, 0, 1, 1], [], []>} : vector<16x128xbf16>, vector<128x128xbf16>, vector<16x128xf32> -> vector<16x128xf32>
    %15 = arith.addf %10, %14 : vector<16x128xf32>
    %c0_20 = arith.constant 0 : index
    %c0_21 = arith.constant 0 : index
    %c0_22 = arith.constant 0 : index
    %16 = vector.load %arg8[%c0_20, %c0_21, %c0_22] : memref<4x16x128xf32, #tpu.memory_space<vmem>>, vector<1x16x128xf32>
    %17 = vector.shape_cast %16 : vector<1x16x128xf32> to vector<16x128xf32>
    %18 = vector.shape_cast %15 : vector<16x128xf32> to vector<1x16x128xf32>
    tpu.vector_store %arg8[%c0_20, %c0_21, %c0_22], %18 {strides = array<i32>} : memref<4x16x128xf32, #tpu.memory_space<vmem>>, vector<1x16x128xf32>,
    %c0_23 = arith.constant 0 : index
    %c0_24 = arith.constant 0 : index
    %c0_25 = arith.constant 0 : index
    %19 = vector.load %arg7[%c0_23, %c0_24, %c0_25] : memref<5x5x128xbf16, #tpu.memory_space<vmem>>, vector<4x4x128xbf16>
    %c1 = arith.constant 1 : index
    %c0_26 = arith.constant 0 : index
    %c0_27 = arith.constant 0 : index
    %20 = vector.load %arg8[%c1, %c0_26, %c0_27] : memref<4x16x128xf32, #tpu.memory_space<vmem>>, vector<1x16x128xf32>
    %21 = vector.shape_cast %20 : vector<1x16x128xf32> to vector<16x128xf32>
    %22 = vector.shape_cast %19 : vector<4x4x128xbf16> to vector<16x128xbf16>
    %c1_28 = arith.constant 1 : index
    %c0_29 = arith.constant 0 : index
    %c0_30 = arith.constant 0 : index
    %23 = vector.load %arg4[%c1_28, %c0_29, %c0_30] : memref<9x128x128xbf16, #tpu.memory_space<vmem>>, vector<1x128x128xbf16>
    %24 = vector.shape_cast %23 : vector<1x128x128xbf16> to vector<128x128xbf16>
    %cst_31 = arith.constant dense<0.000000e+00> : vector<16x128xf32>
    %25 = tpu.matmul %22, %24, %cst_31 {dimension_numbers = #tpu.dot_dimension_numbers<[1], [0], [0], [1], [0, 0, 1, 1], [], []>} : vector<16x128xbf16>, vector<128x128xbf16>, vector<16x128xf32> -> vector<16x128xf32>
    %26 = arith.addf %21, %25 : vector<16x128xf32>
    %c1_32 = arith.constant 1 : index
    %c0_33 = arith.constant 0 : index
    %c0_34 = arith.constant 0 : index
    %27 = vector.load %arg8[%c1_32, %c0_33, %c0_34] : memref<4x16x128xf32, #tpu.memory_space<vmem>>, vector<1x16x128xf32>
    %28 = vector.shape_cast %27 : vector<1x16x128xf32> to vector<16x128xf32>
    %29 = vector.shape_cast %26 : vector<16x128xf32> to vector<1x16x128xf32>
    tpu.vector_store %arg8[%c1_32, %c0_33, %c0_34], %29 {strides = array<i32>} : memref<4x16x128xf32, #tpu.memory_space<vmem>>, vector<1x16x128xf32>,
    %c0_35 = arith.constant 0 : index
    %c1_36 = arith.constant 1 : index
    %c0_37 = arith.constant 0 : index
    %30 = vector.load %arg7[%c0_35, %c1_36, %c0_37] : memref<5x5x128xbf16, #tpu.memory_space<vmem>>, vector<4x4x128xbf16>
    %c1_38 = arith.constant 1 : index
    %c0_39 = arith.constant 0 : index
    %c0_40 = arith.constant 0 : index
    %31 = vector.load %arg8[%c1_38, %c0_39, %c0_40] : memref<4x16x128xf32, #tpu.memory_space<vmem>>, vector<1x16x128xf32>
    %32 = vector.shape_cast %31 : vector<1x16x128xf32> to vector<16x128xf32>
    %33 = vector.shape_cast %30 : vector<4x4x128xbf16> to vector<16x128xbf16>
    %c2 = arith.constant 2 : index
    %c0_41 = arith.constant 0 : index
    %c0_42 = arith.constant 0 : index
    %34 = vector.load %arg4[%c2, %c0_41, %c0_42] : memref<9x128x128xbf16, #tpu.memory_space<vmem>>, vector<1x128x128xbf16>
    %35 = vector.shape_cast %34 : vector<1x128x128xbf16> to vector<128x128xbf16>
    %cst_43 = arith.constant dense<0.000000e+00> : vector<16x128xf32>
    %36 = tpu.matmul %33, %35, %cst_43 {dimension_numbers = #tpu.dot_dimension_numbers<[1], [0], [0], [1], [0, 0, 1, 1], [], []>} : vector<16x128xbf16>, vector<128x128xbf16>, vector<16x128xf32> -> vector<16x128xf32>
    %37 = arith.addf %32, %36 : vector<16x128xf32>
    %c1_44 = arith.constant 1 : index
    %c0_45 = arith.constant 0 : index
    %c0_46 = arith.constant 0 : index
    %38 = vector.load %arg8[%c1_44, %c0_45, %c0_46] : memref<4x16x128xf32, #tpu.memory_space<vmem>>, vector<1x16x128xf32>
    %39 = vector.shape_cast %38 : vector<1x16x128xf32> to vector<16x128xf32>
    %40 = vector.shape_cast %37 : vector<16x128xf32> to vector<1x16x128xf32>
    tpu.vector_store %arg8[%c1_44, %c0_45, %c0_46], %40 {strides = array<i32>} : memref<4x16x128xf32, #tpu.memory_space<vmem>>, vector<1x16x128xf32>,
    %c0_47 = arith.constant 0 : index
    %c0_48 = arith.constant 0 : index
    %c0_49 = arith.constant 0 : index
    %41 = vector.load %arg7[%c0_47, %c0_48, %c0_49] : memref<5x5x128xbf16, #tpu.memory_space<vmem>>, vector<4x4x128xbf16>
    %c2_50 = arith.constant 2 : index
    %c0_51 = arith.constant 0 : index
    %c0_52 = arith.constant 0 : index
    %42 = vector.load %arg8[%c2_50, %c0_51, %c0_52] : memref<4x16x128xf32, #tpu.memory_space<vmem>>, vector<1x16x128xf32>
    %43 = vector.shape_cast %42 : vector<1x16x128xf32> to vector<16x128xf32>
    %44 = vector.shape_cast %41 : vector<4x4x128xbf16> to vector<16x128xbf16>
    %c3 = arith.constant 3 : index
    %c0_53 = arith.constant 0 : index
    %c0_54 = arith.constant 0 : index
    %45 = vector.load %arg4[%c3, %c0_53, %c0_54] : memref<9x128x128xbf16, #tpu.memory_space<vmem>>, vector<1x128x128xbf16>
    %46 = vector.shape_cast %45 : vector<1x128x128xbf16> to vector<128x128xbf16>
    %cst_55 = arith.constant dense<0.000000e+00> : vector<16x128xf32>
    %47 = tpu.matmul %44, %46, %cst_55 {dimension_numbers = #tpu.dot_dimension_numbers<[1], [0], [0], [1], [0, 0, 1, 1], [], []>} : vector<16x128xbf16>, vector<128x128xbf16>, vector<16x128xf32> -> vector<16x128xf32>
    %48 = arith.addf %43, %47 : vector<16x128xf32>
    %c2_56 = arith.constant 2 : index
    %c0_57 = arith.constant 0 : index
    %c0_58 = arith.constant 0 : index
    %49 = vector.load %arg8[%c2_56, %c0_57, %c0_58] : memref<4x16x128xf32, #tpu.memory_space<vmem>>, vector<1x16x128xf32>
    %50 = vector.shape_cast %49 : vector<1x16x128xf32> to vector<16x128xf32>
    %51 = vector.shape_cast %48 : vector<16x128xf32> to vector<1x16x128xf32>
    tpu.vector_store %arg8[%c2_56, %c0_57, %c0_58], %51 {strides = array<i32>} : memref<4x16x128xf32, #tpu.memory_space<vmem>>, vector<1x16x128xf32>,
    %c1_59 = arith.constant 1 : index
    %c0_60 = arith.constant 0 : index
    %c0_61 = arith.constant 0 : index
    %52 = vector.load %arg7[%c1_59, %c0_60, %c0_61] : memref<5x5x128xbf16, #tpu.memory_space<vmem>>, vector<4x4x128xbf16>
    %c2_62 = arith.constant 2 : index
    %c0_63 = arith.constant 0 : index
    %c0_64 = arith.constant 0 : index
    %53 = vector.load %arg8[%c2_62, %c0_63, %c0_64] : memref<4x16x128xf32, #tpu.memory_space<vmem>>, vector<1x16x128xf32>
    %54 = vector.shape_cast %53 : vector<1x16x128xf32> to vector<16x128xf32>
    %55 = vector.shape_cast %52 : vector<4x4x128xbf16> to vector<16x128xbf16>
    %c4 = arith.constant 4 : index
    %c0_65 = arith.constant 0 : index
    %c0_66 = arith.constant 0 : index
    %56 = vector.load %arg4[%c4, %c0_65, %c0_66] : memref<9x128x128xbf16, #tpu.memory_space<vmem>>, vector<1x128x128xbf16>
    %57 = vector.shape_cast %56 : vector<1x128x128xbf16> to vector<128x128xbf16>
    %cst_67 = arith.constant dense<0.000000e+00> : vector<16x128xf32>
    %58 = tpu.matmul %55, %57, %cst_67 {dimension_numbers = #tpu.dot_dimension_numbers<[1], [0], [0], [1], [0, 0, 1, 1], [], []>} : vector<16x128xbf16>, vector<128x128xbf16>, vector<16x128xf32> -> vector<16x128xf32>
    %59 = arith.addf %54, %58 : vector<16x128xf32>
    %c2_68 = arith.constant 2 : index
    %c0_69 = arith.constant 0 : index
    %c0_70 = arith.constant 0 : index
    %60 = vector.load %arg8[%c2_68, %c0_69, %c0_70] : memref<4x16x128xf32, #tpu.memory_space<vmem>>, vector<1x16x128xf32>
    %61 = vector.shape_cast %60 : vector<1x16x128xf32> to vector<16x128xf32>
    %62 = vector.shape_cast %59 : vector<16x128xf32> to vector<1x16x128xf32>
    tpu.vector_store %arg8[%c2_68, %c0_69, %c0_70], %62 {strides = array<i32>} : memref<4x16x128xf32, #tpu.memory_space<vmem>>, vector<1x16x128xf32>,
    %c0_71 = arith.constant 0 : index
    %c0_72 = arith.constant 0 : index
    %c0_73 = arith.constant 0 : index
    %63 = vector.load %arg7[%c0_71, %c0_72, %c0_73] : memref<5x5x128xbf16, #tpu.memory_space<vmem>>, vector<4x4x128xbf16>
    %c3_74 = arith.constant 3 : index
    %c0_75 = arith.constant 0 : index
    %c0_76 = arith.constant 0 : index
    %64 = vector.load %arg8[%c3_74, %c0_75, %c0_76] : memref<4x16x128xf32, #tpu.memory_space<vmem>>, vector<1x16x128xf32>
    %65 = vector.shape_cast %64 : vector<1x16x128xf32> to vector<16x128xf32>
    %66 = vector.shape_cast %63 : vector<4x4x128xbf16> to vector<16x128xbf16>
    %c5 = arith.constant 5 : index
    %c0_77 = arith.constant 0 : index
    %c0_78 = arith.constant 0 : index
    %67 = vector.load %arg4[%c5, %c0_77, %c0_78] : memref<9x128x128xbf16, #tpu.memory_space<vmem>>, vector<1x128x128xbf16>
    %68 = vector.shape_cast %67 : vector<1x128x128xbf16> to vector<128x128xbf16>
    %cst_79 = arith.constant dense<0.000000e+00> : vector<16x128xf32>
    %69 = tpu.matmul %66, %68, %cst_79 {dimension_numbers = #tpu.dot_dimension_numbers<[1], [0], [0], [1], [0, 0, 1, 1], [], []>} : vector<16x128xbf16>, vector<128x128xbf16>, vector<16x128xf32> -> vector<16x128xf32>
    %70 = arith.addf %65, %69 : vector<16x128xf32>
    %c3_80 = arith.constant 3 : index
    %c0_81 = arith.constant 0 : index
    %c0_82 = arith.constant 0 : index
    %71 = vector.load %arg8[%c3_80, %c0_81, %c0_82] : memref<4x16x128xf32, #tpu.memory_space<vmem>>, vector<1x16x128xf32>
    %72 = vector.shape_cast %71 : vector<1x16x128xf32> to vector<16x128xf32>
    %73 = vector.shape_cast %70 : vector<16x128xf32> to vector<1x16x128xf32>
    tpu.vector_store %arg8[%c3_80, %c0_81, %c0_82], %73 {strides = array<i32>} : memref<4x16x128xf32, #tpu.memory_space<vmem>>, vector<1x16x128xf32>,
    %c0_83 = arith.constant 0 : index
    %c1_84 = arith.constant 1 : index
    %c0_85 = arith.constant 0 : index
    %74 = vector.load %arg7[%c0_83, %c1_84, %c0_85] : memref<5x5x128xbf16, #tpu.memory_space<vmem>>, vector<4x4x128xbf16>
    %c3_86 = arith.constant 3 : index
    %c0_87 = arith.constant 0 : index
    %c0_88 = arith.constant 0 : index
    %75 = vector.load %arg8[%c3_86, %c0_87, %c0_88] : memref<4x16x128xf32, #tpu.memory_space<vmem>>, vector<1x16x128xf32>
    %76 = vector.shape_cast %75 : vector<1x16x128xf32> to vector<16x128xf32>
    %77 = vector.shape_cast %74 : vector<4x4x128xbf16> to vector<16x128xbf16>
    %c6 = arith.constant 6 : index
    %c0_89 = arith.constant 0 : index
    %c0_90 = arith.constant 0 : index
    %78 = vector.load %arg4[%c6, %c0_89, %c0_90] : memref<9x128x128xbf16, #tpu.memory_space<vmem>>, vector<1x128x128xbf16>
    %79 = vector.shape_cast %78 : vector<1x128x128xbf16> to vector<128x128xbf16>
    %cst_91 = arith.constant dense<0.000000e+00> : vector<16x128xf32>
    %80 = tpu.matmul %77, %79, %cst_91 {dimension_numbers = #tpu.dot_dimension_numbers<[1], [0], [0], [1], [0, 0, 1, 1], [], []>} : vector<16x128xbf16>, vector<128x128xbf16>, vector<16x128xf32> -> vector<16x128xf32>
    %81 = arith.addf %76, %80 : vector<16x128xf32>
    %c3_92 = arith.constant 3 : index
    %c0_93 = arith.constant 0 : index
    %c0_94 = arith.constant 0 : index
    %82 = vector.load %arg8[%c3_92, %c0_93, %c0_94] : memref<4x16x128xf32, #tpu.memory_space<vmem>>, vector<1x16x128xf32>
    %83 = vector.shape_cast %82 : vector<1x16x128xf32> to vector<16x128xf32>
    %84 = vector.shape_cast %81 : vector<16x128xf32> to vector<1x16x128xf32>
    tpu.vector_store %arg8[%c3_92, %c0_93, %c0_94], %84 {strides = array<i32>} : memref<4x16x128xf32, #tpu.memory_space<vmem>>, vector<1x16x128xf32>,
    %c1_95 = arith.constant 1 : index
    %c0_96 = arith.constant 0 : index
    %c0_97 = arith.constant 0 : index
    %85 = vector.load %arg7[%c1_95, %c0_96, %c0_97] : memref<5x5x128xbf16, #tpu.memory_space<vmem>>, vector<4x4x128xbf16>
    %c3_98 = arith.constant 3 : index
    %c0_99 = arith.constant 0 : index
    %c0_100 = arith.constant 0 : index
    %86 = vector.load %arg8[%c3_98, %c0_99, %c0_100] : memref<4x16x128xf32, #tpu.memory_space<vmem>>, vector<1x16x128xf32>
    %87 = vector.shape_cast %86 : vector<1x16x128xf32> to vector<16x128xf32>
    %88 = vector.shape_cast %85 : vector<4x4x128xbf16> to vector<16x128xbf16>
    %c7 = arith.constant 7 : index
    %c0_101 = arith.constant 0 : index
    %c0_102 = arith.constant 0 : index
    %89 = vector.load %arg4[%c7, %c0_101, %c0_102] : memref<9x128x128xbf16, #tpu.memory_space<vmem>>, vector<1x128x128xbf16>
    %90 = vector.shape_cast %89 : vector<1x128x128xbf16> to vector<128x128xbf16>
    %cst_103 = arith.constant dense<0.000000e+00> : vector<16x128xf32>
    %91 = tpu.matmul %88, %90, %cst_103 {dimension_numbers = #tpu.dot_dimension_numbers<[1], [0], [0], [1], [0, 0, 1, 1], [], []>} : vector<16x128xbf16>, vector<128x128xbf16>, vector<16x128xf32> -> vector<16x128xf32>
    %92 = arith.addf %87, %91 : vector<16x128xf32>
    %c3_104 = arith.constant 3 : index
    %c0_105 = arith.constant 0 : index
    %c0_106 = arith.constant 0 : index
    %93 = vector.load %arg8[%c3_104, %c0_105, %c0_106] : memref<4x16x128xf32, #tpu.memory_space<vmem>>, vector<1x16x128xf32>
    %94 = vector.shape_cast %93 : vector<1x16x128xf32> to vector<16x128xf32>
    %95 = vector.shape_cast %92 : vector<16x128xf32> to vector<1x16x128xf32>
    tpu.vector_store %arg8[%c3_104, %c0_105, %c0_106], %95 {strides = array<i32>} : memref<4x16x128xf32, #tpu.memory_space<vmem>>, vector<1x16x128xf32>,
    %c1_107 = arith.constant 1 : index
    %c1_108 = arith.constant 1 : index
    %c0_109 = arith.constant 0 : index
    %96 = vector.load %arg7[%c1_107, %c1_108, %c0_109] : memref<5x5x128xbf16, #tpu.memory_space<vmem>>, vector<4x4x128xbf16>
    %c3_110 = arith.constant 3 : index
    %c0_111 = arith.constant 0 : index
    %c0_112 = arith.constant 0 : index
    %97 = vector.load %arg8[%c3_110, %c0_111, %c0_112] : memref<4x16x128xf32, #tpu.memory_space<vmem>>, vector<1x16x128xf32>
    %98 = vector.shape_cast %97 : vector<1x16x128xf32> to vector<16x128xf32>
    %99 = vector.shape_cast %96 : vector<4x4x128xbf16> to vector<16x128xbf16>
    %c8 = arith.constant 8 : index
    %c0_113 = arith.constant 0 : index
    %c0_114 = arith.constant 0 : index
    %100 = vector.load %arg4[%c8, %c0_113, %c0_114] : memref<9x128x128xbf16, #tpu.memory_space<vmem>>, vector<1x128x128xbf16>
    %101 = vector.shape_cast %100 : vector<1x128x128xbf16> to vector<128x128xbf16>
    %cst_115 = arith.constant dense<0.000000e+00> : vector<16x128xf32>
    %102 = tpu.matmul %99, %101, %cst_115 {dimension_numbers = #tpu.dot_dimension_numbers<[1], [0], [0], [1], [0, 0, 1, 1], [], []>} : vector<16x128xbf16>, vector<128x128xbf16>, vector<16x128xf32> -> vector<16x128xf32>
    %103 = arith.addf %98, %102 : vector<16x128xf32>
    %c3_116 = arith.constant 3 : index
    %c0_117 = arith.constant 0 : index
    %c0_118 = arith.constant 0 : index
    %104 = vector.load %arg8[%c3_116, %c0_117, %c0_118] : memref<4x16x128xf32, #tpu.memory_space<vmem>>, vector<1x16x128xf32>
    %105 = vector.shape_cast %104 : vector<1x16x128xf32> to vector<16x128xf32>
    %106 = vector.shape_cast %103 : vector<16x128xf32> to vector<1x16x128xf32>
    tpu.vector_store %arg8[%c3_116, %c0_117, %c0_118], %106 {strides = array<i32>} : memref<4x16x128xf32, #tpu.memory_space<vmem>>, vector<1x16x128xf32>,
    %c0_i32_119 = arith.constant 0 : i32
    %107 = arith.cmpi eq, %arg2, %c0_i32_119 : i32
    %108 = arith.extui %107 : i1 to i32
    %c0_i32_120 = arith.constant 0 : i32
    %109 = arith.cmpi ne, %108, %c0_i32_120 : i32
    scf.if %109 {
      %c0_121 = arith.constant 0 : index
      %c0_122 = arith.constant 0 : index
      %c0_123 = arith.constant 0 : index
      %110 = vector.load %arg8[%c0_121, %c0_122, %c0_123] : memref<4x16x128xf32, #tpu.memory_space<vmem>>, vector<4x16x128xf32>
      %c0_124 = arith.constant 0 : index
      %c0_125 = arith.constant 0 : index
      %111 = vector.load %arg5[%c0_124, %c0_125] : memref<1x128xf32, #tpu.memory_space<vmem>>, vector<1x128xf32>
      %112 = vector.shape_cast %111 : vector<1x128xf32> to vector<1x1x128xf32>
      %113 = vector.broadcast %112 : vector<1x1x128xf32> to vector<4x16x128xf32>
      %114 = arith.addf %110, %113 : vector<4x16x128xf32>
      %115 = arith.truncf %114 : vector<4x16x128xf32> to vector<4x16x128xbf16>
      %c0_126 = arith.constant 0 : index
      %c0_127 = arith.constant 0 : index
      %c0_128 = arith.constant 0 : index
      %c0_129 = arith.constant 0 : index
      %116 = vector.load %arg6[%c0_126, %c0_127, %c0_128, %c0_129] : memref<1x4x16x128xbf16, #tpu.memory_space<vmem>>, vector<1x4x16x128xbf16>
      %117 = vector.shape_cast %116 : vector<1x4x16x128xbf16> to vector<4x16x128xbf16>
      %118 = vector.shape_cast %115 : vector<4x16x128xbf16> to vector<1x4x16x128xbf16>
      tpu.vector_store %arg6[%c0_126, %c0_127, %c0_128, %c0_129], %118 {strides = array<i32>} : memref<1x4x16x128xbf16, #tpu.memory_space<vmem>>, vector<1x4x16x128xbf16>,
    } else {
    }
    return
  }
  func.func @transform_0(%arg0: i32, %arg1: i32, %arg2: i32) -> (i32, i32, i32, i32) {
    %c0_i32 = arith.constant 0 : i32
    %c0_i32_0 = arith.constant 0 : i32
    %c0_i32_1 = arith.constant 0 : i32
    return %arg0, %c0_i32, %c0_i32_0, %arg2 : i32, i32, i32, i32
  }
  func.func @transform_1(%arg0: i32, %arg1: i32, %arg2: i32) -> (i32, i32, i32) {
    %c0_i32 = arith.constant 0 : i32
    %c0_i32_0 = arith.constant 0 : i32
    return %c0_i32, %arg2, %arg1 : i32, i32, i32
  }
  func.func @transform_2(%arg0: i32, %arg1: i32, %arg2: i32) -> (i32, i32) {
    %c0_i32 = arith.constant 0 : i32
    %c0_i32_0 = arith.constant 0 : i32
    return %c0_i32, %arg1 : i32, i32
  }
  func.func @transform_3(%arg0: i32, %arg1: i32, %arg2: i32) -> (i32, i32, i32, i32) {
    %c0_i32 = arith.constant 0 : i32
    %c0_i32_0 = arith.constant 0 : i32
    %c0_i32_1 = arith.constant 0 : i32
    return %arg0, %c0_i32, %c0_i32_0, %arg1 : i32, i32, i32, i32
  }
}

module attributes {stable_mosaic.version = 11 : i64} {
  func.func @_conv_kernel(%arg0: i32, %arg1: i32, %arg2: i32, %arg3: memref<1x8x8x256xbf16, #tpu.memory_space<vmem>>, %arg4: memref<1x256x128xbf16, #tpu.memory_space<vmem>>, %arg5: memref<1x128xf32, #tpu.memory_space<vmem>>, %arg6: memref<1x128xf32, #tpu.memory_space<vmem>>, %arg7: memref<1x64x128xbf16, #tpu.memory_space<vmem>>, %arg8: memref<64x128xf32, #tpu.memory_space<vmem>>) attributes {dimension_semantics = [#tpu.dimension_semantics<parallel>, #tpu.dimension_semantics<parallel>, #tpu.dimension_semantics<arbitrary>], iteration_bounds = array<i64: 2, 1, 1>, scalar_prefetch = 0 : i64, scratch_operands = 1 : i64, tpu.core_type = #tpu.core_type<tc>, window_params = [{transform_indices = @transform_0, window_bounds = array<i64: 1, 8, 8, 256>}, {transform_indices = @transform_1, window_bounds = array<i64: 1, 256, 128>}, {transform_indices = @transform_2, window_bounds = array<i64: 1, 128>}, {transform_indices = @transform_3, window_bounds = array<i64: 1, 128>}, {transform_indices = @transform_4, window_bounds = array<i64: 1, 64, 128>}]} {
    %c0_i32 = arith.constant 0 : i32
    %0 = arith.cmpi eq, %arg2, %c0_i32 : i32
    %1 = arith.extui %0 : i1 to i32
    %c0_i32_0 = arith.constant 0 : i32
    %2 = arith.cmpi ne, %1, %c0_i32_0 : i32
    scf.if %2 {
      %cst_13 = arith.constant 0.000000e+00 : f32
      %15 = vector.broadcast %cst_13 : f32 to vector<64x128xf32>
      %c0_14 = arith.constant 0 : index
      %c0_15 = arith.constant 0 : index
      %16 = vector.load %arg8[%c0_14, %c0_15] : memref<64x128xf32, #tpu.memory_space<vmem>>, vector<64x128xf32>
      tpu.vector_store %arg8[%c0_14, %c0_15], %15 {strides = array<i32>} : memref<64x128xf32, #tpu.memory_space<vmem>>, vector<64x128xf32>,
    } else {
    }
    %c0 = arith.constant 0 : index
    %c0_1 = arith.constant 0 : index
    %c0_2 = arith.constant 0 : index
    %c0_3 = arith.constant 0 : index
    %3 = vector.load %arg3[%c0, %c0_1, %c0_2, %c0_3] : memref<1x8x8x256xbf16, #tpu.memory_space<vmem>>, vector<1x8x8x256xbf16>
    %4 = vector.shape_cast %3 : vector<1x8x8x256xbf16> to vector<8x8x256xbf16>
    %c0_4 = arith.constant 0 : index
    %c0_5 = arith.constant 0 : index
    %5 = vector.load %arg8[%c0_4, %c0_5] : memref<64x128xf32, #tpu.memory_space<vmem>>, vector<64x128xf32>
    %6 = vector.shape_cast %4 : vector<8x8x256xbf16> to vector<64x256xbf16>
    %c0_6 = arith.constant 0 : index
    %c0_7 = arith.constant 0 : index
    %c0_8 = arith.constant 0 : index
    %7 = vector.load %arg4[%c0_6, %c0_7, %c0_8] : memref<1x256x128xbf16, #tpu.memory_space<vmem>>, vector<1x256x128xbf16>
    %8 = vector.shape_cast %7 : vector<1x256x128xbf16> to vector<256x128xbf16>
    %cst = arith.constant dense<0.000000e+00> : vector<64x128xf32>
    %9 = tpu.matmul %6, %8, %cst {dimension_numbers = #tpu.dot_dimension_numbers<[1], [0], [0], [1], [0, 0, 1, 1], [], []>} : vector<64x256xbf16>, vector<256x128xbf16>, vector<64x128xf32> -> vector<64x128xf32>
    %10 = arith.addf %5, %9 : vector<64x128xf32>
    %c0_9 = arith.constant 0 : index
    %c0_10 = arith.constant 0 : index
    %11 = vector.load %arg8[%c0_9, %c0_10] : memref<64x128xf32, #tpu.memory_space<vmem>>, vector<64x128xf32>
    tpu.vector_store %arg8[%c0_9, %c0_10], %10 {strides = array<i32>} : memref<64x128xf32, #tpu.memory_space<vmem>>, vector<64x128xf32>,
    %c0_i32_11 = arith.constant 0 : i32
    %12 = arith.cmpi eq, %arg2, %c0_i32_11 : i32
    %13 = arith.extui %12 : i1 to i32
    %c0_i32_12 = arith.constant 0 : i32
    %14 = arith.cmpi ne, %13, %c0_i32_12 : i32
    scf.if %14 {
      %c0_13 = arith.constant 0 : index
      %c0_14 = arith.constant 0 : index
      %15 = vector.load %arg8[%c0_13, %c0_14] : memref<64x128xf32, #tpu.memory_space<vmem>>, vector<64x128xf32>
      %c0_15 = arith.constant 0 : index
      %c0_16 = arith.constant 0 : index
      %16 = vector.load %arg5[%c0_15, %c0_16] : memref<1x128xf32, #tpu.memory_space<vmem>>, vector<1x128xf32>
      %17 = vector.broadcast %16 : vector<1x128xf32> to vector<64x128xf32>
      %18 = arith.mulf %15, %17 : vector<64x128xf32>
      %c0_17 = arith.constant 0 : index
      %c0_18 = arith.constant 0 : index
      %19 = vector.load %arg6[%c0_17, %c0_18] : memref<1x128xf32, #tpu.memory_space<vmem>>, vector<1x128xf32>
      %20 = vector.broadcast %19 : vector<1x128xf32> to vector<64x128xf32>
      %21 = arith.addf %18, %20 : vector<64x128xf32>
      %22 = arith.truncf %21 : vector<64x128xf32> to vector<64x128xbf16>
      %c0_19 = arith.constant 0 : index
      %c0_20 = arith.constant 0 : index
      %c0_21 = arith.constant 0 : index
      %23 = vector.load %arg7[%c0_19, %c0_20, %c0_21] : memref<1x64x128xbf16, #tpu.memory_space<vmem>>, vector<1x64x128xbf16>
      %24 = vector.shape_cast %23 : vector<1x64x128xbf16> to vector<64x128xbf16>
      %25 = vector.shape_cast %22 : vector<64x128xbf16> to vector<1x64x128xbf16>
      tpu.vector_store %arg7[%c0_19, %c0_20, %c0_21], %25 {strides = array<i32>} : memref<1x64x128xbf16, #tpu.memory_space<vmem>>, vector<1x64x128xbf16>,
    } else {
    }
    return
  }
  func.func @transform_0(%arg0: i32, %arg1: i32, %arg2: i32) -> (i32, i32, i32, i32) {
    %c0_i32 = arith.constant 0 : i32
    %c0_i32_0 = arith.constant 0 : i32
    %c0_i32_1 = arith.constant 0 : i32
    return %arg0, %c0_i32, %c0_i32_0, %arg2 : i32, i32, i32, i32
  }
  func.func @transform_1(%arg0: i32, %arg1: i32, %arg2: i32) -> (i32, i32, i32) {
    %c0_i32 = arith.constant 0 : i32
    %c0_i32_0 = arith.constant 0 : i32
    return %c0_i32, %arg2, %arg1 : i32, i32, i32
  }
  func.func @transform_2(%arg0: i32, %arg1: i32, %arg2: i32) -> (i32, i32) {
    %c0_i32 = arith.constant 0 : i32
    %c0_i32_0 = arith.constant 0 : i32
    return %c0_i32, %arg1 : i32, i32
  }
  func.func @transform_3(%arg0: i32, %arg1: i32, %arg2: i32) -> (i32, i32) {
    %c0_i32 = arith.constant 0 : i32
    %c0_i32_0 = arith.constant 0 : i32
    return %c0_i32, %arg1 : i32, i32
  }
  func.func @transform_4(%arg0: i32, %arg1: i32, %arg2: i32) -> (i32, i32, i32) {
    %c0_i32 = arith.constant 0 : i32
    %c0_i32_0 = arith.constant 0 : i32
    return %arg0, %c0_i32, %arg1 : i32, i32, i32
  }
}

module attributes {stable_mosaic.version = 11 : i64} {
  func.func @_convtrans_kernel(%arg0: i32, %arg1: i32, %arg2: i32, %arg3: memref<1x8x8x128xbf16, #tpu.memory_space<vmem>>, %arg4: memref<9x128x128xbf16, #tpu.memory_space<vmem>>, %arg5: memref<1x128xf32, #tpu.memory_space<vmem>>, %arg6: memref<1x4x64x128xbf16, #tpu.memory_space<vmem>>, %arg7: memref<9x9x128xbf16, #tpu.memory_space<vmem>>, %arg8: memref<4x64x128xf32, #tpu.memory_space<vmem>>) attributes {dimension_semantics = [#tpu.dimension_semantics<parallel>, #tpu.dimension_semantics<parallel>, #tpu.dimension_semantics<arbitrary>], iteration_bounds = array<i64: 2, 1, 1>, scalar_prefetch = 0 : i64, scratch_operands = 2 : i64, tpu.core_type = #tpu.core_type<tc>, window_params = [{transform_indices = @transform_0, window_bounds = array<i64: 1, 8, 8, 128>}, {transform_indices = @transform_1, window_bounds = array<i64: 9, 128, 128>}, {transform_indices = @transform_2, window_bounds = array<i64: 1, 128>}, {transform_indices = @transform_3, window_bounds = array<i64: 1, 4, 64, 128>}]} {
    %c0_i32 = arith.constant 0 : i32
    %0 = arith.cmpi eq, %arg2, %c0_i32 : i32
    %1 = arith.extui %0 : i1 to i32
    %c0_i32_0 = arith.constant 0 : i32
    %2 = arith.cmpi ne, %1, %c0_i32_0 : i32
    scf.if %2 {
      %cst_121 = arith.constant 0.000000e+00 : f32
      %110 = vector.broadcast %cst_121 : f32 to vector<4x64x128xf32>
      %c0_122 = arith.constant 0 : index
      %c0_123 = arith.constant 0 : index
      %c0_124 = arith.constant 0 : index
      %111 = vector.load %arg8[%c0_122, %c0_123, %c0_124] : memref<4x64x128xf32, #tpu.memory_space<vmem>>, vector<4x64x128xf32>
      tpu.vector_store %arg8[%c0_122, %c0_123, %c0_124], %110 {strides = array<i32>} : memref<4x64x128xf32, #tpu.memory_space<vmem>>, vector<4x64x128xf32>,
    } else {
    }
    %cst = arith.constant 0.000000e+00 : bf16
    %3 = vector.broadcast %cst : bf16 to vector<9x9x128xbf16>
    %c0 = arith.constant 0 : index
    %c0_1 = arith.constant 0 : index
    %c0_2 = arith.constant 0 : index
    %4 = vector.load %arg7[%c0, %c0_1, %c0_2] : memref<9x9x128xbf16, #tpu.memory_space<vmem>>, vector<9x9x128xbf16>
    tpu.vector_store %arg7[%c0, %c0_1, %c0_2], %3 {strides = array<i32>} : memref<9x9x128xbf16, #tpu.memory_space<vmem>>, vector<9x9x128xbf16>,
    %c0_3 = arith.constant 0 : index
    %c0_4 = arith.constant 0 : index
    %c0_5 = arith.constant 0 : index
    %c0_6 = arith.constant 0 : index
    %5 = vector.load %arg3[%c0_3, %c0_4, %c0_5, %c0_6] : memref<1x8x8x128xbf16, #tpu.memory_space<vmem>>, vector<1x8x8x128xbf16>
    %6 = vector.shape_cast %5 : vector<1x8x8x128xbf16> to vector<8x8x128xbf16>
    %c0_7 = arith.constant 0 : index
    %c0_8 = arith.constant 0 : index
    %c0_9 = arith.constant 0 : index
    %7 = vector.load %arg7[%c0_7, %c0_8, %c0_9] : memref<9x9x128xbf16, #tpu.memory_space<vmem>>, vector<8x8x128xbf16>
    tpu.vector_store %arg7[%c0_7, %c0_8, %c0_9], %6 {strides = array<i32>} : memref<9x9x128xbf16, #tpu.memory_space<vmem>>, vector<8x8x128xbf16>,
    %c0_10 = arith.constant 0 : index
    %c0_11 = arith.constant 0 : index
    %c0_12 = arith.constant 0 : index
    %8 = vector.load %arg7[%c0_10, %c0_11, %c0_12] : memref<9x9x128xbf16, #tpu.memory_space<vmem>>, vector<8x8x128xbf16>
    %c0_13 = arith.constant 0 : index
    %c0_14 = arith.constant 0 : index
    %c0_15 = arith.constant 0 : index
    %9 = vector.load %arg8[%c0_13, %c0_14, %c0_15] : memref<4x64x128xf32, #tpu.memory_space<vmem>>, vector<1x64x128xf32>
    %10 = vector.shape_cast %9 : vector<1x64x128xf32> to vector<64x128xf32>
    %11 = vector.shape_cast %8 : vector<8x8x128xbf16> to vector<64x128xbf16>
    %c0_16 = arith.constant 0 : index
    %c0_17 = arith.constant 0 : index
    %c0_18 = arith.constant 0 : index
    %12 = vector.load %arg4[%c0_16, %c0_17, %c0_18] : memref<9x128x128xbf16, #tpu.memory_space<vmem>>, vector<1x128x128xbf16>
    %13 = vector.shape_cast %12 : vector<1x128x128xbf16> to vector<128x128xbf16>
    %cst_19 = arith.constant dense<0.000000e+00> : vector<64x128xf32>
    %14 = tpu.matmul %11, %13, %cst_19 {dimension_numbers = #tpu.dot_dimension_numbers<[1], [0], [0], [1], [0, 0, 1, 1], [], []>} : vector<64x128xbf16>, vector<128x128xbf16>, vector<64x128xf32> -> vector<64x128xf32>
    %15 = arith.addf %10, %14 : vector<64x128xf32>
    %c0_20 = arith.constant 0 : index
    %c0_21 = arith.constant 0 : index
    %c0_22 = arith.constant 0 : index
    %16 = vector.load %arg8[%c0_20, %c0_21, %c0_22] : memref<4x64x128xf32, #tpu.memory_space<vmem>>, vector<1x64x128xf32>
    %17 = vector.shape_cast %16 : vector<1x64x128xf32> to vector<64x128xf32>
    %18 = vector.shape_cast %15 : vector<64x128xf32> to vector<1x64x128xf32>
    tpu.vector_store %arg8[%c0_20, %c0_21, %c0_22], %18 {strides = array<i32>} : memref<4x64x128xf32, #tpu.memory_space<vmem>>, vector<1x64x128xf32>,
    %c0_23 = arith.constant 0 : index
    %c0_24 = arith.constant 0 : index
    %c0_25 = arith.constant 0 : index
    %19 = vector.load %arg7[%c0_23, %c0_24, %c0_25] : memref<9x9x128xbf16, #tpu.memory_space<vmem>>, vector<8x8x128xbf16>
    %c1 = arith.constant 1 : index
    %c0_26 = arith.constant 0 : index
    %c0_27 = arith.constant 0 : index
    %20 = vector.load %arg8[%c1, %c0_26, %c0_27] : memref<4x64x128xf32, #tpu.memory_space<vmem>>, vector<1x64x128xf32>
    %21 = vector.shape_cast %20 : vector<1x64x128xf32> to vector<64x128xf32>
    %22 = vector.shape_cast %19 : vector<8x8x128xbf16> to vector<64x128xbf16>
    %c1_28 = arith.constant 1 : index
    %c0_29 = arith.constant 0 : index
    %c0_30 = arith.constant 0 : index
    %23 = vector.load %arg4[%c1_28, %c0_29, %c0_30] : memref<9x128x128xbf16, #tpu.memory_space<vmem>>, vector<1x128x128xbf16>
    %24 = vector.shape_cast %23 : vector<1x128x128xbf16> to vector<128x128xbf16>
    %cst_31 = arith.constant dense<0.000000e+00> : vector<64x128xf32>
    %25 = tpu.matmul %22, %24, %cst_31 {dimension_numbers = #tpu.dot_dimension_numbers<[1], [0], [0], [1], [0, 0, 1, 1], [], []>} : vector<64x128xbf16>, vector<128x128xbf16>, vector<64x128xf32> -> vector<64x128xf32>
    %26 = arith.addf %21, %25 : vector<64x128xf32>
    %c1_32 = arith.constant 1 : index
    %c0_33 = arith.constant 0 : index
    %c0_34 = arith.constant 0 : index
    %27 = vector.load %arg8[%c1_32, %c0_33, %c0_34] : memref<4x64x128xf32, #tpu.memory_space<vmem>>, vector<1x64x128xf32>
    %28 = vector.shape_cast %27 : vector<1x64x128xf32> to vector<64x128xf32>
    %29 = vector.shape_cast %26 : vector<64x128xf32> to vector<1x64x128xf32>
    tpu.vector_store %arg8[%c1_32, %c0_33, %c0_34], %29 {strides = array<i32>} : memref<4x64x128xf32, #tpu.memory_space<vmem>>, vector<1x64x128xf32>,
    %c0_35 = arith.constant 0 : index
    %c1_36 = arith.constant 1 : index
    %c0_37 = arith.constant 0 : index
    %30 = vector.load %arg7[%c0_35, %c1_36, %c0_37] : memref<9x9x128xbf16, #tpu.memory_space<vmem>>, vector<8x8x128xbf16>
    %c1_38 = arith.constant 1 : index
    %c0_39 = arith.constant 0 : index
    %c0_40 = arith.constant 0 : index
    %31 = vector.load %arg8[%c1_38, %c0_39, %c0_40] : memref<4x64x128xf32, #tpu.memory_space<vmem>>, vector<1x64x128xf32>
    %32 = vector.shape_cast %31 : vector<1x64x128xf32> to vector<64x128xf32>
    %33 = vector.shape_cast %30 : vector<8x8x128xbf16> to vector<64x128xbf16>
    %c2 = arith.constant 2 : index
    %c0_41 = arith.constant 0 : index
    %c0_42 = arith.constant 0 : index
    %34 = vector.load %arg4[%c2, %c0_41, %c0_42] : memref<9x128x128xbf16, #tpu.memory_space<vmem>>, vector<1x128x128xbf16>
    %35 = vector.shape_cast %34 : vector<1x128x128xbf16> to vector<128x128xbf16>
    %cst_43 = arith.constant dense<0.000000e+00> : vector<64x128xf32>
    %36 = tpu.matmul %33, %35, %cst_43 {dimension_numbers = #tpu.dot_dimension_numbers<[1], [0], [0], [1], [0, 0, 1, 1], [], []>} : vector<64x128xbf16>, vector<128x128xbf16>, vector<64x128xf32> -> vector<64x128xf32>
    %37 = arith.addf %32, %36 : vector<64x128xf32>
    %c1_44 = arith.constant 1 : index
    %c0_45 = arith.constant 0 : index
    %c0_46 = arith.constant 0 : index
    %38 = vector.load %arg8[%c1_44, %c0_45, %c0_46] : memref<4x64x128xf32, #tpu.memory_space<vmem>>, vector<1x64x128xf32>
    %39 = vector.shape_cast %38 : vector<1x64x128xf32> to vector<64x128xf32>
    %40 = vector.shape_cast %37 : vector<64x128xf32> to vector<1x64x128xf32>
    tpu.vector_store %arg8[%c1_44, %c0_45, %c0_46], %40 {strides = array<i32>} : memref<4x64x128xf32, #tpu.memory_space<vmem>>, vector<1x64x128xf32>,
    %c0_47 = arith.constant 0 : index
    %c0_48 = arith.constant 0 : index
    %c0_49 = arith.constant 0 : index
    %41 = vector.load %arg7[%c0_47, %c0_48, %c0_49] : memref<9x9x128xbf16, #tpu.memory_space<vmem>>, vector<8x8x128xbf16>
    %c2_50 = arith.constant 2 : index
    %c0_51 = arith.constant 0 : index
    %c0_52 = arith.constant 0 : index
    %42 = vector.load %arg8[%c2_50, %c0_51, %c0_52] : memref<4x64x128xf32, #tpu.memory_space<vmem>>, vector<1x64x128xf32>
    %43 = vector.shape_cast %42 : vector<1x64x128xf32> to vector<64x128xf32>
    %44 = vector.shape_cast %41 : vector<8x8x128xbf16> to vector<64x128xbf16>
    %c3 = arith.constant 3 : index
    %c0_53 = arith.constant 0 : index
    %c0_54 = arith.constant 0 : index
    %45 = vector.load %arg4[%c3, %c0_53, %c0_54] : memref<9x128x128xbf16, #tpu.memory_space<vmem>>, vector<1x128x128xbf16>
    %46 = vector.shape_cast %45 : vector<1x128x128xbf16> to vector<128x128xbf16>
    %cst_55 = arith.constant dense<0.000000e+00> : vector<64x128xf32>
    %47 = tpu.matmul %44, %46, %cst_55 {dimension_numbers = #tpu.dot_dimension_numbers<[1], [0], [0], [1], [0, 0, 1, 1], [], []>} : vector<64x128xbf16>, vector<128x128xbf16>, vector<64x128xf32> -> vector<64x128xf32>
    %48 = arith.addf %43, %47 : vector<64x128xf32>
    %c2_56 = arith.constant 2 : index
    %c0_57 = arith.constant 0 : index
    %c0_58 = arith.constant 0 : index
    %49 = vector.load %arg8[%c2_56, %c0_57, %c0_58] : memref<4x64x128xf32, #tpu.memory_space<vmem>>, vector<1x64x128xf32>
    %50 = vector.shape_cast %49 : vector<1x64x128xf32> to vector<64x128xf32>
    %51 = vector.shape_cast %48 : vector<64x128xf32> to vector<1x64x128xf32>
    tpu.vector_store %arg8[%c2_56, %c0_57, %c0_58], %51 {strides = array<i32>} : memref<4x64x128xf32, #tpu.memory_space<vmem>>, vector<1x64x128xf32>,
    %c1_59 = arith.constant 1 : index
    %c0_60 = arith.constant 0 : index
    %c0_61 = arith.constant 0 : index
    %52 = vector.load %arg7[%c1_59, %c0_60, %c0_61] : memref<9x9x128xbf16, #tpu.memory_space<vmem>>, vector<8x8x128xbf16>
    %c2_62 = arith.constant 2 : index
    %c0_63 = arith.constant 0 : index
    %c0_64 = arith.constant 0 : index
    %53 = vector.load %arg8[%c2_62, %c0_63, %c0_64] : memref<4x64x128xf32, #tpu.memory_space<vmem>>, vector<1x64x128xf32>
    %54 = vector.shape_cast %53 : vector<1x64x128xf32> to vector<64x128xf32>
    %55 = vector.shape_cast %52 : vector<8x8x128xbf16> to vector<64x128xbf16>
    %c4 = arith.constant 4 : index
    %c0_65 = arith.constant 0 : index
    %c0_66 = arith.constant 0 : index
    %56 = vector.load %arg4[%c4, %c0_65, %c0_66] : memref<9x128x128xbf16, #tpu.memory_space<vmem>>, vector<1x128x128xbf16>
    %57 = vector.shape_cast %56 : vector<1x128x128xbf16> to vector<128x128xbf16>
    %cst_67 = arith.constant dense<0.000000e+00> : vector<64x128xf32>
    %58 = tpu.matmul %55, %57, %cst_67 {dimension_numbers = #tpu.dot_dimension_numbers<[1], [0], [0], [1], [0, 0, 1, 1], [], []>} : vector<64x128xbf16>, vector<128x128xbf16>, vector<64x128xf32> -> vector<64x128xf32>
    %59 = arith.addf %54, %58 : vector<64x128xf32>
    %c2_68 = arith.constant 2 : index
    %c0_69 = arith.constant 0 : index
    %c0_70 = arith.constant 0 : index
    %60 = vector.load %arg8[%c2_68, %c0_69, %c0_70] : memref<4x64x128xf32, #tpu.memory_space<vmem>>, vector<1x64x128xf32>
    %61 = vector.shape_cast %60 : vector<1x64x128xf32> to vector<64x128xf32>
    %62 = vector.shape_cast %59 : vector<64x128xf32> to vector<1x64x128xf32>
    tpu.vector_store %arg8[%c2_68, %c0_69, %c0_70], %62 {strides = array<i32>} : memref<4x64x128xf32, #tpu.memory_space<vmem>>, vector<1x64x128xf32>,
    %c0_71 = arith.constant 0 : index
    %c0_72 = arith.constant 0 : index
    %c0_73 = arith.constant 0 : index
    %63 = vector.load %arg7[%c0_71, %c0_72, %c0_73] : memref<9x9x128xbf16, #tpu.memory_space<vmem>>, vector<8x8x128xbf16>
    %c3_74 = arith.constant 3 : index
    %c0_75 = arith.constant 0 : index
    %c0_76 = arith.constant 0 : index
    %64 = vector.load %arg8[%c3_74, %c0_75, %c0_76] : memref<4x64x128xf32, #tpu.memory_space<vmem>>, vector<1x64x128xf32>
    %65 = vector.shape_cast %64 : vector<1x64x128xf32> to vector<64x128xf32>
    %66 = vector.shape_cast %63 : vector<8x8x128xbf16> to vector<64x128xbf16>
    %c5 = arith.constant 5 : index
    %c0_77 = arith.constant 0 : index
    %c0_78 = arith.constant 0 : index
    %67 = vector.load %arg4[%c5, %c0_77, %c0_78] : memref<9x128x128xbf16, #tpu.memory_space<vmem>>, vector<1x128x128xbf16>
    %68 = vector.shape_cast %67 : vector<1x128x128xbf16> to vector<128x128xbf16>
    %cst_79 = arith.constant dense<0.000000e+00> : vector<64x128xf32>
    %69 = tpu.matmul %66, %68, %cst_79 {dimension_numbers = #tpu.dot_dimension_numbers<[1], [0], [0], [1], [0, 0, 1, 1], [], []>} : vector<64x128xbf16>, vector<128x128xbf16>, vector<64x128xf32> -> vector<64x128xf32>
    %70 = arith.addf %65, %69 : vector<64x128xf32>
    %c3_80 = arith.constant 3 : index
    %c0_81 = arith.constant 0 : index
    %c0_82 = arith.constant 0 : index
    %71 = vector.load %arg8[%c3_80, %c0_81, %c0_82] : memref<4x64x128xf32, #tpu.memory_space<vmem>>, vector<1x64x128xf32>
    %72 = vector.shape_cast %71 : vector<1x64x128xf32> to vector<64x128xf32>
    %73 = vector.shape_cast %70 : vector<64x128xf32> to vector<1x64x128xf32>
    tpu.vector_store %arg8[%c3_80, %c0_81, %c0_82], %73 {strides = array<i32>} : memref<4x64x128xf32, #tpu.memory_space<vmem>>, vector<1x64x128xf32>,
    %c0_83 = arith.constant 0 : index
    %c1_84 = arith.constant 1 : index
    %c0_85 = arith.constant 0 : index
    %74 = vector.load %arg7[%c0_83, %c1_84, %c0_85] : memref<9x9x128xbf16, #tpu.memory_space<vmem>>, vector<8x8x128xbf16>
    %c3_86 = arith.constant 3 : index
    %c0_87 = arith.constant 0 : index
    %c0_88 = arith.constant 0 : index
    %75 = vector.load %arg8[%c3_86, %c0_87, %c0_88] : memref<4x64x128xf32, #tpu.memory_space<vmem>>, vector<1x64x128xf32>
    %76 = vector.shape_cast %75 : vector<1x64x128xf32> to vector<64x128xf32>
    %77 = vector.shape_cast %74 : vector<8x8x128xbf16> to vector<64x128xbf16>
    %c6 = arith.constant 6 : index
    %c0_89 = arith.constant 0 : index
    %c0_90 = arith.constant 0 : index
    %78 = vector.load %arg4[%c6, %c0_89, %c0_90] : memref<9x128x128xbf16, #tpu.memory_space<vmem>>, vector<1x128x128xbf16>
    %79 = vector.shape_cast %78 : vector<1x128x128xbf16> to vector<128x128xbf16>
    %cst_91 = arith.constant dense<0.000000e+00> : vector<64x128xf32>
    %80 = tpu.matmul %77, %79, %cst_91 {dimension_numbers = #tpu.dot_dimension_numbers<[1], [0], [0], [1], [0, 0, 1, 1], [], []>} : vector<64x128xbf16>, vector<128x128xbf16>, vector<64x128xf32> -> vector<64x128xf32>
    %81 = arith.addf %76, %80 : vector<64x128xf32>
    %c3_92 = arith.constant 3 : index
    %c0_93 = arith.constant 0 : index
    %c0_94 = arith.constant 0 : index
    %82 = vector.load %arg8[%c3_92, %c0_93, %c0_94] : memref<4x64x128xf32, #tpu.memory_space<vmem>>, vector<1x64x128xf32>
    %83 = vector.shape_cast %82 : vector<1x64x128xf32> to vector<64x128xf32>
    %84 = vector.shape_cast %81 : vector<64x128xf32> to vector<1x64x128xf32>
    tpu.vector_store %arg8[%c3_92, %c0_93, %c0_94], %84 {strides = array<i32>} : memref<4x64x128xf32, #tpu.memory_space<vmem>>, vector<1x64x128xf32>,
    %c1_95 = arith.constant 1 : index
    %c0_96 = arith.constant 0 : index
    %c0_97 = arith.constant 0 : index
    %85 = vector.load %arg7[%c1_95, %c0_96, %c0_97] : memref<9x9x128xbf16, #tpu.memory_space<vmem>>, vector<8x8x128xbf16>
    %c3_98 = arith.constant 3 : index
    %c0_99 = arith.constant 0 : index
    %c0_100 = arith.constant 0 : index
    %86 = vector.load %arg8[%c3_98, %c0_99, %c0_100] : memref<4x64x128xf32, #tpu.memory_space<vmem>>, vector<1x64x128xf32>
    %87 = vector.shape_cast %86 : vector<1x64x128xf32> to vector<64x128xf32>
    %88 = vector.shape_cast %85 : vector<8x8x128xbf16> to vector<64x128xbf16>
    %c7 = arith.constant 7 : index
    %c0_101 = arith.constant 0 : index
    %c0_102 = arith.constant 0 : index
    %89 = vector.load %arg4[%c7, %c0_101, %c0_102] : memref<9x128x128xbf16, #tpu.memory_space<vmem>>, vector<1x128x128xbf16>
    %90 = vector.shape_cast %89 : vector<1x128x128xbf16> to vector<128x128xbf16>
    %cst_103 = arith.constant dense<0.000000e+00> : vector<64x128xf32>
    %91 = tpu.matmul %88, %90, %cst_103 {dimension_numbers = #tpu.dot_dimension_numbers<[1], [0], [0], [1], [0, 0, 1, 1], [], []>} : vector<64x128xbf16>, vector<128x128xbf16>, vector<64x128xf32> -> vector<64x128xf32>
    %92 = arith.addf %87, %91 : vector<64x128xf32>
    %c3_104 = arith.constant 3 : index
    %c0_105 = arith.constant 0 : index
    %c0_106 = arith.constant 0 : index
    %93 = vector.load %arg8[%c3_104, %c0_105, %c0_106] : memref<4x64x128xf32, #tpu.memory_space<vmem>>, vector<1x64x128xf32>
    %94 = vector.shape_cast %93 : vector<1x64x128xf32> to vector<64x128xf32>
    %95 = vector.shape_cast %92 : vector<64x128xf32> to vector<1x64x128xf32>
    tpu.vector_store %arg8[%c3_104, %c0_105, %c0_106], %95 {strides = array<i32>} : memref<4x64x128xf32, #tpu.memory_space<vmem>>, vector<1x64x128xf32>,
    %c1_107 = arith.constant 1 : index
    %c1_108 = arith.constant 1 : index
    %c0_109 = arith.constant 0 : index
    %96 = vector.load %arg7[%c1_107, %c1_108, %c0_109] : memref<9x9x128xbf16, #tpu.memory_space<vmem>>, vector<8x8x128xbf16>
    %c3_110 = arith.constant 3 : index
    %c0_111 = arith.constant 0 : index
    %c0_112 = arith.constant 0 : index
    %97 = vector.load %arg8[%c3_110, %c0_111, %c0_112] : memref<4x64x128xf32, #tpu.memory_space<vmem>>, vector<1x64x128xf32>
    %98 = vector.shape_cast %97 : vector<1x64x128xf32> to vector<64x128xf32>
    %99 = vector.shape_cast %96 : vector<8x8x128xbf16> to vector<64x128xbf16>
    %c8 = arith.constant 8 : index
    %c0_113 = arith.constant 0 : index
    %c0_114 = arith.constant 0 : index
    %100 = vector.load %arg4[%c8, %c0_113, %c0_114] : memref<9x128x128xbf16, #tpu.memory_space<vmem>>, vector<1x128x128xbf16>
    %101 = vector.shape_cast %100 : vector<1x128x128xbf16> to vector<128x128xbf16>
    %cst_115 = arith.constant dense<0.000000e+00> : vector<64x128xf32>
    %102 = tpu.matmul %99, %101, %cst_115 {dimension_numbers = #tpu.dot_dimension_numbers<[1], [0], [0], [1], [0, 0, 1, 1], [], []>} : vector<64x128xbf16>, vector<128x128xbf16>, vector<64x128xf32> -> vector<64x128xf32>
    %103 = arith.addf %98, %102 : vector<64x128xf32>
    %c3_116 = arith.constant 3 : index
    %c0_117 = arith.constant 0 : index
    %c0_118 = arith.constant 0 : index
    %104 = vector.load %arg8[%c3_116, %c0_117, %c0_118] : memref<4x64x128xf32, #tpu.memory_space<vmem>>, vector<1x64x128xf32>
    %105 = vector.shape_cast %104 : vector<1x64x128xf32> to vector<64x128xf32>
    %106 = vector.shape_cast %103 : vector<64x128xf32> to vector<1x64x128xf32>
    tpu.vector_store %arg8[%c3_116, %c0_117, %c0_118], %106 {strides = array<i32>} : memref<4x64x128xf32, #tpu.memory_space<vmem>>, vector<1x64x128xf32>,
    %c0_i32_119 = arith.constant 0 : i32
    %107 = arith.cmpi eq, %arg2, %c0_i32_119 : i32
    %108 = arith.extui %107 : i1 to i32
    %c0_i32_120 = arith.constant 0 : i32
    %109 = arith.cmpi ne, %108, %c0_i32_120 : i32
    scf.if %109 {
      %c0_121 = arith.constant 0 : index
      %c0_122 = arith.constant 0 : index
      %c0_123 = arith.constant 0 : index
      %110 = vector.load %arg8[%c0_121, %c0_122, %c0_123] : memref<4x64x128xf32, #tpu.memory_space<vmem>>, vector<4x64x128xf32>
      %c0_124 = arith.constant 0 : index
      %c0_125 = arith.constant 0 : index
      %111 = vector.load %arg5[%c0_124, %c0_125] : memref<1x128xf32, #tpu.memory_space<vmem>>, vector<1x128xf32>
      %112 = vector.shape_cast %111 : vector<1x128xf32> to vector<1x1x128xf32>
      %113 = vector.broadcast %112 : vector<1x1x128xf32> to vector<4x64x128xf32>
      %114 = arith.addf %110, %113 : vector<4x64x128xf32>
      %115 = arith.truncf %114 : vector<4x64x128xf32> to vector<4x64x128xbf16>
      %c0_126 = arith.constant 0 : index
      %c0_127 = arith.constant 0 : index
      %c0_128 = arith.constant 0 : index
      %c0_129 = arith.constant 0 : index
      %116 = vector.load %arg6[%c0_126, %c0_127, %c0_128, %c0_129] : memref<1x4x64x128xbf16, #tpu.memory_space<vmem>>, vector<1x4x64x128xbf16>
      %117 = vector.shape_cast %116 : vector<1x4x64x128xbf16> to vector<4x64x128xbf16>
      %118 = vector.shape_cast %115 : vector<4x64x128xbf16> to vector<1x4x64x128xbf16>
      tpu.vector_store %arg6[%c0_126, %c0_127, %c0_128, %c0_129], %118 {strides = array<i32>} : memref<1x4x64x128xbf16, #tpu.memory_space<vmem>>, vector<1x4x64x128xbf16>,
    } else {
    }
    return
  }
  func.func @transform_0(%arg0: i32, %arg1: i32, %arg2: i32) -> (i32, i32, i32, i32) {
    %c0_i32 = arith.constant 0 : i32
    %c0_i32_0 = arith.constant 0 : i32
    %c0_i32_1 = arith.constant 0 : i32
    return %arg0, %c0_i32, %c0_i32_0, %arg2 : i32, i32, i32, i32
  }
  func.func @transform_1(%arg0: i32, %arg1: i32, %arg2: i32) -> (i32, i32, i32) {
    %c0_i32 = arith.constant 0 : i32
    %c0_i32_0 = arith.constant 0 : i32
    return %c0_i32, %arg2, %arg1 : i32, i32, i32
  }
  func.func @transform_2(%arg0: i32, %arg1: i32, %arg2: i32) -> (i32, i32) {
    %c0_i32 = arith.constant 0 : i32
    %c0_i32_0 = arith.constant 0 : i32
    return %c0_i32, %arg1 : i32, i32
  }
  func.func @transform_3(%arg0: i32, %arg1: i32, %arg2: i32) -> (i32, i32, i32, i32) {
    %c0_i32 = arith.constant 0 : i32
    %c0_i32_0 = arith.constant 0 : i32
    %c0_i32_1 = arith.constant 0 : i32
    return %arg0, %c0_i32, %c0_i32_0, %arg1 : i32, i32, i32, i32
  }
}

module attributes {stable_mosaic.version = 11 : i64} {
  func.func @_conv_kernel(%arg0: i32, %arg1: i32, %arg2: i32, %arg3: memref<1x16x16x128xbf16, #tpu.memory_space<vmem>>, %arg4: memref<1x128x128xbf16, #tpu.memory_space<vmem>>, %arg5: memref<1x128xf32, #tpu.memory_space<vmem>>, %arg6: memref<1x128xf32, #tpu.memory_space<vmem>>, %arg7: memref<1x256x128xbf16, #tpu.memory_space<vmem>>, %arg8: memref<256x128xf32, #tpu.memory_space<vmem>>) attributes {dimension_semantics = [#tpu.dimension_semantics<parallel>, #tpu.dimension_semantics<parallel>, #tpu.dimension_semantics<arbitrary>], iteration_bounds = array<i64: 2, 1, 1>, scalar_prefetch = 0 : i64, scratch_operands = 1 : i64, tpu.core_type = #tpu.core_type<tc>, window_params = [{transform_indices = @transform_0, window_bounds = array<i64: 1, 16, 16, 128>}, {transform_indices = @transform_1, window_bounds = array<i64: 1, 128, 128>}, {transform_indices = @transform_2, window_bounds = array<i64: 1, 128>}, {transform_indices = @transform_3, window_bounds = array<i64: 1, 128>}, {transform_indices = @transform_4, window_bounds = array<i64: 1, 256, 128>}]} {
    %c0_i32 = arith.constant 0 : i32
    %0 = arith.cmpi eq, %arg2, %c0_i32 : i32
    %1 = arith.extui %0 : i1 to i32
    %c0_i32_0 = arith.constant 0 : i32
    %2 = arith.cmpi ne, %1, %c0_i32_0 : i32
    scf.if %2 {
      %cst_13 = arith.constant 0.000000e+00 : f32
      %15 = vector.broadcast %cst_13 : f32 to vector<256x128xf32>
      %c0_14 = arith.constant 0 : index
      %c0_15 = arith.constant 0 : index
      %16 = vector.load %arg8[%c0_14, %c0_15] : memref<256x128xf32, #tpu.memory_space<vmem>>, vector<256x128xf32>
      tpu.vector_store %arg8[%c0_14, %c0_15], %15 {strides = array<i32>} : memref<256x128xf32, #tpu.memory_space<vmem>>, vector<256x128xf32>,
    } else {
    }
    %c0 = arith.constant 0 : index
    %c0_1 = arith.constant 0 : index
    %c0_2 = arith.constant 0 : index
    %c0_3 = arith.constant 0 : index
    %3 = vector.load %arg3[%c0, %c0_1, %c0_2, %c0_3] : memref<1x16x16x128xbf16, #tpu.memory_space<vmem>>, vector<1x16x16x128xbf16>
    %4 = vector.shape_cast %3 : vector<1x16x16x128xbf16> to vector<16x16x128xbf16>
    %c0_4 = arith.constant 0 : index
    %c0_5 = arith.constant 0 : index
    %5 = vector.load %arg8[%c0_4, %c0_5] : memref<256x128xf32, #tpu.memory_space<vmem>>, vector<256x128xf32>
    %6 = vector.shape_cast %4 : vector<16x16x128xbf16> to vector<256x128xbf16>
    %c0_6 = arith.constant 0 : index
    %c0_7 = arith.constant 0 : index
    %c0_8 = arith.constant 0 : index
    %7 = vector.load %arg4[%c0_6, %c0_7, %c0_8] : memref<1x128x128xbf16, #tpu.memory_space<vmem>>, vector<1x128x128xbf16>
    %8 = vector.shape_cast %7 : vector<1x128x128xbf16> to vector<128x128xbf16>
    %cst = arith.constant dense<0.000000e+00> : vector<256x128xf32>
    %9 = tpu.matmul %6, %8, %cst {dimension_numbers = #tpu.dot_dimension_numbers<[1], [0], [0], [1], [0, 0, 1, 1], [], []>} : vector<256x128xbf16>, vector<128x128xbf16>, vector<256x128xf32> -> vector<256x128xf32>
    %10 = arith.addf %5, %9 : vector<256x128xf32>
    %c0_9 = arith.constant 0 : index
    %c0_10 = arith.constant 0 : index
    %11 = vector.load %arg8[%c0_9, %c0_10] : memref<256x128xf32, #tpu.memory_space<vmem>>, vector<256x128xf32>
    tpu.vector_store %arg8[%c0_9, %c0_10], %10 {strides = array<i32>} : memref<256x128xf32, #tpu.memory_space<vmem>>, vector<256x128xf32>,
    %c0_i32_11 = arith.constant 0 : i32
    %12 = arith.cmpi eq, %arg2, %c0_i32_11 : i32
    %13 = arith.extui %12 : i1 to i32
    %c0_i32_12 = arith.constant 0 : i32
    %14 = arith.cmpi ne, %13, %c0_i32_12 : i32
    scf.if %14 {
      %c0_13 = arith.constant 0 : index
      %c0_14 = arith.constant 0 : index
      %15 = vector.load %arg8[%c0_13, %c0_14] : memref<256x128xf32, #tpu.memory_space<vmem>>, vector<256x128xf32>
      %c0_15 = arith.constant 0 : index
      %c0_16 = arith.constant 0 : index
      %16 = vector.load %arg5[%c0_15, %c0_16] : memref<1x128xf32, #tpu.memory_space<vmem>>, vector<1x128xf32>
      %17 = vector.broadcast %16 : vector<1x128xf32> to vector<256x128xf32>
      %18 = arith.mulf %15, %17 : vector<256x128xf32>
      %c0_17 = arith.constant 0 : index
      %c0_18 = arith.constant 0 : index
      %19 = vector.load %arg6[%c0_17, %c0_18] : memref<1x128xf32, #tpu.memory_space<vmem>>, vector<1x128xf32>
      %20 = vector.broadcast %19 : vector<1x128xf32> to vector<256x128xf32>
      %21 = arith.addf %18, %20 : vector<256x128xf32>
      %cst_19 = arith.constant 5.000000e-01 : f32
      %22 = vector.broadcast %cst_19 : f32 to vector<256x128xf32>
      %23 = arith.mulf %22, %21 : vector<256x128xf32>
      %24 = math.tanh %23 : vector<256x128xf32>
      %cst_20 = arith.constant 1.000000e+00 : f32
      %25 = vector.broadcast %cst_20 : f32 to vector<256x128xf32>
      %26 = arith.addf %24, %25 : vector<256x128xf32>
      %cst_21 = arith.constant 5.000000e-01 : f32
      %27 = vector.broadcast %cst_21 : f32 to vector<256x128xf32>
      %28 = arith.mulf %27, %26 : vector<256x128xf32>
      %29 = arith.truncf %28 : vector<256x128xf32> to vector<256x128xbf16>
      %c0_22 = arith.constant 0 : index
      %c0_23 = arith.constant 0 : index
      %c0_24 = arith.constant 0 : index
      %30 = vector.load %arg7[%c0_22, %c0_23, %c0_24] : memref<1x256x128xbf16, #tpu.memory_space<vmem>>, vector<1x256x128xbf16>
      %31 = vector.shape_cast %30 : vector<1x256x128xbf16> to vector<256x128xbf16>
      %32 = vector.shape_cast %29 : vector<256x128xbf16> to vector<1x256x128xbf16>
      tpu.vector_store %arg7[%c0_22, %c0_23, %c0_24], %32 {strides = array<i32>} : memref<1x256x128xbf16, #tpu.memory_space<vmem>>, vector<1x256x128xbf16>,
    } else {
    }
    return
  }
  func.func @transform_0(%arg0: i32, %arg1: i32, %arg2: i32) -> (i32, i32, i32, i32) {
    %c0_i32 = arith.constant 0 : i32
    %c0_i32_0 = arith.constant 0 : i32
    %c0_i32_1 = arith.constant 0 : i32
    return %arg0, %c0_i32, %c0_i32_0, %arg2 : i32, i32, i32, i32
  }
  func.func @transform_1(%arg0: i32, %arg1: i32, %arg2: i32) -> (i32, i32, i32) {
    %c0_i32 = arith.constant 0 : i32
    %c0_i32_0 = arith.constant 0 : i32
    return %c0_i32, %arg2, %arg1 : i32, i32, i32
  }
  func.func @transform_2(%arg0: i32, %arg1: i32, %arg2: i32) -> (i32, i32) {
    %c0_i32 = arith.constant 0 : i32
    %c0_i32_0 = arith.constant 0 : i32
    return %c0_i32, %arg1 : i32, i32
  }
  func.func @transform_3(%arg0: i32, %arg1: i32, %arg2: i32) -> (i32, i32) {
    %c0_i32 = arith.constant 0 : i32
    %c0_i32_0 = arith.constant 0 : i32
    return %c0_i32, %arg1 : i32, i32
  }
  func.func @transform_4(%arg0: i32, %arg1: i32, %arg2: i32) -> (i32, i32, i32) {
    %c0_i32 = arith.constant 0 : i32
    %c0_i32_0 = arith.constant 0 : i32
    return %arg0, %c0_i32, %arg1 : i32, i32, i32
  }
}

</mosaic_0001>

<bundles_post_ra>
// kernel: udarknet_forward.11
= control target key start
LH: loop header
LB: loop body
LE: loop exit
PB: predicated region body
PF: predicated region fallthrough
CT: control target
= control target key end

     0   :  { %s2251_s15 = smov 0   ;;  %s2253_s16 = smov 0   ;;  %s2616_s0 = inlined_call_operand.vmem [shape: bf16[2,20,5,128], index: 0, kind: input, shape index: {}]   ;;  %s2617_s1 = inlined_call_operand.vmem [shape: bf16[9,128,128], index: 1, kind: input, shape index: {}]   ;;  %s2618_s2 = inlined_call_operand.vmem [shape: f32[1,128], index: 2, kind: input, shape index: {}]   ;;  %s2619_s3 = inlined_call_operand.vmem [shape: f32[1,128], index: 3, kind: input, shape index: {}]   ;;  %s2620_s4 = inlined_call_operand.vmem [shape: bf16[2,16,128], index: 4, kind: output, shape index: {}]  }
   0x1   :  { %s2255_s17 = smov 0  }
   0x2 LB: > { %s33_s18 = sadd.s32 1, %s2220_s16  ;;  %p1647_p0 = scmp.ge.s32.totalorder %s2224_s17, 1  ;;  %s2224_s17 = sphi %s2255_s17, %s14_s17   ;;  %s2220_s16 = sphi %s2253_s16, %s2628_s16   ;;  %s2216_s15 = sphi %s2251_s15, %s2627_s15  }
   0x3   : > { %p35_p1 = scmp.ge.s32.totalorder %s33_s18, 2  ;;  %p220_p2 = scmp.lt.s32.totalorder %s2224_s17, 3 }
   0x5   : > { %s2630_s18 = smov (%p35_p1, %s33_s18), 0  ;;  %p221_p3 = pnand %p1647_p0, %p220_p2 }
   0x6   : > { %p266_p4 = scmp.lt.s32.totalorder (!%p221_p3), %s2216_s15, 1 }
   0x7   : > { %224 = sbr.rel (%p221_p3) target bundleno = 265 (0x109), region = 36 }
   0xc   : > { %v2105_v0 = vld [vmem:[%s2617_s1 + $0x38] sm:$0xff]  ;;  %v2104_v3 = vld [vmem:[%s2617_s1 + $0x30] sm:$0xff]  ;;  %s2632_s15 = smov (!%p266_p4, %s2216_s15), 1  ;;  %v2103_v8 = vld [vmem:[%s2617_s1 + $0x28] sm:$0xff]  ;;  %vm547_vm0 = vsmask.f32 1280 }
   0xd   : > { %v2121_v1 = vld [vmem:[%s2617_s1 + $0xb8] sm:$0xff]  ;;  %386 = vmatpush.bf16.msra.mxu0 %v2105_v0  ;;  %v2120_v4 = vld [vmem:[%s2617_s1 + $0xb0] sm:$0xff]  ;;  %v2119_v9 = vld [vmem:[%s2617_s1 + $0xa8] sm:$0xff]  ;;  %s2175_s21 = smul.u32 80, %s2632_s15  ;;  %vm521_vm1 = vcmask 1041408   ;;  %vm525_vm3 = vcmask 1043458  }
   0xe   : > { %v2113_v2 = vld [vmem:[%s2617_s1 + $0x78] sm:$0xff]  ;;  %684 = vmatpush.bf16.msra.mxu2 %v2121_v1  ;;  %v2112_v6 = vld [vmem:[%s2617_s1 + $0x70] sm:$0xff]  ;;  %v2111_v10 = vld [vmem:[%s2617_s1 + $0x68] sm:$0xff]  ;;  %vm548_vm2 = vsmask.f32 3336 }
   0xf   : > { %v2129_v5 = vld [vmem:[%s2617_s1 + $0xf8] sm:$0xff]  ;;  %489 = vmatpush.bf16.msra.mxu1 %v2113_v2  ;;  %v2128_v7 = vld [vmem:[%s2617_s1 + $0xf0] sm:$0xff]  ;;  %v2127_v11 = vld [vmem:[%s2617_s1 + $0xe8] sm:$0xff]  ;;  %s2323_s6 = scalar_lea.vmem %s2616_s0, %s2175_s21  ;;  %vm550_vm4 = vsmask.f32 5392  ;;  %s2097_s21 = sshll.u32 %s2632_s15, 3 }
  0x10   : > { %787 = vmatpush.bf16.msra.mxu3 %v2129_v5  ;;  %v2102_v12 = vld [vmem:[%s2617_s1 + $0x20] sm:$0xff]  ;;  %v2101_v16 = vld [vmem:[%s2617_s1 + $0x18] sm:$0xff]  ;;  %v305_v22 = vld [vmem:[%s2323_s6 + $0x8] sm:$0x3]  ;;  %vm552_vm5 = vsmask.f32 7448  ;;  %s296_s24 = scalar_lea.vmem %s2620_s4, %s2097_s21 }
  0x11   : > { %387 = vmatpush.bf16.msra.mxu0 %v2104_v3  ;;  %v2118_v13 = vld [vmem:[%s2617_s1 + $0xa0] sm:$0xff]  ;;  %v2117_v17 = vld [vmem:[%s2617_s1 + $0x98] sm:$0xff]  ;;  %v306_v23 = vld [vmem:[%s2323_s6 + $0xc] sm:$0x3]  ;;  %332 = vst [vmem:[#allocation1 + $0x2] ss:$4 sm:$0xff] %v305_v22 }
  0x12   : > { %685 = vmatpush.bf16.msra.mxu2 %v2120_v4  ;;  %v2110_v14 = vld [vmem:[%s2617_s1 + $0x60] sm:$0xff]  ;;  %v2109_v18 = vld [vmem:[%s2617_s1 + $0x58] sm:$0xff]  ;;  %v2100_v24 = vld [vmem:[%s2617_s1 + $0x10] sm:$0xff]  ;;  %335 = vst [vmem:[#allocation1 + $0x3] ss:$4 sm:$0xff] %v306_v23 }
  0x13   : > { %490 = vmatpush.bf16.msra.mxu1 %v2112_v6  ;;  %v2126_v15 = vld [vmem:[%s2617_s1 + $0xe0] sm:$0xff]  ;;  %v2125_v19 = vld [vmem:[%s2617_s1 + $0xd8] sm:$0xff]  ;;  %v2116_v25 = vld [vmem:[%s2617_s1 + $0x90] sm:$0xff] }
  0x14   : > { %788 = vmatpush.bf16.msra.mxu3 %v2128_v7  ;;  %v303_v20 = vld [vmem:[%s2323_s6] sm:$0x3]  ;;  %v304_v21 = vld [vmem:[%s2323_s6 + $0x4] sm:$0x3]  ;;  %v2108_v26 = vld [vmem:[%s2617_s1 + $0x50] sm:$0xff] }
  0x15   : > { %388 = vmatpush.bf16.msra.mxu0 %v2103_v8  ;;  %326 = vst [vmem:[#allocation1] ss:$4 sm:$0xff] %v303_v20  ;;  %v2124_v27 = vld [vmem:[%s2617_s1 + $0xd0] sm:$0xff]  ;;  %v507_v28 = vld [vmem:[%s2323_s6] sm:$0x7]  ;;  %v2099_v35 = vld [vmem:[%s2617_s1 + $0x8] sm:$0xff] }
  0x16   : > { %686 = vmatpush.bf16.msra.mxu2 %v2119_v9  ;;  %329 = vst [vmem:[#allocation1 + $0x1] ss:$4 sm:$0xff] %v304_v21  ;;  %v508_v29 = vld [vmem:[%s2323_s6 + $0x4] sm:$0x7]  ;;  %v509_v30 = vld [vmem:[%s2323_s6 + $0x8] sm:$0x7]  ;;  %vm2401_vm6 = vmor %vm547_vm0, %vm548_vm2 }
  0x17   : > { %491 = vmatpush.bf16.msra.mxu1 %v2111_v10  ;;  %v510_v31 = vld [vmem:[%s2323_s6 + $0xc] sm:$0x7]  ;;  %v517_v32 = vrot.slane %v507_v28, 2  ;;  %v518_v33 = vrot.slane %v508_v29, 2  ;;  %v519_v34 = vrot.slane %v509_v30, 2  ;;  %v2098_v47 = vld [vmem:[%s2617_s1] sm:$0xff]  ;;  %vm2411_vm7 = vmor %vm2401_vm6, %vm550_vm4 }
  0x18   : > { %789 = vmatpush.bf16.msra.mxu3 %v2127_v11  ;;  %v2115_v36 = vld [vmem:[%s2617_s1 + $0x88] sm:$0xff]  ;;  %v1683_v37 = vld [vmem:[%s2323_s6 + $0x14] sm:$0x3]  ;;  %v520_v38 = vrot.slane %v510_v31, 2  ;;  %v1684_v42 = vld [vmem:[%s2323_s6 + $0x18] sm:$0x3] }
  0x19   : > { %389 = vmatpush.bf16.msra.mxu0 %v2102_v12  ;;  %v524_v39 = vsel %vm521_vm1, %v507_v28, %v517_v32  ;;  %v526_v40 = vsel %vm525_vm3, %v507_v28, %v517_v32  ;;  %v2107_v41 = vld [vmem:[%s2617_s1 + $0x48] sm:$0xff]  ;;  %v531_v44 = vsel %vm521_vm1, %v508_v29, %v518_v33  ;;  %v532_v45 = vsel %vm525_vm3, %v508_v29, %v518_v33  ;;  %v2114_v48 = vld [vmem:[%s2617_s1 + $0x80] sm:$0xff]  ;;  %v1685_v50 = vld [vmem:[%s2323_s6 + $0x1c] sm:$0x3] }
  0x1a   : > { %687 = vmatpush.bf16.msra.mxu2 %v2118_v13  ;;  %v528_v43 = vrot.slane %v526_v40, 2  ;;  %v538_v46 = vsel %vm525_vm3, %v509_v30, %v519_v34  ;;  %v2123_v49 = vld [vmem:[%s2617_s1 + $0xc8] sm:$0xff]  ;;  %v534_v51 = vrot.slane %v532_v45, 2  ;;  %v537_v52 = vsel %vm521_vm1, %v509_v30, %v519_v34  ;;  %v2137_v54 = vld [vmem:[%s2617_s1 + $0x138] sm:$0xff]  ;;  %v2106_v55 = vld [vmem:[%s2617_s1 + $0x40] sm:$0xff] }
  0x1b   : > { %492 = vmatpush.bf16.msra.mxu1 %v2110_v14  ;;  %v544_v53 = vsel %vm525_vm3, %v510_v31, %v520_v38  ;;  %v1686_v56 = vld [vmem:[%s2323_s6 + $0x20] sm:$0x3]  ;;  %v540_v57 = vrot.slane %v538_v46, 2  ;;  %v554_v58 = vshrl.u32 %v524_v39, 16  ;;  %v557_v59 = vshll.u32 %v524_v39, 16  ;;  %v2153_v60 = vld [vmem:[%s2617_s1 + $0x1b8] sm:$0xff]  ;;  %vm2430_vm8 = vmor %vm2411_vm7, %vm552_vm5 }
  0x1c   : > { %790 = vmatpush.bf16.msra.mxu3 %v2126_v15  ;;  %v2145_v61 = vld [vmem:[%s2617_s1 + $0x178] sm:$0xff]  ;;  %v543_v63 = vsel %vm521_vm1, %v510_v31, %v520_v38  ;;  %v546_v0 = vrot.slane %v544_v53, 2  ;;  %v567_v2 = vshrl.u32 %v531_v44, 16  ;;  %v570_v3 = vshll.u32 %v531_v44, 16  ;;  %v2122_v12 = vld [vmem:[%s2617_s1 + $0xc0] sm:$0xff]  ;;  %v2136_v23 = vld [vmem:[%s2617_s1 + $0x130] sm:$0xff] }
  0x1d   : > { %390 = vmatpush.bf16.msra.mxu0 %v2101_v16  ;;  %v336_v62 = vld.sshfl [vmem:[#allocation1] sm:$0xff pattern:$0x73625140]  ;;  %v556_v4 = vrot.slane %v554_v58, 6  ;;  %v559_v5 = vrot.slane %v557_v59, 7  ;;  %v563_v6 = vshll.u32 %v528_v43, 16 }
  0x1e   : > { %688 = vmatpush.bf16.msra.mxu2 %v2117_v17  ;;  %429 = vst [vmem:[#allocation1] ss:$4 sm:$0xff] %v1683_v37  ;;  %v580_v7 = vshrl.u32 %v537_v52, 16  ;;  %v569_v8 = vrot.slane %v567_v2, 6  ;;  %v572_v9 = vrot.slane %v570_v3, 7  ;;  %v576_v10 = vshll.u32 %v534_v51, 16 }
  0x1f   : > { %493 = vmatpush.bf16.msra.mxu1 %v2109_v18  ;;  %432 = vst [vmem:[#allocation1 + $0x1] ss:$4 sm:$0xff] %v1684_v42  ;;  %v583_v11 = vshll.u32 %v537_v52, 16  ;;  %v560_v14 = vor.u32 %v559_v5, %v556_v4  ;;  %v589_v16 = vshll.u32 %v540_v57, 16  ;;  %v593_v17 = vshrl.u32 %v543_v63, 16  ;;  %v2161_v18 = vld [vmem:[%s2617_s1 + $0x1f8] sm:$0xff] }
  0x20   : > { %791 = vmatpush.bf16.msra.mxu3 %v2125_v19  ;;  %435 = vst [vmem:[#allocation1 + $0x2] ss:$4 sm:$0xff] %v1685_v50  ;;  %v582_v15 = vrot.slane %v580_v7, 6  ;;  %v573_v19 = vor.u32 %v572_v9, %v569_v8  ;;  %v596_v21 = vshll.u32 %v543_v63, 16  ;;  %v602_v22 = vshll.u32 %v546_v0, 16  ;;  %v2144_v28 = vld [vmem:[%s2617_s1 + $0x170] sm:$0xff] }
  0x21   : > { %391 = vmatpush.bf16.msra.mxu0 %v2100_v24  ;;  %438 = vst [vmem:[#allocation1 + $0x3] ss:$4 sm:$0xff] %v1686_v56  ;;  %v585_v20 = vrot.slane %v583_v11, 7  ;;  %v561_v24 = vrot.slane %v560_v14, 2  ;;  %v578_v31 = vrot.slane %v576_v10, 7  ;;  %v591_v34 = vrot.slane %v589_v16, 7 }
  0x22   : > { %689 = vmatpush.bf16.msra.mxu2 %v2116_v25  ;;  %v565_v25 = vrot.slane %v563_v6, 7  ;;  %v574_v30 = vrot.slane %v573_v19, 2  ;;  %v598_v33 = vrot.slane %v596_v21, 7  ;;  %v604_v38 = vrot.slane %v602_v22, 7  ;;  %v2135_v39 = vld [vmem:[%s2617_s1 + $0x128] sm:$0xff]  ;;  %v2150_v50 = vld [vmem:[%s2617_s1 + $0x1a0] sm:$0xff] }
  0x23   : > { %494 = vmatpush.bf16.msra.mxu1 %v2108_v26  ;;  %v595_v26 = vrot.slane %v593_v17, 6  ;;  %v586_v32 = vor.u32 %v585_v20, %v582_v15  ;;  %v2143_v42 = vld [vmem:[%s2617_s1 + $0x168] sm:$0xff]  ;;  %v2142_v51 = vld [vmem:[%s2617_s1 + $0x160] sm:$0xff]  ;;  %v2149_v56 = vld [vmem:[%s2617_s1 + $0x198] sm:$0xff] }
  0x24   : > { %792 = vmatpush.bf16.msra.mxu3 %v2124_v27  ;;  %v2152_v27 = vld [vmem:[%s2617_s1 + $0x1b0] sm:$0xff]  ;;  %v566_v40 = vsel %vm2430_vm8, %v561_v24, %v565_v25  ;;  %v579_v43 = vsel %vm2430_vm8, %v574_v30, %v578_v31  ;;  %v2158_v52 = vld [vmem:[%s2617_s1 + $0x1e0] sm:$0xff]  ;;  %v1887_v53 = vld [vmem:[%s2323_s6 + $0x28] sm:$0x7] }
  0x25   : > { %392 = vmatpush.bf16.msra.mxu0 %v2099_v35  ;;  %v2160_v35 = vld [vmem:[%s2617_s1 + $0x1f0] sm:$0xff]  ;;  %v599_v37 = vor.u32 %v598_v33, %v595_v26  ;;  %v2141_v57 = vld [vmem:[%s2617_s1 + $0x158] sm:$0xff]  ;;  %v1784_v0 = vld [vmem:[%s2323_s6 + $0x2c] sm:$0x3] }
  0x26   : > { %690 = vmatpush.bf16.msra.mxu2 %v2115_v36  ;;  %v587_v36 = vrot.slane %v586_v32, 2  ;;  %v1889_v58 = vld [vmem:[%s2323_s6 + $0x30] sm:$0x7]  ;;  %v1890_v59 = vld [vmem:[%s2323_s6 + $0x34] sm:$0x7]  ;;  %v2147_v14 = vld [vmem:[%s2617_s1 + $0x188] sm:$0xff] }
  0x27   : > { %495 = vmatpush.bf16.msra.mxu1 %v2107_v41  ;;  %v2151_v41 = vld [vmem:[%s2617_s1 + $0x1a8] sm:$0xff]  ;;  %v600_v44 = vrot.slane %v599_v37, 2  ;;  %v1785_v1 = vld [vmem:[%s2323_s6 + $0x30] sm:$0x3]  ;;  %v920_v3 = vrot.slane %v1889_v58, 2  ;;  %v921_v7 = vrot.slane %v1890_v59, 2 }
  0x28   : > { %793 = vmatpush.bf16.msra.mxu3 %v2123_v49  ;;  %v439_v45 = vld.sshfl [vmem:[#allocation1] sm:$0xff pattern:$0x73625140]  ;;  %v592_v46 = vsel %vm2430_vm8, %v587_v36, %v591_v34  ;;  %v2132_v2 = vld [vmem:[%s2617_s1 + $0x110] sm:$0xff]  ;;  %v2139_v15 = vld [vmem:[%s2617_s1 + $0x148] sm:$0xff] }
  0x29   : > { %393 = vmatpush.bf16.msra.mxu0 %v2098_v47  ;;  %v605_v47 = vsel %vm2430_vm8, %v600_v44, %v604_v38  ;;  %624 = vst [vmem:[#allocation1] ss:$4 sm:$0xff] %v566_v40  ;;  %v2134_v49 = vld [vmem:[%s2617_s1 + $0x120] sm:$0xff]  ;;  %v2148_v5 = vld [vmem:[%s2617_s1 + $0x190] sm:$0xff]  ;;  %v936_v13 = vsel %vm521_vm1, %v1889_v58, %v920_v3  ;;  %v942_v16 = vsel %vm521_vm1, %v1890_v59, %v921_v7  ;;  %v2169_v31 = vld [vmem:[%s2617_s1 + $0x238] sm:$0xff] }
  0x2a   : > { %691 = vmatpush.bf16.msra.mxu2 %v2114_v48  ;;  %v2159_v48 = vld [vmem:[%s2617_s1 + $0x1e8] sm:$0xff]  ;;  %627 = vst [vmem:[#allocation1 + $0x1] ss:$4 sm:$0xff] %v579_v43  ;;  %v2140_v6 = vld [vmem:[%s2617_s1 + $0x150] sm:$0xff]  ;;  %v975_v24 = vshll.u32 %v936_v13, 16  ;;  %v2130_v25 = vld [vmem:[%s2617_s1 + $0x100] sm:$0xff]  ;;  %v943_v34 = vsel %vm525_vm3, %v1890_v59, %v921_v7 }
  0x2b   : > { %496 = vmatpush.bf16.msra.mxu1 %v2106_v55  ;;  %630 = vst [vmem:[#allocation1 + $0x2] ss:$4 sm:$0xff] %v592_v46  ;;  %v1888_v55 = vld [vmem:[%s2323_s6 + $0x2c] sm:$0x7]  ;;  %v1786_v8 = vld [vmem:[%s2323_s6 + $0x34] sm:$0x3] }
  0x2c   : > { %794 = vmatpush.bf16.msra.mxu3 %v2122_v12  ;;  %394 = vmatmul.bf16.vlgmr.msra.gmra.mxu0 %v336_v62  ;;  %633 = vst [vmem:[#allocation1 + $0x3] ss:$4 sm:$0xff] %v605_v47  ;;  %v2157_v62 = vld [vmem:[%s2617_s1 + $0x1d8] sm:$0xff]  ;;  %v919_v63 = vrot.slane %v1888_v55, 2  ;;  %v2156_v10 = vld [vmem:[%s2617_s1 + $0x1d0] sm:$0xff]  ;;  %v2131_v12 = vld [vmem:[%s2617_s1 + $0x108] sm:$0xff] }
  0x2d   : > { %890 = vmatpush.bf16.msrb.mxu0 %v2137_v54  ;;  %v2133_v54 = vld [vmem:[%s2617_s1 + $0x118] sm:$0xff]  ;;  %v2146_v26 = vld [vmem:[%s2617_s1 + $0x180] sm:$0xff]  ;;  %v988_v30 = vshll.u32 %v942_v16, 16  ;;  %v945_v47 = vrot.slane %v943_v34, 2 }
  0x2e   : > { %1179 = vmatpush.bf16.msrb.mxu2 %v2153_v60  ;;  %497 = vmatmul.bf16.vlgmr.msra.gmra.mxu1 %v439_v45  ;;  %v918_v60 = vrot.slane %v1887_v53, 2  ;;  %v930_v11 = vsel %vm521_vm1, %v1888_v55, %v919_v63  ;;  %v931_v22 = vsel %vm525_vm3, %v1888_v55, %v919_v63  ;;  %v1835_v32 = vld [vmem:[%s2323_s6 + $0x3c] sm:$0x3]  ;;  %v2138_v37 = vld [vmem:[%s2617_s1 + $0x140] sm:$0xff]  ;;  %v977_v45 = vrot.slane %v975_v24, 7 }
  0x2f   : > { %1076 = vmatpush.bf16.msrb.mxu1 %v2145_v61  ;;  %v1783_v61 = vld [vmem:[%s2323_s6 + $0x28] sm:$0x3]  ;;  %v959_v20 = vshrl.u32 %v930_v11, 16  ;;  %v962_v21 = vshll.u32 %v930_v11, 16  ;;  %v1836_v38 = vld [vmem:[%s2323_s6 + $0x40] sm:$0x3] }
  0x30   : > { %1282 = vmatpush.bf16.msrb.mxu3 %v2161_v18  ;;  %v924_v9 = vsel %vm521_vm1, %v1887_v53, %v918_v60  ;;  %v925_v19 = vsel %vm525_vm3, %v1887_v53, %v918_v60  ;;  %v2155_v53 = vld [vmem:[%s2617_s1 + $0x1c8] sm:$0xff]  ;;  %v2154_v59 = vld [vmem:[%s2617_s1 + $0x1c0] sm:$0xff] }
  0x31   : > { %891 = vmatpush.bf16.msrb.mxu0 %v2136_v23  ;;  %v946_v17 = vshrl.u32 %v924_v9, 16  ;;  %v949_v18 = vshll.u32 %v924_v9, 16  ;;  %v972_v23 = vshrl.u32 %v936_v13, 16  ;;  %v927_v33 = vrot.slane %v925_v19, 2  ;;  %v2043_v11 = vld [vmem:[%s2323_s6 + $0x4] sm:$0x7] }
  0x32   : > { %1180 = vmatpush.bf16.msrb.mxu2 %v2152_v27  ;;  %v937_v27 = vsel %vm525_vm3, %v1889_v58, %v920_v3  ;;  %v961_v40 = vrot.slane %v959_v20, 6 }
  0x33   : > { %1077 = vmatpush.bf16.msrb.mxu1 %v2144_v28  ;;  %v634_v4 = vld.sshfl [vmem:[#allocation1] sm:$0xff pattern:$0x73625140]  ;;  %v985_v28 = vshrl.u32 %v942_v16, 16  ;;  %v951_v36 = vrot.slane %v949_v18, 7  ;;  %v939_v43 = vrot.slane %v937_v27, 2 }
  0x34   : > { %1283 = vmatpush.bf16.msrb.mxu3 %v2160_v35  ;;  %692 = vmatmul.bf16.vlgmr.msra.gmra.mxu2 %v634_v4  ;;  %727 = vst [vmem:[#allocation1] ss:$4 sm:$0xff] %v1783_v61  ;;  %v948_v35 = vrot.slane %v946_v17, 6  ;;  %v974_v44 = vrot.slane %v972_v23, 6  ;;  %v994_v61 = vshll.u32 %v945_v47, 16  ;;  %v1310_v17 = vrot.slane %v2043_v11, 2 }
  0x35   : > { %892 = vmatpush.bf16.msrb.mxu0 %v2135_v39  ;;  %730 = vst [vmem:[#allocation1 + $0x1] ss:$4 sm:$0xff] %v1784_v0  ;;  %v933_v39 = vrot.slane %v931_v22, 2  ;;  %v981_v58 = vshll.u32 %v939_v43, 16  ;;  %v2046_v16 = vld [vmem:[%s2323_s6 + $0x10] sm:$0x7] }
  0x36   : > { %1181 = vmatpush.bf16.msrb.mxu2 %v2151_v41  ;;  %733 = vst [vmem:[#allocation1 + $0x2] ss:$4 sm:$0xff] %v1785_v1  ;;  %v964_v41 = vrot.slane %v962_v21, 7  ;;  %v1313_v20 = vrot.slane %v2046_v16, 2  ;;  %v1316_v21 = vsel %vm521_vm1, %v2043_v11, %v1310_v17  ;;  %v1317_v22 = vsel %vm525_vm3, %v2043_v11, %v1310_v17 }
  0x37   : > { %1078 = vmatpush.bf16.msrb.mxu1 %v2143_v42  ;;  %736 = vst [vmem:[#allocation1 + $0x3] ss:$4 sm:$0xff] %v1786_v8  ;;  %v1837_v42 = vld [vmem:[%s2323_s6 + $0x44] sm:$0x3]  ;;  %v968_v55 = vshll.u32 %v933_v39, 16  ;;  %v983_v4 = vrot.slane %v981_v58, 7 }
  0x38   : > { %1284 = vmatpush.bf16.msrb.mxu3 %v2159_v48  ;;  %v987_v48 = vrot.slane %v985_v28, 6  ;;  %v1338_v34 = vshrl.u32 %v1316_v21, 16 }
  0x39   : > { %893 = vmatpush.bf16.msrb.mxu0 %v2134_v49  ;;  %v990_v49 = vrot.slane %v988_v30, 7  ;;  %v970_v1 = vrot.slane %v968_v55, 7  ;;  %v2163_v55 = vld [vmem:[%s2617_s1 + $0x208] sm:$0xff] }
  0x3a   : > { %1182 = vmatpush.bf16.msrb.mxu2 %v2150_v50  ;;  %v1838_v50 = vld [vmem:[%s2323_s6 + $0x48] sm:$0x3] }
  0x3b   : > { %1079 = vmatpush.bf16.msrb.mxu1 %v2142_v51  ;;  %v952_v51 = vor.u32 %v951_v36, %v948_v35  ;;  %v991_v60 = vor.u32 %v990_v49, %v987_v48  ;;  %v1939_v35 = vld [vmem:[%s2323_s6 + $0x4] sm:$0x3] }
  0x3c   : > { %1285 = vmatpush.bf16.msrb.mxu3 %v2158_v52  ;;  %v955_v52 = vshll.u32 %v927_v33, 16  ;;  %v1335_v33 = vsel %vm525_vm3, %v2046_v16, %v1313_v20 }
  0x3d   : > { %894 = vmatpush.bf16.msrb.mxu0 %v2133_v54  ;;  %v965_v54 = vor.u32 %v964_v41, %v961_v40  ;;  %v1337_v36 = vrot.slane %v1335_v33, 2  ;;  %v2164_v40 = vld [vmem:[%s2617_s1 + $0x210] sm:$0xff]  ;;  %v1940_v41 = vld [vmem:[%s2323_s6 + $0x8] sm:$0x3] }
  0x3e   : > { %1183 = vmatpush.bf16.msrb.mxu2 %v2149_v56  ;;  %v737_v46 = vld.sshfl [vmem:[#allocation1] sm:$0xff pattern:$0x73625140]  ;;  %v2168_v56 = vld [vmem:[%s2617_s1 + $0x230] sm:$0xff]  ;;  %v957_v63 = vrot.slane %v955_v52, 7 }
  0x3f   : > { %1080 = vmatpush.bf16.msrb.mxu1 %v2141_v57  ;;  %795 = vmatmul.bf16.vlgmr.msra.gmra.mxu3 %v737_v46  ;;  %830 = vst [vmem:[#allocation1] ss:$4 sm:$0xff] %v1835_v32  ;;  %v978_v57 = vor.u32 %v977_v45, %v974_v44  ;;  %v966_v0 = vrot.slane %v965_v54, 2  ;;  %v1334_v32 = vsel %vm521_vm1, %v2046_v16, %v1313_v20  ;;  %v1941_v46 = vld [vmem:[%s2323_s6 + $0xc] sm:$0x3] }
  0x40   : > { %1286 = vmatpush.bf16.msrb.mxu3 %v2157_v62  ;;  %833 = vst [vmem:[#allocation1 + $0x1] ss:$4 sm:$0xff] %v1836_v38  ;;  %v953_v62 = vrot.slane %v952_v51, 2  ;;  %v1992_v16 = vld [vmem:[%s2323_s6 + $0x1c] sm:$0x3] }
  0x41   : > { %895 = vmatpush.bf16.msrb.mxu0 %v2132_v2  ;;  %836 = vst [vmem:[#allocation1 + $0x2] ss:$4 sm:$0xff] %v1837_v42  ;;  %v2167_v2 = vld [vmem:[%s2617_s1 + $0x228] sm:$0xff]  ;;  %v979_v3 = vrot.slane %v978_v57, 2  ;;  %v971_v8 = vsel %vm2430_vm8, %v966_v0, %v970_v1  ;;  %v1340_v42 = vrot.slane %v1338_v34, 6  ;;  %v1386_v0 = vshll.u32 %v1337_v36, 16 }
  0x42   : > { %1184 = vmatpush.bf16.msrb.mxu2 %v2148_v5  ;;  %839 = vst [vmem:[#allocation1 + $0x3] ss:$4 sm:$0xff] %v1838_v50  ;;  %v992_v5 = vrot.slane %v991_v60, 2  ;;  %v958_v7 = vsel %vm2430_vm8, %v953_v62, %v957_v63  ;;  %v1942_v50 = vld [vmem:[%s2323_s6 + $0x10] sm:$0x3]  ;;  %v1380_v60 = vshll.u32 %v1334_v32, 16 }
  0x43   : > { %1081 = vmatpush.bf16.msrb.mxu1 %v2140_v6  ;;  %v996_v6 = vrot.slane %v994_v61, 7 }
  0x44   : > { %1287 = vmatpush.bf16.msrb.mxu3 %v2156_v10  ;;  %v984_v10 = vsel %vm2430_vm8, %v979_v3, %v983_v4  ;;  %v1382_v4 = vrot.slane %v1380_v60, 7 }
  0x45   : > { %896 = vmatpush.bf16.msrb.mxu0 %v2131_v12  ;;  %v2166_v12 = vld [vmem:[%s2617_s1 + $0x220] sm:$0xff]  ;;  %v997_v13 = vsel %vm2430_vm8, %v992_v5, %v996_v6 }
  0x46   : > { %1185 = vmatpush.bf16.msrb.mxu2 %v2147_v14  ;;  %v2044_v14 = vld [vmem:[%s2323_s6 + $0x8] sm:$0x7] }
  0x47   : > { %1082 = vmatpush.bf16.msrb.mxu1 %v2139_v15  ;;  %v2045_v15 = vld [vmem:[%s2323_s6 + $0xc] sm:$0x7]  ;;  %v1311_v18 = vrot.slane %v2044_v14, 2 }
  0x48   : > { %1288 = vmatpush.bf16.msrb.mxu3 %v2155_v53  ;;  %v1312_v19 = vrot.slane %v2045_v15, 2 }
  0x49   : > { %897 = vmatpush.bf16.msrb.mxu0 %v2130_v25  ;;  %v840_v9 = vld.sshfl [vmem:[#allocation1] sm:$0xff pattern:$0x73625140]  ;;  %v1322_v23 = vsel %vm521_vm1, %v2044_v14, %v1311_v18  ;;  %v1323_v24 = vsel %vm525_vm3, %v2044_v14, %v1311_v18  ;;  %v2165_v25 = vld [vmem:[%s2617_s1 + $0x218] sm:$0xff] }
  0x4a   : > { %1186 = vmatpush.bf16.msrb.mxu2 %v2146_v26  ;;  %1016 = vst [vmem:[#allocation1] ss:$4 sm:$0xff] %v958_v7  ;;  %v1319_v26 = vrot.slane %v1317_v22, 2  ;;  %v1325_v27 = vrot.slane %v1323_v24, 2  ;;  %v1328_v28 = vsel %vm521_vm1, %v2045_v15, %v1312_v19  ;;  %v1329_v30 = vsel %vm525_vm3, %v2045_v15, %v1312_v19  ;;  %v1991_v15 = vld [vmem:[%s2323_s6 + $0x18] sm:$0x3] }
  0x4b   : > { %1083 = vmatpush.bf16.msrb.mxu1 %v2138_v37  ;;  %1019 = vst [vmem:[#allocation1 + $0x1] ss:$4 sm:$0xff] %v971_v8  ;;  %v1341_v37 = vshll.u32 %v1316_v21, 16  ;;  %v1351_v39 = vshrl.u32 %v1322_v23, 16  ;;  %v1354_v43 = vshll.u32 %v1322_v23, 16  ;;  %v1364_v45 = vshrl.u32 %v1328_v28, 16 }
  0x4c   : > { %1289 = vmatpush.bf16.msrb.mxu3 %v2154_v59  ;;  %898 = vmatmul.bf16.vlgmr.msrb.gmra.mxu0 %v840_v9  ;;  %1022 = vst [vmem:[#allocation1 + $0x2] ss:$4 sm:$0xff] %v984_v10  ;;  %v1347_v38 = vshll.u32 %v1319_v26, 16  ;;  %v1360_v44 = vshll.u32 %v1325_v27, 16  ;;  %v1367_v49 = vshll.u32 %v1328_v28, 16  ;;  %v1377_v59 = vshrl.u32 %v1334_v32, 16 }
  0x4d   : > { %1468 = vmatpush.bf16.msra.mxu0 %v2169_v31  ;;  %1025 = vst [vmem:[#allocation1 + $0x3] ss:$4 sm:$0xff] %v997_v13  ;;  %v1331_v31 = vrot.slane %v1329_v30, 2  ;;  %v1343_v47 = vrot.slane %v1341_v37, 7  ;;  %v1353_v48 = vrot.slane %v1351_v39, 6  ;;  %v1356_v52 = vrot.slane %v1354_v43, 7 }
  0x4e   : > { %v1349_v51 = vrot.slane %v1347_v38, 7  ;;  %v1366_v53 = vrot.slane %v1364_v45, 6  ;;  %v1369_v58 = vrot.slane %v1367_v49, 7  ;;  %v1362_v62 = vrot.slane %v1360_v44, 7  ;;  %v2162_v10 = vld [vmem:[%s2617_s1 + $0x200] sm:$0xff] }
  0x4f   : > { %v1373_v54 = vshll.u32 %v1331_v31, 16  ;;  %v1344_v57 = vor.u32 %v1343_v47, %v1340_v42  ;;  %v1357_v61 = vor.u32 %v1356_v52, %v1353_v48  ;;  %v1379_v3 = vrot.slane %v1377_v59, 6  ;;  %v1993_v18 = vld [vmem:[%s2323_s6 + $0x20] sm:$0x3]  ;;  %v1994_v19 = vld [vmem:[%s2323_s6 + $0x24] sm:$0x3] }
  0x50   : > { %v1388_v9 = vrot.slane %v1386_v0, 7  ;;  %v2200_v49 = vld [vmem:[%s2618_s2] ss:$0 sm:$0xff] }
  0x51   : > { %1469 = vmatpush.bf16.msra.mxu0 %v2168_v56  ;;  %v1375_v63 = vrot.slane %v1373_v54, 7  ;;  %v1345_v1 = vrot.slane %v1344_v57, 2  ;;  %v1358_v5 = vrot.slane %v1357_v61, 2  ;;  %v1383_v8 = vor.u32 %v1382_v4, %v1379_v3 }
  0x53   : > { %v1350_v6 = vsel %vm2430_vm8, %v1345_v1, %v1349_v51  ;;  %v1363_v11 = vsel %vm2430_vm8, %v1358_v5, %v1362_v62  ;;  %v1384_v13 = vrot.slane %v1383_v8, 2 }
  0x54   : > { %v1026_v56 = vld.sshfl [vmem:[#allocation1] sm:$0xff pattern:$0x73625140] }
  0x55   : > { %1470 = vmatpush.bf16.msra.mxu0 %v2167_v2  ;;  %1119 = vst [vmem:[#allocation1] ss:$4 sm:$0xff] %v1939_v35  ;;  %1084 = vmatmul.bf16.vlgmr.msrb.gmra.mxu1 %v1026_v56  ;;  %v1370_v2 = vor.u32 %v1369_v58, %v1366_v53  ;;  %v1389_v14 = vsel %vm2430_vm8, %v1384_v13, %v1388_v9 }
  0x56   : > { %1122 = vst [vmem:[#allocation1 + $0x1] ss:$4 sm:$0xff] %v1940_v41 }
  0x57   : > { %1125 = vst [vmem:[#allocation1 + $0x2] ss:$4 sm:$0xff] %v1941_v46  ;;  %v1371_v7 = vrot.slane %v1370_v2, 2 }
  0x58   : > { %1128 = vst [vmem:[#allocation1 + $0x3] ss:$4 sm:$0xff] %v1942_v50 }
  0x59   : > { %1471 = vmatpush.bf16.msra.mxu0 %v2166_v12  ;;  %v1376_v12 = vsel %vm2430_vm8, %v1371_v7, %v1375_v63 }
  0x5d   : > { %1472 = vmatpush.bf16.msra.mxu0 %v2165_v25 }
  0x5f   : > { %v1129_v17 = vld.sshfl [vmem:[#allocation1] sm:$0xff pattern:$0x73625140] }
  0x60   : > { %1187 = vmatmul.bf16.vlgmr.msrb.gmra.mxu2 %v1129_v17  ;;  %1222 = vst [vmem:[#allocation1] ss:$4 sm:$0xff] %v1991_v15 }
  0x61   : > { %1473 = vmatpush.bf16.msra.mxu0 %v2164_v40  ;;  %1225 = vst [vmem:[#allocation1 + $0x1] ss:$4 sm:$0xff] %v1992_v16 }
  0x62   : > { %1228 = vst [vmem:[#allocation1 + $0x2] ss:$4 sm:$0xff] %v1993_v18 }
  0x63   : > { %1231 = vst [vmem:[#allocation1 + $0x3] ss:$4 sm:$0xff] %v1994_v19 }
  0x65   : > { %1474 = vmatpush.bf16.msra.mxu0 %v2163_v55  ;;  %v2201_v55 = vld [vmem:[%s2619_s3] ss:$0 sm:$0xff] }
  0x69   : > { %1475 = vmatpush.bf16.msra.mxu0 %v2162_v10 }
  0x6a   : > { %v1232_v20 = vld.sshfl [vmem:[#allocation1] sm:$0xff pattern:$0x73625140] }
  0x6b   : > { %1290 = vmatmul.bf16.vlgmr.msrb.gmra.mxu3 %v1232_v20  ;;  %1408 = vst [vmem:[#allocation1] ss:$4 sm:$0xff] %v1350_v6 }
  0x6c   : > { %1411 = vst [vmem:[#allocation1 + $0x1] ss:$4 sm:$0xff] %v1363_v11 }
  0x6d   : > { %1414 = vst [vmem:[#allocation1 + $0x2] ss:$4 sm:$0xff] %v1376_v12 }
  0x6e   : > { %1417 = vst [vmem:[#allocation1 + $0x3] ss:$4 sm:$0xff] %v1389_v14 }
  0x75   : > { %v1418_v21 = vld.sshfl [vmem:[#allocation1] sm:$0xff pattern:$0x73625140] }
  0x76   : > { %1476 = vmatmul.bf16.vlgmr.msra.gmra.mxu0 %v1418_v21 }
  0xa9   : > { %v395_v29 = vpop.f32.mrf.mxu0 }
  0xab   : > { %v498_v22 = vpop.f32.mrf.mxu1 }
  0xac   : > { %v503_v25 = vadd.f32 %v498_v22, %v395_v29 }
  0xb1   : > { %v397_v24 = vpop.f32.mrf.mxu0 }
  0xb3   : > { %v500_v27 = vpop.f32.mrf.mxu1 }
  0xb4   : > { %v504_v34 = vadd.f32 %v500_v27, %v397_v24 }
  0xb7   : > { %v693_v23 = vpop.f32.mrf.mxu2 }
  0xb8   : > { %v698_v28 = vadd.f32 %v693_v23, %v503_v25 }
  0xbf   : > { %v695_v30 = vpop.f32.mrf.mxu2 }
  0xc0   : > { %v699_v39 = vadd.f32 %v695_v30, %v504_v34 }
  0xc2   : > { %v796_v26 = vpop.f32.mrf.mxu3 }
  0xc3   : > { %v801_v32 = vadd.f32 %v796_v26, %v698_v28 }
  0xc9   : > { %v899_v31 = vpop.f32.mrf.mxu0 }
  0xca   : > { %v798_v33 = vpop.f32.mrf.mxu3  ;;  %v904_v35 = vadd.f32 %v899_v31, %v801_v32 }
  0xcb   : > { %v802_v42 = vadd.f32 %v798_v33, %v699_v39 }
  0xd1   : > { %v901_v38 = vpop.f32.mrf.mxu0 }
  0xd2   : > { %v1085_v36 = vpop.f32.mrf.mxu1  ;;  %v905_v44 = vadd.f32 %v901_v38, %v802_v42 }
  0xd3   : > { %v1090_v40 = vadd.f32 %v1085_v36, %v904_v35 }
  0xda   : > { %v1087_v46 = vpop.f32.mrf.mxu1 }
  0xdb   : > { %v1091_v51 = vadd.f32 %v1087_v46, %v905_v44 }
  0xe3   : > { %v1188_v37 = vpop.f32.mrf.mxu2 }
  0xe4   : > { %v1193_v43 = vadd.f32 %v1188_v37, %v1090_v40 }
  0xeb   : > { %v1190_v50 = vpop.f32.mrf.mxu2 }
  0xec   : > { %v1194_v53 = vadd.f32 %v1190_v50, %v1091_v51 }
  0xee   : > { %v1291_v41 = vpop.f32.mrf.mxu3 }
  0xef   : > { %v1296_v45 = vadd.f32 %v1291_v41, %v1193_v43 }
  0xf3   : > { %v1477_v47 = vpop.f32.mrf.mxu0 }
  0xf4   : > { %v1482_v48 = vadd.f32 %v1477_v47, %v1296_v45 }
  0xf6   : > { %v1293_v52 = vpop.f32.mrf.mxu3  ;;  %v1495_v54 = vmul.f32 %v2200_v49, %v1482_v48 }
  0xf7   : > { %v1297_v56 = vadd.f32 %v1293_v52, %v1194_v53 }
  0xf8   : > { %v1501_v58 = vadd.f32 %v2201_v55, %v1495_v54 }
  0xfa   : > { %v1503_v61 = vmul.f32 0.1, %v1501_v58 }
  0xfb   : > { %v1479_v57 = vpop.f32.mrf.mxu0 }
  0xfc   : > { %v1483_v59 = vadd.f32 %v1479_v57, %v1297_v56  ;;  %v1505_v0 = vmax.f32 %v1501_v58, %v1503_v61 }
  0xfe   : > { %v1496_v60 = vmul.f32 %v2200_v49, %v1483_v59 }
 0x100   : > { %v1502_v62 = vadd.f32 %v2201_v55, %v1496_v60 }
 0x102   : > { %v1504_v63 = vmul.f32 0.1, %v1502_v62 }
 0x104   : > { %v1506_v1 = vmax.f32 %v1502_v62, %v1504_v63 }
 0x106   : > { %v2173_v2 = vpack.c.bf16 %v1506_v1, %v1505_v0 }
 0x108   : > { %2174 = vst [vmem:[%s296_s24] sm:$0xff] %v2173_v2  }
 0x109 PF: > { %s14_s17 = sadd.s32 1, %s2224_s17   ;;  %s2627_s15 = smov %s2220_s16 }
 0x10a   : > { %p11_p5 = scmp.ge.s32.totalorder %s14_s17, 4   ;;  %s2628_s16 = smov %s2630_s18 }
 0x10c   :  { %13 = sbr.rel (!%p11_p5) target bundleno = 2 (0x2), region = 123 }

// kernel: udarknet_forward.9
= control target key start
LH: loop header
LB: loop body
LE: loop exit
PB: predicated region body
PF: predicated region fallthrough
CT: control target
= control target key end

     0   :  { %s3007_s15 = smov 0   ;;  %s3009_s16 = smov 0   ;;  %s3475_s0 = inlined_call_operand.vmem [shape: bf16[2,36,9,128], index: 0, kind: input, shape index: {}]   ;;  %s3476_s1 = inlined_call_operand.vmem [shape: bf16[9,128,128], index: 1, kind: input, shape index: {}]   ;;  %s3477_s2 = inlined_call_operand.vmem [shape: f32[1,128], index: 2, kind: input, shape index: {}]   ;;  %s3478_s3 = inlined_call_operand.vmem [shape: f32[1,128], index: 3, kind: input, shape index: {}]   ;;  %s3479_s4 = inlined_call_operand.vmem [shape: bf16[2,64,128], index: 4, kind: output, shape index: {}]  }
   0x1   :  { %s3011_s17 = smov 0  }
   0x2 LB: > { %s33_s18 = sadd.s32 1, %s2976_s16  ;;  %p2205_p0 = scmp.ge.s32.totalorder %s2980_s17, 1  ;;  %s2980_s17 = sphi %s3011_s17, %s14_s17   ;;  %s2976_s16 = sphi %s3009_s16, %s3483_s16   ;;  %s2972_s15 = sphi %s3007_s15, %s3482_s15  }
   0x3   : > { %p35_p1 = scmp.ge.s32.totalorder %s33_s18, 2  ;;  %p220_p2 = scmp.lt.s32.totalorder %s2980_s17, 3 }
   0x5   : > { %s3485_s18 = smov (%p35_p1, %s33_s18), 0  ;;  %p221_p3 = pnand %p2205_p0, %p220_p2 }
   0x6   : > { %p266_p4 = scmp.lt.s32.totalorder (!%p221_p3), %s2972_s15, 1 }
   0x7   : > { %224 = sbr.rel (%p221_p3) target bundleno = 341 (0x155), region = 36 }
   0xc   : > { %v2807_v0 = vld [vmem:[%s3476_s1 + $0x38] sm:$0xff]  ;;  %v2806_v2 = vld [vmem:[%s3476_s1 + $0x30] sm:$0xff]  ;;  %s3487_s15 = smov (!%p266_p4, %s2972_s15), 1  ;;  %v2805_v6 = vld [vmem:[%s3476_s1 + $0x28] sm:$0xff]  ;;  %vm633_vm0 = vsmask.f32 3328 }
   0xd   : > { %v2827_v1 = vld [vmem:[%s3476_s1 + $0xb8] sm:$0xff]  ;;  %2915 = vmatpush.bf16.msra.mxu1 %v2807_v0  ;;  %413 = vmatpush.bf16.msra.mxu0 %v2807_v0  ;;  %v2826_v3 = vld [vmem:[%s3476_s1 + $0xb0] sm:$0xff]  ;;  %s2931_s29 = smul.u32 288, %s3487_s15  ;;  %v2825_v7 = vld [vmem:[%s3476_s1 + $0xa8] sm:$0xff]  ;;  %vm634_vm1 = vsmask.f32 7440 }
   0xe   : > { %829 = vmatpush.bf16.msra.mxu2 %v2827_v1  ;;  %v2839_v4 = vld [vmem:[%s3476_s1 + $0xf8] sm:$0xff]  ;;  %v2838_v5 = vld [vmem:[%s3476_s1 + $0xf0] sm:$0xff]  ;;  %v2837_v8 = vld [vmem:[%s3476_s1 + $0xe8] sm:$0xff]  ;;  %s2795_s22 = sshll.u32 %s3487_s15, 5 }
   0xf   : > { %980 = vmatpush.bf16.msra.mxu3 %v2839_v4  ;;  %s3052_s10 = scalar_lea.vmem %s3475_s0, %s2931_s29  ;;  %v2804_v10 = vld [vmem:[%s3476_s1 + $0x20] sm:$0xff]  ;;  %v2803_v23 = vld [vmem:[%s3476_s1 + $0x18] sm:$0xff]  ;;  %v2802_v31 = vld [vmem:[%s3476_s1 + $0x10] sm:$0xff]  ;;  %s3440_s25 = scalar_lea.vmem %s3479_s4, %s2795_s22 }
  0x10   : > { %v609_v9 = vld [vmem:[%s3052_s10] sm:$0xf]  ;;  %v611_v11 = vld [vmem:[%s3052_s10 + $0x8] sm:$0xf]  ;;  %v610_v16 = vld [vmem:[%s3052_s10 + $0x4] sm:$0x1] }
  0x11   : > { %2916 = vmatpush.bf16.msra.mxu1 %v2806_v2  ;;  %414 = vmatpush.bf16.msra.mxu0 %v2806_v2  ;;  %v2824_v12 = vld [vmem:[%s3476_s1 + $0xa0] sm:$0xff]  ;;  %v637_v13 = vshrl.u32 %v609_v9, 16  ;;  %v640_v14 = vshll.u32 %v609_v9, 16  ;;  %v651_v15 = vshrl.u32 %v611_v11, 16  ;;  %v612_v17 = vld [vmem:[%s3052_s10 + $0xc] sm:$0x1]  ;;  %vm3089_vm2 = vmor %vm633_vm0, %vm634_vm1 }
  0x12   : > { %830 = vmatpush.bf16.msra.mxu2 %v2826_v3  ;;  %v654_v18 = vshll.u32 %v611_v11, 16  ;;  %v2836_v19 = vld [vmem:[%s3476_s1 + $0xe0] sm:$0xff]  ;;  %v2823_v25 = vld [vmem:[%s3476_s1 + $0x98] sm:$0xff]  ;;  %v646_v27 = vshll.u32 %v610_v16, 16  ;;  %v660_v28 = vshll.u32 %v612_v17, 16  ;;  %v2822_v32 = vld [vmem:[%s3476_s1 + $0x90] sm:$0xff] }
  0x13   : > { %981 = vmatpush.bf16.msra.mxu3 %v2838_v5  ;;  %v639_v20 = vrot.slane %v637_v13, 4  ;;  %v642_v21 = vrot.slane %v640_v14, 5  ;;  %v653_v22 = vrot.slane %v651_v15, 4  ;;  %v2835_v30 = vld [vmem:[%s3476_s1 + $0xd8] sm:$0xff]  ;;  %v613_v37 = vld [vmem:[%s3052_s10 + $0x10] sm:$0xf] }
  0x14   : > { %v656_v24 = vrot.slane %v654_v18, 5  ;;  %v648_v34 = vrot.slane %v646_v27, 5  ;;  %v662_v36 = vrot.slane %v660_v28, 5  ;;  %v615_v39 = vld [vmem:[%s3052_s10 + $0x18] sm:$0xf]  ;;  %v2834_v40 = vld [vmem:[%s3476_s1 + $0xd0] sm:$0xff] }
  0x15   : > { %2917 = vmatpush.bf16.msra.mxu1 %v2805_v6  ;;  %415 = vmatpush.bf16.msra.mxu0 %v2805_v6  ;;  %v643_v26 = vor.u32 %v642_v21, %v639_v20  ;;  %v2801_v41 = vld [vmem:[%s3476_s1 + $0x8] sm:$0xff]  ;;  %v665_v42 = vshrl.u32 %v613_v37, 16  ;;  %v668_v43 = vshll.u32 %v613_v37, 16  ;;  %v679_v47 = vshrl.u32 %v615_v39, 16  ;;  %v2800_v49 = vld [vmem:[%s3476_s1] sm:$0xff]  ;;  %v2819_v52 = vld [vmem:[%s3476_s1 + $0x78] sm:$0xff] }
  0x16   : > { %831 = vmatpush.bf16.msra.mxu2 %v2825_v7  ;;  %v657_v29 = vor.u32 %v656_v24, %v653_v22  ;;  %v2821_v44 = vld [vmem:[%s3476_s1 + $0x88] sm:$0xff]  ;;  %v682_v48 = vshll.u32 %v615_v39, 16  ;;  %v2219_v50 = vld [vmem:[%s3052_s10 + $0x20] sm:$0xf]  ;;  %v614_v59 = vld [vmem:[%s3052_s10 + $0x14] sm:$0x1] }
  0x17   : > { %982 = vmatpush.bf16.msra.mxu3 %v2837_v8  ;;  %v644_v33 = vrot.slane %v643_v26, 4  ;;  %v2798_v51 = vld [vmem:[%s3052_s10 + $0x24] sm:$0xf0]  ;;  %v2820_v54 = vld [vmem:[%s3476_s1 + $0x80] sm:$0xff]  ;;  %v667_v60 = vrot.slane %v665_v42, 4  ;;  %v670_v61 = vrot.slane %v668_v43, 5 }
  0x18   : > { %v658_v35 = vrot.slane %v657_v29, 4  ;;  %v2833_v53 = vld [vmem:[%s3476_s1 + $0xc8] sm:$0xff]  ;;  %v2211_v55 = vld [vmem:[%s3052_s10] sm:$0xf]  ;;  %v681_v62 = vrot.slane %v679_v47, 4  ;;  %v684_v63 = vrot.slane %v682_v48, 5  ;;  %v2220_v3 = vor.u32 %v2798_v51, %v2219_v50 }
  0x19   : > { %2918 = vmatpush.bf16.msra.mxu1 %v2804_v10  ;;  %416 = vmatpush.bf16.msra.mxu0 %v2804_v10  ;;  %v649_v45 = vsel %vm3089_vm2, %v644_v33, %v648_v34  ;;  %v2796_v56 = vld [vmem:[%s3052_s10 + $0x4] sm:$0xf0]  ;;  %v2851_v0 = vld [vmem:[%s3476_s1 + $0x138] sm:$0xff]  ;;  %v2832_v6 = vld [vmem:[%s3476_s1 + $0xc0] sm:$0xff]  ;;  %v674_v9 = vshll.u32 %v614_v59, 16  ;;  %v671_v11 = vor.u32 %v670_v61, %v667_v60 }
  0x1a   : > { %832 = vmatpush.bf16.msra.mxu2 %v2824_v12  ;;  %v663_v46 = vsel %vm3089_vm2, %v658_v35, %v662_v36  ;;  %v765_v57 = vunpack.c.l.b16 %v649_v45  ;;  %v2871_v1 = vld [vmem:[%s3476_s1 + $0x1b8] sm:$0xff]  ;;  %v2212_v4 = vor.u32 %v2796_v56, %v2211_v55  ;;  %v2403_v7 = vld [vmem:[%s3052_s10 + $0x90] sm:$0xf]  ;;  %v685_v12 = vor.u32 %v684_v63, %v681_v62  ;;  %v2817_v18 = vld [vmem:[%s3476_s1 + $0x68] sm:$0xff] }
  0x1b   : > { %983 = vmatpush.bf16.msra.mxu3 %v2836_v19  ;;  %v766_v58 = vunpack.c.l.b16 %v663_v46  ;;  %v616_v2 = vld [vmem:[%s3052_s10 + $0x1c] sm:$0x1]  ;;  %v2828_v8 = vld [vmem:[%s3052_s10 + $0x94] sm:$0xf0]  ;;  %v2818_v10 = vld [vmem:[%s3476_s1 + $0x70] sm:$0xff]  ;;  %v676_v19 = vrot.slane %v674_v9, 5 }
  0x1c   : > { %v688_v13 = vshll.u32 %v616_v2, 16  ;;  %v2883_v14 = vld [vmem:[%s3476_s1 + $0x1f8] sm:$0xff]  ;;  %v2850_v15 = vld [vmem:[%s3476_s1 + $0x130] sm:$0xff]  ;;  %v2404_v17 = vor.u32 %v2828_v8, %v2403_v7  ;;  %v672_v20 = vrot.slane %v671_v11, 4  ;;  %v686_v21 = vrot.slane %v685_v12, 4  ;;  %v2869_v26 = vld [vmem:[%s3476_s1 + $0x1a8] sm:$0xff] }
  0x1d   : > { %2919 = vmatpush.bf16.msra.mxu1 %v2803_v23  ;;  %417 = vmatpush.bf16.msra.mxu0 %v2803_v23  ;;  %v773_v5 = vpack.c.b16 %v766_v58, %v765_v57  ;;  %v2870_v16 = vld [vmem:[%s3476_s1 + $0x1b0] sm:$0xff]  ;;  %v617_v24 = vld [vmem:[%s3052_s10 + $0x20] sm:$0xf]  ;;  %v619_v27 = vld [vmem:[%s3052_s10 + $0x28] sm:$0xf] }
  0x1e   : > { %833 = vmatpush.bf16.msra.mxu2 %v2823_v25  ;;  %v690_v22 = vrot.slane %v688_v13, 5  ;;  %v2882_v23 = vld [vmem:[%s3476_s1 + $0x1f0] sm:$0xff]  ;;  %v2849_v25 = vld [vmem:[%s3476_s1 + $0x128] sm:$0xff]  ;;  %v693_v28 = vshrl.u32 %v617_v24, 16  ;;  %v696_v29 = vshll.u32 %v617_v24, 16  ;;  %v707_v33 = vshrl.u32 %v619_v27, 16 }
  0x1f   : > { %984 = vmatpush.bf16.msra.mxu3 %v2835_v30  ;;  %v2816_v30 = vld [vmem:[%s3476_s1 + $0x60] sm:$0xff]  ;;  %v710_v34 = vshll.u32 %v619_v27, 16  ;;  %v2881_v35 = vld [vmem:[%s3476_s1 + $0x1e8] sm:$0xff]  ;;  %v2223_v39 = vld [vmem:[%s3052_s10 + $0x30] sm:$0xf] }
  0x20   : > { %v2848_v36 = vld [vmem:[%s3476_s1 + $0x120] sm:$0xff]  ;;  %v2797_v42 = vld [vmem:[%s3052_s10 + $0x14] sm:$0xf0]  ;;  %v695_v45 = vrot.slane %v693_v28, 4  ;;  %v698_v46 = vrot.slane %v696_v29, 5  ;;  %v709_v48 = vrot.slane %v707_v33, 4 }
  0x21   : > { %2920 = vmatpush.bf16.msra.mxu1 %v2802_v31  ;;  %418 = vmatpush.bf16.msra.mxu0 %v2802_v31  ;;  %v677_v31 = vsel %vm3089_vm2, %v672_v20, %v676_v19  ;;  %v2868_v37 = vld [vmem:[%s3476_s1 + $0x1a0] sm:$0xff]  ;;  %v2815_v47 = vld [vmem:[%s3476_s1 + $0x58] sm:$0xff]  ;;  %v2829_v57 = vld [vmem:[%s3052_s10 + $0xa4] sm:$0xf0] }
  0x22   : > { %834 = vmatpush.bf16.msra.mxu2 %v2822_v32  ;;  %v691_v32 = vsel %vm3089_vm2, %v686_v21, %v690_v22  ;;  %v767_v43 = vunpack.c.l.b16 %v677_v31  ;;  %v2847_v50 = vld [vmem:[%s3476_s1 + $0x118] sm:$0xff]  ;;  %v618_v51 = vld [vmem:[%s3052_s10 + $0x24] sm:$0x1]  ;;  %v2407_v56 = vld [vmem:[%s3052_s10 + $0xa0] sm:$0xf]  ;;  %v699_v58 = vor.u32 %v698_v46, %v695_v45 }
  0x23   : > { %985 = vmatpush.bf16.msra.mxu3 %v2834_v40  ;;  %v2799_v40 = vld [vmem:[%s3052_s10 + $0x34] sm:$0xf0]  ;;  %v2814_v59 = vld [vmem:[%s3476_s1 + $0x50] sm:$0xff]  ;;  %v702_v60 = vshll.u32 %v618_v51, 16  ;;  %v2813_v2 = vld [vmem:[%s3476_s1 + $0x48] sm:$0xff] }
  0x24   : > { %v2846_v63 = vld [vmem:[%s3476_s1 + $0x110] sm:$0xff]  ;;  %v2880_v7 = vld [vmem:[%s3476_s1 + $0x1e0] sm:$0xff]  ;;  %v2845_v9 = vld [vmem:[%s3476_s1 + $0x108] sm:$0xff] }
  0x25   : > { %2921 = vmatpush.bf16.msra.mxu1 %v2801_v41  ;;  %419 = vmatpush.bf16.msra.mxu0 %v2801_v41  ;;  %v2215_v41 = vld [vmem:[%s3052_s10 + $0x10] sm:$0xf]  ;;  %v2859_v20 = vld [vmem:[%s3476_s1 + $0x178] sm:$0xff]  ;;  %v2844_v21 = vld [vmem:[%s3476_s1 + $0x100] sm:$0xff] }
  0x26   : > { %835 = vmatpush.bf16.msra.mxu2 %v2821_v44  ;;  %v768_v44 = vunpack.c.l.b16 %v691_v32  ;;  %v621_v8 = vld [vmem:[%s3052_s10 + $0x30] sm:$0xf]  ;;  %v2283_v22 = vld [vmem:[%s3052_s10 + $0x48] sm:$0xf]  ;;  %v2891_v24 = vld [vmem:[%s3476_s1 + $0x238] sm:$0xff] }
  0x27   : > { %986 = vmatpush.bf16.msra.mxu3 %v2833_v53  ;;  %v2224_v53 = vor.u32 %v2799_v40, %v2223_v39  ;;  %v2866_v11 = vld [vmem:[%s3476_s1 + $0x190] sm:$0xff]  ;;  %v721_v12 = vshrl.u32 %v621_v8, 16  ;;  %v724_v13 = vshll.u32 %v621_v8, 16 }
  0x28   : > { %v774_v55 = vpack.c.b16 %v768_v44, %v767_v43  ;;  %v2858_v33 = vld [vmem:[%s3476_s1 + $0x170] sm:$0xff] }
  0x29   : > { %2922 = vmatpush.bf16.msra.mxu1 %v2800_v49  ;;  %420 = vmatpush.bf16.msra.mxu0 %v2800_v49  ;;  %v712_v49 = vrot.slane %v710_v34, 5  ;;  %v723_v29 = vrot.slane %v721_v12, 4  ;;  %v622_v34 = vld [vmem:[%s3052_s10 + $0x34] sm:$0x1]  ;;  %v2411_v40 = vld [vmem:[%s3052_s10 + $0xb0] sm:$0xf] }
  0x2a   : > { %836 = vmatpush.bf16.msra.mxu2 %v2820_v54  ;;  %v2216_v54 = vor.u32 %v2797_v42, %v2215_v41  ;;  %v2830_v41 = vld [vmem:[%s3052_s10 + $0xb4] sm:$0xf0]  ;;  %v2890_v43 = vld [vmem:[%s3476_s1 + $0x230] sm:$0xff]  ;;  %v730_v44 = vshll.u32 %v622_v34, 16  ;;  %v2853_v12 = vld [vmem:[%s3476_s1 + $0x148] sm:$0xff] }
  0x2b   : > { %987 = vmatpush.bf16.msra.mxu3 %v2832_v6  ;;  %v713_v61 = vor.u32 %v712_v49, %v709_v48  ;;  %v2865_v48 = vld [vmem:[%s3476_s1 + $0x188] sm:$0xff]  ;;  %v2412_v49 = vor.u32 %v2830_v41, %v2411_v40  ;;  %v2731_v34 = vld [vmem:[%s3052_s10 + $0x10] sm:$0xf] }
  0x2c   : > { %431 = vmatmul.bf16.vlgmr.msra.gmra.mxu1 %v2220_v3  ;;  %421 = vmatmul.bf16.vlgmr.msra.gmra.mxu0 %v2212_v4  ;;  %v700_v3 = vrot.slane %v699_v58, 4  ;;  %v704_v4 = vrot.slane %v702_v60, 5  ;;  %v732_v51 = vrot.slane %v730_v44, 5  ;;  %v2877_v58 = vld [vmem:[%s3476_s1 + $0x1c8] sm:$0xff]  ;;  %v2295_v44 = vld [vmem:[%s3052_s10 + $0x78] sm:$0xf] }
  0x2d   : > { %564 = vmatpush.bf16.msrb.mxu1 %v2819_v52  ;;  %1131 = vmatpush.bf16.msrb.mxu0 %v2851_v0  ;;  %v620_v52 = vld [vmem:[%s3052_s10 + $0x2c] sm:$0x1]  ;;  %v2408_v0 = vor.u32 %v2829_v57, %v2407_v56  ;;  %v2856_v57 = vld [vmem:[%s3476_s1 + $0x160] sm:$0xff] }
  0x2e   : > { %1544 = vmatpush.bf16.msrb.mxu2 %v2871_v1  ;;  %988 = vmatmul.bf16.vlgmr.msra.gmra.mxu3 %v2404_v17  ;;  %v716_v62 = vshll.u32 %v620_v52, 16  ;;  %v2867_v1 = vld [vmem:[%s3476_s1 + $0x198] sm:$0xff]  ;;  %v2889_v56 = vld [vmem:[%s3476_s1 + $0x228] sm:$0xff] }
  0x2f   : > { %837 = vmatmul.bf16.vlgmr.msra.gmra.mxu2 %v773_v5  ;;  %1695 = vmatpush.bf16.msrb.mxu3 %v2883_v14  ;;  %v714_v5 = vrot.slane %v713_v61, 4  ;;  %v2879_v14 = vld [vmem:[%s3476_s1 + $0x1d8] sm:$0xff] }
  0x30   : > { %v718_v6 = vrot.slane %v716_v62, 5  ;;  %v2855_v62 = vld [vmem:[%s3476_s1 + $0x158] sm:$0xff] }
  0x31   : > { %565 = vmatpush.bf16.msrb.mxu1 %v2818_v10  ;;  %1132 = vmatpush.bf16.msrb.mxu0 %v2850_v15  ;;  %v623_v10 = vld [vmem:[%s3052_s10 + $0x38] sm:$0xf]  ;;  %v2812_v15 = vld [vmem:[%s3476_s1 + $0x40] sm:$0xff] }
  0x32   : > { %1545 = vmatpush.bf16.msrb.mxu2 %v2870_v16  ;;  %v705_v16 = vsel %vm3089_vm2, %v700_v3, %v704_v4  ;;  %v719_v17 = vsel %vm3089_vm2, %v714_v5, %v718_v6  ;;  %v738_v19 = vshll.u32 %v623_v10, 16  ;;  %v2854_v5 = vld [vmem:[%s3476_s1 + $0x150] sm:$0xff] }
  0x33   : > { %1696 = vmatpush.bf16.msrb.mxu3 %v2882_v23  ;;  %v2808_v23 = vld [vmem:[%s3052_s10 + $0x4c] sm:$0xf0]  ;;  %v769_v27 = vunpack.c.l.b16 %v705_v16  ;;  %v770_v28 = vunpack.c.l.b16 %v719_v17  ;;  %v2291_v17 = vld [vmem:[%s3052_s10 + $0x68] sm:$0xf] }
  0x34   : > { %v740_v32 = vrot.slane %v738_v19, 5  ;;  %v2886_v16 = vld [vmem:[%s3476_s1 + $0x210] sm:$0xff] }
  0x35   : > { %566 = vmatpush.bf16.msrb.mxu1 %v2817_v18  ;;  %1133 = vmatpush.bf16.msrb.mxu0 %v2849_v25  ;;  %v735_v18 = vshrl.u32 %v623_v10, 16  ;;  %v2475_v25 = vld [vmem:[%s3052_s10 + $0xd8] sm:$0xf]  ;;  %v775_v39 = vpack.c.b16 %v770_v28, %v769_v27  ;;  %v2831_v10 = vld [vmem:[%s3052_s10 + $0xc4] sm:$0xf0] }
  0x36   : > { %1546 = vmatpush.bf16.msrb.mxu2 %v2869_v26  ;;  %v2840_v26 = vld [vmem:[%s3052_s10 + $0xdc] sm:$0xf0]  ;;  %v2810_v19 = vld [vmem:[%s3052_s10 + $0x6c] sm:$0xf0]  ;;  %v2872_v28 = vld [vmem:[%s3052_s10 + $0x54] sm:$0xf0] }
  0x37   : > { %1697 = vmatpush.bf16.msrb.mxu3 %v2881_v35  ;;  %v737_v31 = vrot.slane %v735_v18, 4  ;;  %v624_v35 = vld [vmem:[%s3052_s10 + $0x3c] sm:$0x1]  ;;  %v2885_v18 = vld [vmem:[%s3476_s1 + $0x208] sm:$0xff]  ;;  %v2683_v27 = vld [vmem:[%s3052_s10 + $0x50] sm:$0xf] }
  0x38   : > { %v744_v46 = vshll.u32 %v624_v35, 16 }
  0x39   : > { %567 = vmatpush.bf16.msrb.mxu1 %v2816_v30  ;;  %1134 = vmatpush.bf16.msrb.mxu0 %v2848_v36  ;;  %v726_v30 = vrot.slane %v724_v13, 5  ;;  %v2284_v36 = vor.u32 %v2808_v23, %v2283_v22  ;;  %v741_v45 = vor.u32 %v740_v32, %v737_v31  ;;  %v2876_v13 = vld [vmem:[%s3476_s1 + $0x1c0] sm:$0xff]  ;;  %v2611_v22 = vld [vmem:[%s3052_s10 + $0x8] sm:$0xf]  ;;  %v2860_v23 = vld [vmem:[%s3052_s10 + $0xc] sm:$0xf0] }
  0x3a   : > { %1547 = vmatpush.bf16.msrb.mxu2 %v2868_v37  ;;  %v2476_v37 = vor.u32 %v2840_v26, %v2475_v25  ;;  %v2612_v26 = vor.u32 %v2860_v23, %v2611_v22  ;;  %v2521_v31 = vld [vmem:[%s3052_s10 + $0x90] sm:$0xf]  ;;  %v2523_v32 = vld [vmem:[%s3052_s10 + $0x98] sm:$0xf] }
  0x3b   : > { %1698 = vmatpush.bf16.msrb.mxu3 %v2880_v7  ;;  %v727_v42 = vor.u32 %v726_v30, %v723_v29  ;;  %v742_v52 = vrot.slane %v741_v45, 4  ;;  %v2684_v29 = vor.u32 %v2872_v28, %v2683_v27  ;;  %v2884_v30 = vld [vmem:[%s3476_s1 + $0x200] sm:$0xff]  ;;  %v1201_v35 = vshrl.u32 %v2521_v31, 16 }
  0x3c   : > { %436 = vmatmul.bf16.gmra.mxu1 %v2224_v53  ;;  %426 = vmatmul.bf16.gmra.mxu0 %v2216_v54  ;;  %v746_v53 = vrot.slane %v744_v46, 5  ;;  %v2864_v54 = vld [vmem:[%s3476_s1 + $0x180] sm:$0xff]  ;;  %v2487_v46 = vld [vmem:[%s3052_s10 + $0x108] sm:$0xf] }
  0x3d   : > { %568 = vmatpush.bf16.msrb.mxu1 %v2815_v47  ;;  %1135 = vmatpush.bf16.msrb.mxu0 %v2847_v50  ;;  %v2857_v47 = vld [vmem:[%s3476_s1 + $0x168] sm:$0xff]  ;;  %v728_v50 = vrot.slane %v727_v42, 4  ;;  %v1779_v42 = vshrl.u32 %v2731_v34, 16  ;;  %v2811_v45 = vld [vmem:[%s3052_s10 + $0x7c] sm:$0xf0] }
  0x3e   : > { %1548 = vmatpush.bf16.msrb.mxu2 %v2867_v1  ;;  %993 = vmatmul.bf16.gmra.mxu3 %v2408_v0  ;;  %v747_v61 = vsel %vm3089_vm2, %v742_v52, %v746_v53  ;;  %v2809_v0 = vld [vmem:[%s3052_s10 + $0x5c] sm:$0xf0]  ;;  %v2479_v1 = vld [vmem:[%s3052_s10 + $0xe8] sm:$0xf] }
  0x3f   : > { %842 = vmatmul.bf16.gmra.mxu2 %v774_v55  ;;  %1699 = vmatpush.bf16.msrb.mxu3 %v2879_v14  ;;  %v2878_v55 = vld [vmem:[%s3476_s1 + $0x1d0] sm:$0xff]  ;;  %v733_v60 = vsel %vm3089_vm2, %v728_v50, %v732_v51  ;;  %v772_v4 = vunpack.c.l.b16 %v747_v61  ;;  %v2887_v14 = vld [vmem:[%s3476_s1 + $0x218] sm:$0xff]  ;;  %v1203_v51 = vrot.slane %v1201_v35, 4 }
  0x40   : > { %v771_v3 = vunpack.c.l.b16 %v733_v60  ;;  %v2524_v50 = vld [vmem:[%s3052_s10 + $0x9c] sm:$0x1]  ;;  %v2730_v60 = vld [vmem:[%s3052_s10 + $0xc] sm:$0x1]  ;;  %v2732_v61 = vld [vmem:[%s3052_s10 + $0x14] sm:$0x1] }
  0x41   : > { %569 = vmatpush.bf16.msrb.mxu1 %v2814_v59  ;;  %1136 = vmatpush.bf16.msrb.mxu0 %v2846_v63  ;;  %v2888_v59 = vld [vmem:[%s3476_s1 + $0x220] sm:$0xff]  ;;  %v2287_v63 = vld [vmem:[%s3052_s10 + $0x58] sm:$0xf] }
  0x42   : > { %1549 = vmatpush.bf16.msrb.mxu2 %v2866_v11  ;;  %v2288_v6 = vor.u32 %v2809_v0, %v2287_v63  ;;  %v776_v8 = vpack.c.b16 %v772_v4, %v771_v3  ;;  %v1224_v0 = vshll.u32 %v2524_v50, 16 }
  0x43   : > { %1700 = vmatpush.bf16.msrb.mxu3 %v2878_v55  ;;  %v2861_v55 = vld [vmem:[%s3052_s10 + $0x1c] sm:$0xf0] }
  0x45   : > { %570 = vmatpush.bf16.msrb.mxu1 %v2813_v2  ;;  %1137 = vmatpush.bf16.msrb.mxu0 %v2845_v9  ;;  %v2841_v2 = vld [vmem:[%s3052_s10 + $0xec] sm:$0xf0]  ;;  %v2415_v9 = vld [vmem:[%s3052_s10 + $0xc0] sm:$0xf] }
  0x46   : > { %1550 = vmatpush.bf16.msrb.mxu2 %v2865_v48  ;;  %v2480_v7 = vor.u32 %v2841_v2, %v2479_v1  ;;  %v2416_v11 = vor.u32 %v2831_v10, %v2415_v9  ;;  %v2615_v48 = vld [vmem:[%s3052_s10 + $0x18] sm:$0xf]  ;;  %v1788_v10 = vshll.u32 %v2732_v61, 16 }
  0x47   : > { %1701 = vmatpush.bf16.msrb.mxu3 %v2877_v58  ;;  %v1781_v58 = vrot.slane %v1779_v42, 4  ;;  %v2616_v2 = vor.u32 %v2861_v55, %v2615_v48  ;;  %v2528_v42 = vld [vmem:[%s3052_s10 + $0xac] sm:$0x1] }
  0x48   : > { %v1790_v23 = vrot.slane %v1788_v10, 5 }
  0x49   : > { %571 = vmatpush.bf16.msrb.mxu1 %v2812_v15  ;;  %1138 = vmatpush.bf16.msrb.mxu0 %v2844_v21  ;;  %v2852_v15 = vld [vmem:[%s3476_s1 + $0x140] sm:$0xff] }
  0x4a   : > { %1551 = vmatpush.bf16.msrb.mxu2 %v2864_v54  ;;  %v2842_v21 = vld [vmem:[%s3052_s10 + $0xfc] sm:$0xf0] }
  0x4b   : > { %1702 = vmatpush.bf16.msrb.mxu3 %v2876_v13  ;;  %v2525_v13 = vld [vmem:[%s3052_s10 + $0xa0] sm:$0xf] }
  0x4c   : > { %572 = vmatmul.bf16.vlgmr.msrb.gmra.mxu1 %v2284_v36  ;;  %1139 = vmatmul.bf16.vlgmr.msrb.gmra.mxu0 %v2476_v37  ;;  %v1204_v36 = vshll.u32 %v2521_v31, 16  ;;  %v1215_v37 = vshrl.u32 %v2523_v32, 16 }
  0x4d   : > { %1393 = vmatpush.bf16.msra.mxu1 %v2859_v20  ;;  %1957 = vmatpush.bf16.msra.mxu0 %v2891_v24  ;;  %v2483_v20 = vld [vmem:[%s3052_s10 + $0xf8] sm:$0xf] }
  0x4e   : > { %998 = vmatmul.bf16.gmra.mxu3 %v2412_v49  ;;  %2923 = vmatpush.bf16.msra.mxu2 %v2891_v24  ;;  %v2292_v24 = vor.u32 %v2810_v19, %v2291_v17  ;;  %v2484_v25 = vor.u32 %v2842_v21, %v2483_v20  ;;  %v2522_v49 = vld [vmem:[%s3052_s10 + $0x94] sm:$0x1]  ;;  %v1206_v52 = vrot.slane %v1204_v36, 5  ;;  %v1217_v53 = vrot.slane %v1215_v37, 4  ;;  %v2735_v19 = vld [vmem:[%s3052_s10 + $0x20] sm:$0xf] }
  0x4f   : > { %847 = vmatmul.bf16.gmra.mxu2 %v775_v39  ;;  %v1218_v39 = vshll.u32 %v2523_v32, 16  ;;  %v1210_v63 = vshll.u32 %v2522_v49, 16  ;;  %v1810_v31 = vshll.u32 %v2735_v19, 16  ;;  %v2526_v36 = vld [vmem:[%s3052_s10 + $0xa4] sm:$0x1] }
  0x50   : > { %v1207_v3 = vor.u32 %v1206_v52, %v1203_v51  ;;  %v2734_v51 = vld [vmem:[%s3052_s10 + $0x1c] sm:$0x1]  ;;  %v2736_v52 = vld [vmem:[%s3052_s10 + $0x24] sm:$0x1] }
  0x51   : > { %1394 = vmatpush.bf16.msra.mxu1 %v2858_v33  ;;  %1958 = vmatpush.bf16.msra.mxu0 %v2890_v43  ;;  %v2729_v33 = vld [vmem:[%s3052_s10 + $0x8] sm:$0xf]  ;;  %v1220_v54 = vrot.slane %v1218_v39, 5 }
  0x52   : > { %2924 = vmatpush.bf16.msra.mxu2 %v2890_v43  ;;  %v1765_v40 = vshrl.u32 %v2729_v33, 16  ;;  %v1768_v41 = vshll.u32 %v2729_v33, 16  ;;  %v1782_v43 = vshll.u32 %v2731_v34, 16 }
  0x53   : > { %v1221_v4 = vor.u32 %v1220_v54, %v1217_v53  ;;  %v2619_v53 = vld [vmem:[%s3052_s10 + $0x28] sm:$0xf]  ;;  %v2862_v54 = vld [vmem:[%s3052_s10 + $0x2c] sm:$0xf0] }
  0x55   : > { %1395 = vmatpush.bf16.msra.mxu1 %v2857_v47  ;;  %1959 = vmatpush.bf16.msra.mxu0 %v2889_v56  ;;  %v2843_v47 = vld [vmem:[%s3052_s10 + $0x10c] sm:$0xf0] }
  0x56   : > { %2925 = vmatpush.bf16.msra.mxu2 %v2889_v56  ;;  %v1767_v56 = vrot.slane %v1765_v40, 4  ;;  %v2488_v1 = vor.u32 %v2843_v47, %v2487_v46  ;;  %v1812_v46 = vrot.slane %v1810_v31, 5 }
  0x59   : > { %1396 = vmatpush.bf16.msra.mxu1 %v2856_v57  ;;  %1960 = vmatpush.bf16.msra.mxu0 %v2888_v59  ;;  %v1770_v57 = vrot.slane %v1768_v41, 5 }
  0x5a   : > { %2926 = vmatpush.bf16.msra.mxu2 %v2888_v59  ;;  %v1784_v59 = vrot.slane %v1782_v43, 5 }
  0x5c   : > { %577 = vmatmul.bf16.gmra.mxu1 %v2288_v6  ;;  %1144 = vmatmul.bf16.gmra.mxu0 %v2480_v7  ;;  %v2873_v6 = vld [vmem:[%s3052_s10 + $0x64] sm:$0xf0]  ;;  %v1771_v7 = vor.u32 %v1770_v57, %v1767_v56  ;;  %v1785_v9 = vor.u32 %v1784_v59, %v1781_v58  ;;  %v1238_v56 = vshll.u32 %v2526_v36, 16  ;;  %v1252_v58 = vshll.u32 %v2528_v42, 16  ;;  %v2530_v42 = vld [vmem:[%s3052_s10 + $0xb4] sm:$0x1] }
  0x5d   : > { %1397 = vmatpush.bf16.msra.mxu1 %v2855_v62  ;;  %1961 = vmatpush.bf16.msra.mxu0 %v2887_v14  ;;  %v2296_v62 = vor.u32 %v2811_v45, %v2295_v44 }
  0x5e   : > { %1003 = vmatmul.bf16.gmra.mxu3 %v2416_v11  ;;  %2927 = vmatpush.bf16.msra.mxu2 %v2887_v14  ;;  %v1212_v11 = vrot.slane %v1210_v63, 5  ;;  %v2527_v14 = vld [vmem:[%s3052_s10 + $0xa8] sm:$0xf]  ;;  %v1772_v20 = vrot.slane %v1771_v7, 4  ;;  %v1786_v22 = vrot.slane %v1785_v9, 4  ;;  %v1254_v7 = vrot.slane %v1252_v58, 5 }
  0x5f   : > { %852 = vmatmul.bf16.gmra.mxu2 %v776_v8  ;;  %v1774_v8 = vshll.u32 %v2730_v60, 16  ;;  %v1246_v27 = vshll.u32 %v2527_v14, 16  ;;  %v1802_v60 = vshll.u32 %v2734_v51, 16  ;;  %v2623_v51 = vld [vmem:[%s3052_s10 + $0x38] sm:$0xf] }
  0x60   : > { %v1791_v35 = vsel %vm3089_vm2, %v1786_v22, %v1790_v23  ;;  %v2742_v58 = vld [vmem:[%s3052_s10 + $0x3c] sm:$0x1] }
  0x61   : > { %1398 = vmatpush.bf16.msra.mxu1 %v2854_v5  ;;  %1962 = vmatpush.bf16.msra.mxu0 %v2886_v16  ;;  %v2687_v5 = vld [vmem:[%s3052_s10 + $0x60] sm:$0xf]  ;;  %v1776_v21 = vrot.slane %v1774_v8, 5  ;;  %v1248_v41 = vrot.slane %v1246_v27, 5  ;;  %v1894_v50 = vunpack.c.l.b16 %v1791_v35  ;;  %v1804_v9 = vrot.slane %v1802_v60, 5 }
  0x62   : > { %2928 = vmatpush.bf16.msra.mxu2 %v2886_v16  ;;  %v1222_v16 = vrot.slane %v1221_v4, 4  ;;  %v2688_v17 = vor.u32 %v2873_v6, %v2687_v5  ;;  %v1240_v5 = vrot.slane %v1238_v56, 5  ;;  %v2863_v56 = vld [vmem:[%s3052_s10 + $0x3c] sm:$0xf0] }
  0x63   : > { %v1777_v34 = vsel %vm3089_vm2, %v1772_v20, %v1776_v21  ;;  %v2741_v21 = vld [vmem:[%s3052_s10 + $0x38] sm:$0xf] }
  0x64   : > { %v1893_v49 = vunpack.c.l.b16 %v1777_v34  ;;  %v1852_v34 = vshll.u32 %v2741_v21, 16 }
  0x65   : > { %1399 = vmatpush.bf16.msra.mxu1 %v2853_v12  ;;  %1963 = vmatpush.bf16.msra.mxu0 %v2885_v18  ;;  %v1226_v12 = vrot.slane %v1224_v0, 5 }
  0x66   : > { %2929 = vmatpush.bf16.msra.mxu2 %v2885_v18  ;;  %v2733_v18 = vld [vmem:[%s3052_s10 + $0x18] sm:$0xf]  ;;  %v1901_v0 = vpack.c.b16 %v1894_v50, %v1893_v49 }
  0x67   : > { %v1793_v28 = vshrl.u32 %v2733_v18, 16  ;;  %v1227_v33 = vsel %vm3089_vm2, %v1222_v16, %v1226_v12  ;;  %v2529_v12 = vld [vmem:[%s3052_s10 + $0xb0] sm:$0xf] }
  0x68   : > { %v1330_v48 = vunpack.c.l.b16 %v1227_v33  ;;  %v2739_v16 = vld [vmem:[%s3052_s10 + $0x30] sm:$0xf]  ;;  %v1260_v20 = vshll.u32 %v2529_v12, 16  ;;  %v1849_v33 = vshrl.u32 %v2741_v21, 16 }
  0x69   : > { %1400 = vmatpush.bf16.msra.mxu1 %v2852_v15  ;;  %1964 = vmatpush.bf16.msra.mxu0 %v2884_v30  ;;  %v1208_v15 = vrot.slane %v1207_v3, 4  ;;  %v1795_v43 = vrot.slane %v1793_v28, 4  ;;  %v2874_v3 = vld [vmem:[%s3052_s10 + $0x74] sm:$0xf0] }
  0x6a   : > { %2930 = vmatpush.bf16.msra.mxu2 %v2884_v30  ;;  %v1807_v30 = vshrl.u32 %v2735_v19, 16  ;;  %v1257_v19 = vshrl.u32 %v2529_v12, 16  ;;  %v1262_v36 = vrot.slane %v1260_v20, 5 }
  0x6b   : > { %v1213_v32 = vsel %vm3089_vm2, %v1208_v15, %v1212_v11  ;;  %v2737_v15 = vld [vmem:[%s3052_s10 + $0x28] sm:$0xf] }
  0x6c   : > { %582 = vmatmul.bf16.gmra.mxu1 %v2292_v24  ;;  %1149 = vmatmul.bf16.gmra.mxu0 %v2484_v25  ;;  %v1229_v24 = vshrl.u32 %v2525_v13, 16  ;;  %v1232_v25 = vshll.u32 %v2525_v13, 16  ;;  %v1809_v45 = vrot.slane %v1807_v30, 4  ;;  %v1329_v47 = vunpack.c.l.b16 %v1213_v32 }
  0x6d   : > { %v1821_v27 = vshrl.u32 %v2737_v15, 16  ;;  %v1824_v28 = vshll.u32 %v2737_v15, 16  ;;  %v1838_v30 = vshll.u32 %v2739_v16, 16  ;;  %v1259_v35 = vrot.slane %v1257_v19, 4 }
  0x6e   : > { %1703 = vmatmul.bf16.vlgmr.msrb.gmra.mxu3 %v2684_v29  ;;  %v1796_v29 = vshll.u32 %v2733_v18, 16  ;;  %v1231_v37 = vrot.slane %v1229_v24, 4  ;;  %v1234_v39 = vrot.slane %v1232_v25, 5  ;;  %v1813_v61 = vor.u32 %v1812_v46, %v1809_v45  ;;  %v2738_v46 = vld [vmem:[%s3052_s10 + $0x2c] sm:$0x1] }
  0x6f   : > { %1552 = vmatmul.bf16.vlgmr.msrb.gmra.mxu2 %v2612_v26  ;;  %v1243_v26 = vshrl.u32 %v2527_v14, 16  ;;  %v1337_v63 = vpack.c.b16 %v1330_v48, %v1329_v47  ;;  %v2531_v14 = vld [vmem:[%s3052_s10 + $0xb8] sm:$0xf]  ;;  %v1823_v47 = vrot.slane %v1821_v27, 4  ;;  %v1826_v48 = vrot.slane %v1824_v28, 5 }
  0x70   : > { %v1798_v44 = vrot.slane %v1796_v29, 5  ;;  %v1235_v55 = vor.u32 %v1234_v39, %v1231_v37  ;;  %v1814_v10 = vrot.slane %v1813_v61, 4  ;;  %v1271_v24 = vshrl.u32 %v2531_v14, 16  ;;  %v2535_v27 = vld [vmem:[%s3052_s10 + $0xc8] sm:$0xf] }
  0x71   : > { %v1245_v40 = vrot.slane %v1243_v26, 4  ;;  %v1274_v25 = vshll.u32 %v2531_v14, 16  ;;  %v2743_v26 = vld [vmem:[%s3052_s10 + $0x40] sm:$0xf]  ;;  %v1835_v29 = vshrl.u32 %v2739_v16, 16  ;;  %v1840_v50 = vrot.slane %v1838_v30, 5 }
  0x72   : > { %v1799_v59 = vor.u32 %v1798_v44, %v1795_v43  ;;  %v1236_v4 = vrot.slane %v1235_v55, 4  ;;  %v1863_v37 = vshrl.u32 %v2743_v26, 16  ;;  %v1866_v39 = vshll.u32 %v2743_v26, 16  ;;  %v2532_v43 = vld [vmem:[%s3052_s10 + $0xbc] sm:$0x1] }
  0x73   : > { %v1249_v57 = vor.u32 %v1248_v41, %v1245_v40  ;;  %v1273_v44 = vrot.slane %v1271_v24, 4  ;;  %v1276_v45 = vrot.slane %v1274_v25, 5  ;;  %v1837_v49 = vrot.slane %v1835_v29, 4  ;;  %v2533_v24 = vld [vmem:[%s3052_s10 + $0xc0] sm:$0xf] }
  0x74   : > { %v1800_v8 = vrot.slane %v1799_v59, 4  ;;  %v1865_v59 = vrot.slane %v1863_v37, 4  ;;  %v1868_v60 = vrot.slane %v1866_v39, 5  ;;  %v1266_v61 = vshll.u32 %v2530_v42, 16 }
  0x75   : > { %v1250_v6 = vrot.slane %v1249_v57, 4  ;;  %v1263_v57 = vor.u32 %v1262_v36, %v1259_v35  ;;  %v1299_v35 = vshrl.u32 %v2535_v27, 16  ;;  %v1302_v36 = vshll.u32 %v2535_v27, 16 }
  0x76   : > { %v1805_v22 = vsel %vm3089_vm2, %v1800_v8, %v1804_v9  ;;  %v2875_v8 = vld [vmem:[%s3052_s10 + $0x84] sm:$0xf0]  ;;  %v1869_v12 = vor.u32 %v1868_v60, %v1865_v59  ;;  %v1268_v14 = vrot.slane %v1266_v61, 5 }
  0x77   : > { %v1255_v18 = vsel %vm3089_vm2, %v1250_v6, %v1254_v7  ;;  %v1895_v40 = vunpack.c.l.b16 %v1805_v22  ;;  %v2624_v6 = vor.u32 %v2863_v56, %v2623_v51  ;;  %v2695_v7 = vld [vmem:[%s3052_s10 + $0x80] sm:$0xf] }
  0x78   : > { %v1332_v32 = vunpack.c.l.b16 %v1255_v18  ;;  %v2696_v18 = vor.u32 %v2875_v8, %v2695_v7  ;;  %v1870_v25 = vrot.slane %v1869_v12, 4 }
  0x7c   : > { %587 = vmatmul.bf16.gmra.mxu1 %v2296_v62  ;;  %1154 = vmatmul.bf16.gmra.mxu0 %v2488_v1  ;;  %v1816_v62 = vshll.u32 %v2736_v52, 16  ;;  %v2620_v1 = vor.u32 %v2862_v54, %v2619_v53  ;;  %v2740_v52 = vld [vmem:[%s3052_s10 + $0x34] sm:$0x1]  ;;  %v1851_v53 = vrot.slane %v1849_v33, 4  ;;  %v1854_v54 = vrot.slane %v1852_v34, 5 }
  0x7d   : > { %v1288_v34 = vshll.u32 %v2533_v24, 16 }
  0x7e   : > { %1708 = vmatmul.bf16.gmra.mxu3 %v2688_v17  ;;  %v1818_v11 = vrot.slane %v1816_v62, 5  ;;  %v1241_v17 = vsel %vm3089_vm2, %v1236_v4, %v1240_v5  ;;  %v1277_v62 = vor.u32 %v1276_v45, %v1273_v44  ;;  %v1841_v4 = vor.u32 %v1840_v50, %v1837_v49  ;;  %v2536_v50 = vld [vmem:[%s3052_s10 + $0xcc] sm:$0x1] }
  0x7f   : > { %1557 = vmatmul.bf16.gmra.mxu2 %v2616_v2  ;;  %v2691_v2 = vld [vmem:[%s3052_s10 + $0x70] sm:$0xf]  ;;  %v1331_v31 = vunpack.c.l.b16 %v1241_v17  ;;  %v1844_v5 = vshll.u32 %v2740_v52, 16  ;;  %v1855_v9 = vor.u32 %v1854_v54, %v1851_v53  ;;  %v1304_v49 = vrot.slane %v1302_v36, 5 }
  0x80   : > { %v2692_v13 = vor.u32 %v2874_v3, %v2691_v2  ;;  %v1819_v23 = vsel %vm3089_vm2, %v1814_v10, %v1818_v11  ;;  %v1827_v3 = vor.u32 %v1826_v48, %v1823_v47  ;;  %v1858_v10 = vshll.u32 %v2742_v58, 16 }
  0x81   : > { %v1896_v41 = vunpack.c.l.b16 %v1819_v23  ;;  %v1338_v55 = vpack.c.b16 %v1332_v32, %v1331_v31  ;;  %v1264_v11 = vrot.slane %v1263_v57, 4  ;;  %v1278_v15 = vrot.slane %v1277_v62, 4 }
  0x82   : > { %v1828_v19 = vrot.slane %v1827_v3, 4  ;;  %v1842_v20 = vrot.slane %v1841_v4, 4  ;;  %v1846_v21 = vrot.slane %v1844_v5, 5  ;;  %v1856_v22 = vrot.slane %v1855_v9, 4 }
  0x83   : > { %v1902_v2 = vpack.c.b16 %v1896_v41, %v1895_v40  ;;  %v1860_v23 = vrot.slane %v1858_v10, 5  ;;  %v1269_v28 = vsel %vm3089_vm2, %v1264_v11, %v1268_v14  ;;  %v1285_v32 = vshrl.u32 %v2533_v24, 16 }
  0x84   : > { %v1847_v31 = vsel %vm3089_vm2, %v1842_v20, %v1846_v21  ;;  %v1333_v39 = vunpack.c.l.b16 %v1269_v28  ;;  %v1290_v47 = vrot.slane %v1288_v34, 5  ;;  %v1301_v48 = vrot.slane %v1299_v35, 4 }
  0x85   : > { %v1861_v33 = vsel %vm3089_vm2, %v1856_v22, %v1860_v23  ;;  %v1898_v42 = vunpack.c.l.b16 %v1847_v31  ;;  %v1287_v44 = vrot.slane %v1285_v32, 4  ;;  %v1308_v59 = vshll.u32 %v2536_v50, 16 }
  0x86   : > { %v1305_v58 = vor.u32 %v1304_v49, %v1301_v48 }
  0x87   : > { %v1291_v57 = vor.u32 %v1290_v47, %v1287_v44 }
  0x88   : > { %v1306_v62 = vrot.slane %v1305_v58, 4 }
  0x89   : > { %v1292_v60 = vrot.slane %v1291_v57, 4 }
  0x8c   : > { %1401 = vmatmul.bf16.vlgmr.msra.gmra.mxu1 %v1337_v63  ;;  %1965 = vmatmul.bf16.vlgmr.msra.gmra.mxu0 %v1901_v0  ;;  %v1280_v63 = vshll.u32 %v2532_v43, 16  ;;  %v1830_v0 = vshll.u32 %v2738_v46, 16  ;;  %v1899_v43 = vunpack.c.l.b16 %v1861_v33  ;;  %v2534_v46 = vld [vmem:[%s3052_s10 + $0xc4] sm:$0x1] }
  0x8d   : > { %v1294_v53 = vshll.u32 %v2534_v46, 16 }
  0x8e   : > { %1713 = vmatmul.bf16.gmra.mxu3 %v2692_v13  ;;  %v1282_v16 = vrot.slane %v1280_v63, 5  ;;  %v1832_v17 = vrot.slane %v1830_v0, 5  ;;  %v1310_v63 = vrot.slane %v1308_v59, 5 }
  0x8f   : > { %1562 = vmatmul.bf16.gmra.mxu2 %v2620_v1  ;;  %v2744_v1 = vld [vmem:[%s3052_s10 + $0x44] sm:$0x1]  ;;  %v1296_v61 = vrot.slane %v1294_v53, 5 }
  0x90   : > { %v1872_v13 = vshll.u32 %v2744_v1, 16  ;;  %v1283_v29 = vsel %vm3089_vm2, %v1278_v15, %v1282_v16  ;;  %v1833_v30 = vsel %vm3089_vm2, %v1828_v19, %v1832_v17  ;;  %v1311_v4 = vsel %vm3089_vm2, %v1306_v62, %v1310_v63 }
  0x91   : > { %v1334_v40 = vunpack.c.l.b16 %v1283_v29  ;;  %v1897_v41 = vunpack.c.l.b16 %v1833_v30  ;;  %v1297_v3 = vsel %vm3089_vm2, %v1292_v60, %v1296_v61  ;;  %v1336_v7 = vunpack.c.l.b16 %v1311_v4 }
  0x92   : > { %v1874_v26 = vrot.slane %v1872_v13, 5 }
  0x93   : > { %v1339_v51 = vpack.c.b16 %v1334_v40, %v1333_v39  ;;  %v1903_v52 = vpack.c.b16 %v1898_v42, %v1897_v41 }
  0x94   : > { %v1875_v37 = vsel %vm3089_vm2, %v1870_v25, %v1874_v26 }
  0x95   : > { %v1900_v45 = vunpack.c.l.b16 %v1875_v37 }
  0x97   : > { %v1904_v56 = vpack.c.b16 %v1900_v45, %v1899_v43 }
  0x9c   : > { %1406 = vmatmul.bf16.gmra.mxu1 %v1338_v55  ;;  %1970 = vmatmul.bf16.gmra.mxu0 %v1902_v2 }
  0x9e   : > { %1718 = vmatmul.bf16.gmra.mxu3 %v2696_v18 }
  0x9f   : > { %1567 = vmatmul.bf16.gmra.mxu2 %v2624_v6  ;;  %v1335_v6 = vunpack.c.l.b16 %v1297_v3 }
  0xa1   : > { %v1340_v8 = vpack.c.b16 %v1336_v7, %v1335_v6 }
  0xa9   : > { %v432_v54 = vpop.f32.mrf.mxu1  ;;  %v422_v55 = vpop.f32.mrf.mxu0 }
  0xac   : > { %1411 = vmatmul.bf16.gmra.mxu1 %v1339_v51  ;;  %1975 = vmatmul.bf16.gmra.mxu0 %v1903_v52 }
  0xaf   : > { %1980 = vmatmul.bf16.vlgmr.msra.gmra.mxu2 %v1904_v56 }
  0xb1   : > { %v434_v1 = vpop.f32.mrf.mxu1  ;;  %v424_v2 = vpop.f32.mrf.mxu0 }
  0xb2   : > { %v838_v0 = vpop.f32.mrf.mxu2  ;;  %v989_v5 = vpop.f32.mrf.mxu3 }
  0xb9   : > { %v437_v10 = vpop.f32.mrf.mxu1  ;;  %v427_v11 = vpop.f32.mrf.mxu0 }
  0xba   : > { %v840_v9 = vpop.f32.mrf.mxu2  ;;  %v3397_v12 = vpop.f32.mrf.mxu3 }
  0xbc   : > { %1416 = vmatmul.bf16.gmra.mxu1 %v1340_v8 }
  0xc1   : > { %v439_v14 = vpop.f32.mrf.mxu1  ;;  %v429_v15 = vpop.f32.mrf.mxu0 }
  0xc2   : > { %v843_v13 = vpop.f32.mrf.mxu2  ;;  %v994_v16 = vpop.f32.mrf.mxu3 }
  0xc9   : > { %v573_v18 = vpop.f32.mrf.mxu1  ;;  %v1140_v19 = vpop.f32.mrf.mxu0 }
  0xca   : > { %v845_v17 = vpop.f32.mrf.mxu2  ;;  %v593_v20 = vadd.f32 %v573_v18, %v422_v55  ;;  %v3399_v21 = vpop.f32.mrf.mxu3 }
  0xcc   : > { %v858_v38 = vadd.f32 %v838_v0, %v593_v20 }
  0xce   : > { %v1009_v22 = vadd.f32 %v989_v5, %v858_v38 }
  0xd0   : > { %v1160_v23 = vadd.f32 %v1140_v19, %v1009_v22  ;;  %v3423_v19 = vld [vmem:[%s3477_s2] ss:$0 sm:$0xff] }
  0xd1   : > { %v575_v25 = vpop.f32.mrf.mxu1  ;;  %v1142_v26 = vpop.f32.mrf.mxu0 }
  0xd2   : > { %v848_v24 = vpop.f32.mrf.mxu2  ;;  %v594_v27 = vadd.f32 %v575_v25, %v424_v2  ;;  %v999_v29 = vpop.f32.mrf.mxu3 }
  0xd4   : > { %v859_v28 = vadd.f32 %v840_v9, %v594_v27 }
  0xd9   : > { %v578_v31 = vpop.f32.mrf.mxu1  ;;  %v1145_v32 = vpop.f32.mrf.mxu0 }
  0xda   : > { %v850_v30 = vpop.f32.mrf.mxu2  ;;  %v595_v33 = vadd.f32 %v578_v31, %v427_v11  ;;  %v3401_v39 = vpop.f32.mrf.mxu3 }
  0xdc   : > { %v860_v34 = vadd.f32 %v843_v13, %v595_v33 }
  0xde   : > { %v1011_v35 = vadd.f32 %v994_v16, %v860_v34 }
  0xe0   : > { %v1162_v36 = vadd.f32 %v1145_v32, %v1011_v35 }
  0xe1   : > { %v580_v40 = vpop.f32.mrf.mxu1  ;;  %v3403_v41 = vpop.f32.mrf.mxu0 }
  0xe2   : > { %v853_v37 = vpop.f32.mrf.mxu2  ;;  %v596_v42 = vadd.f32 %v580_v40, %v429_v15  ;;  %v1004_v48 = vpop.f32.mrf.mxu3  ;;  %v1010_v15 = vadd.f32 %v3397_v12, %v859_v28  ;;  %v3429_v12 = vld [vmem:[%s3478_s3] ss:$0 sm:$0xff] }
  0xe4   : > { %v861_v43 = vadd.f32 %v845_v17, %v596_v42  ;;  %v1161_v17 = vadd.f32 %v1142_v26, %v1010_v15 }
  0xe6   : > { %v1012_v33 = vadd.f32 %v3399_v21, %v861_v43 }
  0xe9   : > { %v583_v45 = vpop.f32.mrf.mxu1  ;;  %v1150_v46 = vpop.f32.mrf.mxu0 }
  0xea   : > { %v855_v44 = vpop.f32.mrf.mxu2  ;;  %v597_v47 = vadd.f32 %v583_v45, %v432_v54  ;;  %v3411_v58 = vpop.f32.mrf.mxu3 }
  0xec   : > { %v862_v49 = vadd.f32 %v848_v24, %v597_v47 }
  0xee   : > { %v1013_v50 = vadd.f32 %v999_v29, %v862_v49 }
  0xf0   : > { %v3405_v51 = vadd.f32 %v1150_v46, %v1013_v50  ;;  %v1163_v46 = vadd.f32 %v3403_v41, %v1012_v33 }
  0xf1   : > { %v585_v53 = vpop.f32.mrf.mxu1  ;;  %v3407_v55 = vpop.f32.mrf.mxu0 }
  0xf2   : > { %v1553_v52 = vpop.f32.mrf.mxu2  ;;  %v598_v56 = vadd.f32 %v585_v53, %v434_v1  ;;  %v1704_v0 = vpop.f32.mrf.mxu3 }
  0xf4   : > { %v3409_v57 = vadd.f32 %v850_v30, %v598_v56 }
  0xf9   : > { %v588_v60 = vpop.f32.mrf.mxu1  ;;  %v1155_v61 = vpop.f32.mrf.mxu0 }
  0xfa   : > { %v1555_v59 = vpop.f32.mrf.mxu2  ;;  %v599_v62 = vadd.f32 %v588_v60, %v437_v10  ;;  %v1706_v1 = vpop.f32.mrf.mxu3 }
  0xfc   : > { %v864_v63 = vadd.f32 %v853_v37, %v599_v62 }
  0xfe   : > { %v1015_v54 = vadd.f32 %v1004_v48, %v864_v63 }
 0x100   : > { %v3413_v2 = vadd.f32 %v1155_v61, %v1015_v54 }
 0x101   : > { %v590_v4 = vpop.f32.mrf.mxu1  ;;  %v3415_v5 = vpop.f32.mrf.mxu0 }
 0x102   : > { %v1558_v3 = vpop.f32.mrf.mxu2  ;;  %v600_v6 = vadd.f32 %v590_v4, %v439_v14  ;;  %v1709_v22 = vpop.f32.mrf.mxu3 }
 0x104   : > { %v3417_v7 = vadd.f32 %v855_v44, %v600_v6 }
 0x109   : > { %v1402_v8 = vpop.f32.mrf.mxu1  ;;  %v1966_v9 = vpop.f32.mrf.mxu0 }
 0x10a   : > { %v1422_v11 = vadd.f32 %v1402_v8, %v1160_v23  ;;  %v1560_v13 = vpop.f32.mrf.mxu2  ;;  %v1711_v40 = vpop.f32.mrf.mxu3 }
 0x10c   : > { %v1573_v10 = vadd.f32 %v1553_v52, %v1422_v11 }
 0x10e   : > { %v1724_v16 = vadd.f32 %v1704_v0, %v1573_v10 }
 0x110   : > { %v1986_v18 = vadd.f32 %v1966_v9, %v1724_v16 }
 0x111   : > { %v1404_v20 = vpop.f32.mrf.mxu1  ;;  %v1968_v14 = vpop.f32.mrf.mxu0 }
 0x112   : > { %v1423_v38 = vadd.f32 %v1404_v20, %v1161_v17  ;;  %v2017_v24 = vmul.f32 %v3423_v19, %v1986_v18  ;;  %v1563_v25 = vpop.f32.mrf.mxu2 }
 0x114   : > { %v1574_v23 = vadd.f32 %v1555_v59, %v1423_v38  ;;  %v2029_v27 = vadd.f32 %v3429_v12, %v2017_v24  ;;  %v1714_v59 = vpop.f32.mrf.mxu3 }
 0x116   : > { %v1725_v26 = vadd.f32 %v1706_v1, %v1574_v23  ;;  %v2037_v34 = vmul.f32 0.1, %v2029_v27 }
 0x118   : > { %v1987_v28 = vadd.f32 %v1968_v14, %v1725_v26  ;;  %v2045_v47 = vmax.f32 %v2029_v27, %v2037_v34  ;;  %v1016_v27 = vadd.f32 %v3411_v58, %v3417_v7 }
 0x119   : > { %v1407_v29 = vpop.f32.mrf.mxu1  ;;  %v1971_v30 = vpop.f32.mrf.mxu0 }
 0x11a   : > { %v2018_v31 = vmul.f32 %v3423_v19, %v1987_v28  ;;  %v1424_v32 = vadd.f32 %v1407_v29, %v1162_v36  ;;  %v1565_v45 = vpop.f32.mrf.mxu2  ;;  %v1167_v34 = vadd.f32 %v3415_v5, %v1016_v27 }
 0x11c   : > { %v2030_v35 = vadd.f32 %v3429_v12, %v2018_v31  ;;  %v1575_v37 = vadd.f32 %v1558_v3, %v1424_v32  ;;  %v1014_v3 = vadd.f32 %v3401_v39, %v3409_v57  ;;  %v1716_v16 = vpop.f32.mrf.mxu3 }
 0x11e   : > { %v2038_v42 = vmul.f32 0.1, %v2030_v35  ;;  %v1726_v44 = vadd.f32 %v1709_v22, %v1575_v37  ;;  %v1165_v11 = vadd.f32 %v3407_v55, %v1014_v3 }
 0x120   : > { %v2046_v48 = vmax.f32 %v2030_v35, %v2038_v42  ;;  %v1988_v49 = vadd.f32 %v1971_v30, %v1726_v44 }
 0x121   : > { %v1409_v21 = vpop.f32.mrf.mxu1  ;;  %v1973_v36 = vpop.f32.mrf.mxu0 }
 0x122   : > { %v2895_v43 = vpack.c.bf16 %v2046_v48, %v2045_v47  ;;  %v1425_v50 = vadd.f32 %v1409_v21, %v1163_v46  ;;  %v2019_v52 = vmul.f32 %v3423_v19, %v1988_v49  ;;  %v1568_v61 = vpop.f32.mrf.mxu2 }
 0x124   : > { %2896 = vst [vmem:[%s3440_s25] sm:$0xff] %v2895_v43   ;;  %v1576_v53 = vadd.f32 %v1560_v13, %v1425_v50  ;;  %v2031_v41 = vadd.f32 %v3429_v12, %v2019_v52  ;;  %v1719_v26 = vpop.f32.mrf.mxu3 }
 0x126   : > { %v1727_v56 = vadd.f32 %v1711_v40, %v1576_v53  ;;  %v2039_v4 = vmul.f32 0.1, %v2031_v41 }
 0x128   : > { %v1989_v60 = vadd.f32 %v1973_v36, %v1727_v56  ;;  %v2047_v13 = vmax.f32 %v2031_v41, %v2039_v4 }
 0x129   : > { %v1412_v62 = vpop.f32.mrf.mxu1  ;;  %v1976_v0 = vpop.f32.mrf.mxu0 }
 0x12a   : > { %v2020_v63 = vmul.f32 %v3423_v19, %v1989_v60  ;;  %v1426_v54 = vadd.f32 %v1412_v62, %v3405_v51  ;;  %v1570_v20 = vpop.f32.mrf.mxu2 }
 0x12c   : > { %v2032_v6 = vadd.f32 %v3429_v12, %v2020_v63  ;;  %v1577_v1 = vadd.f32 %v1563_v25, %v1426_v54  ;;  %v1721_v7 = vpop.f32.mrf.mxu3 }
 0x12e   : > { %v2040_v8 = vmul.f32 0.1, %v2032_v6  ;;  %v1728_v9 = vadd.f32 %v1714_v59, %v1577_v1 }
 0x130   : > { %v2048_v15 = vmax.f32 %v2032_v6, %v2040_v8  ;;  %v1990_v10 = vadd.f32 %v1976_v0, %v1728_v9 }
 0x131   : > { %v1414_v17 = vpop.f32.mrf.mxu1  ;;  %v1978_v57 = vpop.f32.mrf.mxu0 }
 0x132   : > { %v2900_v18 = vpack.c.bf16 %v2048_v15, %v2047_v13  ;;  %v1427_v51 = vadd.f32 %v1414_v17, %v1165_v11  ;;  %v2021_v14 = vmul.f32 %v3423_v19, %v1990_v10  ;;  %v1981_v31 = vpop.f32.mrf.mxu2 }
 0x134   : > { %2912 = vst [vmem:[%s3440_s25 + $0x8] sm:$0xff] %v2900_v18   ;;  %v1578_v39 = vadd.f32 %v1565_v45, %v1427_v51  ;;  %v2033_v22 = vadd.f32 %v3429_v12, %v2021_v14 }
 0x136   : > { %v1729_v38 = vadd.f32 %v1716_v16, %v1578_v39  ;;  %v2041_v28 = vmul.f32 0.1, %v2033_v22 }
 0x138   : > { %v1991_v24 = vadd.f32 %v1978_v57, %v1729_v38  ;;  %v2049_v35 = vmax.f32 %v2033_v22, %v2041_v28 }
 0x139   : > { %v1417_v23 = vpop.f32.mrf.mxu1 }
 0x13a   : > { %v2022_v55 = vmul.f32 %v3423_v19, %v1991_v24  ;;  %v1428_v25 = vadd.f32 %v1417_v23, %v3413_v2  ;;  %v1983_v47 = vpop.f32.mrf.mxu2 }
 0x13c   : > { %v2034_v29 = vadd.f32 %v3429_v12, %v2022_v55  ;;  %v1579_v30 = vadd.f32 %v1568_v61, %v1428_v25 }
 0x13e   : > { %v2042_v32 = vmul.f32 0.1, %v2034_v29  ;;  %v1730_v33 = vadd.f32 %v1719_v26, %v1579_v30 }
 0x140   : > { %v2050_v37 = vmax.f32 %v2034_v29, %v2042_v32  ;;  %v1992_v40 = vadd.f32 %v1981_v31, %v1730_v33 }
 0x141   : > { %v1419_v42 = vpop.f32.mrf.mxu1 }
 0x142   : > { %v2905_v44 = vpack.c.bf16 %v2050_v37, %v2049_v35  ;;  %v1429_v2 = vadd.f32 %v1419_v42, %v1167_v34  ;;  %v2023_v45 = vmul.f32 %v3423_v19, %v1992_v40 }
 0x144   : > { %2913 = vst [vmem:[%s3440_s25 + $0x10] sm:$0xff] %v2905_v44   ;;  %v1580_v58 = vadd.f32 %v1570_v20, %v1429_v2  ;;  %v2035_v48 = vadd.f32 %v3429_v12, %v2023_v45 }
 0x146   : > { %v1731_v46 = vadd.f32 %v1721_v7, %v1580_v58  ;;  %v2043_v5 = vmul.f32 0.1, %v2035_v48 }
 0x148   : > { %v1993_v49 = vadd.f32 %v1983_v47, %v1731_v46  ;;  %v2051_v50 = vmax.f32 %v2035_v48, %v2043_v5 }
 0x14a   : > { %v2024_v21 = vmul.f32 %v3423_v19, %v1993_v49 }
 0x14c   : > { %v2036_v36 = vadd.f32 %v3429_v12, %v2024_v21 }
 0x14e   : > { %v2044_v43 = vmul.f32 0.1, %v2036_v36 }
 0x150   : > { %v2052_v52 = vmax.f32 %v2036_v36, %v2044_v43 }
 0x152   : > { %v2910_v53 = vpack.c.bf16 %v2052_v52, %v2051_v50 }
 0x154   : > { %2914 = vst [vmem:[%s3440_s25 + $0x18] sm:$0xff] %v2910_v53  }
 0x155 PF: > { %s14_s17 = sadd.s32 1, %s2980_s17   ;;  %s3482_s15 = smov %s2976_s16 }
 0x156   : > { %p11_p5 = scmp.ge.s32.totalorder %s14_s17, 4   ;;  %s3483_s16 = smov %s3485_s18 }
 0x158   :  { %13 = sbr.rel (!%p11_p5) target bundleno = 2 (0x2), region = 96 }

// kernel: udarknet_forward.10
= control target key start
LH: loop header
LB: loop body
LE: loop exit
PB: predicated region body
PF: predicated region fallthrough
CT: control target
= control target key end

     0   :  { %s3309_s24 = smov 0   ;;  %s3867_s0 = inlined_call_operand.vmem [shape: bf16[2,8,8,128], index: 0, kind: input, shape index: {}]   ;;  %s3868_s1 = inlined_call_operand.vmem [shape: bf16[1,128,128], index: 1, kind: input, shape index: {}]   ;;  %s3869_s2 = inlined_call_operand.vmem [shape: f32[1,128], index: 2, kind: input, shape index: {}]   ;;  %s3870_s3 = inlined_call_operand.vmem [shape: f32[1,128], index: 3, kind: input, shape index: {}]   ;;  %s3871_s4 = inlined_call_operand.vmem [shape: bf16[9,128,128], index: 4, kind: input, shape index: {}]   ;;  %s3872_s5 = inlined_call_operand.vmem [shape: f32[1,128], index: 5, kind: input, shape index: {}]   ;;  %s3873_s6 = inlined_call_operand.vmem [shape: f32[1,128], index: 6, kind: input, shape index: {}]   ;;  %s3874_s7 = inlined_call_operand.vmem [shape: bf16[2,64,128], index: 7, kind: output, shape index: {}]  }
   0x1 LB: > { %s2563_s25 = sadd.s32 4294967295, %s3266_s24   ;;  %p2567_p0 = scmp.ge.s32.totalorder %s3266_s24, 1  ;;  %s3266_s24 = sphi %s3309_s24, %s17_s24  }
   0x2   : > { %p237_p1 = scmp.lt.s32.totalorder %s3266_s24, 3 }
   0x4   : > { %p238_p2 = pnand %p2567_p0, %p237_p1 }
   0x5   : > { %p269_p3 = scmp.lt.s32.totalorder (!%p238_p2), %s2563_s25, 1 }
   0x6   : > { %241 = sbr.rel (%p238_p2) target bundleno = 524 (0x20c), region = 48 }
   0xb   : > { %v3123_v0 = vld [vmem:[%s3868_s1 + $0x38] sm:$0xff]  ;;  %v3122_v1 = vld [vmem:[%s3868_s1 + $0x30] sm:$0xff]  ;;  %v3121_v2 = vld [vmem:[%s3868_s1 + $0x28] sm:$0xff]  ;;  %v3268_v7 = vmov 0   ;;  %s3884_s25 = smov (!%p269_p3, %s2563_s25), 1  ;;  %vm554_vm0 = vcmask 1043456  }
   0xc   : > { %396 = vmatpush.bf16.msra.mxu0 %v3123_v0  ;;  %3231 = vmatpush.bf16.msra.mxu2 %v3123_v0  ;;  %v3120_v3 = vld [vmem:[%s3868_s1 + $0x20] sm:$0xff]  ;;  %v3119_v4 = vld [vmem:[%s3868_s1 + $0x18] sm:$0xff]  ;;  %v3118_v6 = vld [vmem:[%s3868_s1 + $0x10] sm:$0xff]  ;;  %290 = vst [vmem:[#allocation2 + $0x8] sm:$0xf] %v3268_v7  ;;  %s3110_s19 = sshll.u32 %s3884_s25, 5 }
   0xd   : > { %v3135_v5 = vld [vmem:[%s3871_s4 + $0x38] sm:$0xff]  ;;  %291 = vst [vmem:[#allocation2 + $0xc] sm:$0x1] %v3268_v7  ;;  %v3117_v8 = vld [vmem:[%s3868_s1 + $0x8] sm:$0xff]  ;;  %v3116_v9 = vld [vmem:[%s3868_s1] sm:$0xff]  ;;  %s3352_s26 = scalar_lea.vmem %s3867_s0, %s3110_s19  ;;  %vm560_vm2 = vcmask 1040384   ;;  %s3832_s27 = scalar_lea.vmem %s3874_s7, %s3110_s19 }
   0xe   : > { %704 = vmatpush.bf16.msra.mxu1 %v3135_v5  ;;  %3239 = vmatpush.bf16.msra.mxu3 %v3135_v5  ;;  %288 = vst [vmem:[#allocation2] sm:$0xf] %v3268_v7  ;;  %v3112_v10 = vld [vmem:[%s3352_s26] sm:$0xff]  ;;  %v3114_v11 = vld [vmem:[%s3352_s26 + $0x10] sm:$0xff]  ;;  %v3113_v12 = vld [vmem:[%s3352_s26 + $0x8] sm:$0xff]  ;;  %vm1038_vm9 = vcmask 1042432  }
   0xf   : > { %289 = vst [vmem:[#allocation2 + $0x4] sm:$0x1] %v3268_v7  ;;  %v3115_v13 = vld [vmem:[%s3352_s26 + $0x18] sm:$0xff]  ;;  %v3134_v14 = vld [vmem:[%s3871_s4 + $0x30] sm:$0xff]  ;;  %v3133_v15 = vld [vmem:[%s3871_s4 + $0x28] sm:$0xff]  ;;  %vm1039_vm10 = vcmask 1046532  }
  0x10   : > { %397 = vmatpush.bf16.msra.mxu0 %v3122_v1  ;;  %3232 = vmatpush.bf16.msra.mxu2 %v3122_v1  ;;  %292 = vst [vmem:[#allocation2 + $0x10] sm:$0xf] %v3268_v7  ;;  %v3163_v16 = vld [vmem:[%s3871_s4 + $0xf8] sm:$0xff]  ;;  %v3132_v18 = vld [vmem:[%s3871_s4 + $0x20] sm:$0xff]  ;;  %v3162_v19 = vld [vmem:[%s3871_s4 + $0xf0] sm:$0xff] }
  0x11   : > { %293 = vst [vmem:[#allocation2 + $0x14] sm:$0x1] %v3268_v7  ;;  %v3143_v17 = vld [vmem:[%s3871_s4 + $0x78] sm:$0xff]  ;;  %v3142_v20 = vld [vmem:[%s3871_s4 + $0x70] sm:$0xff]  ;;  %v3161_v22 = vld [vmem:[%s3871_s4 + $0xe8] sm:$0xff] }
  0x12   : > { %294 = vst [vmem:[#allocation2 + $0x18] sm:$0xf] %v3268_v7  ;;  %705 = vmatpush.bf16.msra.mxu1 %v3134_v14  ;;  %3240 = vmatpush.bf16.msra.mxu3 %v3134_v14  ;;  %v3131_v21 = vld [vmem:[%s3871_s4 + $0x18] sm:$0xff]  ;;  %v3141_v23 = vld [vmem:[%s3871_s4 + $0x68] sm:$0xff]  ;;  %v3130_v24 = vld [vmem:[%s3871_s4 + $0x10] sm:$0xff] }
  0x13   : > { %295 = vst [vmem:[#allocation2 + $0x1c] sm:$0x1] %v3268_v7  ;;  %v3160_v25 = vld [vmem:[%s3871_s4 + $0xe0] sm:$0xff]  ;;  %v3129_v27 = vld [vmem:[%s3871_s4 + $0x8] sm:$0xff]  ;;  %v3159_v28 = vld [vmem:[%s3871_s4 + $0xd8] sm:$0xff] }
  0x14   : > { %398 = vmatpush.bf16.msra.mxu0 %v3121_v2  ;;  %3233 = vmatpush.bf16.msra.mxu2 %v3121_v2  ;;  %296 = vst [vmem:[#allocation2 + $0x20] sm:$0xf] %v3268_v7  ;;  %v3140_v26 = vld [vmem:[%s3871_s4 + $0x60] sm:$0xff]  ;;  %v3139_v29 = vld [vmem:[%s3871_s4 + $0x58] sm:$0xff]  ;;  %v3158_v31 = vld [vmem:[%s3871_s4 + $0xd0] sm:$0xff] }
  0x15   : > { %297 = vst [vmem:[#allocation2 + $0x24] sm:$0x1] %v3268_v7  ;;  %v3128_v30 = vld [vmem:[%s3871_s4] sm:$0xff]  ;;  %v3138_v33 = vld [vmem:[%s3871_s4 + $0x50] sm:$0xff]  ;;  %v3157_v34 = vld [vmem:[%s3871_s4 + $0xc8] sm:$0xff] }
  0x16   : > { %298 = vst [vmem:[#allocation2 + $0x28] sm:$0xf] %v3268_v7  ;;  %706 = vmatpush.bf16.msra.mxu1 %v3133_v15  ;;  %3241 = vmatpush.bf16.msra.mxu3 %v3133_v15  ;;  %v3415_v32 = vld [vmem:[%s3869_s2] ss:$0 sm:$0xff]  ;;  %v3171_v35 = vld [vmem:[%s3871_s4 + $0x138] sm:$0xff]  ;;  %v3137_v39 = vld [vmem:[%s3871_s4 + $0x48] sm:$0xff] }
  0x17   : > { %299 = vst [vmem:[#allocation2 + $0x2c] sm:$0x1] %v3268_v7  ;;  %v3429_v36 = vld [vmem:[%s3870_s3] ss:$0 sm:$0xff]  ;;  %v3170_v42 = vld [vmem:[%s3871_s4 + $0x130] sm:$0xff]  ;;  %v3169_v47 = vld [vmem:[%s3871_s4 + $0x128] sm:$0xff] }
  0x18   : > { %399 = vmatpush.bf16.msra.mxu0 %v3120_v3  ;;  %3234 = vmatpush.bf16.msra.mxu2 %v3120_v3  ;;  %300 = vst [vmem:[#allocation2 + $0x30] sm:$0xf] %v3268_v7  ;;  %v3156_v40 = vld [vmem:[%s3871_s4 + $0xc0] sm:$0xff]  ;;  %vm555_vm1 = vsmask.f32 7938  ;;  %vm3662_vm11 = vmor %vm1038_vm9, %vm1039_vm10 }
  0x19   : > { %301 = vst [vmem:[#allocation2 + $0x34] sm:$0x1] %v3268_v7  ;;  %v3136_v44 = vld [vmem:[%s3871_s4 + $0x40] sm:$0xff]  ;;  %vm561_vm3 = vsmask.f32 256  ;;  %vm3455_vm4 = vmand %vm554_vm0, %vm555_vm1 }
  0x1a   : > { %302 = vst [vmem:[#allocation2 + $0x38] sm:$0xf] %v3268_v7  ;;  %707 = vmatpush.bf16.msra.mxu1 %v3132_v18  ;;  %3242 = vmatpush.bf16.msra.mxu3 %v3132_v18  ;;  %v741_v45 = vld [vmem:[#allocation2] sm:$0xf]  ;;  %v742_v3 = vld [vmem:[#allocation2 + $0x4] sm:$0x1]  ;;  %vm3460_vm5 = vmand %vm560_vm2, %vm561_vm3 }
  0x1b   : > { %303 = vst [vmem:[#allocation2 + $0x3c] sm:$0x1] %v3268_v7  ;;  %v761_v51 = vshrl.u32 %v741_v45, 16  ;;  %v764_v52 = vshll.u32 %v741_v45, 16  ;;  %v3168_v61 = vld [vmem:[%s3871_s4 + $0x120] sm:$0xff] }
  0x1c   : > { %400 = vmatpush.bf16.msra.mxu0 %v3119_v4  ;;  %3235 = vmatpush.bf16.msra.mxu2 %v3119_v4  ;;  %304 = vst [vmem:[#allocation2 + $0x40] sm:$0xf] %v3268_v7  ;;  %v557_v4 = vld [vmem:[#allocation2 + $0x8] sm:$0xf]  ;;  %vm757_vm6 = vsmask.f32 3328 }
  0x1d   : > { %305 = vst [vmem:[#allocation2 + $0x44] sm:$0x1] %v3268_v7  ;;  %v763_v59 = vrot.slane %v761_v51, 4  ;;  %v766_v60 = vrot.slane %v764_v52, 5  ;;  %vm758_vm7 = vsmask.f32 7440 }
  0x1e   : > { %306 = vst [vmem:[#allocation2 + $0x48] sm:$0xf] %v3268_v7  ;;  %708 = vmatpush.bf16.msra.mxu1 %v3131_v21  ;;  %3243 = vmatpush.bf16.msra.mxu3 %v3131_v21  ;;  %v584_v21 = vld [vmem:[#allocation2 + $0x28] sm:$0xf]  ;;  %vm3487_vm8 = vmor %vm757_vm6, %vm758_vm7 }
  0x1f   : > { %307 = vst [vmem:[#allocation2 + $0x4c] sm:$0x1] %v3268_v7  ;;  %v767_v15 = vor.u32 %v766_v60, %v763_v59 }
  0x20   : > { %401 = vmatpush.bf16.msra.mxu0 %v3118_v6  ;;  %3236 = vmatpush.bf16.msra.mxu2 %v3118_v6  ;;  %v563_v6 = vld [vmem:[#allocation2 + $0xc] sm:$0x1] }
  0x22   : > { %709 = vmatpush.bf16.msra.mxu1 %v3130_v24  ;;  %3244 = vmatpush.bf16.msra.mxu3 %v3130_v24 }
  0x24   : > { %402 = vmatpush.bf16.msra.mxu0 %v3117_v8  ;;  %3237 = vmatpush.bf16.msra.mxu2 %v3117_v8 }
  0x26   : > { %710 = vmatpush.bf16.msra.mxu1 %v3129_v27  ;;  %3245 = vmatpush.bf16.msra.mxu3 %v3129_v27  ;;  %v587_v27 = vld [vmem:[#allocation2 + $0x2c] sm:$0x1] }
  0x28   : > { %403 = vmatpush.bf16.msra.mxu0 %v3116_v9  ;;  %3238 = vmatpush.bf16.msra.mxu2 %v3116_v9 }
  0x2a   : > { %711 = vmatpush.bf16.msra.mxu1 %v3128_v30  ;;  %3246 = vmatpush.bf16.msra.mxu3 %v3128_v30 }
  0x2b   : > { %404 = vmatmul.bf16.vlgmr.msra.gmra.mxu0 %v3112_v10  ;;  %414 = vmatmul.bf16.vlgmr.msra.gmra.mxu2 %v3114_v11 }
  0x2c   : > { %1304 = vmatpush.bf16.msrb.mxu0 %v3163_v16  ;;  %953 = vmatpush.bf16.msrb.mxu2 %v3143_v17  ;;  %v770_v16 = vshll.u32 %v742_v3, 16  ;;  %v590_v3 = vld [vmem:[#allocation2 + $0x30] sm:$0xf] }
  0x2e   : > { %1566 = vmatpush.bf16.msrb.mxu1 %v3171_v35  ;;  %v3480_v35 = vrot.slane %v770_v16, 5 }
  0x30   : > { %1305 = vmatpush.bf16.msrb.mxu0 %v3162_v19  ;;  %954 = vmatpush.bf16.msrb.mxu2 %v3142_v20 }
  0x32   : > { %1567 = vmatpush.bf16.msrb.mxu1 %v3170_v42 }
  0x34   : > { %1306 = vmatpush.bf16.msrb.mxu0 %v3161_v22  ;;  %955 = vmatpush.bf16.msrb.mxu2 %v3141_v23 }
  0x36   : > { %1568 = vmatpush.bf16.msrb.mxu1 %v3169_v47  ;;  %v566_v47 = vld [vmem:[#allocation2 + $0x10] sm:$0xf] }
  0x38   : > { %1307 = vmatpush.bf16.msrb.mxu0 %v3160_v25  ;;  %956 = vmatpush.bf16.msrb.mxu2 %v3140_v26  ;;  %v3166_v25 = vld [vmem:[%s3871_s4 + $0x110] sm:$0xff] }
  0x3a   : > { %1569 = vmatpush.bf16.msrb.mxu1 %v3168_v61 }
  0x3b   : > { %409 = vmatmul.bf16.gmra.mxu0 %v3113_v12  ;;  %419 = vmatmul.bf16.gmra.mxu2 %v3115_v13  ;;  %v3167_v12 = vld [vmem:[%s3871_s4 + $0x118] sm:$0xff] }
  0x3c   : > { %1308 = vmatpush.bf16.msrb.mxu0 %v3159_v28  ;;  %957 = vmatpush.bf16.msrb.mxu2 %v3139_v29 }
  0x3e   : > { %1570 = vmatpush.bf16.msrb.mxu1 %v3167_v12 }
  0x40   : > { %1309 = vmatpush.bf16.msrb.mxu0 %v3158_v31  ;;  %958 = vmatpush.bf16.msrb.mxu2 %v3138_v33 }
  0x42   : > { %1571 = vmatpush.bf16.msrb.mxu1 %v3166_v25 }
  0x44   : > { %1310 = vmatpush.bf16.msrb.mxu0 %v3157_v34  ;;  %959 = vmatpush.bf16.msrb.mxu2 %v3137_v39  ;;  %v3478_v34 = vrot.slane %v767_v15, 4 }
  0x46   : > { %v773_v59 = vsel %vm3487_vm8, %v3478_v34, %v3480_v35  ;;  %v575_v34 = vld [vmem:[#allocation2 + $0x1c] sm:$0x1] }
  0x48   : > { %1311 = vmatpush.bf16.msrb.mxu0 %v3156_v40  ;;  %960 = vmatpush.bf16.msrb.mxu2 %v3136_v44  ;;  %v3165_v44 = vld [vmem:[%s3871_s4 + $0x108] sm:$0xff] }
  0x49   : > { %1572 = vmatpush.bf16.msrb.mxu1 %v3165_v44 }
  0xa8   : > { %v405_v37 = vpop.f32.mrf.mxu0 }
  0xa9   : > { %v429_v38 = vmul.f32 %v3415_v32, %v405_v37  ;;  %v3151_v37 = vld [vmem:[%s3871_s4 + $0xb8] sm:$0xff] }
  0xaa   : > { %1154 = vmatpush.bf16.msrb.mxu3 %v3151_v37 }
  0xab   : > { %v441_v41 = vadd.f32 %v3429_v36, %v429_v38 }
  0xad   : > { %v449_v43 = vmul.f32 0.1, %v441_v41 }
  0xae   : > { %v415_v46 = vpop.f32.mrf.mxu2 }
  0xaf   : > { %v457_v48 = vmax.f32 %v441_v41, %v449_v43  ;;  %v433_v49 = vmul.f32 %v3415_v32, %v415_v46 }
  0xb0   : > { %v407_v50 = vpop.f32.mrf.mxu0 }
  0xb1   : > { %v465_v53 = vpack.c.bf16 %v457_v48, %v457_v48  ;;  %v445_v54 = vadd.f32 %v3429_v36, %v433_v49  ;;  %v430_v55 = vmul.f32 %v3415_v32, %v407_v50  ;;  %v569_v48 = vld [vmem:[#allocation2 + $0x14] sm:$0x1] }
  0xb3   : > { %v474_v56 = vshrl.u32 %v465_v53, 16  ;;  %v453_v57 = vmul.f32 0.1, %v445_v54  ;;  %v442_v58 = vadd.f32 %v3429_v36, %v430_v55  ;;  %v477_v63 = vshll.u32 %v465_v53, 16  ;;  %v2622_v55 = vld [vmem:[#allocation2] sm:$0xf] }
  0xb5   : > { %v476_v62 = vrot.slane %v474_v56, 7  ;;  %v461_v1 = vmax.f32 %v445_v54, %v453_v57  ;;  %v450_v2 = vmul.f32 0.1, %v442_v58 }
  0xb6   : > { %v417_v7 = vpop.f32.mrf.mxu2 }
  0xb7   : > { %v479_v8 = vor.u32 %v477_v63, %v476_v62  ;;  %v480_v9 = vrot.slane %v476_v62, 4  ;;  %v469_v10 = vpack.c.bf16 %v461_v1, %v461_v1  ;;  %v458_v11 = vmax.f32 %v442_v58, %v450_v2 }
  0xb8   : > { %v434_v13 = vmul.f32 %v3415_v32, %v417_v7  ;;  %v410_v14 = vpop.f32.mrf.mxu0 }
  0xb9   : > { %v558_v17 = vsel %vm3455_vm4, %v479_v8, %v557_v4  ;;  %v564_v18 = vsel %vm3460_vm5, %v480_v9, %v563_v6  ;;  %v506_v19 = vshrl.u32 %v469_v10, 16  ;;  %v509_v20 = vshll.u32 %v469_v10, 16  ;;  %v593_v4 = vld [vmem:[#allocation2 + $0x34] sm:$0x1] }
  0xba   : > { %559 = vst [vmem:[#allocation2 + $0x8] sm:$0xf] %v558_v17  ;;  %v466_v22 = vpack.c.bf16 %v458_v11, %v458_v11  ;;  %v446_v23 = vadd.f32 %v3429_v36, %v434_v13  ;;  %v431_v24 = vmul.f32 %v3415_v32, %v410_v14  ;;  %v3150_v10 = vld [vmem:[%s3871_s4 + $0xb0] sm:$0xff]  ;;  %v3164_v11 = vld [vmem:[%s3871_s4 + $0x100] sm:$0xff] }
  0xbb   : > { %565 = vst [vmem:[#allocation2 + $0xc] sm:$0x1] %v564_v18  ;;  %v508_v26 = vrot.slane %v506_v19, 7  ;;  %1155 = vmatpush.bf16.msrb.mxu3 %v3150_v10  ;;  %1573 = vmatpush.bf16.msrb.mxu1 %v3164_v11  ;;  %v581_v10 = vld [vmem:[#allocation2 + $0x24] sm:$0x1] }
  0xbc   : > { %v482_v28 = vshrl.u32 %v466_v22, 16  ;;  %v454_v29 = vmul.f32 0.1, %v446_v23  ;;  %v443_v30 = vadd.f32 %v3429_v36, %v431_v24  ;;  %v485_v39 = vshll.u32 %v466_v22, 16 }
  0xbd   : > { %v511_v31 = vor.u32 %v509_v20, %v508_v26  ;;  %v512_v33 = vrot.slane %v508_v26, 4  ;;  %v3149_v20 = vld [vmem:[%s3871_s4 + $0xa8] sm:$0xff] }
  0xbe   : > { %v484_v38 = vrot.slane %v482_v28, 7  ;;  %v462_v40 = vmax.f32 %v446_v23, %v454_v29  ;;  %v451_v41 = vmul.f32 0.1, %v443_v30  ;;  %v420_v42 = vpop.f32.mrf.mxu2 }
  0xbf   : > { %v585_v45 = vsel %vm3455_vm4, %v511_v31, %v584_v21  ;;  %v588_v46 = vsel %vm3460_vm5, %v512_v33, %v587_v27  ;;  %v435_v49 = vmul.f32 %v3415_v32, %v420_v42  ;;  %v572_v27 = vld [vmem:[#allocation2 + $0x18] sm:$0xf]  ;;  %1156 = vmatpush.bf16.msrb.mxu3 %v3149_v20 }
  0xc0   : > { %586 = vst [vmem:[#allocation2 + $0x28] sm:$0xf] %v585_v45  ;;  %v487_v50 = vor.u32 %v485_v39, %v484_v38  ;;  %v488_v51 = vrot.slane %v484_v38, 4  ;;  %v470_v52 = vpack.c.bf16 %v462_v40, %v462_v40  ;;  %v459_v53 = vmax.f32 %v443_v30, %v451_v41  ;;  %v412_v54 = vpop.f32.mrf.mxu0  ;;  %v596_v45 = vld [vmem:[#allocation2 + $0x38] sm:$0xf] }
  0xc1   : > { %589 = vst [vmem:[#allocation2 + $0x2c] sm:$0x1] %v588_v46  ;;  %v447_v56 = vadd.f32 %v3429_v36, %v435_v49  ;;  %v432_v57 = vmul.f32 %v3415_v32, %v412_v54  ;;  %v3124_v58 = vld [vmem:[#allocation2 + $0x4] sm:$0xf0]  ;;  %v889_v38 = vunpack.c.l.b16 %v773_v59  ;;  %v599_v54 = vld [vmem:[#allocation2 + $0x3c] sm:$0x1] }
  0xc2   : > { %v567_v60 = vsel %vm3455_vm4, %v487_v50, %v566_v47  ;;  %v570_v61 = vsel %vm3460_vm5, %v488_v51, %v569_v48  ;;  %v514_v62 = vshrl.u32 %v470_v52, 16  ;;  %v517_v63 = vshll.u32 %v470_v52, 16  ;;  %v743_v1 = vld [vmem:[#allocation2 + $0x8] sm:$0xf]  ;;  %v744_v2 = vld [vmem:[#allocation2 + $0xc] sm:$0x1] }
  0xc3   : > { %568 = vst [vmem:[#allocation2 + $0x10] sm:$0xf] %v567_v60  ;;  %v467_v6 = vpack.c.bf16 %v459_v53, %v459_v53  ;;  %v455_v7 = vmul.f32 0.1, %v447_v56  ;;  %v444_v8 = vadd.f32 %v3429_v36, %v432_v57  ;;  %v2623_v9 = vor.u32 %v3124_v58, %v2622_v55  ;;  %v2790_v35 = vld [vmem:[#allocation2 + $0x8] sm:$0xf] }
  0xc4   : > { %571 = vst [vmem:[#allocation2 + $0x14] sm:$0x1] %v570_v61  ;;  %v516_v12 = vrot.slane %v514_v62, 7  ;;  %v775_v13 = vshrl.u32 %v743_v1, 16  ;;  %v778_v14 = vshll.u32 %v743_v1, 16  ;;  %v784_v15 = vshll.u32 %v744_v2, 16 }
  0xc5   : > { %v490_v16 = vshrl.u32 %v467_v6, 16  ;;  %v493_v17 = vshll.u32 %v467_v6, 16  ;;  %v463_v18 = vmax.f32 %v447_v56, %v455_v7  ;;  %v452_v19 = vmul.f32 0.1, %v444_v8  ;;  %712 = vmatmul.bf16.vlgmr.msra.gmra.mxu1 %v2623_v9  ;;  %v3524_v39 = vld [vmem:[#allocation2 + $0x8] sm:$0xf] }
  0xc6   : > { %v519_v21 = vor.u32 %v517_v63, %v516_v12  ;;  %v520_v22 = vrot.slane %v516_v12, 4  ;;  %v422_v23 = vpop.f32.mrf.mxu2  ;;  %v777_v24 = vrot.slane %v775_v13, 4  ;;  %v780_v25 = vrot.slane %v778_v14, 5  ;;  %v3147_v7 = vld [vmem:[%s3871_s4 + $0x98] sm:$0xff]  ;;  %v1358_v13 = vld [vmem:[#allocation2 + $0xc] sm:$0x1] }
  0xc7   : > { %v492_v26 = vrot.slane %v490_v16, 7  ;;  %v471_v28 = vpack.c.bf16 %v463_v18, %v463_v18  ;;  %v460_v29 = vmax.f32 %v444_v8, %v452_v19  ;;  %v436_v30 = vmul.f32 %v3415_v32, %v422_v23  ;;  %v3148_v32 = vld [vmem:[%s3871_s4 + $0xa0] sm:$0xff]  ;;  %v3199_v14 = vld [vmem:[%s3871_s4 + $0x1f8] sm:$0xff] }
  0xc8   : > { %v591_v31 = vsel %vm3455_vm4, %v519_v21, %v590_v3  ;;  %v594_v33 = vsel %vm3460_vm5, %v520_v22, %v593_v4  ;;  %v781_v37 = vor.u32 %v780_v25, %v777_v24  ;;  %v786_v50 = vrot.slane %v784_v15, 5  ;;  %1157 = vmatpush.bf16.msrb.mxu3 %v3148_v32  ;;  %v578_v3 = vld [vmem:[#allocation2 + $0x20] sm:$0xf]  ;;  %2177 = vmatpush.bf16.msra.mxu0 %v3199_v14 }
  0xc9   : > { %592 = vst [vmem:[#allocation2 + $0x30] sm:$0xf] %v591_v31  ;;  %v495_v40 = vor.u32 %v493_v17, %v492_v26  ;;  %v496_v41 = vrot.slane %v492_v26, 4  ;;  %v522_v42 = vshrl.u32 %v471_v28, 16  ;;  %v525_v44 = vshll.u32 %v471_v28, 16  ;;  %v3146_v28 = vld [vmem:[%s3871_s4 + $0x90] sm:$0xff] }
  0xca   : > { %595 = vst [vmem:[#allocation2 + $0x34] sm:$0x1] %v594_v33  ;;  %v468_v46 = vpack.c.bf16 %v460_v29, %v460_v29  ;;  %v448_v47 = vadd.f32 %v3429_v36, %v436_v30  ;;  %v3152_v48 = vld [vmem:[#allocation2 + $0xc] sm:$0xf0]  ;;  %v782_v49 = vrot.slane %v781_v37, 4  ;;  %v1374_v36 = vshrl.u32 %v3524_v39, 16 }
  0xcb   : > { %v573_v51 = vsel %vm3455_vm4, %v495_v40, %v572_v27  ;;  %v576_v52 = vsel %vm3460_vm5, %v496_v41, %v575_v34  ;;  %v524_v53 = vrot.slane %v522_v42, 7  ;;  %v2791_v55 = vor.u32 %v3152_v48, %v2790_v35  ;;  %v745_v56 = vld [vmem:[#allocation2 + $0x10] sm:$0xf]  ;;  %v746_v18 = vld [vmem:[#allocation2 + $0x14] sm:$0x1]  ;;  %v3179_v29 = vld [vmem:[%s3871_s4 + $0x178] sm:$0xff] }
  0xcc   : > { %574 = vst [vmem:[#allocation2 + $0x18] sm:$0xf] %v573_v51  ;;  %v498_v57 = vshrl.u32 %v468_v46, 16  ;;  %v456_v58 = vmul.f32 0.1, %v448_v47  ;;  %v787_v59 = vsel %vm3487_vm8, %v782_v49, %v786_v50  ;;  %v789_v63 = vshrl.u32 %v745_v56, 16  ;;  %1158 = vmatpush.bf16.msrb.mxu3 %v3147_v7  ;;  %1764 = vmatpush.bf16.msra.mxu2 %v3179_v29 }
  0xcd   : > { %577 = vst [vmem:[#allocation2 + $0x1c] sm:$0x1] %v576_v52  ;;  %v527_v60 = vor.u32 %v525_v44, %v524_v53  ;;  %v528_v61 = vrot.slane %v524_v53, 4  ;;  %1312 = vmatmul.bf16.vlgmr.msrb.gmra.mxu0 %v2791_v55  ;;  %v890_v62 = vunpack.c.l.b16 %v787_v59  ;;  %v501_v2 = vshll.u32 %v468_v46, 16  ;;  %v2626_v20 = vld [vmem:[#allocation2 + $0x10] sm:$0xf] }
  0xce   : > { %v500_v1 = vrot.slane %v498_v57, 7  ;;  %v464_v4 = vmax.f32 %v448_v47, %v456_v58  ;;  %v792_v6 = vshll.u32 %v745_v56, 16  ;;  %v791_v12 = vrot.slane %v789_v63, 4  ;;  %v3552_v27 = vld [vmem:[#allocation2 + $0x10] sm:$0xf]  ;;  %v3145_v50 = vld [vmem:[%s3871_s4 + $0x88] sm:$0xff] }
  0xcf   : > { %v597_v8 = vsel %vm3455_vm4, %v527_v60, %v596_v45  ;;  %v600_v9 = vsel %vm3460_vm5, %v528_v61, %v599_v54  ;;  %v897_v11 = vpack.c.b16 %v890_v62, %v889_v38  ;;  %v1376_v21 = vrot.slane %v1374_v36, 4  ;;  %v602_v30 = vld [vmem:[#allocation2 + $0x40] sm:$0xf]  ;;  %v605_v41 = vld [vmem:[#allocation2 + $0x44] sm:$0x1]  ;;  %v3198_v49 = vld [vmem:[%s3871_s4 + $0x1f0] sm:$0xff] }
  0xd0   : > { %598 = vst [vmem:[#allocation2 + $0x38] sm:$0xf] %v597_v8  ;;  %v503_v15 = vor.u32 %v501_v2, %v500_v1  ;;  %v504_v16 = vrot.slane %v500_v1, 4  ;;  %v472_v17 = vpack.c.bf16 %v464_v4, %v464_v4  ;;  %v794_v19 = vrot.slane %v792_v6, 5  ;;  %1159 = vmatpush.bf16.msrb.mxu3 %v3146_v28  ;;  %v1360_v54 = vld [vmem:[#allocation2 + $0x14] sm:$0x1]  ;;  %2178 = vmatpush.bf16.msra.mxu0 %v3198_v49 }
  0xd1   : > { %601 = vst [vmem:[#allocation2 + $0x3c] sm:$0x1] %v600_v9  ;;  %961 = vmatmul.bf16.vlgmr.msrb.gmra.mxu2 %v897_v11  ;;  %v1377_v22 = vshll.u32 %v3524_v39, 16  ;;  %v798_v34 = vshll.u32 %v746_v18, 16  ;;  %v1383_v35 = vshll.u32 %v1358_v13, 16  ;;  %v1388_v55 = vshrl.u32 %v3552_v27, 16 }
  0xd2   : > { %v579_v23 = vsel %vm3455_vm4, %v503_v15, %v578_v3  ;;  %v582_v24 = vsel %vm3460_vm5, %v504_v16, %v581_v10  ;;  %v530_v25 = vshrl.u32 %v472_v17, 16  ;;  %v533_v26 = vshll.u32 %v472_v17, 16  ;;  %v3178_v56 = vld [vmem:[%s3871_s4 + $0x170] sm:$0xff]  ;;  %v3126_v59 = vld [vmem:[#allocation2 + $0x24] sm:$0xf0]  ;;  %v3144_v1 = vld [vmem:[%s3871_s4 + $0x80] sm:$0xff] }
  0xd3   : > { %580 = vst [vmem:[#allocation2 + $0x20] sm:$0xf] %v579_v23  ;;  %v3125_v31 = vld [vmem:[#allocation2 + $0x14] sm:$0xf0]  ;;  %v795_v33 = vor.u32 %v794_v19, %v791_v12  ;;  %v1379_v40 = vrot.slane %v1377_v22, 5  ;;  %v800_v60 = vrot.slane %v798_v34, 5  ;;  %1765 = vmatpush.bf16.msra.mxu2 %v3178_v56 }
  0xd4   : > { %583 = vst [vmem:[#allocation2 + $0x24] sm:$0x1] %v582_v24  ;;  %v532_v37 = vrot.slane %v530_v25, 7  ;;  %v2627_v38 = vor.u32 %v3125_v31, %v2626_v20  ;;  %v747_v39 = vld [vmem:[#allocation2 + $0x18] sm:$0xf]  ;;  %v1385_v61 = vrot.slane %v1383_v35, 5  ;;  %1160 = vmatpush.bf16.msrb.mxu3 %v3145_v50 }
  0xd5   : > { %v748_v42 = vld [vmem:[#allocation2 + $0x1c] sm:$0x1]  ;;  %v803_v44 = vshrl.u32 %v747_v39, 16  ;;  %v806_v32 = vshll.u32 %v747_v39, 16  ;;  %v796_v47 = vrot.slane %v795_v33, 4  ;;  %v1380_v48 = vor.u32 %v1379_v40, %v1376_v21  ;;  %v3197_v63 = vld [vmem:[%s3871_s4 + $0x1e8] sm:$0xff] }
  0xd6   : > { %v535_v45 = vor.u32 %v533_v26, %v532_v37  ;;  %v536_v46 = vrot.slane %v532_v37, 4  ;;  %717 = vmatmul.bf16.gmra.mxu1 %v2627_v38  ;;  %v812_v53 = vshll.u32 %v748_v42, 16  ;;  %v2794_v36 = vld [vmem:[#allocation2 + $0x18] sm:$0xf]  ;;  %v751_v62 = vld [vmem:[#allocation2 + $0x28] sm:$0xf]  ;;  %2179 = vmatpush.bf16.msra.mxu0 %v3197_v63 }
  0xd7   : > { %v805_v51 = vrot.slane %v803_v44, 4  ;;  %v808_v52 = vrot.slane %v806_v32, 5  ;;  %v1381_v2 = vrot.slane %v1380_v48, 4  ;;  %v1390_v3 = vrot.slane %v1388_v55, 4  ;;  %v3177_v4 = vld [vmem:[%s3871_s4 + $0x168] sm:$0xff]  ;;  %v3196_v18 = vld [vmem:[%s3871_s4 + $0x1e0] sm:$0xff] }
  0xd8   : > { %v603_v57 = vsel %vm3455_vm4, %v535_v45, %v602_v30  ;;  %v606_v58 = vsel %vm3460_vm5, %v536_v46, %v605_v41  ;;  %v1391_v5 = vshll.u32 %v3552_v27, 16  ;;  %v801_v8 = vsel %vm3487_vm8, %v796_v47, %v800_v60  ;;  %v1361_v22 = vld [vmem:[#allocation2 + $0x18] sm:$0xf]  ;;  %v752_v27 = vld [vmem:[#allocation2 + $0x2c] sm:$0x1]  ;;  %1161 = vmatpush.bf16.msrb.mxu3 %v3144_v1  ;;  %1766 = vmatpush.bf16.msra.mxu2 %v3177_v4  ;;  %v3176_v35 = vld [vmem:[%s3871_s4 + $0x160] sm:$0xff] }
  0xd9   : > { %604 = vst [vmem:[#allocation2 + $0x40] sm:$0xf] %v603_v57  ;;  %v809_v0 = vor.u32 %v808_v52, %v805_v51  ;;  %v814_v12 = vrot.slane %v812_v53, 5  ;;  %v1386_v14 = vsel %vm3487_vm8, %v1381_v2, %v1385_v61  ;;  %v1397_v16 = vshll.u32 %v1360_v54, 16  ;;  %v3191_v41 = vld [vmem:[%s3871_s4 + $0x1b8] sm:$0xff]  ;;  %v3194_v60 = vld [vmem:[%s3871_s4 + $0x1d0] sm:$0xff] }
  0xda   : > { %607 = vst [vmem:[#allocation2 + $0x44] sm:$0x1] %v606_v58  ;;  %v2630_v6 = vld [vmem:[#allocation2 + $0x20] sm:$0xf]  ;;  %v1393_v15 = vrot.slane %v1391_v5, 5  ;;  %v831_v21 = vshrl.u32 %v751_v62, 16  ;;  %v891_v23 = vunpack.c.l.b16 %v801_v8  ;;  %v1502_v29 = vunpack.c.l.b16 %v1386_v14  ;;  %2180 = vmatpush.bf16.msra.mxu0 %v3196_v18 }
  0xdb   : > { %v3153_v7 = vld [vmem:[#allocation2 + $0x1c] sm:$0xf0]  ;;  %v2631_v9 = vor.u32 %v3126_v59, %v2630_v6  ;;  %v810_v11 = vrot.slane %v809_v0, 4  ;;  %v750_v26 = vld [vmem:[#allocation2 + $0x24] sm:$0x1]  ;;  %v834_v33 = vshll.u32 %v751_v62, 16 }
  0xdc   : > { %v2795_v10 = vor.u32 %v3153_v7, %v2794_v36  ;;  %v749_v13 = vld [vmem:[#allocation2 + $0x20] sm:$0xf]  ;;  %v1394_v25 = vor.u32 %v1393_v15, %v1390_v3  ;;  %v833_v31 = vrot.slane %v831_v21, 4  ;;  %v1399_v39 = vrot.slane %v1397_v16, 5  ;;  %v3195_v46 = vld [vmem:[%s3871_s4 + $0x1d8] sm:$0xff]  ;;  %1767 = vmatpush.bf16.msra.mxu2 %v3176_v35  ;;  %v3190_v15 = vld [vmem:[%s3871_s4 + $0x1b0] sm:$0xff] }
  0xdd   : > { %v817_v17 = vshrl.u32 %v749_v13, 16  ;;  %722 = vmatmul.bf16.vlgmr.msra.gmra.mxu3 %v2631_v9  ;;  %v815_v19 = vsel %vm3487_vm8, %v810_v11, %v814_v12  ;;  %v820_v20 = vshll.u32 %v749_v13, 16  ;;  %v1363_v34 = vld [vmem:[#allocation2 + $0x20] sm:$0xf]  ;;  %v1402_v40 = vshrl.u32 %v1361_v22, 16  ;;  %v3175_v57 = vld [vmem:[%s3871_s4 + $0x158] sm:$0xff] }
  0xde   : > { %1317 = vmatmul.bf16.gmra.mxu0 %v2795_v10  ;;  %v892_v24 = vunpack.c.l.b16 %v815_v19  ;;  %v1395_v38 = vrot.slane %v1394_v25, 4  ;;  %v826_v44 = vshll.u32 %v750_v26, 16  ;;  %v836_v32 = vrot.slane %v834_v33, 5  ;;  %v1362_v49 = vld [vmem:[#allocation2 + $0x1c] sm:$0x1]  ;;  %1915 = vmatpush.bf16.msra.mxu3 %v3191_v41  ;;  %v3174_v12 = vld [vmem:[%s3871_s4 + $0x150] sm:$0xff] }
  0xdf   : > { %v819_v28 = vrot.slane %v817_v17, 4  ;;  %v822_v30 = vrot.slane %v820_v20, 5  ;;  %v1405_v45 = vshll.u32 %v1361_v22, 16  ;;  %v840_v48 = vshll.u32 %v752_v27, 16  ;;  %v1364_v55 = vld [vmem:[#allocation2 + $0x24] sm:$0x1]  ;;  %2181 = vmatpush.bf16.msra.mxu0 %v3195_v46 }
  0xe0   : > { %v898_v37 = vpack.c.b16 %v892_v24, %v891_v23  ;;  %v1400_v47 = vsel %vm3487_vm8, %v1395_v38, %v1399_v39  ;;  %v1404_v50 = vrot.slane %v1402_v40, 4  ;;  %v1416_v51 = vshrl.u32 %v1363_v34, 16  ;;  %v2798_v58 = vld [vmem:[#allocation2 + $0x28] sm:$0xf]  ;;  %v3127_v62 = vld [vmem:[#allocation2 + $0x34] sm:$0xf0]  ;;  %1768 = vmatpush.bf16.msra.mxu2 %v3175_v57 }
  0xe1   : > { %v823_v42 = vor.u32 %v822_v30, %v819_v28  ;;  %v1503_v52 = vunpack.c.l.b16 %v1400_v47  ;;  %v837_v54 = vor.u32 %v836_v32, %v833_v31  ;;  %v1407_v56 = vrot.slane %v1405_v45, 5  ;;  %v3154_v63 = vld [vmem:[#allocation2 + $0x2c] sm:$0xf0]  ;;  %v3610_v6 = vld [vmem:[#allocation2] sm:$0xe]  ;;  %v3193_v16 = vld [vmem:[%s3871_s4 + $0x1c8] sm:$0xff] }
  0xe2   : > { %966 = vmatmul.bf16.gmra.mxu2 %v898_v37  ;;  %v1418_v59 = vrot.slane %v1416_v51, 4  ;;  %v1419_v36 = vshll.u32 %v1363_v34, 16  ;;  %v828_v1 = vrot.slane %v826_v44, 5  ;;  %v1411_v0 = vshll.u32 %v1362_v49, 16  ;;  %v753_v7 = vld [vmem:[#allocation2 + $0x30] sm:$0xf]  ;;  %1916 = vmatpush.bf16.msra.mxu3 %v3190_v15 }
  0xe3   : > { %v824_v53 = vrot.slane %v823_v42, 4  ;;  %v1510_v61 = vpack.c.b16 %v1503_v52, %v1502_v29  ;;  %v838_v2 = vrot.slane %v837_v54, 4  ;;  %v842_v3 = vrot.slane %v840_v48, 5  ;;  %v2634_v8 = vld [vmem:[#allocation2 + $0x30] sm:$0xf]  ;;  %2182 = vmatpush.bf16.msra.mxu0 %v3194_v60  ;;  %v3207_v17 = vld [vmem:[%s3871_s4 + $0x238] sm:$0xff] }
  0xe4   : > { %v1421_v5 = vrot.slane %v1419_v36, 5  ;;  %v1425_v4 = vshll.u32 %v1364_v55, 16  ;;  %v1408_v10 = vor.u32 %v1407_v56, %v1404_v50  ;;  %v3614_v11 = vld [vmem:[#allocation2 + $0x4] sm:$0x1]  ;;  %v3619_v14 = vld [vmem:[#allocation2 + $0x8] sm:$0xe]  ;;  %v2635_v18 = vor.u32 %v3127_v62, %v2634_v8  ;;  %2375 = vmatpush.bf16.msra.mxu1 %v3207_v17  ;;  %1769 = vmatpush.bf16.msra.mxu2 %v3174_v12 }
  0xe5   : > { %v829_v9 = vsel %vm3487_vm8, %v824_v53, %v828_v1  ;;  %v2799_v19 = vor.u32 %v3154_v63, %v2798_v58  ;;  %v1413_v20 = vrot.slane %v1411_v0, 5  ;;  %v3630_v21 = vld [vmem:[#allocation2 + $0xc] sm:$0x1]  ;;  %v755_v22 = vld [vmem:[#allocation2 + $0x38] sm:$0xf]  ;;  %v845_v23 = vshrl.u32 %v753_v7, 16 }
  0xe6   : > { %1574 = vmatmul.bf16.vlgmr.msrb.gmra.mxu1 %v1510_v61  ;;  %v1422_v13 = vor.u32 %v1421_v5, %v1418_v59  ;;  %v843_v24 = vsel %vm3487_vm8, %v838_v2, %v842_v3  ;;  %v893_v25 = vunpack.c.l.b16 %v829_v9  ;;  %v1427_v27 = vrot.slane %v1425_v4, 5  ;;  %v754_v28 = vld [vmem:[#allocation2 + $0x34] sm:$0x1]  ;;  %v1365_v29 = vld [vmem:[#allocation2 + $0x28] sm:$0xf]  ;;  %v3192_v42 = vld [vmem:[%s3871_s4 + $0x1c0] sm:$0xff] }
  0xe7   : > { %v3206_v30 = vld [vmem:[%s3871_s4 + $0x230] sm:$0xff]  ;;  %v1409_v31 = vrot.slane %v1408_v10, 4  ;;  %v2716_v33 = vrot.slane %v3610_v6, 9  ;;  %v756_v34 = vld [vmem:[#allocation2 + $0x3c] sm:$0x1]  ;;  %v848_v35 = vshll.u32 %v753_v7, 16  ;;  %2183 = vmatpush.bf16.msra.mxu0 %v3193_v16  ;;  %v894_v44 = vunpack.c.l.b16 %v843_v24 }
  0xe8   : > { %v1423_v26 = vrot.slane %v1422_v13, 4  ;;  %v3173_v37 = vld [vmem:[%s3871_s4 + $0x148] sm:$0xff]  ;;  %v1043_v38 = vrot.slane %v3614_v11, 5  ;;  %v847_v39 = vrot.slane %v845_v23, 4  ;;  %v859_v40 = vshrl.u32 %v755_v22, 16  ;;  %2376 = vmatpush.bf16.msra.mxu1 %v3206_v30  ;;  %v3172_v57 = vld [vmem:[%s3871_s4 + $0x140] sm:$0xff] }
  0xe9   : > { %v862_v41 = vshll.u32 %v755_v22, 16  ;;  %v2717_v45 = vrot.slane %v3619_v14, 9  ;;  %v850_v46 = vrot.slane %v848_v35, 5  ;;  %v1367_v47 = vld [vmem:[#allocation2 + $0x30] sm:$0xf]  ;;  %v3189_v48 = vld [vmem:[%s3871_s4 + $0x1a8] sm:$0xff]  ;;  %v899_v53 = vpack.c.b16 %v894_v44, %v893_v25  ;;  %1770 = vmatpush.bf16.msra.mxu2 %v3173_v37 }
  0xea   : > { %v1428_v32 = vsel %vm3487_vm8, %v1423_v26, %v1427_v27  ;;  %v1047_v49 = vrot.slane %v3630_v21, 5  ;;  %v861_v50 = vrot.slane %v859_v40, 4  ;;  %v1430_v52 = vshrl.u32 %v1365_v29, 16  ;;  %1917 = vmatpush.bf16.msra.mxu3 %v3189_v48  ;;  %v3205_v58 = vld [vmem:[%s3871_s4 + $0x228] sm:$0xff]  ;;  %v1368_v0 = vld [vmem:[#allocation2 + $0x34] sm:$0x1] }
  0xeb   : > { %v864_v51 = vrot.slane %v862_v41, 5  ;;  %v1414_v54 = vsel %vm3487_vm8, %v1409_v31, %v1413_v20  ;;  %v854_v55 = vshll.u32 %v754_v28, 16  ;;  %v1433_v56 = vshll.u32 %v1365_v29, 16  ;;  %v1366_v62 = vld [vmem:[#allocation2 + $0x2c] sm:$0x1]  ;;  %2184 = vmatpush.bf16.msra.mxu0 %v3192_v42  ;;  %v3204_v12 = vld [vmem:[%s3871_s4 + $0x220] sm:$0xff] }
  0xec   : > { %v1505_v59 = vunpack.c.l.b16 %v1428_v32  ;;  %v851_v60 = vor.u32 %v850_v46, %v847_v39  ;;  %v868_v61 = vshll.u32 %v756_v34, 16  ;;  %v1444_v63 = vshrl.u32 %v1367_v47, 16  ;;  %2377 = vmatpush.bf16.msra.mxu1 %v3205_v58  ;;  %v1968_v11 = vld [vmem:[#allocation2 + $0x10] sm:$0xf]  ;;  %v2802_v17 = vld [vmem:[#allocation2 + $0x38] sm:$0xf] }
  0xed   : > { %727 = vmatmul.bf16.gmra.mxu3 %v2635_v18  ;;  %v865_v1 = vor.u32 %v864_v51, %v861_v50  ;;  %v1432_v2 = vrot.slane %v1430_v52, 4  ;;  %v1435_v3 = vrot.slane %v1433_v56, 5  ;;  %v1447_v5 = vshll.u32 %v1367_v47, 16  ;;  %1771 = vmatpush.bf16.msra.mxu2 %v3172_v57  ;;  %v3155_v22 = vld [vmem:[#allocation2 + $0x3c] sm:$0xf0]  ;;  %v3203_v30 = vld [vmem:[%s3871_s4 + $0x218] sm:$0xff] }
  0xee   : > { %1322 = vmatmul.bf16.gmra.mxu0 %v2799_v19  ;;  %v1504_v4 = vunpack.c.l.b16 %v1414_v54  ;;  %v1446_v6 = vrot.slane %v1444_v63, 4  ;;  %v1044_v7 = vsel %vm3662_vm11, %v2716_v33, %v1043_v38  ;;  %v1048_v8 = vsel %vm3662_vm11, %v2717_v45, %v1047_v49  ;;  %v1970_v23 = vld [vmem:[#allocation2 + $0x18] sm:$0xf]  ;;  %v1010_v28 = vld [vmem:[#allocation2 + $0x10] sm:$0xe]  ;;  %v3188_v29 = vld [vmem:[%s3871_s4 + $0x1a0] sm:$0xff] }
  0xef   : > { %v856_v9 = vrot.slane %v854_v55, 5  ;;  %v1449_v10 = vrot.slane %v1447_v5, 5  ;;  %v852_v14 = vrot.slane %v851_v60, 4  ;;  %v1439_v15 = vshll.u32 %v1366_v62, 16  ;;  %v1011_v35 = vld [vmem:[#allocation2 + $0x14] sm:$0x1]  ;;  %1918 = vmatpush.bf16.msra.mxu3 %v3188_v29 }
  0xf0   : > { %v1511_v13 = vpack.c.b16 %v1505_v59, %v1504_v4  ;;  %v1453_v16 = vshll.u32 %v1368_v0, 16  ;;  %v866_v18 = vrot.slane %v865_v1, 4  ;;  %v870_v19 = vrot.slane %v868_v61, 5  ;;  %2378 = vmatpush.bf16.msra.mxu1 %v3204_v12  ;;  %v1012_v37 = vld [vmem:[#allocation2 + $0x18] sm:$0xe]  ;;  %v3202_v48 = vld [vmem:[%s3871_s4 + $0x210] sm:$0xff] }
  0xf1   : > { %v1436_v20 = vor.u32 %v1435_v3, %v1432_v2  ;;  %v1450_v21 = vor.u32 %v1449_v10, %v1446_v6  ;;  %v1985_v24 = vshrl.u32 %v1968_v11, 16  ;;  %v1988_v25 = vshll.u32 %v1968_v11, 16  ;;  %v1013_v41 = vld [vmem:[#allocation2 + $0x1c] sm:$0x1]  ;;  %v1369_v47 = vld [vmem:[#allocation2 + $0x38] sm:$0xf] }
  0xf2   : > { %971 = vmatmul.bf16.gmra.mxu2 %v899_v53  ;;  %v1090_v26 = vunpack.c.l.b16 %v1044_v7  ;;  %v1091_v27 = vunpack.c.l.b16 %v1048_v8  ;;  %v857_v31 = vsel %vm3487_vm8, %v852_v14, %v856_v9  ;;  %v1441_v33 = vrot.slane %v1439_v15, 5  ;;  %v1969_v52 = vld [vmem:[#allocation2 + $0x14] sm:$0x1]  ;;  %v1971_v53 = vld [vmem:[#allocation2 + $0x1c] sm:$0x1]  ;;  %v3201_v6 = vld [vmem:[%s3871_s4 + $0x208] sm:$0xff] }
  0xf3   : > { %v1455_v34 = vrot.slane %v1453_v16, 5  ;;  %v871_v38 = vsel %vm3487_vm8, %v866_v18, %v870_v19  ;;  %v1437_v39 = vrot.slane %v1436_v20, 4  ;;  %v1451_v40 = vrot.slane %v1450_v21, 4  ;;  %v1371_v59 = vld [vmem:[#allocation2 + $0x40] sm:$0xf]  ;;  %v3187_v1 = vld [vmem:[%s3871_s4 + $0x198] sm:$0xff] }
  0xf4   : > { %v1999_v42 = vshrl.u32 %v1970_v23, 16  ;;  %v2803_v44 = vor.u32 %v3155_v22, %v2802_v17  ;;  %v1987_v32 = vrot.slane %v1985_v24, 4  ;;  %v1990_v45 = vrot.slane %v1988_v25, 5  ;;  %2379 = vmatpush.bf16.msra.mxu1 %v3203_v30  ;;  %v1619_v5 = vld [vmem:[#allocation2 + $0x8] sm:$0xe]  ;;  %1919 = vmatpush.bf16.msra.mxu3 %v3187_v1 }
  0xf5   : > { %v2002_v46 = vshll.u32 %v1970_v23, 16  ;;  %v1098_v49 = vpack.c.b16 %v1091_v27, %v1090_v26  ;;  %v895_v50 = vunpack.c.l.b16 %v857_v31  ;;  %v2718_v51 = vrot.slane %v1010_v28, 9  ;;  %v1620_v8 = vld [vmem:[#allocation2 + $0xc] sm:$0x1]  ;;  %v1621_v9 = vld [vmem:[#allocation2 + $0x10] sm:$0xe] }
  0xf6   : > { %1579 = vmatmul.bf16.gmra.mxu1 %v1511_v13  ;;  %v2001_v54 = vrot.slane %v1999_v42, 4  ;;  %v896_v55 = vunpack.c.l.b16 %v871_v38  ;;  %v1051_v56 = vrot.slane %v1011_v35, 5  ;;  %v2719_v57 = vrot.slane %v1012_v37, 9  ;;  %v1622_v15 = vld [vmem:[#allocation2 + $0x14] sm:$0x1]  ;;  %v3200_v26 = vld [vmem:[%s3871_s4 + $0x200] sm:$0xff] }
  0xf7   : > { %v2004_v58 = vrot.slane %v2002_v46, 5  ;;  %v1442_v60 = vsel %vm3487_vm8, %v1437_v39, %v1441_v33  ;;  %v1456_v61 = vsel %vm3487_vm8, %v1451_v40, %v1455_v34  ;;  %v1055_v62 = vrot.slane %v1013_v41, 5  ;;  %v1370_v16 = vld [vmem:[#allocation2 + $0x3c] sm:$0x1]  ;;  %v1972_v21 = vld [vmem:[#allocation2 + $0x20] sm:$0xf] }
  0xf8   : > { %v1458_v63 = vshrl.u32 %v1369_v47, 16  ;;  %v1991_v0 = vor.u32 %v1990_v45, %v1987_v32  ;;  %v2008_v3 = vshll.u32 %v1971_v53, 16  ;;  %v1461_v4 = vshll.u32 %v1369_v47, 16  ;;  %2380 = vmatpush.bf16.msra.mxu1 %v3202_v48  ;;  %v3186_v27 = vld [vmem:[%s3871_s4 + $0x190] sm:$0xff]  ;;  %v1372_v31 = vld [vmem:[#allocation2 + $0x44] sm:$0x1] }
  0xf9   : > { %v2005_v2 = vor.u32 %v2004_v58, %v2001_v54  ;;  %v1994_v7 = vshll.u32 %v1969_v52, 16  ;;  %v1472_v10 = vshrl.u32 %v1371_v59, 16  ;;  %v900_v11 = vpack.c.b16 %v896_v55, %v895_v50  ;;  %1920 = vmatpush.bf16.msra.mxu3 %v3186_v27  ;;  %v1974_v42 = vld [vmem:[#allocation2 + $0x28] sm:$0xf]  ;;  %v1626_v27 = vld [vmem:[#allocation2 + $0x24] sm:$0x1] }
  0xfa   : > { %v1506_v12 = vunpack.c.l.b16 %v1442_v60  ;;  %v1507_v13 = vunpack.c.l.b16 %v1456_v61  ;;  %v1052_v17 = vsel %vm3662_vm11, %v2718_v51, %v1051_v56  ;;  %v1460_v18 = vrot.slane %v1458_v63, 4  ;;  %v2958_v43 = vld [vmem:[#allocation2 + $0x10] sm:$0xf] }
  0xfb   : > { %v2006_v14 = vrot.slane %v2005_v2, 4  ;;  %v1463_v19 = vrot.slane %v1461_v4, 5  ;;  %v1475_v20 = vshll.u32 %v1371_v59, 16  ;;  %v1056_v22 = vsel %vm3662_vm11, %v2719_v57, %v1055_v62  ;;  %v1973_v2 = vld [vmem:[#allocation2 + $0x24] sm:$0x1] }
  0xfc   : > { %v1992_v23 = vrot.slane %v1991_v0, 4  ;;  %v2010_v24 = vrot.slane %v2008_v3, 5  ;;  %v1474_v25 = vrot.slane %v1472_v10, 4  ;;  %2381 = vmatpush.bf16.msra.mxu1 %v3201_v6  ;;  %v1996_v28 = vrot.slane %v1994_v7, 5  ;;  %v1014_v0 = vld [vmem:[#allocation2 + $0x20] sm:$0xe] }
  0xfd   : > { %1162 = vmatmul.bf16.vlgmr.msrb.gmra.mxu3 %v1098_v49  ;;  %v2884_v29 = vrot.slane %v1619_v5, 9  ;;  %v1653_v30 = vrot.slane %v1620_v8, 5  ;;  %v1477_v33 = vrot.slane %v1475_v20, 5  ;;  %v1512_v34 = vpack.c.b16 %v1507_v13, %v1506_v12  ;;  %v1975_v3 = vld [vmem:[#allocation2 + $0x2c] sm:$0x1] }
  0xfe   : > { %1327 = vmatmul.bf16.gmra.mxu0 %v2803_v44  ;;  %v2011_v35 = vsel %vm3487_vm8, %v2006_v14, %v2010_v24  ;;  %v2885_v37 = vrot.slane %v1621_v9, 9  ;;  %v2013_v38 = vshrl.u32 %v1972_v21, 16  ;;  %v1657_v39 = vrot.slane %v1622_v15, 5  ;;  %v1015_v4 = vld [vmem:[#allocation2 + $0x24] sm:$0x1] }
  0xff   : > { %v1464_v40 = vor.u32 %v1463_v19, %v1460_v18  ;;  %v1467_v41 = vshll.u32 %v1370_v16, 16  ;;  %v2016_v44 = vshll.u32 %v1972_v21, 16  ;;  %v1997_v32 = vsel %vm3487_vm8, %v1992_v23, %v1996_v28  ;;  %v1016_v6 = vld [vmem:[#allocation2 + $0x28] sm:$0xe]  ;;  %v1017_v7 = vld [vmem:[#allocation2 + $0x2c] sm:$0x1] }
 0x100   : > { %v1478_v45 = vor.u32 %v1477_v33, %v1474_v25  ;;  %v1481_v46 = vshll.u32 %v1372_v31, 16  ;;  %2382 = vmatpush.bf16.msra.mxu1 %v3200_v26  ;;  %v1092_v47 = vunpack.c.l.b16 %v1052_v17  ;;  %v1093_v48 = vunpack.c.l.b16 %v1056_v22  ;;  %v1623_v22 = vld [vmem:[#allocation2 + $0x18] sm:$0xe]  ;;  %v1624_v25 = vld [vmem:[#allocation2 + $0x1c] sm:$0x1]  ;;  %v3184_v33 = vld [vmem:[%s3871_s4 + $0x180] sm:$0xff] }
 0x101   : > { %v2114_v49 = vunpack.c.l.b16 %v2011_v35  ;;  %v1654_v50 = vsel %vm3662_vm11, %v2884_v29, %v1653_v30  ;;  %v2015_v51 = vrot.slane %v2013_v38, 4  ;;  %v2018_v52 = vrot.slane %v2016_v44, 5  ;;  %v1625_v26 = vld [vmem:[#allocation2 + $0x20] sm:$0xe]  ;;  %v1978_v31 = vld [vmem:[#allocation2 + $0x38] sm:$0xf] }
 0x102   : > { %976 = vmatmul.bf16.gmra.mxu2 %v900_v11  ;;  %v2027_v53 = vshrl.u32 %v1974_v42, 16  ;;  %v2030_v54 = vshll.u32 %v1974_v42, 16  ;;  %v2113_v55 = vunpack.c.l.b16 %v1997_v32  ;;  %v1658_v56 = vsel %vm3662_vm11, %v2885_v37, %v1657_v39  ;;  %v3185_v11 = vld [vmem:[%s3871_s4 + $0x188] sm:$0xff]  ;;  %v1976_v37 = vld [vmem:[#allocation2 + $0x30] sm:$0xf] }
 0x103   : > { %v1465_v57 = vrot.slane %v1464_v40, 4  ;;  %v1469_v58 = vrot.slane %v1467_v41, 5  ;;  %v1479_v59 = vrot.slane %v1478_v45, 4  ;;  %v1483_v60 = vrot.slane %v1481_v46, 5  ;;  %1921 = vmatpush.bf16.msra.mxu3 %v3185_v11  ;;  %v2230_v32 = vld [vmem:[#allocation2 + $0x10] sm:$0xe] }
 0x104   : > { %v2029_v61 = vrot.slane %v2027_v53, 4  ;;  %v2032_v62 = vrot.slane %v2030_v54, 5  ;;  %v1099_v63 = vpack.c.b16 %v1093_v48, %v1092_v47  ;;  %v2121_v1 = vpack.c.b16 %v2114_v49, %v2113_v55  ;;  %v2231_v48 = vld [vmem:[#allocation2 + $0x14] sm:$0x1]  ;;  %v2232_v53 = vld [vmem:[#allocation2 + $0x18] sm:$0xe] }
 0x105   : > { %v1701_v5 = vunpack.c.l.b16 %v1658_v56  ;;  %v2019_v8 = vor.u32 %v2018_v52, %v2015_v51  ;;  %v1700_v9 = vunpack.c.l.b16 %v1654_v50  ;;  %v1470_v10 = vsel %vm3487_vm8, %v1465_v57, %v1469_v58  ;;  %v2233_v54 = vld [vmem:[#allocation2 + $0x1c] sm:$0x1] }
 0x106   : > { %1584 = vmatmul.bf16.gmra.mxu1 %v1512_v34  ;;  %v1484_v12 = vsel %vm3487_vm8, %v1479_v59, %v1483_v60  ;;  %v2022_v13 = vshll.u32 %v1973_v2, 16  ;;  %v2033_v14 = vor.u32 %v2032_v62, %v2029_v61  ;;  %v2036_v15 = vshll.u32 %v1975_v3, 16  ;;  %v1019_v3 = vld [vmem:[#allocation2 + $0x34] sm:$0x1]  ;;  %v1021_v11 = vld [vmem:[#allocation2 + $0x3c] sm:$0x1] }
 0x107   : > { %v2720_v16 = vrot.slane %v1014_v0, 9  ;;  %v1059_v17 = vrot.slane %v1015_v4, 5  ;;  %v2721_v18 = vrot.slane %v1016_v6, 9  ;;  %v1063_v19 = vrot.slane %v1017_v7, 5  ;;  %1922 = vmatpush.bf16.msra.mxu3 %v3184_v33 }
 0x108   : > { %v1708_v20 = vpack.c.b16 %v1701_v5, %v1700_v9  ;;  %v2020_v21 = vrot.slane %v2019_v8, 4  ;;  %v1508_v23 = vunpack.c.l.b16 %v1470_v10  ;;  %v1509_v24 = vunpack.c.l.b16 %v1484_v12  ;;  %v1977_v8 = vld [vmem:[#allocation2 + $0x34] sm:$0x1]  ;;  %v1020_v10 = vld [vmem:[#allocation2 + $0x38] sm:$0xe] }
 0x109   : > { %v2024_v28 = vrot.slane %v2022_v13, 5  ;;  %v2034_v29 = vrot.slane %v2033_v14, 4  ;;  %v2038_v30 = vrot.slane %v2036_v15, 5  ;;  %v1060_v34 = vsel %vm3662_vm11, %v2720_v16, %v1059_v17 }
 0x10a   : > { %v1064_v35 = vsel %vm3662_vm11, %v2721_v18, %v1063_v19  ;;  %v2886_v39 = vrot.slane %v1623_v22, 9  ;;  %v1661_v40 = vrot.slane %v1624_v25, 5  ;;  %v2887_v41 = vrot.slane %v1625_v26, 9  ;;  %v1629_v25 = vld [vmem:[#allocation2 + $0x30] sm:$0xe] }
 0x10b   : > { %v2025_v38 = vsel %vm3487_vm8, %v2020_v21, %v2024_v28  ;;  %v1513_v42 = vpack.c.b16 %v1509_v24, %v1508_v23  ;;  %v1665_v44 = vrot.slane %v1626_v27, 5  ;;  %v2055_v45 = vshrl.u32 %v1978_v31, 16  ;;  %v1627_v21 = vld [vmem:[#allocation2 + $0x28] sm:$0xe]  ;;  %v1628_v24 = vld [vmem:[#allocation2 + $0x2c] sm:$0x1] }
 0x10c   : > { %v2058_v46 = vshll.u32 %v1978_v31, 16  ;;  %v2039_v47 = vsel %vm3487_vm8, %v2034_v29, %v2038_v30  ;;  %v2041_v49 = vshrl.u32 %v1976_v37, 16  ;;  %v2044_v50 = vshll.u32 %v1976_v37, 16  ;;  %v1630_v29 = vld [vmem:[#allocation2 + $0x34] sm:$0x1] }
 0x10d   : > { %1167 = vmatmul.bf16.gmra.mxu3 %v1099_v63  ;;  %v1094_v51 = vunpack.c.l.b16 %v1060_v34  ;;  %v2115_v52 = vunpack.c.l.b16 %v2025_v38  ;;  %v1095_v55 = vunpack.c.l.b16 %v1064_v35  ;;  %v3052_v56 = vrot.slane %v2230_v32, 9  ;;  %v1018_v63 = vld [vmem:[#allocation2 + $0x30] sm:$0xe]  ;;  %v1980_v30 = vld [vmem:[#allocation2 + $0x40] sm:$0xf] }
 0x10e   : > { %2185 = vmatmul.bf16.vlgmr.msra.gmra.mxu0 %v2121_v1  ;;  %v2057_v57 = vrot.slane %v2055_v45, 4  ;;  %v2060_v58 = vrot.slane %v2058_v46, 5  ;;  %v2116_v59 = vunpack.c.l.b16 %v2039_v47  ;;  %v1662_v60 = vsel %vm3662_vm11, %v2886_v39, %v1661_v40  ;;  %v1979_v1 = vld [vmem:[#allocation2 + $0x3c] sm:$0x1]  ;;  %v1982_v35 = vld [vmem:[#allocation2 + $0x48] sm:$0xf] }
 0x10f   : > { %v1666_v61 = vsel %vm3662_vm11, %v2887_v41, %v1665_v44  ;;  %v2264_v62 = vrot.slane %v2231_v48, 5  ;;  %v3053_v0 = vrot.slane %v2232_v53, 9  ;;  %v2268_v2 = vrot.slane %v2233_v54, 5  ;;  %v2234_v32 = vld [vmem:[#allocation2 + $0x20] sm:$0xe] }
 0x110   : > { %v2043_v5 = vrot.slane %v2041_v49, 4  ;;  %v2046_v4 = vrot.slane %v2044_v50, 5  ;;  %v1100_v6 = vpack.c.b16 %v1095_v55, %v1094_v51  ;;  %v2122_v7 = vpack.c.b16 %v2116_v59, %v2115_v52  ;;  %v2235_v47 = vld [vmem:[#allocation2 + $0x24] sm:$0x1] }
 0x111   : > { %v1703_v9 = vunpack.c.l.b16 %v1666_v61  ;;  %v2061_v12 = vor.u32 %v2060_v58, %v2057_v57  ;;  %v2064_v13 = vshll.u32 %v1979_v1, 16  ;;  %v1702_v14 = vunpack.c.l.b16 %v1662_v60  ;;  %v2236_v58 = vld [vmem:[#allocation2 + $0x28] sm:$0xe]  ;;  %v2237_v61 = vld [vmem:[#allocation2 + $0x2c] sm:$0x1] }
 0x112   : > { %1772 = vmatmul.bf16.vlgmr.msra.gmra.mxu2 %v1708_v20  ;;  %v2722_v15 = vrot.slane %v1018_v63, 9  ;;  %v1067_v16 = vrot.slane %v1019_v3, 5  ;;  %v2265_v17 = vsel %vm3662_vm11, %v3052_v56, %v2264_v62  ;;  %v2269_v18 = vsel %vm3662_vm11, %v3053_v0, %v2268_v2  ;;  %v1981_v3 = vld [vmem:[#allocation2 + $0x44] sm:$0x1] }
 0x113   : > { %v2047_v19 = vor.u32 %v2046_v4, %v2043_v5  ;;  %v2050_v20 = vshll.u32 %v1977_v8, 16  ;;  %v2723_v22 = vrot.slane %v1020_v10, 9  ;;  %v1071_v23 = vrot.slane %v1021_v11, 5  ;;  %v1983_v5 = vld [vmem:[#allocation2 + $0x4c] sm:$0x1] }
 0x114   : > { %v1709_v26 = vpack.c.b16 %v1703_v9, %v1702_v14  ;;  %v2062_v27 = vrot.slane %v2061_v12, 4  ;;  %v2066_v28 = vrot.slane %v2064_v13, 5  ;;  %v2311_v31 = vunpack.c.l.b16 %v2265_v17 }
 0x115   : > { %v2312_v33 = vunpack.c.l.b16 %v2269_v18  ;;  %v1068_v34 = vsel %vm3662_vm11, %v2722_v15, %v1067_v16  ;;  %v2048_v37 = vrot.slane %v2047_v19, 4  ;;  %v2052_v38 = vrot.slane %v2050_v20, 5 }
 0x116   : > { %1589 = vmatmul.bf16.gmra.mxu1 %v1513_v42  ;;  %v2888_v39 = vrot.slane %v1627_v21, 9  ;;  %v1669_v40 = vrot.slane %v1628_v24, 5  ;;  %v1072_v41 = vsel %vm3662_vm11, %v2723_v22, %v1071_v23  ;;  %v2889_v42 = vrot.slane %v1629_v25, 9  ;;  %v1631_v23 = vld [vmem:[#allocation2 + $0x38] sm:$0xe] }
 0x117   : > { %v1673_v44 = vrot.slane %v1630_v29, 5  ;;  %v2069_v45 = vshrl.u32 %v1980_v30, 16  ;;  %v2067_v46 = vsel %vm3487_vm8, %v2062_v27, %v2066_v28  ;;  %v2072_v48 = vshll.u32 %v1980_v30, 16  ;;  %v1632_v25 = vld [vmem:[#allocation2 + $0x3c] sm:$0x1] }
 0x118   : > { %v2083_v49 = vshrl.u32 %v1982_v35, 16  ;;  %v2086_v50 = vshll.u32 %v1982_v35, 16  ;;  %v2319_v51 = vpack.c.b16 %v2312_v33, %v2311_v31  ;;  %v1096_v52 = vunpack.c.l.b16 %v1068_v34  ;;  %v1634_v27 = vld [vmem:[#allocation2 + $0x44] sm:$0x1] }
 0x119   : > { %v1097_v53 = vunpack.c.l.b16 %v1072_v41  ;;  %v2053_v54 = vsel %vm3487_vm8, %v2048_v37, %v2052_v38  ;;  %v1670_v55 = vsel %vm3662_vm11, %v2888_v39, %v1669_v40  ;;  %v2118_v56 = vunpack.c.l.b16 %v2067_v46  ;;  %v2240_v39 = vld [vmem:[#allocation2 + $0x38] sm:$0xe]  ;;  %v2241_v40 = vld [vmem:[#allocation2 + $0x3c] sm:$0x1] }
 0x11a   : > { %v1674_v57 = vsel %vm3662_vm11, %v2889_v42, %v1673_v44  ;;  %v3054_v59 = vrot.slane %v2234_v32, 9  ;;  %v2272_v60 = vrot.slane %v2235_v47, 5  ;;  %v2071_v62 = vrot.slane %v2069_v45, 4  ;;  %v3180_v41 = vld [vmem:[#allocation2 + $0x14] sm:$0xf0] }
 0x11b   : > { %v2074_v63 = vrot.slane %v2072_v48, 5  ;;  %v2085_v1 = vrot.slane %v2083_v49, 4  ;;  %v2088_v0 = vrot.slane %v2086_v50, 5  ;;  %v2117_v2 = vunpack.c.l.b16 %v2053_v54  ;;  %v2238_v32 = vld [vmem:[#allocation2 + $0x30] sm:$0xe] }
 0x11c   : > { %v1101_v4 = vpack.c.b16 %v1097_v53, %v1096_v52  ;;  %v1705_v9 = vunpack.c.l.b16 %v1674_v57  ;;  %v2273_v10 = vsel %vm3662_vm11, %v3054_v59, %v2272_v60  ;;  %v2276_v11 = vrot.slane %v2237_v61, 5  ;;  %v2239_v45 = vld [vmem:[#allocation2 + $0x34] sm:$0x1]  ;;  %v2242_v61 = vld [vmem:[#allocation2 + $0x40] sm:$0xe] }
 0x11d   : > { %1172 = vmatmul.bf16.gmra.mxu3 %v1100_v6  ;;  %v1704_v6 = vunpack.c.l.b16 %v1670_v55  ;;  %v2123_v8 = vpack.c.b16 %v2118_v56, %v2117_v2  ;;  %v2075_v12 = vor.u32 %v2074_v63, %v2071_v62  ;;  %v2078_v13 = vshll.u32 %v1981_v3, 16  ;;  %v2243_v62 = vld [vmem:[#allocation2 + $0x44] sm:$0x1]  ;;  %v2244_v63 = vld [vmem:[#allocation2 + $0x48] sm:$0xe] }
 0x11e   : > { %2190 = vmatmul.bf16.gmra.mxu0 %v2122_v7  ;;  %v3055_v7 = vrot.slane %v2236_v58, 9  ;;  %v2089_v14 = vor.u32 %v2088_v0, %v2085_v1  ;;  %v2092_v15 = vshll.u32 %v1983_v5, 16  ;;  %v2313_v18 = vunpack.c.l.b16 %v2273_v10  ;;  %v2245_v1 = vld [vmem:[#allocation2 + $0x4c] sm:$0x1]  ;;  %v2962_v0 = vld [vmem:[#allocation2 + $0x20] sm:$0xf] }
 0x11f   : > { %v1710_v16 = vpack.c.b16 %v1705_v9, %v1704_v6  ;;  %v2076_v19 = vrot.slane %v2075_v12, 4  ;;  %v2080_v20 = vrot.slane %v2078_v13, 5  ;;  %v2890_v31 = vrot.slane %v1631_v23, 9  ;;  %v3181_v3 = vld [vmem:[#allocation2 + $0x24] sm:$0xf0] }
 0x120   : > { %v2277_v17 = vsel %vm3662_vm11, %v3055_v7, %v2276_v11  ;;  %v2090_v21 = vrot.slane %v2089_v14, 4  ;;  %v2094_v22 = vrot.slane %v2092_v15, 5  ;;  %v1677_v33 = vrot.slane %v1632_v25, 5 }
 0x121   : > { %v2314_v24 = vunpack.c.l.b16 %v2277_v17  ;;  %v2081_v29 = vsel %vm3487_vm8, %v2076_v19, %v2080_v20  ;;  %v1681_v35 = vrot.slane %v1634_v27, 5  ;;  %v3057_v46 = vrot.slane %v2240_v39, 9  ;;  %v3182_v17 = vld [vmem:[#allocation2 + $0x34] sm:$0xf0]  ;;  %v2970_v27 = vld [vmem:[#allocation2 + $0x40] sm:$0xf] }
 0x122   : > { %1777 = vmatmul.bf16.gmra.mxu2 %v1709_v26  ;;  %v1633_v26 = vld [vmem:[#allocation2 + $0x40] sm:$0xe]  ;;  %v2095_v30 = vsel %vm3487_vm8, %v2090_v21, %v2094_v22  ;;  %v2119_v37 = vunpack.c.l.b16 %v2081_v29  ;;  %v1678_v42 = vsel %vm3662_vm11, %v2890_v31, %v1677_v33  ;;  %v2284_v47 = vrot.slane %v2241_v40, 5 }
 0x123   : > { %v2320_v28 = vpack.c.b16 %v2314_v24, %v2313_v18  ;;  %v2891_v34 = vrot.slane %v1633_v26, 9  ;;  %v2120_v38 = vunpack.c.l.b16 %v2095_v30  ;;  %v2959_v48 = vor.u32 %v3180_v41, %v2958_v43  ;;  %v2966_v18 = vld [vmem:[#allocation2 + $0x30] sm:$0xf] }
 0x124   : > { %v1706_v50 = vunpack.c.l.b16 %v1678_v42  ;;  %v3056_v52 = vrot.slane %v2238_v32, 9  ;;  %v2280_v53 = vrot.slane %v2239_v45, 5  ;;  %v2285_v54 = vsel %vm3662_vm11, %v3057_v46, %v2284_v47 }
 0x125   : > { %v1682_v44 = vsel %vm3662_vm11, %v2891_v34, %v1681_v35  ;;  %v2124_v49 = vpack.c.b16 %v2120_v38, %v2119_v37  ;;  %v2316_v57 = vunpack.c.l.b16 %v2285_v54  ;;  %v3058_v5 = vrot.slane %v2242_v61, 9 }
 0x126   : > { %2383 = vmatmul.bf16.vlgmr.msra.gmra.mxu1 %v2319_v51  ;;  %v1707_v51 = vunpack.c.l.b16 %v1682_v44  ;;  %v2281_v56 = vsel %vm3662_vm11, %v3056_v52, %v2280_v53  ;;  %v3059_v6 = vrot.slane %v2244_v63, 9  ;;  %v2292_v7 = vrot.slane %v2245_v1, 5 }
 0x127   : > { %v2315_v59 = vunpack.c.l.b16 %v2281_v56  ;;  %v2967_v19 = vor.u32 %v3182_v17, %v2966_v18 }
 0x128   : > { %v1711_v55 = vpack.c.b16 %v1707_v51, %v1706_v50  ;;  %v2293_v10 = vsel %vm3662_vm11, %v3059_v6, %v2292_v7 }
 0x129   : > { %v2321_v60 = vpack.c.b16 %v2316_v57, %v2315_v59  ;;  %v2318_v12 = vunpack.c.l.b16 %v2293_v10 }
 0x12d   : > { %1177 = vmatmul.bf16.gmra.mxu3 %v1101_v4  ;;  %v2288_v4 = vrot.slane %v2243_v62, 5 }
 0x12e   : > { %2195 = vmatmul.bf16.gmra.mxu0 %v2123_v8  ;;  %v2963_v8 = vor.u32 %v3181_v3, %v2962_v0 }
 0x12f   : > { %v2289_v9 = vsel %vm3662_vm11, %v3058_v5, %v2288_v4 }
 0x130   : > { %v2317_v11 = vunpack.c.l.b16 %v2289_v9 }
 0x132   : > { %1782 = vmatmul.bf16.gmra.mxu2 %v1710_v16  ;;  %v2322_v16 = vpack.c.b16 %v2318_v12, %v2317_v11 }
 0x136   : > { %2388 = vmatmul.bf16.gmra.mxu1 %v2320_v28  ;;  %v3183_v28 = vld [vmem:[#allocation2 + $0x44] sm:$0xf0] }
 0x137   : > { %v2971_v29 = vor.u32 %v3183_v28, %v2970_v27  ;;  %v3810_v27 = vld [vmem:[%s3872_s5] ss:$0 sm:$0xff] }
 0x13d   : > { %1923 = vmatmul.bf16.vlgmr.msra.gmra.mxu3 %v2959_v48 }
 0x13e   : > { %2200 = vmatmul.bf16.gmra.mxu0 %v2124_v49 }
 0x142   : > { %1787 = vmatmul.bf16.gmra.mxu2 %v1711_v55  ;;  %v713_v58 = vpop.f32.mrf.mxu1 }
 0x146   : > { %2393 = vmatmul.bf16.gmra.mxu1 %v2321_v60 }
 0x14a   : > { %v3768_v2 = vpop.f32.mrf.mxu1  ;;  %v1313_v23 = vpop.f32.mrf.mxu0 }
 0x14d   : > { %1928 = vmatmul.bf16.gmra.mxu3 %v2963_v8 }
 0x152   : > { %v1315_v31 = vpop.f32.mrf.mxu0 }
 0x153   : > { %v718_v13 = vpop.f32.mrf.mxu1 }
 0x154   : > { %v962_v14 = vpop.f32.mrf.mxu2 }
 0x155   : > { %v990_v15 = vadd.f32 %v962_v14, %v713_v58 }
 0x156   : > { %2398 = vmatmul.bf16.gmra.mxu1 %v2322_v16 }
 0x15b   : > { %v3774_v20 = vpop.f32.mrf.mxu1  ;;  %v1318_v38 = vpop.f32.mrf.mxu0 }
 0x15c   : > { %v964_v21 = vpop.f32.mrf.mxu2 }
 0x15d   : > { %1933 = vmatmul.bf16.gmra.mxu3 %v2967_v19 }
 0x160   : > { %v723_v22 = vpop.f32.mrf.mxu3 }
 0x163   : > { %v1575_v25 = vpop.f32.mrf.mxu1  ;;  %v3784_v32 = vpop.f32.mrf.mxu0 }
 0x165   : > { %v967_v24 = vpop.f32.mrf.mxu2 }
 0x166   : > { %v992_v36 = vadd.f32 %v967_v24, %v718_v13 }
 0x168   : > { %v3776_v26 = vpop.f32.mrf.mxu3 }
 0x16b   : > { %v1577_v33 = vpop.f32.mrf.mxu1  ;;  %v1323_v50 = vpop.f32.mrf.mxu0 }
 0x16d   : > { %v3778_v30 = vpop.f32.mrf.mxu2  ;;  %1938 = vmatmul.bf16.gmra.mxu3 %v2971_v29 }
 0x170   : > { %v728_v34 = vpop.f32.mrf.mxu3 }
 0x173   : > { %v1580_v40 = vpop.f32.mrf.mxu1  ;;  %v3788_v56 = vpop.f32.mrf.mxu0 }
 0x175   : > { %v972_v35 = vpop.f32.mrf.mxu2 }
 0x176   : > { %v994_v37 = vadd.f32 %v972_v35, %v723_v22 }
 0x178   : > { %v3780_v39 = vpop.f32.mrf.mxu3 }
 0x17b   : > { %v3786_v43 = vpop.f32.mrf.mxu1  ;;  %v1328_v59 = vpop.f32.mrf.mxu0 }
 0x17d   : > { %v3782_v41 = vpop.f32.mrf.mxu2 }
 0x180   : > { %v1163_v42 = vpop.f32.mrf.mxu3 }
 0x181   : > { %v1191_v44 = vadd.f32 %v1163_v42, %v990_v15  ;;  %v991_v15 = vadd.f32 %v964_v21, %v3768_v2  ;;  %v3816_v21 = vld [vmem:[%s3873_s6] ss:$0 sm:$0xff] }
 0x183   : > { %v1341_v45 = vadd.f32 %v1313_v23, %v1191_v44  ;;  %v1585_v51 = vpop.f32.mrf.mxu1  ;;  %v3798_v5 = vpop.f32.mrf.mxu0 }
 0x185   : > { %v977_v46 = vpop.f32.mrf.mxu2  ;;  %v1603_v47 = vadd.f32 %v1575_v25, %v1341_v45 }
 0x186   : > { %v996_v48 = vadd.f32 %v977_v46, %v728_v34 }
 0x188   : > { %v1165_v49 = vpop.f32.mrf.mxu3 }
 0x189   : > { %v1192_v16 = vadd.f32 %v1165_v49, %v991_v15 }
 0x18b   : > { %v3790_v57 = vpop.f32.mrf.mxu1  ;;  %v2186_v10 = vpop.f32.mrf.mxu0  ;;  %v1342_v23 = vadd.f32 %v1315_v31, %v1192_v16 }
 0x18d   : > { %v3792_v1 = vpop.f32.mrf.mxu2  ;;  %v1604_v28 = vadd.f32 %v1577_v33, %v1342_v23 }
 0x190   : > { %v1168_v52 = vpop.f32.mrf.mxu3 }
 0x191   : > { %v1193_v53 = vadd.f32 %v1168_v52, %v992_v36 }
 0x193   : > { %v1343_v54 = vadd.f32 %v1318_v38, %v1193_v53  ;;  %v1590_v62 = vpop.f32.mrf.mxu1  ;;  %v2188_v17 = vpop.f32.mrf.mxu0 }
 0x195   : > { %v1605_v55 = vadd.f32 %v1580_v40, %v1343_v54  ;;  %v1773_v6 = vpop.f32.mrf.mxu2  ;;  %v993_v40 = vadd.f32 %v3778_v30, %v3774_v20 }
 0x196   : > { %v1801_v18 = vadd.f32 %v1773_v6, %v1603_v47 }
 0x198   : > { %v1170_v58 = vpop.f32.mrf.mxu3 }
 0x199   : > { %v1194_v45 = vadd.f32 %v1170_v58, %v993_v40 }
 0x19b   : > { %v3800_v4 = vpop.f32.mrf.mxu1  ;;  %v2191_v31 = vpop.f32.mrf.mxu0  ;;  %v1344_v52 = vadd.f32 %v3784_v32, %v1194_v45 }
 0x19d   : > { %v1775_v13 = vpop.f32.mrf.mxu2 }
 0x19e   : > { %v1802_v34 = vadd.f32 %v1775_v13, %v1604_v28 }
 0x1a0   : > { %v1173_v60 = vpop.f32.mrf.mxu3 }
 0x1a1   : > { %v1195_v61 = vadd.f32 %v1173_v60, %v994_v37 }
 0x1a3   : > { %v1345_v63 = vadd.f32 %v1323_v50, %v1195_v61  ;;  %v2384_v12 = vpop.f32.mrf.mxu1 }
 0x1a5   : > { %v3794_v0 = vadd.f32 %v1585_v51, %v1345_v63  ;;  %v1778_v25 = vpop.f32.mrf.mxu2 }
 0x1a6   : > { %v1803_v47 = vadd.f32 %v1778_v25, %v1605_v55  ;;  %v1606_v55 = vadd.f32 %v3786_v43, %v1344_v52  ;;  %v995_v43 = vadd.f32 %v3782_v41, %v3776_v26  ;;  %v282_v25 = vld [vmem:[%s3352_s26 + $0x8] sm:$0xff]   ;;  %v997_v52 = vadd.f32 %v3792_v1, %v3780_v39 }
 0x1a8   : > { %v3796_v3 = vpop.f32.mrf.mxu3 }
 0x1ab   : > { %v2386_v19 = vpop.f32.mrf.mxu1 }
 0x1ad   : > { %v1780_v44 = vpop.f32.mrf.mxu2 }
 0x1b0   : > { %v1178_v7 = vpop.f32.mrf.mxu3 }
 0x1b1   : > { %v1197_v8 = vadd.f32 %v1178_v7, %v996_v48  ;;  %v280_v48 = vld [vmem:[%s3352_s26] sm:$0xff]  }
 0x1b2   : > { %v2476_v20 = vunpack.c.l.bf16 %v280_v48  ;;  %v2477_v61 = vunpack.c.h.bf16 %v280_v48 }
 0x1b3   : > { %v1347_v9 = vadd.f32 %v1328_v59, %v1197_v8  ;;  %v2389_v38 = vpop.f32.mrf.mxu1  ;;  %v2193_v59 = vpop.f32.mrf.mxu0  ;;  %v1804_v8 = vadd.f32 %v1780_v44, %v1606_v55 }
 0x1b5   : > { %v3802_v11 = vadd.f32 %v1590_v62, %v1347_v9  ;;  %v1783_v7 = vpop.f32.mrf.mxu2 }
 0x1b8   : > { %v3804_v14 = vpop.f32.mrf.mxu3 }
 0x1bb   : > { %v2391_v58 = vpop.f32.mrf.mxu1 }
 0x1c0   : > { %v1924_v22 = vpop.f32.mrf.mxu3 }
 0x1c1   : > { %v1952_v24 = vadd.f32 %v1924_v22, %v1801_v18  ;;  %v2196_v18 = vpop.f32.mrf.mxu0 }
 0x1c3   : > { %v2214_v36 = vadd.f32 %v2186_v10, %v1952_v24  ;;  %v2394_v23 = vpop.f32.mrf.mxu1  ;;  %v1805_v24 = vadd.f32 %v1783_v7, %v3794_v0 }
 0x1c5   : > { %v2412_v29 = vadd.f32 %v2384_v12, %v2214_v36 }
 0x1c7   : > { %v2440_v2 = vmul.f32 %v3810_v27, %v2412_v29  ;;  %v1785_v29 = vpop.f32.mrf.mxu2 }
 0x1c8   : > { %v1926_v35 = vpop.f32.mrf.mxu3 }
 0x1c9   : > { %v1953_v37 = vadd.f32 %v1926_v35, %v1802_v34  ;;  %v2452_v42 = vadd.f32 %v3816_v21, %v2440_v2 }
 0x1cb   : > { %v2215_v33 = vadd.f32 %v2188_v17, %v1953_v37  ;;  %v2460_v49 = vmul.f32 0.1, %v2452_v42 }
 0x1cd   : > { %v2413_v46 = vadd.f32 %v2386_v19, %v2215_v33  ;;  %v2468_v30 = vmax.f32 %v2452_v42, %v2460_v49  ;;  %v1196_v19 = vadd.f32 %v3796_v3, %v995_v43  ;;  %v2198_v33 = vpop.f32.mrf.mxu0 }
 0x1cf   : > { %v2441_v50 = vmul.f32 %v3810_v27, %v2413_v46  ;;  %v2484_v9 = vadd.f32 %v2476_v20, %v2468_v30  ;;  %v1346_v2 = vadd.f32 %v3788_v56, %v1196_v19  ;;  %v284_v30 = vld [vmem:[%s3352_s26 + $0x10] sm:$0xff]  }
 0x1d0   : > { %v1929_v51 = vpop.f32.mrf.mxu3 }
 0x1d1   : > { %v2453_v53 = vadd.f32 %v3816_v21, %v2441_v50  ;;  %v1954_v54 = vadd.f32 %v1929_v51, %v1803_v47  ;;  %v1608_v40 = vadd.f32 %v3790_v57, %v1346_v2  ;;  %v2396_v47 = vpop.f32.mrf.mxu1  ;;  %v1788_v51 = vpop.f32.mrf.mxu2 }
 0x1d2   : > { %v1807_v20 = vadd.f32 %v1788_v51, %v3802_v11 }
 0x1d3   : > { %v2461_v60 = vmul.f32 0.1, %v2453_v53  ;;  %v2216_v62 = vadd.f32 %v2191_v31, %v1954_v54  ;;  %v2478_v31 = vunpack.c.l.bf16 %v282_v25  ;;  %v1806_v44 = vadd.f32 %v1785_v29, %v1608_v40 }
 0x1d4   : > { %v1198_v54 = vadd.f32 %v3804_v14, %v997_v52  ;;  %v2481_v14 = vunpack.c.h.bf16 %v284_v30 }
 0x1d5   : > { %v2469_v63 = vmax.f32 %v2453_v53, %v2461_v60  ;;  %v2414_v6 = vadd.f32 %v2389_v38, %v2216_v62  ;;  %v2479_v38 = vunpack.c.h.bf16 %v282_v25  ;;  %v2201_v62 = vpop.f32.mrf.mxu0 }
 0x1d6   : > { %v1348_v55 = vadd.f32 %v3798_v5, %v1198_v54 }
 0x1d7   : > { %v2485_v32 = vadd.f32 %v2477_v61, %v2469_v63  ;;  %v2442_v10 = vmul.f32 %v3810_v27, %v2414_v6  ;;  %v2480_v6 = vunpack.c.l.bf16 %v284_v30 }
 0x1d8   : > { %v1931_v12 = vpop.f32.mrf.mxu3  ;;  %v1610_v11 = vadd.f32 %v3800_v4, %v1348_v55 }
 0x1d9   : > { %v3211_v13 = vpack.c.bf16 %v2485_v32, %v2484_v9  ;;  %v1955_v15 = vadd.f32 %v1931_v12, %v1804_v8  ;;  %v2454_v16 = vadd.f32 %v3816_v21, %v2442_v10  ;;  %v2399_v1 = vpop.f32.mrf.mxu1  ;;  %v1790_v32 = vpop.f32.mrf.mxu2 }
 0x1db   : > { %3212 = vst [vmem:[%s3832_s27] sm:$0xff] %v3211_v13   ;;  %v2217_v17 = vadd.f32 %v2193_v59, %v1955_v15  ;;  %v2462_v36 = vmul.f32 0.1, %v2454_v16  ;;  %v1808_v13 = vadd.f32 %v1790_v32, %v1610_v11 }
 0x1dd   : > { %v2415_v22 = vadd.f32 %v2391_v58, %v2217_v17  ;;  %v2470_v35 = vmax.f32 %v2454_v16, %v2462_v36  ;;  %v2203_v19 = vpop.f32.mrf.mxu0 }
 0x1df   : > { %v2443_v28 = vmul.f32 %v3810_v27, %v2415_v22  ;;  %v2486_v45 = vadd.f32 %v2478_v31, %v2470_v35 }
 0x1e0   : > { %v1934_v34 = vpop.f32.mrf.mxu3 }
 0x1e1   : > { %v2455_v26 = vadd.f32 %v3816_v21, %v2443_v28  ;;  %v1956_v41 = vadd.f32 %v1934_v34, %v1805_v24  ;;  %v2401_v24 = vpop.f32.mrf.mxu1  ;;  %v286_v28 = vld [vmem:[%s3352_s26 + $0x18] sm:$0xff]  }
 0x1e2   : > { %v2482_v2 = vunpack.c.l.bf16 %v286_v28 }
 0x1e3   : > { %v2463_v37 = vmul.f32 0.1, %v2455_v26  ;;  %v2218_v3 = vadd.f32 %v2196_v18, %v1956_v41  ;;  %v2483_v41 = vunpack.c.h.bf16 %v286_v28 }
 0x1e5   : > { %v2471_v0 = vmax.f32 %v2455_v26, %v2463_v37  ;;  %v2416_v42 = vadd.f32 %v2394_v23, %v2218_v3 }
 0x1e7   : > { %v2487_v46 = vadd.f32 %v2479_v38, %v2471_v0  ;;  %v2444_v56 = vmul.f32 %v3810_v27, %v2416_v42 }
 0x1e8   : > { %v1936_v48 = vpop.f32.mrf.mxu3 }
 0x1e9   : > { %v3216_v49 = vpack.c.bf16 %v2487_v46, %v2486_v45  ;;  %v1957_v50 = vadd.f32 %v1936_v48, %v1806_v44  ;;  %v2456_v57 = vadd.f32 %v3816_v21, %v2444_v56 }
 0x1eb   : > { %3228 = vst [vmem:[%s3832_s27 + $0x8] sm:$0xff] %v3216_v49   ;;  %v2219_v53 = vadd.f32 %v2198_v33, %v1957_v50  ;;  %v2464_v60 = vmul.f32 0.1, %v2456_v57 }
 0x1ed   : > { %v2417_v59 = vadd.f32 %v2396_v47, %v2219_v53  ;;  %v2472_v7 = vmax.f32 %v2456_v57, %v2464_v60 }
 0x1ef   : > { %v2445_v61 = vmul.f32 %v3810_v27, %v2417_v59  ;;  %v2488_v15 = vadd.f32 %v2480_v6, %v2472_v7 }
 0x1f0   : > { %v1939_v58 = vpop.f32.mrf.mxu3 }
 0x1f1   : > { %v2457_v63 = vadd.f32 %v3816_v21, %v2445_v61  ;;  %v1958_v39 = vadd.f32 %v1939_v58, %v1807_v20 }
 0x1f3   : > { %v2465_v8 = vmul.f32 0.1, %v2457_v63  ;;  %v2220_v9 = vadd.f32 %v2201_v62, %v1958_v39 }
 0x1f5   : > { %v2473_v10 = vmax.f32 %v2457_v63, %v2465_v8  ;;  %v2418_v12 = vadd.f32 %v2399_v1, %v2220_v9 }
 0x1f7   : > { %v2489_v43 = vadd.f32 %v2481_v14, %v2473_v10  ;;  %v2446_v5 = vmul.f32 %v3810_v27, %v2418_v12 }
 0x1f8   : > { %v1941_v16 = vpop.f32.mrf.mxu3 }
 0x1f9   : > { %v3221_v17 = vpack.c.bf16 %v2489_v43, %v2488_v15  ;;  %v1959_v18 = vadd.f32 %v1941_v16, %v1808_v13  ;;  %v2458_v22 = vadd.f32 %v3816_v21, %v2446_v5 }
 0x1fb   : > { %3229 = vst [vmem:[%s3832_s27 + $0x10] sm:$0xff] %v3221_v17   ;;  %v2221_v23 = vadd.f32 %v2203_v19, %v1959_v18  ;;  %v2466_v4 = vmul.f32 0.1, %v2458_v22 }
 0x1fd   : > { %v2419_v25 = vadd.f32 %v2401_v24, %v2221_v23  ;;  %v2474_v34 = vmax.f32 %v2458_v22, %v2466_v4 }
 0x1ff   : > { %v2447_v36 = vmul.f32 %v3810_v27, %v2419_v25  ;;  %v2490_v35 = vadd.f32 %v2482_v2, %v2474_v34 }
 0x201   : > { %v2459_v29 = vadd.f32 %v3816_v21, %v2447_v36 }
 0x203   : > { %v2467_v26 = vmul.f32 0.1, %v2459_v29 }
 0x205   : > { %v2475_v31 = vmax.f32 %v2459_v29, %v2467_v26 }
 0x207   : > { %v2491_v37 = vadd.f32 %v2483_v41, %v2475_v31 }
 0x209   : > { %v3226_v38 = vpack.c.bf16 %v2491_v37, %v2490_v35 }
 0x20b   : > { %3230 = vst [vmem:[%s3832_s27 + $0x18] sm:$0xff] %v3226_v38  }
 0x20c PF: > { %s17_s24 = sadd.s32 1, %s3266_s24  }
 0x20d   : > { %p14_p4 = scmp.ge.s32.totalorder %s17_s24, 4  }
 0x20f   :  { %16 = sbr.rel (!%p14_p4) target bundleno = 1 (0x1), region = 88 }

// kernel: udarknet_forward.12
= control target key start
LH: loop header
LB: loop body
LE: loop exit
PB: predicated region body
PF: predicated region fallthrough
CT: control target
= control target key end

     0   :  { %s2540_s24 = smov 0   ;;  %s2998_s0 = inlined_call_operand.vmem [shape: bf16[2,4,4,128], index: 0, kind: input, shape index: {}]   ;;  %s2999_s1 = inlined_call_operand.vmem [shape: bf16[1,128,128], index: 1, kind: input, shape index: {}]   ;;  %s3000_s2 = inlined_call_operand.vmem [shape: f32[1,128], index: 2, kind: input, shape index: {}]   ;;  %s3001_s3 = inlined_call_operand.vmem [shape: f32[1,128], index: 3, kind: input, shape index: {}]   ;;  %s3002_s4 = inlined_call_operand.vmem [shape: bf16[9,128,128], index: 4, kind: input, shape index: {}]   ;;  %s3003_s5 = inlined_call_operand.vmem [shape: f32[1,128], index: 5, kind: input, shape index: {}]   ;;  %s3004_s6 = inlined_call_operand.vmem [shape: f32[1,128], index: 6, kind: input, shape index: {}]   ;;  %s3005_s7 = inlined_call_operand.vmem [shape: bf16[2,16,128], index: 7, kind: output, shape index: {}]  }
   0x1 LB: > { %s1908_s25 = sadd.s32 4294967295, %s2497_s24   ;;  %p1912_p0 = scmp.ge.s32.totalorder %s2497_s24, 1  ;;  %s2497_s24 = sphi %s2540_s24, %s17_s24  }
   0x2   : > { %p237_p1 = scmp.lt.s32.totalorder %s2497_s24, 3 }
   0x4   : > { %p238_p2 = pnand %p1912_p0, %p237_p1 }
   0x5   : > { %p269_p3 = scmp.lt.s32.totalorder (!%p238_p2), %s1908_s25, 1 }
   0x6   : > { %241 = sbr.rel (%p238_p2) target bundleno = 461 (0x1cd), region = 48 }
   0xb   : > { %v2400_v0 = vld [vmem:[%s2999_s1 + $0x38] sm:$0xff]  ;;  %v2399_v1 = vld [vmem:[%s2999_s1 + $0x30] sm:$0xff]  ;;  %s3017_s25 = smov (!%p269_p3, %s1908_s25), 1  ;;  %v2499_v2 = vmov 0   ;;  %v2398_v3 = vld [vmem:[%s2999_s1 + $0x28] sm:$0xff]  ;;  %vm403_vm0 = vcmask 1041408  }
   0xc   : > { %367 = vmatpush.bf16.msra.mxu0 %v2400_v0  ;;  %284 = vst [vmem:[#allocation2] sm:$0x7] %v2499_v2  ;;  %s2391_s30 = sshll.u32 %s3017_s25, 3  ;;  %v2397_v8 = vld [vmem:[%s2999_s1 + $0x20] sm:$0xff]  ;;  %v2396_v9 = vld [vmem:[%s2999_s1 + $0x18] sm:$0xff]  ;;  %v2395_v10 = vld [vmem:[%s2999_s1 + $0x10] sm:$0xff] }
   0xd   : > { %285 = vst [vmem:[#allocation2 + $0x4] sm:$0x7] %v2499_v2  ;;  %s273_s12 = scalar_lea.vmem %s2998_s0, %s2391_s30  ;;  %v2394_v11 = vld [vmem:[%s2999_s1 + $0x8] sm:$0xff]  ;;  %v2393_v12 = vld [vmem:[%s2999_s1] sm:$0xff]  ;;  %vm407_vm1 = vcmask 1043458   ;;  %vm459_vm2 = vcmask 1042432   ;;  %s278_s17 = scalar_lea.vmem %s3005_s7, %s2391_s30 }
   0xe   : > { %286 = vst [vmem:[#allocation2 + $0x8] sm:$0x7] %v2499_v2  ;;  %v2565_v4 = vld [vmem:[%s273_s12] sm:$0x3]  ;;  %v2567_v5 = vld [vmem:[%s273_s12 + $0x2] sm:$0x3] }
   0xf   : > { %289 = vst [vmem:[#allocation2 + $0x14] sm:$0x7] %v2499_v2  ;;  %v2569_v6 = vld [vmem:[%s273_s12 + $0x4] sm:$0x3]  ;;  %v2571_v7 = vld [vmem:[%s273_s12 + $0x6] sm:$0x3] }
  0x10   : > { %368 = vmatpush.bf16.msra.mxu0 %v2399_v1  ;;  %307 = vst [vmem:[#allocation1] ss:$4 sm:$0xff] %v2565_v4  ;;  %v2487_v14 = vld [vmem:[%s3000_s2] ss:$0 sm:$0xff]  ;;  %vm460_vm3 = vsmask.f32 2306 }
  0x11   : > { %310 = vst [vmem:[#allocation1 + $0x1] ss:$4 sm:$0xff] %v2567_v5  ;;  %v2488_v15 = vld [vmem:[%s3001_s3] ss:$0 sm:$0xff]  ;;  %v2408_v39 = vld [vmem:[%s3002_s4 + $0x38] sm:$0xff]  ;;  %vm2605_vm4 = vmand %vm459_vm2, %vm460_vm3  ;;  %vm804_vm12 = vcmask 1040384  }
  0x12   : > { %313 = vst [vmem:[#allocation1 + $0x2] ss:$4 sm:$0xff] %v2569_v6  ;;  %555 = vmatpush.bf16.msra.mxu1 %v2408_v39  ;;  %v2407_v50 = vld [vmem:[%s3002_s4 + $0x30] sm:$0xff]  ;;  %v2406_v54 = vld [vmem:[%s3002_s4 + $0x28] sm:$0xff]  ;;  %v2405_v55 = vld [vmem:[%s3002_s4 + $0x20] sm:$0xff]  ;;  %vm805_vm13 = vcmask 1042434  }
  0x13   : > { %316 = vst [vmem:[#allocation1 + $0x3] ss:$4 sm:$0xff] %v2571_v7  ;;  %v474_v33 = vld [vmem:[#allocation2] sm:$0x3]  ;;  %v2416_v56 = vld [vmem:[%s3002_s4 + $0x78] sm:$0xff]  ;;  %v2415_v62 = vld [vmem:[%s3002_s4 + $0x70] sm:$0xff] }
  0x14   : > { %369 = vmatpush.bf16.msra.mxu0 %v2398_v3  ;;  %287 = vst [vmem:[#allocation2 + $0xc] sm:$0x7] %v2499_v2  ;;  %v462_v45 = vld [vmem:[#allocation2 + $0x4] sm:$0x7]  ;;  %744 = vmatpush.bf16.msra.mxu2 %v2416_v56  ;;  %v2404_v59 = vld [vmem:[%s3002_s4 + $0x18] sm:$0xff]  ;;  %v2403_v63 = vld [vmem:[%s3002_s4 + $0x10] sm:$0xff] }
  0x15   : > { %288 = vst [vmem:[#allocation2 + $0x10] sm:$0x7] %v2499_v2  ;;  %v465_v49 = vld [vmem:[#allocation2 + $0x8] sm:$0x7]  ;;  %v571_v60 = vld [vmem:[#allocation2] sm:$0x7]  ;;  %vm806_vm14 = vmor %vm804_vm12, %vm805_vm13 }
  0x16   : > { %556 = vmatpush.bf16.msra.mxu1 %v2407_v50  ;;  %v2424_v0 = vld [vmem:[%s3002_s4 + $0xb8] sm:$0xff]  ;;  %v579_v1 = vrot.slane %v571_v60, 2  ;;  %v2414_v3 = vld [vmem:[%s3002_s4 + $0x68] sm:$0xff]  ;;  %v2411_v39 = vld [vmem:[%s3002_s4 + $0x50] sm:$0xff]  ;;  %vm607_vm5 = vsmask.f32 1280 }
  0x17   : > { %905 = vmatpush.bf16.msra.mxu3 %v2424_v0  ;;  %vm608_vm6 = vsmask.f32 3336  ;;  %vm610_vm8 = vsmask.f32 5392  ;;  %vm612_vm9 = vsmask.f32 7448 }
  0x18   : > { %370 = vmatpush.bf16.msra.mxu0 %v2397_v8  ;;  %745 = vmatpush.bf16.msra.mxu2 %v2415_v62  ;;  %vm2694_vm7 = vmor %vm607_vm5, %vm608_vm6  ;;  %v2429_v62 = vld [vmem:[%s3002_s4 + $0xe0] sm:$0xff]  ;;  %vm807_vm15 = vcmask 1044484   ;;  %vm809_vm2 = vcmask 1046534  }
  0x19   : > { %vm611_vm10 = vmor %vm2694_vm7, %vm610_vm8 }
  0x1a   : > { %v317_v13 = vld.sshfl [vmem:[#allocation1] sm:$0xff pattern:$0x73625140]  ;;  %557 = vmatpush.bf16.msra.mxu1 %v2406_v54  ;;  %vm2715_vm11 = vmor %vm611_vm10, %vm612_vm9 }
  0x1b   : > { %vm2754_vm3 = vmor %vm806_vm14, %vm807_vm15 }
  0x1c   : > { %371 = vmatpush.bf16.msra.mxu0 %v2396_v9  ;;  %v2402_v9 = vld [vmem:[%s3002_s4 + $0x8] sm:$0xff]  ;;  %746 = vmatpush.bf16.msra.mxu2 %v2414_v3 }
  0x1e   : > { %558 = vmatpush.bf16.msra.mxu1 %v2405_v55 }
  0x20   : > { %372 = vmatpush.bf16.msra.mxu0 %v2395_v10  ;;  %v2423_v10 = vld [vmem:[%s3002_s4 + $0xb0] sm:$0xff] }
  0x21   : > { %906 = vmatpush.bf16.msra.mxu3 %v2423_v10 }
  0x22   : > { %559 = vmatpush.bf16.msra.mxu1 %v2404_v59 }
  0x24   : > { %373 = vmatpush.bf16.msra.mxu0 %v2394_v11 }
  0x26   : > { %560 = vmatpush.bf16.msra.mxu1 %v2403_v63 }
  0x28   : > { %374 = vmatpush.bf16.msra.mxu0 %v2393_v12  ;;  %v585_v12 = vsel %vm403_vm0, %v571_v60, %v579_v1 }
  0x2a   : > { %561 = vmatpush.bf16.msra.mxu1 %v2402_v9 }
  0x2b   : > { %375 = vmatmul.bf16.vlgmr.msra.gmra.mxu0 %v317_v13 }
  0xa8   : > { %v376_v16 = vpop.f32.mrf.mxu0 }
  0xa9   : > { %v385_v17 = vmul.f32 %v2487_v14, %v376_v16 }
  0xab   : > { %v391_v18 = vadd.f32 %v2488_v15, %v385_v17 }
  0xad   : > { %v393_v19 = vmul.f32 0.1, %v391_v18 }
  0xaf   : > { %v395_v20 = vmax.f32 %v391_v18, %v393_v19  ;;  %v614_v19 = vshrl.u32 %v585_v12, 16 }
  0xb0   : > { %v378_v21 = vpop.f32.mrf.mxu0 }
  0xb1   : > { %v397_v22 = vpack.c.bf16 %v395_v20, %v395_v20  ;;  %v386_v23 = vmul.f32 %v2487_v14, %v378_v21  ;;  %v2413_v14 = vld [vmem:[%s3002_s4 + $0x60] sm:$0xff]  ;;  %v2422_v21 = vld [vmem:[%s3002_s4 + $0xa8] sm:$0xff] }
  0xb2   : > { %v2401_v20 = vld [vmem:[%s3002_s4] sm:$0xff]  ;;  %747 = vmatpush.bf16.msra.mxu2 %v2413_v14  ;;  %907 = vmatpush.bf16.msra.mxu3 %v2422_v21 }
  0xb3   : > { %v401_v24 = vrot.slane %v397_v22, 2  ;;  %v392_v25 = vadd.f32 %v2488_v15, %v386_v23  ;;  %v617_v23 = vshll.u32 %v585_v12, 16  ;;  %562 = vmatpush.bf16.msra.mxu1 %v2401_v20  ;;  %v764_v12 = vld [vmem:[#allocation2] sm:$0x6] }
  0xb5   : > { %v406_v26 = vsel %vm403_vm0, %v397_v22, %v401_v24  ;;  %v408_v27 = vsel %vm407_vm1, %v397_v22, %v401_v24  ;;  %v394_v29 = vmul.f32 0.1, %v392_v25  ;;  %v586_v22 = vsel %vm407_vm1, %v571_v60, %v579_v1 }
  0xb6   : > { %v410_v28 = vrot.slane %v408_v27, 2  ;;  %417 = vst [vmem:[#allocation1] ss:$2 sm:$0xff] %v406_v26  ;;  %v2412_v26 = vld [vmem:[%s3002_s4 + $0x58] sm:$0xff] }
  0xb7   : > { %v396_v30 = vmax.f32 %v392_v25, %v394_v29  ;;  %v2432_v27 = vld [vmem:[%s3002_s4 + $0xf8] sm:$0xff]  ;;  %748 = vmatpush.bf16.msra.mxu2 %v2412_v26 }
  0xb8   : > { %421 = vst [vmem:[#allocation1 + $0x10] ss:$2 sm:$0xff] %v410_v28  ;;  %v468_v28 = vld [vmem:[#allocation2 + $0xc] sm:$0x7]  ;;  %1007 = vmatpush.bf16.msrb.mxu0 %v2432_v27 }
  0xb9   : > { %v398_v31 = vpack.c.bf16 %v396_v30, %v396_v30  ;;  %v588_v30 = vrot.slane %v586_v22, 2 }
  0xbb   : > { %v402_v34 = vrot.slane %v398_v31, 2  ;;  %v623_v50 = vshll.u32 %v588_v30, 16  ;;  %749 = vmatpush.bf16.msra.mxu2 %v2411_v39  ;;  %v2438_v39 = vld [vmem:[%s3002_s4 + $0x128] sm:$0xff] }
  0xbd   : > { %v418_v32 = vld.sshfl [vmem:[#allocation1] sm:$0xff pattern:$0x75643120]  ;;  %v413_v37 = vsel %vm403_vm0, %v398_v31, %v402_v34  ;;  %v414_v38 = vsel %vm407_vm1, %v398_v31, %v402_v34  ;;  %v2431_v34 = vld [vmem:[%s3002_s4 + $0xf0] sm:$0xff] }
  0xbe   : > { %v430_v35 = vshrl.u32 %v418_v32, 16  ;;  %v433_v41 = vshll.u32 %v418_v32, 16  ;;  %v416_v43 = vrot.slane %v414_v38, 2  ;;  %424 = vst [vmem:[#allocation1 + $0x20] ss:$2 sm:$0xff] %v413_v37  ;;  %v616_v32 = vrot.slane %v614_v19, 6  ;;  %1008 = vmatpush.bf16.msrb.mxu0 %v2431_v34 }
  0xbf   : > { %v422_v36 = vld.sshfl [vmem:[#allocation1 + $0x10] sm:$0xff pattern:$0x75643120] }
  0xc0   : > { %v432_v40 = vrot.slane %v430_v35, 7  ;;  %v436_v42 = vshrl.u32 %v422_v36, 16  ;;  %495 = vst [vmem:[#allocation1] ss:$4 sm:$0xff] %v474_v33  ;;  %v439_v48 = vshll.u32 %v422_v36, 16  ;;  %v2421_v33 = vld [vmem:[%s3002_s4 + $0xa0] sm:$0xff] }
  0xc1   : > { %428 = vst [vmem:[#allocation1 + $0x30] ss:$2 sm:$0xff] %v416_v43  ;;  %v619_v35 = vrot.slane %v617_v23, 7  ;;  %908 = vmatpush.bf16.msra.mxu3 %v2421_v33 }
  0xc2   : > { %v435_v46 = vor.u32 %v433_v41, %v432_v40  ;;  %v438_v47 = vrot.slane %v436_v42, 7  ;;  %v471_v42 = vld [vmem:[#allocation2 + $0x10] sm:$0x7] }
  0xc3   : > { %v620_v55 = vor.u32 %v619_v35, %v616_v32  ;;  %v2418_v32 = vld [vmem:[%s3002_s4 + $0x88] sm:$0xff] }
  0xc4   : > { %v441_v51 = vor.u32 %v439_v48, %v438_v47  ;;  %v463_v52 = vsel %vm2605_vm4, %v435_v46, %v462_v45  ;;  %v2420_v47 = vld [vmem:[%s3002_s4 + $0x98] sm:$0xff]  ;;  %v2430_v48 = vld [vmem:[%s3002_s4 + $0xe8] sm:$0xff] }
  0xc5   : > { %464 = vst [vmem:[#allocation2 + $0x4] sm:$0x7] %v463_v52  ;;  %v425_v61 = vld.sshfl [vmem:[#allocation1 + $0x20] sm:$0xff pattern:$0x75643120]  ;;  %v2410_v52 = vld [vmem:[%s3002_s4 + $0x48] sm:$0xff]  ;;  %909 = vmatpush.bf16.msra.mxu3 %v2420_v47  ;;  %1009 = vmatpush.bf16.msrb.mxu0 %v2430_v48 }
  0xc6   : > { %v466_v53 = vsel %vm2605_vm4, %v441_v51, %v465_v49  ;;  %v442_v2 = vshrl.u32 %v425_v61, 16  ;;  %v445_v17 = vshll.u32 %v425_v61, 16  ;;  %v2419_v61 = vld [vmem:[%s3002_s4 + $0x90] sm:$0xff]  ;;  %750 = vmatpush.bf16.msra.mxu2 %v2410_v52  ;;  %v621_v3 = vrot.slane %v620_v55, 2 }
  0xc7   : > { %467 = vst [vmem:[#allocation2 + $0x8] sm:$0x7] %v466_v53  ;;  %v2440_v53 = vld [vmem:[%s3002_s4 + $0x138] sm:$0xff]  ;;  %v2427_v52 = vld [vmem:[%s3002_s4 + $0xd0] sm:$0xff] }
  0xc8   : > { %v444_v13 = vrot.slane %v442_v2, 7  ;;  %v429_v15 = vld.sshfl [vmem:[#allocation1 + $0x30] sm:$0xff pattern:$0x75643120]  ;;  %1193 = vmatpush.bf16.msrb.mxu1 %v2440_v53  ;;  %v2409_v2 = vld [vmem:[%s3002_s4 + $0x40] sm:$0xff] }
  0xc9   : > { %v448_v25 = vshrl.u32 %v429_v15, 16  ;;  %v451_v37 = vshll.u32 %v429_v15, 16  ;;  %910 = vmatpush.bf16.msra.mxu3 %v2419_v61  ;;  %1010 = vmatpush.bf16.msrb.mxu0 %v2429_v62  ;;  %v2437_v53 = vld [vmem:[%s3002_s4 + $0x120] sm:$0xff] }
  0xca   : > { %v447_v24 = vor.u32 %v445_v17, %v444_v13  ;;  %751 = vmatpush.bf16.msra.mxu2 %v2409_v2 }
  0xcb   : > { %v450_v36 = vrot.slane %v448_v25, 7 }
  0xcc   : > { %v475_v57 = vld [vmem:[#allocation2 + $0x4] sm:$0x3]  ;;  %v469_v38 = vsel %vm2605_vm4, %v447_v24, %v468_v28  ;;  %v772_v24 = vrot.slane %v764_v12, 2 }
  0xcd   : > { %498 = vst [vmem:[#allocation1 + $0x1] ss:$4 sm:$0xff] %v475_v57  ;;  %v572_v8 = vld [vmem:[#allocation2 + $0x4] sm:$0x7]  ;;  %v453_v46 = vor.u32 %v451_v37, %v450_v36  ;;  %v2428_v36 = vld [vmem:[%s3002_s4 + $0xd8] sm:$0xff]  ;;  %911 = vmatpush.bf16.msra.mxu3 %v2418_v32 }
  0xce   : > { %v476_v58 = vld [vmem:[#allocation2 + $0x8] sm:$0x3]  ;;  %v580_v16 = vrot.slane %v572_v8, 2  ;;  %470 = vst [vmem:[#allocation2 + $0xc] sm:$0x7] %v469_v38  ;;  %1011 = vmatpush.bf16.msrb.mxu0 %v2428_v36  ;;  %v780_v47 = vsel %vm407_vm1, %v764_v12, %v772_v24  ;;  %v2434_v36 = vld [vmem:[%s3002_s4 + $0x108] sm:$0xff] }
  0xcf   : > { %501 = vst [vmem:[#allocation1 + $0x2] ss:$4 sm:$0xff] %v476_v58  ;;  %v573_v11 = vld [vmem:[#allocation2 + $0x8] sm:$0x7]  ;;  %v472_v51 = vsel %vm2605_vm4, %v453_v46, %v471_v42  ;;  %v765_v30 = vld [vmem:[#allocation2 + $0x4] sm:$0x6]  ;;  %v778_v46 = vsel %vm403_vm0, %v764_v12, %v772_v24  ;;  %vm2786_vm4 = vmor %vm2754_vm3, %vm809_vm2 }
  0xd0   : > { %v581_v18 = vrot.slane %v573_v11, 2  ;;  %v591_v29 = vsel %vm403_vm0, %v572_v8, %v580_v16  ;;  %v592_v49 = vsel %vm407_vm1, %v572_v8, %v580_v16  ;;  %473 = vst [vmem:[#allocation2 + $0x10] sm:$0x7] %v472_v51  ;;  %v625_v8 = vrot.slane %v623_v50, 7  ;;  %v2439_v16 = vld [vmem:[%s3002_s4 + $0x130] sm:$0xff]  ;;  %v2448_v50 = vld [vmem:[%s3002_s4 + $0x178] sm:$0xff] }
  0xd1   : > { %v627_v40 = vshrl.u32 %v591_v29, 16  ;;  %v630_v41 = vshll.u32 %v591_v29, 16  ;;  %v594_v60 = vrot.slane %v592_v49, 2  ;;  %1194 = vmatpush.bf16.msrb.mxu1 %v2439_v16  ;;  %v2417_v51 = vld [vmem:[%s3002_s4 + $0x80] sm:$0xff]  ;;  %v2030_v44 = vrot.slane %v780_v47, 9  ;;  %1347 = vmatpush.bf16.msrb.mxu2 %v2448_v50 }
  0xd2   : > { %v597_v31 = vsel %vm403_vm0, %v573_v11, %v581_v18  ;;  %v598_v54 = vsel %vm407_vm1, %v573_v11, %v581_v18  ;;  %v626_v22 = vsel %vm2715_vm11, %v621_v3, %v625_v8  ;;  %912 = vmatpush.bf16.msra.mxu3 %v2417_v51  ;;  %v2766_v62 = vld [vmem:[#allocation2 + $0x4] sm:$0x7]  ;;  %1012 = vmatpush.bf16.msrb.mxu0 %v2427_v52  ;;  %v2425_v24 = vld [vmem:[%s3002_s4 + $0xc0] sm:$0xff] }
  0xd3   : > { %v640_v43 = vshrl.u32 %v597_v31, 16  ;;  %v643_v45 = vshll.u32 %v597_v31, 16  ;;  %v629_v56 = vrot.slane %v627_v40, 6  ;;  %v632_v57 = vrot.slane %v630_v41, 7  ;;  %v766_v31 = vld [vmem:[#allocation2 + $0x8] sm:$0x6] }
  0xd4   : > { %v600_v63 = vrot.slane %v598_v54, 2  ;;  %v636_v13 = vshll.u32 %v594_v60, 16  ;;  %v773_v41 = vrot.slane %v765_v30, 2  ;;  %v2433_v50 = vld [vmem:[%s3002_s4 + $0x100] sm:$0xff]  ;;  %v2462_v51 = vld [vmem:[%s3002_s4 + $0x1e8] sm:$0xff] }
  0xd5   : > { %v642_v58 = vrot.slane %v640_v43, 6  ;;  %v645_v59 = vrot.slane %v643_v45, 7  ;;  %v477_v0 = vld [vmem:[#allocation2 + $0xc] sm:$0x3]  ;;  %v633_v9 = vor.u32 %v632_v57, %v629_v56  ;;  %v774_v45 = vrot.slane %v766_v31, 2  ;;  %1195 = vmatpush.bf16.msrb.mxu1 %v2438_v39  ;;  %v2453_v39 = vld [vmem:[%s3002_s4 + $0x1a0] sm:$0xff] }
  0xd6   : > { %v574_v1 = vld [vmem:[#allocation2 + $0xc] sm:$0x7]  ;;  %504 = vst [vmem:[#allocation1 + $0x3] ss:$4 sm:$0xff] %v477_v0  ;;  %v649_v18 = vshll.u32 %v600_v63, 16  ;;  %v638_v29 = vrot.slane %v636_v13, 7  ;;  %v785_v54 = vsel %vm403_vm0, %v765_v30, %v773_v41  ;;  %v787_v55 = vsel %vm407_vm1, %v765_v30, %v773_v41 }
  0xd7   : > { %v582_v10 = vrot.slane %v574_v1, 2  ;;  %v646_v11 = vor.u32 %v645_v59, %v642_v58  ;;  %v634_v23 = vrot.slane %v633_v9, 2  ;;  %v767_v38 = vld [vmem:[#allocation2 + $0xc] sm:$0x6]  ;;  %v2029_v57 = vrot.slane %v778_v46, 9  ;;  %v2456_v59 = vld [vmem:[%s3002_s4 + $0x1b8] sm:$0xff] }
  0xd8   : > { %v651_v33 = vrot.slane %v649_v18, 7  ;;  %v775_v49 = vrot.slane %v767_v38, 2  ;;  %v2447_v58 = vld [vmem:[%s3002_s4 + $0x170] sm:$0xff]  ;;  %v792_v60 = vsel %vm403_vm0, %v766_v31, %v774_v45  ;;  %v794_v61 = vsel %vm407_vm1, %v766_v31, %v774_v45  ;;  %v2426_v63 = vld [vmem:[%s3002_s4 + $0xc8] sm:$0xff]  ;;  %v2436_v0 = vld [vmem:[%s3002_s4 + $0x118] sm:$0xff]  ;;  %1450 = vmatpush.bf16.msrb.mxu3 %v2456_v59 }
  0xd9   : > { %v603_v14 = vsel %vm403_vm0, %v574_v1, %v582_v10  ;;  %v604_v15 = vsel %vm407_vm1, %v574_v1, %v582_v10  ;;  %v647_v25 = vrot.slane %v646_v11, 2  ;;  %v639_v37 = vsel %vm2715_vm11, %v634_v23, %v638_v29  ;;  %1196 = vmatpush.bf16.msrb.mxu1 %v2437_v53  ;;  %v2774_v1 = vld [vmem:[#allocation2 + $0x8] sm:$0x7]  ;;  %v2778_v8 = vld [vmem:[#allocation2 + $0xc] sm:$0x7]  ;;  %1348 = vmatpush.bf16.msrb.mxu2 %v2447_v58  ;;  %v2464_v29 = vld [vmem:[%s3002_s4 + $0x1f8] sm:$0xff] }
  0xda   : > { %v606_v19 = vrot.slane %v604_v15, 2  ;;  %v653_v20 = vshrl.u32 %v603_v14, 16  ;;  %v656_v21 = vshll.u32 %v603_v14, 16  ;;  %v799_v2 = vsel %vm403_vm0, %v767_v38, %v775_v49  ;;  %v2455_v9 = vld [vmem:[%s3002_s4 + $0x1b0] sm:$0xff]  ;;  %v2790_v13 = vld [vmem:[#allocation2 + $0x10] sm:$0x7]  ;;  %1013 = vmatpush.bf16.msrb.mxu0 %v2426_v63 }
  0xdb   : > { %v652_v40 = vsel %vm2715_vm11, %v647_v25, %v651_v33  ;;  %v801_v3 = vsel %vm407_vm1, %v767_v38, %v775_v49  ;;  %v2031_v11 = vrot.slane %v785_v54, 9  ;;  %v2032_v12 = vrot.slane %v787_v55, 9  ;;  %v2435_v25 = vld [vmem:[%s3002_s4 + $0x110] sm:$0xff]  ;;  %v2445_v33 = vld [vmem:[%s3002_s4 + $0x160] sm:$0xff]  ;;  %v2444_v46 = vld [vmem:[%s3002_s4 + $0x158] sm:$0xff] }
  0xdc   : > { %v655_v26 = vrot.slane %v653_v20, 6  ;;  %v658_v27 = vrot.slane %v656_v21, 7  ;;  %v662_v28 = vshll.u32 %v606_v19, 16  ;;  %v814_v14 = vsel %vm2786_vm4, %v2029_v57, %v2030_v44  ;;  %v2446_v19 = vld [vmem:[%s3002_s4 + $0x168] sm:$0xff]  ;;  %1451 = vmatpush.bf16.msrb.mxu3 %v2455_v9  ;;  %v2452_v56 = vld [vmem:[%s3002_s4 + $0x198] sm:$0xff]  ;;  %v2443_v63 = vld [vmem:[%s3002_s4 + $0x150] sm:$0xff] }
  0xdd   : > { %v505_v34 = vld.sshfl [vmem:[#allocation1] sm:$0xff pattern:$0x73625140]  ;;  %v2033_v15 = vrot.slane %v792_v60, 9  ;;  %v2034_v16 = vrot.slane %v794_v61, 9  ;;  %v1035_v18 = vrot.slane %v2766_v62, 2  ;;  %1197 = vmatpush.bf16.msrb.mxu1 %v2436_v0  ;;  %v818_v30 = vsel %vm2786_vm4, %v2031_v11, %v2032_v12  ;;  %1349 = vmatpush.bf16.msrb.mxu2 %v2446_v19 }
  0xde   : > { %v659_v35 = vor.u32 %v658_v27, %v655_v26  ;;  %684 = vst [vmem:[#allocation1] ss:$4 sm:$0xff] %v626_v22  ;;  %563 = vmatmul.bf16.vlgmr.msra.gmra.mxu1 %v505_v34  ;;  %v664_v43 = vrot.slane %v662_v28, 7  ;;  %v1036_v20 = vrot.slane %v2774_v1, 2  ;;  %v2035_v21 = vrot.slane %v799_v2, 9  ;;  %v2454_v28 = vld [vmem:[%s3002_s4 + $0x1a8] sm:$0xff]  ;;  %1014 = vmatpush.bf16.msrb.mxu0 %v2425_v24 }
  0xdf   : > { %687 = vst [vmem:[#allocation1 + $0x1] ss:$4 sm:$0xff] %v639_v37  ;;  %v2036_v22 = vrot.slane %v801_v3, 9  ;;  %v1037_v23 = vrot.slane %v2778_v8, 2  ;;  %v1038_v27 = vrot.slane %v2790_v13, 2  ;;  %v822_v31 = vsel %vm2786_vm4, %v2033_v15, %v2034_v16  ;;  %v2472_v57 = vld [vmem:[%s3002_s4 + $0x238] sm:$0xff] }
  0xe0   : > { %v660_v42 = vrot.slane %v659_v35, 2  ;;  %690 = vst [vmem:[#allocation1 + $0x2] ss:$4 sm:$0xff] %v652_v40  ;;  %v1041_v32 = vsel %vm403_vm0, %v2766_v62, %v1035_v18  ;;  %v1047_v37 = vsel %vm403_vm0, %v2774_v1, %v1036_v20  ;;  %1452 = vmatpush.bf16.msrb.mxu3 %v2454_v28  ;;  %v2463_v40 = vld [vmem:[%s3002_s4 + $0x1f0] sm:$0xff]  ;;  %v925_v52 = vld [vmem:[#allocation2 + $0x4] sm:$0x3]  ;;  %v1042_v0 = vsel %vm407_vm1, %v2766_v62, %v1035_v18 }
  0xe1   : > { %v826_v34 = vsel %vm2786_vm4, %v2035_v21, %v2036_v22  ;;  %v1053_v35 = vsel %vm403_vm0, %v2778_v8, %v1037_v23  ;;  %1198 = vmatpush.bf16.msrb.mxu1 %v2435_v25  ;;  %v1059_v38 = vsel %vm403_vm0, %v2790_v13, %v1038_v27  ;;  %v1063_v41 = vshrl.u32 %v1041_v32, 16  ;;  %1350 = vmatpush.bf16.msrb.mxu2 %v2445_v33  ;;  %v926_v44 = vld [vmem:[#allocation2 + $0x8] sm:$0x3]  ;;  %v927_v12 = vld [vmem:[#allocation2 + $0xc] sm:$0x3]  ;;  %v2442_v21 = vld [vmem:[%s3002_s4 + $0x148] sm:$0xff] }
  0xe2   : > { %v665_v48 = vsel %vm2715_vm11, %v660_v42, %v664_v43  ;;  %1636 = vmatpush.bf16.msra.mxu0 %v2464_v29  ;;  %v1066_v42 = vshll.u32 %v1041_v32, 16  ;;  %v1089_v43 = vshrl.u32 %v1053_v35, 16  ;;  %v1092_v45 = vshll.u32 %v1053_v35, 16  ;;  %v2451_v16 = vld [vmem:[%s3002_s4 + $0x190] sm:$0xff]  ;;  %v928_v19 = vld [vmem:[#allocation2 + $0x10] sm:$0x3] }
  0xe3   : > { %693 = vst [vmem:[#allocation1 + $0x3] ss:$4 sm:$0xff] %v665_v48  ;;  %v1076_v47 = vshrl.u32 %v1047_v37, 16  ;;  %v1102_v48 = vshrl.u32 %v1059_v38, 16  ;;  %v1105_v49 = vshll.u32 %v1059_v38, 16  ;;  %v1065_v53 = vrot.slane %v1063_v41, 6 }
  0xe4   : > { %1453 = vmatpush.bf16.msrb.mxu3 %v2453_v39  ;;  %v1079_v54 = vshll.u32 %v1047_v37, 16  ;;  %v1054_v55 = vsel %vm407_vm1, %v2778_v8, %v1037_v23  ;;  %v1068_v58 = vrot.slane %v1066_v42, 7  ;;  %v1060_v59 = vsel %vm407_vm1, %v2790_v13, %v1038_v27  ;;  %v2450_v29 = vld [vmem:[%s3002_s4 + $0x188] sm:$0xff]  ;;  %v2441_v33 = vld [vmem:[%s3002_s4 + $0x140] sm:$0xff]  ;;  %v1214_v35 = vld [vmem:[#allocation2 + $0x8] sm:$0x6] }
  0xe5   : > { %1199 = vmatpush.bf16.msrb.mxu1 %v2434_v36  ;;  %v1091_v60 = vrot.slane %v1089_v43, 6  ;;  %v1094_v61 = vrot.slane %v1092_v45, 7  ;;  %1351 = vmatpush.bf16.msrb.mxu2 %v2444_v46  ;;  %v1078_v2 = vrot.slane %v1076_v47, 6  ;;  %v1104_v8 = vrot.slane %v1102_v48, 6  ;;  %v1213_v38 = vld [vmem:[#allocation2 + $0x4] sm:$0x6] }
  0xe6   : > { %1637 = vmatpush.bf16.msra.mxu0 %v2463_v40  ;;  %v1107_v9 = vrot.slane %v1105_v49, 7  ;;  %v1048_v11 = vsel %vm407_vm1, %v2774_v1, %v1036_v20  ;;  %v1056_v13 = vrot.slane %v1054_v55, 2  ;;  %v1081_v62 = vrot.slane %v1079_v54, 7  ;;  %v2471_v1 = vld [vmem:[%s3002_s4 + $0x230] sm:$0xff]  ;;  %v1216_v45 = vld [vmem:[#allocation2 + $0x10] sm:$0x6] }
  0xe7   : > { %v1062_v15 = vrot.slane %v1060_v59, 2  ;;  %v1044_v18 = vrot.slane %v1042_v0, 2  ;;  %v1095_v20 = vor.u32 %v1094_v61, %v1091_v60  ;;  %v1050_v22 = vrot.slane %v1048_v11, 2  ;;  %v1215_v40 = vld [vmem:[#allocation2 + $0xc] sm:$0x6]  ;;  %v2449_v46 = vld [vmem:[%s3002_s4 + $0x180] sm:$0xff] }
  0xe8   : > { %1454 = vmatpush.bf16.msrb.mxu3 %v2452_v56  ;;  %v1108_v23 = vor.u32 %v1107_v9, %v1104_v8  ;;  %v1069_v24 = vor.u32 %v1068_v58, %v1065_v53  ;;  %v1098_v25 = vshll.u32 %v1056_v13, 16  ;;  %v1082_v27 = vor.u32 %v1081_v62, %v1078_v2  ;;  %v2459_v41 = vld [vmem:[%s3002_s4 + $0x1d0] sm:$0xff]  ;;  %v2469_v47 = vld [vmem:[%s3002_s4 + $0x220] sm:$0xff]  ;;  %v2468_v59 = vld [vmem:[%s3002_s4 + $0x218] sm:$0xff] }
  0xe9   : > { %1200 = vmatpush.bf16.msrb.mxu1 %v2433_v50  ;;  %1352 = vmatpush.bf16.msrb.mxu2 %v2443_v63  ;;  %v1111_v28 = vshll.u32 %v1062_v15, 16  ;;  %v1096_v32 = vrot.slane %v1095_v20, 2  ;;  %v1222_v49 = vrot.slane %v1214_v35, 2  ;;  %v1223_v54 = vrot.slane %v1215_v40, 2  ;;  %v2457_v8 = vld [vmem:[%s3002_s4 + $0x1c0] sm:$0xff]  ;;  %v2467_v15 = vld [vmem:[%s3002_s4 + $0x210] sm:$0xff] }
  0xea   : > { %v694_v26 = vld.sshfl [vmem:[#allocation1] sm:$0xff pattern:$0x73625140]  ;;  %1638 = vmatpush.bf16.msra.mxu0 %v2462_v51  ;;  %v1109_v36 = vrot.slane %v1108_v23, 2  ;;  %v1070_v37 = vrot.slane %v1069_v24, 2  ;;  %v1100_v39 = vrot.slane %v1098_v25, 7 }
  0xeb   : > { %845 = vst [vmem:[#allocation1] ss:$4 sm:$0xff] %v814_v14  ;;  %752 = vmatmul.bf16.vlgmr.msra.gmra.mxu2 %v694_v26  ;;  %v2461_v14 = vld [vmem:[%s3002_s4 + $0x1e0] sm:$0xff]  ;;  %v2460_v26 = vld [vmem:[%s3002_s4 + $0x1d8] sm:$0xff]  ;;  %v1083_v42 = vrot.slane %v1082_v27, 2  ;;  %v1113_v43 = vrot.slane %v1111_v28, 7  ;;  %v1234_v60 = vsel %vm403_vm0, %v1214_v35, %v1222_v49  ;;  %v1236_v61 = vsel %vm407_vm1, %v1214_v35, %v1222_v49 }
  0xec   : > { %848 = vst [vmem:[#allocation1 + $0x1] ss:$4 sm:$0xff] %v818_v30  ;;  %1455 = vmatpush.bf16.msrb.mxu3 %v2451_v16  ;;  %v2470_v30 = vld [vmem:[%s3002_s4 + $0x228] sm:$0xff]  ;;  %v1101_v51 = vsel %vm2715_vm11, %v1096_v32, %v1100_v39  ;;  %v1224_v56 = vrot.slane %v1216_v45, 2  ;;  %v1221_v58 = vrot.slane %v1213_v38, 2  ;;  %v1241_v63 = vsel %vm403_vm0, %v1215_v40, %v1223_v54 }
  0xed   : > { %851 = vst [vmem:[#allocation1 + $0x2] ss:$4 sm:$0xff] %v822_v31  ;;  %1790 = vmatpush.bf16.msra.mxu1 %v2472_v57  ;;  %v1072_v31 = vshll.u32 %v1044_v18, 16  ;;  %1353 = vmatpush.bf16.msrb.mxu2 %v2442_v21  ;;  %v1114_v53 = vsel %vm2715_vm11, %v1109_v36, %v1113_v43  ;;  %v2458_v57 = vld [vmem:[%s3002_s4 + $0x1c8] sm:$0xff]  ;;  %v1243_v0 = vsel %vm407_vm1, %v1215_v40, %v1223_v54  ;;  %v1470_v9 = vld [vmem:[#allocation2 + $0x8] sm:$0x7] }
  0xee   : > { %854 = vst [vmem:[#allocation1 + $0x3] ss:$4 sm:$0xff] %v826_v34  ;;  %1639 = vmatpush.bf16.msra.mxu0 %v2461_v14  ;;  %v1085_v34 = vshll.u32 %v1050_v22, 16  ;;  %v1248_v2 = vsel %vm403_vm0, %v1216_v45, %v1224_v56  ;;  %v1227_v11 = vsel %vm403_vm0, %v1213_v38, %v1221_v58  ;;  %v2183_v13 = vrot.slane %v1234_v60, 9  ;;  %v1471_v62 = vld [vmem:[#allocation2 + $0xc] sm:$0x7] }
  0xef   : > { %v1074_v48 = vrot.slane %v1072_v31, 7  ;;  %v2184_v14 = vrot.slane %v1236_v61, 9  ;;  %v2185_v16 = vrot.slane %v1241_v63, 9  ;;  %v1473_v18 = vld [vmem:[#allocation2 + $0x14] sm:$0x7]  ;;  %v1478_v22 = vrot.slane %v1470_v9, 2 }
  0xf0   : > { %1456 = vmatpush.bf16.msrb.mxu3 %v2450_v29  ;;  %v1472_v21 = vld [vmem:[#allocation2 + $0x10] sm:$0x7]  ;;  %v2181_v23 = vrot.slane %v1227_v11, 9  ;;  %v1479_v25 = vrot.slane %v1471_v62, 2  ;;  %v1481_v28 = vrot.slane %v1473_v18, 2  ;;  %v2466_v31 = vld [vmem:[%s3002_s4 + $0x208] sm:$0xff] }
  0xf1   : > { %1791 = vmatpush.bf16.msra.mxu1 %v2471_v1  ;;  %1354 = vmatpush.bf16.msrb.mxu2 %v2441_v33  ;;  %v1075_v55 = vsel %vm2715_vm11, %v1070_v37, %v1074_v48  ;;  %v2186_v1 = vrot.slane %v1243_v0, 9  ;;  %v1484_v33 = vsel %vm403_vm0, %v1470_v9, %v1478_v22  ;;  %v2465_v37 = vld [vmem:[%s3002_s4 + $0x200] sm:$0xff]  ;;  %v1485_v43 = vsel %vm407_vm1, %v1470_v9, %v1478_v22  ;;  %v1370_v54 = vld [vmem:[#allocation2 + $0x10] sm:$0x3]  ;;  %v1371_v63 = vld [vmem:[#allocation2 + $0x14] sm:$0x3] }
  0xf2   : > { %1640 = vmatpush.bf16.msra.mxu0 %v2460_v26  ;;  %v1260_v26 = vsel %vm2786_vm4, %v2183_v13, %v2184_v14  ;;  %v1502_v36 = vsel %vm403_vm0, %v1473_v18, %v1481_v28  ;;  %v1506_v39 = vshrl.u32 %v1484_v33, 16  ;;  %v1509_v40 = vshll.u32 %v1484_v33, 16  ;;  %v1656_v22 = vld [vmem:[#allocation2 + $0x8] sm:$0x6] }
  0xf3   : > { %v1264_v29 = vsel %vm2786_vm4, %v2185_v16, %v2186_v1 }
  0xf4   : > { %1457 = vmatpush.bf16.msrb.mxu3 %v2449_v46  ;;  %v1548_v46 = vshll.u32 %v1502_v36, 16 }
  0xf5   : > { %v855_v3 = vld.sshfl [vmem:[#allocation1] sm:$0xff pattern:$0x73625140]  ;;  %1792 = vmatpush.bf16.msra.mxu1 %v2470_v30  ;;  %v1480_v30 = vrot.slane %v1472_v21, 2 }
  0xf6   : > { %947 = vst [vmem:[#allocation1] ss:$4 sm:$0xff] %v925_v52  ;;  %913 = vmatmul.bf16.vlgmr.msra.gmra.mxu3 %v855_v3  ;;  %v1087_v52 = vrot.slane %v1085_v34, 7  ;;  %1641 = vmatpush.bf16.msra.mxu0 %v2459_v41  ;;  %v1250_v3 = vsel %vm407_vm1, %v1216_v45, %v1224_v56  ;;  %v1490_v34 = vsel %vm403_vm0, %v1471_v62, %v1479_v25  ;;  %v1545_v45 = vshrl.u32 %v1502_v36, 16 }
  0xf7   : > { %950 = vst [vmem:[#allocation1 + $0x1] ss:$4 sm:$0xff] %v926_v44  ;;  %v2188_v20 = vrot.slane %v1250_v3, 9  ;;  %v1519_v41 = vshrl.u32 %v1490_v34, 16  ;;  %v1550_v61 = vrot.slane %v1548_v46, 7 }
  0xf8   : > { %953 = vst [vmem:[#allocation1 + $0x2] ss:$4 sm:$0xff] %v927_v12  ;;  %v1088_v44 = vsel %vm2715_vm11, %v1083_v42, %v1087_v52  ;;  %v1229_v12 = vsel %vm407_vm1, %v1213_v38, %v1221_v58  ;;  %v1496_v38 = vsel %vm403_vm0, %v1472_v21, %v1480_v30  ;;  %v1522_v42 = vshll.u32 %v1490_v34, 16  ;;  %v1368_v3 = vld [vmem:[#allocation2 + $0x8] sm:$0x3] }
  0xf9   : > { %956 = vst [vmem:[#allocation1 + $0x3] ss:$4 sm:$0xff] %v928_v19  ;;  %1793 = vmatpush.bf16.msra.mxu1 %v2469_v47  ;;  %v2187_v19 = vrot.slane %v1248_v2, 9  ;;  %v2182_v24 = vrot.slane %v1229_v12, 9  ;;  %v1503_v47 = vsel %vm407_vm1, %v1473_v18, %v1481_v28  ;;  %v1532_v48 = vshrl.u32 %v1496_v38, 16 }
  0xfa   : > { %1642 = vmatpush.bf16.msra.mxu0 %v2458_v57  ;;  %v1535_v49 = vshll.u32 %v1496_v38, 16  ;;  %v1511_v52 = vrot.slane %v1509_v40, 7  ;;  %v1521_v56 = vrot.slane %v1519_v41, 6  ;;  %v1524_v57 = vrot.slane %v1522_v42, 7 }
  0xfb   : > { %v1268_v32 = vsel %vm2786_vm4, %v2187_v19, %v2188_v20  ;;  %v1256_v35 = vsel %vm2786_vm4, %v2181_v23, %v2182_v24  ;;  %v1497_v58 = vsel %vm407_vm1, %v1472_v21, %v1480_v30  ;;  %v1547_v60 = vrot.slane %v1545_v45, 6  ;;  %v1657_v23 = vld [vmem:[#allocation2 + $0xc] sm:$0x6] }
  0xfc   : > { %v1534_v0 = vrot.slane %v1532_v48, 6  ;;  %v1537_v2 = vrot.slane %v1535_v49, 7  ;;  %v1499_v9 = vrot.slane %v1497_v58, 2  ;;  %v1525_v12 = vor.u32 %v1524_v57, %v1521_v56 }
  0xfd   : > { %1794 = vmatpush.bf16.msra.mxu1 %v2468_v59  ;;  %v1505_v59 = vrot.slane %v1503_v47, 2  ;;  %v1551_v13 = vor.u32 %v1550_v61, %v1547_v60  ;;  %v1665_v33 = vrot.slane %v1657_v23, 2  ;;  %v1830_v58 = vunpack.c.l.bf16 %v2569_v6 }
  0xfe   : > { %1643 = vmatpush.bf16.msra.mxu0 %v2457_v8  ;;  %v1541_v18 = vshll.u32 %v1499_v9, 16  ;;  %v1526_v19 = vrot.slane %v1525_v12, 2  ;;  %v1831_v60 = vunpack.c.l.bf16 %v2571_v7 }
  0xff   : > { %v1554_v14 = vshll.u32 %v1505_v59, 16  ;;  %v1552_v20 = vrot.slane %v1551_v13, 2  ;;  %v1677_v41 = vsel %vm403_vm0, %v1657_v23, %v1665_v33  ;;  %v1679_v42 = vsel %vm407_vm1, %v1657_v23, %v1665_v33  ;;  %v2490_v33 = vld [vmem:[%s3004_s6] ss:$0 sm:$0xff] }
 0x100   : > { %v957_v50 = vld.sshfl [vmem:[#allocation1] sm:$0xff pattern:$0x73625140]  ;;  %v2335_v49 = vrot.slane %v1677_v41, 9 }
 0x101   : > { %1139 = vst [vmem:[#allocation1 + $0x2] ss:$4 sm:$0xff] %v1101_v51  ;;  %1015 = vmatmul.bf16.vlgmr.msrb.gmra.mxu0 %v957_v50  ;;  %1795 = vmatpush.bf16.msra.mxu1 %v2467_v15  ;;  %v1487_v50 = vrot.slane %v1485_v43, 2  ;;  %v1508_v51 = vrot.slane %v1506_v39, 6  ;;  %v1538_v15 = vor.u32 %v1537_v2, %v1534_v0  ;;  %v1556_v21 = vrot.slane %v1554_v14, 7 }
 0x102   : > { %1142 = vst [vmem:[#allocation1 + $0x3] ss:$4 sm:$0xff] %v1114_v53  ;;  %v1369_v53 = vld [vmem:[#allocation2 + $0xc] sm:$0x3]  ;;  %v1828_v0 = vunpack.c.l.bf16 %v2565_v4  ;;  %v1829_v2 = vunpack.c.l.bf16 %v2567_v5 }
 0x103   : > { %1133 = vst [vmem:[#allocation1] ss:$4 sm:$0xff] %v1075_v55  ;;  %v1491_v55 = vsel %vm407_vm1, %v1471_v62, %v1479_v25  ;;  %v1512_v11 = vor.u32 %v1511_v52, %v1508_v51  ;;  %v1515_v62 = vshll.u32 %v1487_v50, 16  ;;  %v1539_v25 = vrot.slane %v1538_v15, 2 }
 0x104   : > { %1136 = vst [vmem:[#allocation1 + $0x1] ss:$4 sm:$0xff] %v1088_v44  ;;  %v1493_v8 = vrot.slane %v1491_v55, 2  ;;  %v2336_v50 = vrot.slane %v1679_v42, 9 }
 0x105   : > { %1796 = vmatpush.bf16.msra.mxu1 %v2466_v31  ;;  %v1513_v1 = vrot.slane %v1512_v11, 2  ;;  %v1517_v24 = vrot.slane %v1515_v62, 7  ;;  %v1543_v31 = vrot.slane %v1541_v18, 7 }
 0x106   : > { %v1528_v16 = vshll.u32 %v1493_v8, 16  ;;  %v1703_v57 = vsel %vm2786_vm4, %v2335_v49, %v2336_v50 }
 0x107   : > { %v1518_v30 = vsel %vm2715_vm11, %v1513_v1, %v1517_v24  ;;  %v1544_v38 = vsel %vm2715_vm11, %v1539_v25, %v1543_v31 }
 0x108   : > { %v1530_v28 = vrot.slane %v1528_v16, 7 }
 0x109   : > { %1797 = vmatpush.bf16.msra.mxu1 %v2465_v37 }
 0x10a   : > { %v1531_v34 = vsel %vm2715_vm11, %v1526_v19, %v1530_v28 }
 0x10b   : > { %v1143_v27 = vld.sshfl [vmem:[#allocation1] sm:$0xff pattern:$0x73625140] }
 0x10c   : > { %1201 = vmatmul.bf16.vlgmr.msrb.gmra.mxu1 %v1143_v27  ;;  %1290 = vst [vmem:[#allocation1 + $0x1] ss:$4 sm:$0xff] %v1260_v26  ;;  %v1659_v26 = vld [vmem:[#allocation2 + $0x14] sm:$0x6]  ;;  %v1658_v27 = vld [vmem:[#allocation2 + $0x10] sm:$0x6] }
 0x10d   : > { %1293 = vst [vmem:[#allocation1 + $0x2] ss:$4 sm:$0xff] %v1264_v29  ;;  %v1667_v36 = vrot.slane %v1659_v26, 2  ;;  %v1666_v37 = vrot.slane %v1658_v27, 2 }
 0x10e   : > { %1296 = vst [vmem:[#allocation1 + $0x3] ss:$4 sm:$0xff] %v1268_v32  ;;  %v1664_v32 = vrot.slane %v1656_v22, 2 }
 0x10f   : > { %1287 = vst [vmem:[#allocation1] ss:$4 sm:$0xff] %v1256_v35  ;;  %v1557_v35 = vsel %vm2715_vm11, %v1552_v20, %v1556_v21  ;;  %v1691_v43 = vsel %vm403_vm0, %v1659_v26, %v1667_v36  ;;  %v1693_v45 = vsel %vm407_vm1, %v1659_v26, %v1667_v36  ;;  %v1684_v46 = vsel %vm403_vm0, %v1658_v27, %v1666_v37  ;;  %v2489_v26 = vld [vmem:[%s3003_s5] ss:$0 sm:$0xff] }
 0x110   : > { %v1670_v39 = vsel %vm403_vm0, %v1656_v22, %v1664_v32  ;;  %v1672_v40 = vsel %vm407_vm1, %v1656_v22, %v1664_v32  ;;  %v1686_v17 = vsel %vm407_vm1, %v1658_v27, %v1666_v37  ;;  %v2339_v51 = vrot.slane %v1691_v43, 9 }
 0x111   : > { %v2333_v47 = vrot.slane %v1670_v39, 9  ;;  %v2334_v48 = vrot.slane %v1672_v40, 9  ;;  %v2340_v52 = vrot.slane %v1693_v45, 9 }
 0x113   : > { %v1699_v56 = vsel %vm2786_vm4, %v2333_v47, %v2334_v48 }
 0x116   : > { %v1297_v44 = vld.sshfl [vmem:[#allocation1] sm:$0xff pattern:$0x73625140] }
 0x117   : > { %1355 = vmatmul.bf16.vlgmr.msrb.gmra.mxu2 %v1297_v44  ;;  %1393 = vst [vmem:[#allocation1 + $0x1] ss:$4 sm:$0xff] %v1369_v53  ;;  %v2337_v53 = vrot.slane %v1684_v46, 9  ;;  %v1711_v44 = vsel %vm2786_vm4, %v2339_v51, %v2340_v52 }
 0x118   : > { %1396 = vst [vmem:[#allocation1 + $0x2] ss:$4 sm:$0xff] %v1370_v54  ;;  %v2338_v54 = vrot.slane %v1686_v17, 9 }
 0x119   : > { %1390 = vst [vmem:[#allocation1] ss:$4 sm:$0xff] %v1368_v3 }
 0x11a   : > { %1399 = vst [vmem:[#allocation1 + $0x3] ss:$4 sm:$0xff] %v1371_v63  ;;  %v1707_v59 = vsel %vm2786_vm4, %v2337_v53, %v2338_v54 }
 0x121   : > { %v1400_v29 = vld.sshfl [vmem:[#allocation1] sm:$0xff pattern:$0x73625140] }
 0x122   : > { %1458 = vmatmul.bf16.vlgmr.msrb.gmra.mxu3 %v1400_v29  ;;  %1576 = vst [vmem:[#allocation1] ss:$4 sm:$0xff] %v1518_v30 }
 0x123   : > { %1579 = vst [vmem:[#allocation1 + $0x1] ss:$4 sm:$0xff] %v1531_v34 }
 0x124   : > { %1582 = vst [vmem:[#allocation1 + $0x2] ss:$4 sm:$0xff] %v1544_v38 }
 0x125   : > { %1585 = vst [vmem:[#allocation1 + $0x3] ss:$4 sm:$0xff] %v1557_v35 }
 0x12c   : > { %v1586_v55 = vld.sshfl [vmem:[#allocation1] sm:$0xff pattern:$0x73625140] }
 0x12d   : > { %1644 = vmatmul.bf16.vlgmr.msra.gmra.mxu0 %v1586_v55  ;;  %1730 = vst [vmem:[#allocation1] ss:$4 sm:$0xff] %v1699_v56 }
 0x12e   : > { %1733 = vst [vmem:[#allocation1 + $0x1] ss:$4 sm:$0xff] %v1703_v57 }
 0x12f   : > { %1736 = vst [vmem:[#allocation1 + $0x2] ss:$4 sm:$0xff] %v1707_v59 }
 0x130   : > { %1739 = vst [vmem:[#allocation1 + $0x3] ss:$4 sm:$0xff] %v1711_v44 }
 0x131   : > { %1840 = vst [vmem:[#allocation1 + $0x10] ss:$2 sm:$0xff] %v1830_v58 }
 0x132   : > { %1842 = vst [vmem:[#allocation1 + $0x11] ss:$2 sm:$0xff] %v1831_v60 }
 0x137   : > { %v1740_v61 = vld.sshfl [vmem:[#allocation1] sm:$0xff pattern:$0x73625140] }
 0x138   : > { %1798 = vmatmul.bf16.vlgmr.msra.gmra.mxu1 %v1740_v61  ;;  %1836 = vst [vmem:[#allocation1] ss:$2 sm:$0xff] %v1828_v0 }
 0x139   : > { %1838 = vst [vmem:[#allocation1 + $0x1] ss:$2 sm:$0xff] %v1829_v2  ;;  %v1844_v46 = vld.sshfl [vmem:[#allocation1 + $0x10] sm:$0xff pattern:$0x75316420] }
 0x140   : > { %v1843_v45 = vld.sshfl [vmem:[#allocation1] sm:$0xff pattern:$0x75316420] }
 0x15b   : > { %v564_v63 = vpop.f32.mrf.mxu1 }
 0x163   : > { %v566_v10 = vpop.f32.mrf.mxu1 }
 0x16e   : > { %v753_v3 = vpop.f32.mrf.mxu2 }
 0x16f   : > { %v760_v12 = vadd.f32 %v753_v3, %v564_v63 }
 0x176   : > { %v755_v9 = vpop.f32.mrf.mxu2 }
 0x177   : > { %v761_v1 = vadd.f32 %v755_v9, %v566_v10 }
 0x179   : > { %v914_v6 = vpop.f32.mrf.mxu3 }
 0x17a   : > { %v921_v13 = vadd.f32 %v914_v6, %v760_v12 }
 0x17e   : > { %v1016_v8 = vpop.f32.mrf.mxu0 }
 0x17f   : > { %v1023_v15 = vadd.f32 %v1016_v8, %v921_v13 }
 0x181   : > { %v916_v11 = vpop.f32.mrf.mxu3 }
 0x182   : > { %v922_v19 = vadd.f32 %v916_v11, %v761_v1 }
 0x186   : > { %v1018_v14 = vpop.f32.mrf.mxu0 }
 0x187   : > { %v1024_v22 = vadd.f32 %v1018_v14, %v922_v19 }
 0x189   : > { %v1202_v7 = vpop.f32.mrf.mxu1 }
 0x18a   : > { %v1209_v18 = vadd.f32 %v1202_v7, %v1023_v15 }
 0x191   : > { %v1204_v4 = vpop.f32.mrf.mxu1 }
 0x192   : > { %v1210_v24 = vadd.f32 %v1204_v4, %v1024_v22 }
 0x19a   : > { %v1356_v62 = vpop.f32.mrf.mxu2 }
 0x19b   : > { %v1363_v5 = vadd.f32 %v1356_v62, %v1209_v18 }
 0x1a2   : > { %v1358_v23 = vpop.f32.mrf.mxu2 }
 0x1a3   : > { %v1364_v29 = vadd.f32 %v1358_v23, %v1210_v24 }
 0x1a5   : > { %v1459_v16 = vpop.f32.mrf.mxu3 }
 0x1a6   : > { %v1466_v21 = vadd.f32 %v1459_v16, %v1363_v5 }
 0x1aa   : > { %v1645_v20 = vpop.f32.mrf.mxu0 }
 0x1ab   : > { %v1652_v25 = vadd.f32 %v1645_v20, %v1466_v21 }
 0x1ad   : > { %v1461_v27 = vpop.f32.mrf.mxu3 }
 0x1ae   : > { %v1467_v31 = vadd.f32 %v1461_v27, %v1364_v29 }
 0x1b2   : > { %v1647_v34 = vpop.f32.mrf.mxu0 }
 0x1b3   : > { %v1653_v35 = vadd.f32 %v1647_v34, %v1467_v31 }
 0x1b5   : > { %v1799_v28 = vpop.f32.mrf.mxu1 }
 0x1b6   : > { %v1806_v30 = vadd.f32 %v1799_v28, %v1652_v25 }
 0x1b8   : > { %v1816_v32 = vmul.f32 %v2489_v26, %v1806_v30 }
 0x1ba   : > { %v1822_v36 = vadd.f32 %v2490_v33, %v1816_v32 }
 0x1bc   : > { %v1824_v39 = vmul.f32 0.1, %v1822_v36 }
 0x1bd   : > { %v1801_v37 = vpop.f32.mrf.mxu1 }
 0x1be   : > { %v1807_v38 = vadd.f32 %v1801_v37, %v1653_v35  ;;  %v1826_v42 = vmax.f32 %v1822_v36, %v1824_v39 }
 0x1c0   : > { %v1817_v40 = vmul.f32 %v2489_v26, %v1807_v38  ;;  %v1847_v47 = vadd.f32 %v1843_v45, %v1826_v42 }
 0x1c2   : > { %v1823_v41 = vadd.f32 %v2490_v33, %v1817_v40 }
 0x1c4   : > { %v1825_v43 = vmul.f32 0.1, %v1823_v41 }
 0x1c6   : > { %v1827_v17 = vmax.f32 %v1823_v41, %v1825_v43 }
 0x1c8   : > { %v1848_v48 = vadd.f32 %v1844_v46, %v1827_v17 }
 0x1ca   : > { %v2476_v49 = vpack.c.bf16 %v1848_v48, %v1847_v47 }
 0x1cc   : > { %2477 = vst [vmem:[%s278_s17] sm:$0xff] %v2476_v49  }
 0x1cd PF: > { %s17_s24 = sadd.s32 1, %s2497_s24  }
 0x1ce   : > { %p14_p4 = scmp.ge.s32.totalorder %s17_s24, 4  }
 0x1d0   :  { %16 = sbr.rel (!%p14_p4) target bundleno = 1 (0x1), region = 124 }

// kernel: udarknet_forward.13
= control target key start
LH: loop header
LB: loop body
LE: loop exit
PB: predicated region body
PF: predicated region fallthrough
CT: control target
= control target key end

     0   :  { %s815_s15 = smov 0   ;;  %s817_s16 = smov 0   ;;  %s906_s0 = inlined_call_operand.vmem [shape: bf16[2,4,4,256], index: 0, kind: input, shape index: {}]   ;;  %s907_s1 = inlined_call_operand.vmem [shape: bf16[1,256,128], index: 1, kind: input, shape index: {}]   ;;  %s908_s2 = inlined_call_operand.vmem [shape: f32[1,128], index: 2, kind: input, shape index: {}]   ;;  %s909_s3 = inlined_call_operand.vmem [shape: f32[1,128], index: 3, kind: input, shape index: {}]   ;;  %s910_s4 = inlined_call_operand.vmem [shape: bf16[2,16,128], index: 4, kind: output, shape index: {}]  }
   0x1   :  { %s819_s17 = smov 0  }
   0x2 LB: > { %s33_s18 = sadd.s32 1, %s784_s16  ;;  %p646_p0 = scmp.ge.s32.totalorder %s788_s17, 1  ;;  %s788_s17 = sphi %s819_s17, %s14_s17   ;;  %s784_s16 = sphi %s817_s16, %s912_s16   ;;  %s780_s15 = sphi %s815_s15, %s911_s15  }
   0x3   : > { %p35_p1 = scmp.ge.s32.totalorder %s33_s18, 2  ;;  %p222_p2 = scmp.lt.s32.totalorder %s788_s17, 3 }
   0x5   : > { %s914_s18 = smov (%p35_p1, %s33_s18), 0  ;;  %p223_p3 = pnand %p646_p0, %p222_p2 }
   0x6   : > { %p270_p4 = scmp.lt.s32.totalorder (!%p223_p3), %s780_s15, 1 }
   0x7   : > { %226 = sbr.rel (%p223_p3) target bundleno = 188 (0xbc), region = 36 }
   0xc   : > { %v726_v0 = vld [vmem:[%s907_s1 + $0x38] sm:$0xff]  ;;  %v725_v2 = vld [vmem:[%s907_s1 + $0x30] sm:$0xff]  ;;  %s916_s15 = smov (!%p270_p4, %s780_s15), 1  ;;  %v724_v4 = vld [vmem:[%s907_s1 + $0x28] sm:$0xff] }
   0xd   : > { %v734_v1 = vld [vmem:[%s907_s1 + $0x78] sm:$0xff]  ;;  %457 = vmatpush.bf16.msra.mxu0 %v726_v0  ;;  %v733_v3 = vld [vmem:[%s907_s1 + $0x70] sm:$0xff]  ;;  %s717_s29 = sshll.u32 %s916_s15, 4  ;;  %v732_v5 = vld [vmem:[%s907_s1 + $0x68] sm:$0xff]  ;;  %s718_s11 = sshll.u32 %s916_s15, 3 }
   0xe   : > { %471 = vmatpush.bf16.msra.mxu1 %v734_v1  ;;  %s277_s8 = scalar_lea.vmem %s906_s0, %s717_s29  ;;  %v723_v10 = vld [vmem:[%s907_s1 + $0x20] sm:$0xff]  ;;  %v722_v12 = vld [vmem:[%s907_s1 + $0x18] sm:$0xff]  ;;  %v721_v14 = vld [vmem:[%s907_s1 + $0x10] sm:$0xff]  ;;  %s301_s14 = scalar_lea.vmem %s910_s4, %s718_s11 }
   0xf   : > { %v308_v6 = vld [vmem:[%s277_s8] sm:$0xf]  ;;  %v309_v7 = vld [vmem:[%s277_s8 + $0x4] sm:$0xf]  ;;  %v310_v8 = vld [vmem:[%s277_s8 + $0x8] sm:$0xf] }
  0x10   : > { %v311_v9 = vld [vmem:[%s277_s8 + $0xc] sm:$0xf]  ;;  %347 = vst [vmem:[#allocation1] ss:$4 sm:$0xff] %v308_v6  ;;  %v731_v11 = vld [vmem:[%s907_s1 + $0x60] sm:$0xff]  ;;  %v730_v13 = vld [vmem:[%s907_s1 + $0x58] sm:$0xff] }
  0x11   : > { %458 = vmatpush.bf16.msra.mxu0 %v725_v2  ;;  %350 = vst [vmem:[#allocation1 + $0x1] ss:$4 sm:$0xff] %v309_v7  ;;  %v729_v15 = vld [vmem:[%s907_s1 + $0x50] sm:$0xff]  ;;  %v720_v16 = vld [vmem:[%s907_s1 + $0x8] sm:$0xff]  ;;  %v719_v18 = vld [vmem:[%s907_s1] sm:$0xff] }
  0x12   : > { %472 = vmatpush.bf16.msra.mxu1 %v733_v3  ;;  %353 = vst [vmem:[#allocation1 + $0x2] ss:$4 sm:$0xff] %v310_v8  ;;  %v728_v17 = vld [vmem:[%s907_s1 + $0x48] sm:$0xff]  ;;  %v727_v19 = vld [vmem:[%s907_s1 + $0x40] sm:$0xff] }
  0x13   : > { %356 = vst [vmem:[#allocation1 + $0x3] ss:$4 sm:$0xff] %v311_v9  ;;  %v764_v25 = vld [vmem:[%s908_s2] ss:$0 sm:$0xff] }
  0x14   : > { %v765_v29 = vld [vmem:[%s909_s3] ss:$0 sm:$0xff] }
  0x15   : > { %459 = vmatpush.bf16.msra.mxu0 %v724_v4 }
  0x16   : > { %473 = vmatpush.bf16.msra.mxu1 %v732_v5 }
  0x19   : > { %460 = vmatpush.bf16.msra.mxu0 %v723_v10 }
  0x1a   : > { %474 = vmatpush.bf16.msra.mxu1 %v731_v11  ;;  %v357_v20 = vld.sshfl [vmem:[#allocation1] sm:$0xff pattern:$0x73625140]  ;;  %v358_v21 = vld.sshfl [vmem:[#allocation1 + $0x8] sm:$0xff pattern:$0x73625140] }
  0x1d   : > { %461 = vmatpush.bf16.msra.mxu0 %v722_v12 }
  0x1e   : > { %475 = vmatpush.bf16.msra.mxu1 %v730_v13 }
  0x21   : > { %462 = vmatpush.bf16.msra.mxu0 %v721_v14 }
  0x22   : > { %476 = vmatpush.bf16.msra.mxu1 %v729_v15 }
  0x25   : > { %463 = vmatpush.bf16.msra.mxu0 %v720_v16 }
  0x26   : > { %477 = vmatpush.bf16.msra.mxu1 %v728_v17 }
  0x29   : > { %464 = vmatpush.bf16.msra.mxu0 %v719_v18 }
  0x2a   : > { %478 = vmatpush.bf16.msra.mxu1 %v727_v19 }
  0x2c   : > { %465 = vmatmul.bf16.vlgmr.msra.gmra.mxu0 %v357_v20 }
  0x2d   : > { %479 = vmatmul.bf16.vlgmr.msra.gmra.mxu1 %v358_v21 }
  0xa9   : > { %v466_v22 = vpop.f32.mrf.mxu0 }
  0xaa   : > { %v480_v23 = vpop.f32.mrf.mxu1 }
  0xab   : > { %v481_v24 = vadd.f32 %v480_v23, %v466_v22 }
  0xad   : > { %v498_v28 = vmul.f32 %v764_v25, %v481_v24 }
  0xaf   : > { %v504_v32 = vadd.f32 %v765_v29, %v498_v28 }
  0xb1   : > { %v468_v26 = vpop.f32.mrf.mxu0 }
  0xb2   : > { %v482_v27 = vpop.f32.mrf.mxu1 }
  0xb3   : > { %v483_v30 = vadd.f32 %v482_v27, %v468_v26 }
  0xb5   : > { %v499_v31 = vmul.f32 %v764_v25, %v483_v30 }
  0xb7   : > { %v505_v33 = vadd.f32 %v765_v29, %v499_v31 }
  0xb9   : > { %v738_v34 = vpack.c.bf16 %v505_v33, %v504_v32 }
  0xbb   : > { %739 = vst [vmem:[%s301_s14] sm:$0xff] %v738_v34  }
  0xbc PF: > { %s14_s17 = sadd.s32 1, %s788_s17   ;;  %s911_s15 = smov %s784_s16 }
  0xbd   : > { %p11_p5 = scmp.ge.s32.totalorder %s14_s17, 4   ;;  %s912_s16 = smov %s914_s18 }
  0xbf   :  { %13 = sbr.rel (!%p11_p5) target bundleno = 2 (0x2), region = 86 }

// kernel: udarknet_forward.15
= control target key start
LH: loop header
LB: loop body
LE: loop exit
PB: predicated region body
PF: predicated region fallthrough
CT: control target
= control target key end

     0   :  { %s1002_s15 = smov 0   ;;  %s1004_s16 = smov 0   ;;  %s1121_s0 = inlined_call_operand.vmem [shape: bf16[2,8,8,256], index: 0, kind: input, shape index: {}]   ;;  %s1122_s1 = inlined_call_operand.vmem [shape: bf16[1,256,128], index: 1, kind: input, shape index: {}]   ;;  %s1123_s2 = inlined_call_operand.vmem [shape: f32[1,128], index: 2, kind: input, shape index: {}]   ;;  %s1124_s3 = inlined_call_operand.vmem [shape: f32[1,128], index: 3, kind: input, shape index: {}]   ;;  %s1125_s4 = inlined_call_operand.vmem [shape: bf16[2,64,128], index: 4, kind: output, shape index: {}]  }
   0x1   :  { %s1006_s17 = smov 0  }
   0x2 LB: > { %s33_s18 = sadd.s32 1, %s971_s16  ;;  %p759_p0 = scmp.ge.s32.totalorder %s975_s17, 1  ;;  %s975_s17 = sphi %s1006_s17, %s14_s17   ;;  %s971_s16 = sphi %s1004_s16, %s1127_s16   ;;  %s967_s15 = sphi %s1002_s15, %s1126_s15  }
   0x3   : > { %p35_p1 = scmp.ge.s32.totalorder %s33_s18, 2  ;;  %p222_p2 = scmp.lt.s32.totalorder %s975_s17, 3 }
   0x5   : > { %s1129_s18 = smov (%p35_p1, %s33_s18), 0  ;;  %p223_p3 = pnand %p759_p0, %p222_p2 }
   0x6   : > { %p270_p4 = scmp.lt.s32.totalorder (!%p223_p3), %s967_s15, 1 }
   0x7   : > { %226 = sbr.rel (%p223_p3) target bundleno = 210 (0xd2), region = 36 }
   0xc   : > { %v879_v0 = vld [vmem:[%s1122_s1 + $0x38] sm:$0xff]  ;;  %v878_v2 = vld [vmem:[%s1122_s1 + $0x30] sm:$0xff]  ;;  %v877_v4 = vld [vmem:[%s1122_s1 + $0x28] sm:$0xff]  ;;  %s1131_s15 = smov (!%p270_p4, %s967_s15), 1 }
   0xd   : > { %v887_v1 = vld [vmem:[%s1122_s1 + $0x78] sm:$0xff]  ;;  %498 = vmatpush.bf16.msra.mxu0 %v879_v0  ;;  %911 = vmatpush.bf16.msra.mxu2 %v879_v0  ;;  %v886_v3 = vld [vmem:[%s1122_s1 + $0x70] sm:$0xff]  ;;  %v885_v5 = vld [vmem:[%s1122_s1 + $0x68] sm:$0xff]  ;;  %s862_s21 = sshll.u32 %s1131_s15, 6  ;;  %s863_s11 = sshll.u32 %s1131_s15, 5 }
   0xe   : > { %527 = vmatpush.bf16.msra.mxu1 %v887_v1  ;;  %919 = vmatpush.bf16.msra.mxu3 %v887_v1  ;;  %v876_v6 = vld [vmem:[%s1122_s1 + $0x20] sm:$0xff]  ;;  %v875_v8 = vld [vmem:[%s1122_s1 + $0x18] sm:$0xff]  ;;  %v874_v10 = vld [vmem:[%s1122_s1 + $0x10] sm:$0xff]  ;;  %s1069_s26 = scalar_lea.vmem %s1121_s0, %s862_s21  ;;  %s1106_s14 = scalar_lea.vmem %s1125_s4, %s863_s11 }
   0xf   : > { %v884_v7 = vld [vmem:[%s1122_s1 + $0x60] sm:$0xff]  ;;  %v883_v9 = vld [vmem:[%s1122_s1 + $0x58] sm:$0xff]  ;;  %v882_v11 = vld [vmem:[%s1122_s1 + $0x50] sm:$0xff] }
  0x10   : > { %v873_v12 = vld [vmem:[%s1122_s1 + $0x8] sm:$0xff]  ;;  %v872_v14 = vld [vmem:[%s1122_s1] sm:$0xff]  ;;  %v774_v28 = vld [vmem:[%s1069_s26 + $0x10] sm:$0xf] }
  0x11   : > { %499 = vmatpush.bf16.msra.mxu0 %v878_v2  ;;  %912 = vmatpush.bf16.msra.mxu2 %v878_v2  ;;  %v881_v13 = vld [vmem:[%s1122_s1 + $0x48] sm:$0xff]  ;;  %v880_v15 = vld [vmem:[%s1122_s1 + $0x40] sm:$0xff]  ;;  %v867_v29 = vld [vmem:[%s1069_s26 + $0x14] sm:$0xf0] }
  0x12   : > { %528 = vmatpush.bf16.msra.mxu1 %v886_v3  ;;  %920 = vmatpush.bf16.msra.mxu3 %v886_v3  ;;  %v766_v16 = vld [vmem:[%s1069_s26] sm:$0xf]  ;;  %v865_v17 = vld [vmem:[%s1069_s26 + $0x4] sm:$0xf0]  ;;  %v864_v20 = vld [vmem:[%s1069_s26 + $0x4] sm:$0xf]  ;;  %v775_v36 = vor.u32 %v867_v29, %v774_v28 }
  0x13   : > { %v782_v18 = vld [vmem:[%s1069_s26 + $0x20] sm:$0xf]  ;;  %v869_v19 = vld [vmem:[%s1069_s26 + $0x24] sm:$0xf0]  ;;  %v768_v21 = vld [vmem:[%s1069_s26 + $0x8] sm:$0xf0]  ;;  %v767_v24 = vor.u32 %v865_v17, %v766_v16 }
  0x14   : > { %v868_v22 = vld [vmem:[%s1069_s26 + $0x24] sm:$0xf]  ;;  %v784_v23 = vld [vmem:[%s1069_s26 + $0x28] sm:$0xf0]  ;;  %v783_v25 = vor.u32 %v869_v19, %v782_v18  ;;  %v771_v26 = vor.u32 %v864_v20, %v768_v21  ;;  %v790_v30 = vld [vmem:[%s1069_s26 + $0x30] sm:$0xf] }
  0x15   : > { %500 = vmatpush.bf16.msra.mxu0 %v877_v4  ;;  %913 = vmatpush.bf16.msra.mxu2 %v877_v4  ;;  %v787_v27 = vor.u32 %v868_v22, %v784_v23  ;;  %v871_v31 = vld [vmem:[%s1069_s26 + $0x34] sm:$0xf0]  ;;  %v866_v32 = vld [vmem:[%s1069_s26 + $0x14] sm:$0xf]  ;;  %v776_v33 = vld [vmem:[%s1069_s26 + $0x18] sm:$0xf0] }
  0x16   : > { %529 = vmatpush.bf16.msra.mxu1 %v885_v5  ;;  %921 = vmatpush.bf16.msra.mxu3 %v885_v5  ;;  %v870_v34 = vld [vmem:[%s1069_s26 + $0x34] sm:$0xf]  ;;  %v792_v35 = vld [vmem:[%s1069_s26 + $0x38] sm:$0xf0]  ;;  %v791_v37 = vor.u32 %v871_v31, %v790_v30  ;;  %v779_v38 = vor.u32 %v866_v32, %v776_v33  ;;  %v951_v43 = vld [vmem:[%s1123_s2] ss:$0 sm:$0xff] }
  0x17   : > { %v795_v39 = vor.u32 %v870_v34, %v792_v35  ;;  %v952_v49 = vld [vmem:[%s1124_s3] ss:$0 sm:$0xff] }
  0x19   : > { %501 = vmatpush.bf16.msra.mxu0 %v876_v6  ;;  %914 = vmatpush.bf16.msra.mxu2 %v876_v6 }
  0x1a   : > { %530 = vmatpush.bf16.msra.mxu1 %v884_v7  ;;  %922 = vmatpush.bf16.msra.mxu3 %v884_v7 }
  0x1d   : > { %502 = vmatpush.bf16.msra.mxu0 %v875_v8  ;;  %915 = vmatpush.bf16.msra.mxu2 %v875_v8 }
  0x1e   : > { %531 = vmatpush.bf16.msra.mxu1 %v883_v9  ;;  %923 = vmatpush.bf16.msra.mxu3 %v883_v9 }
  0x21   : > { %503 = vmatpush.bf16.msra.mxu0 %v874_v10  ;;  %916 = vmatpush.bf16.msra.mxu2 %v874_v10 }
  0x22   : > { %532 = vmatpush.bf16.msra.mxu1 %v882_v11  ;;  %924 = vmatpush.bf16.msra.mxu3 %v882_v11 }
  0x25   : > { %504 = vmatpush.bf16.msra.mxu0 %v873_v12  ;;  %917 = vmatpush.bf16.msra.mxu2 %v873_v12 }
  0x26   : > { %533 = vmatpush.bf16.msra.mxu1 %v881_v13  ;;  %925 = vmatpush.bf16.msra.mxu3 %v881_v13 }
  0x29   : > { %505 = vmatpush.bf16.msra.mxu0 %v872_v14  ;;  %918 = vmatpush.bf16.msra.mxu2 %v872_v14 }
  0x2a   : > { %534 = vmatpush.bf16.msra.mxu1 %v880_v15  ;;  %926 = vmatpush.bf16.msra.mxu3 %v880_v15 }
  0x2c   : > { %506 = vmatmul.bf16.vlgmr.msra.gmra.mxu0 %v767_v24  ;;  %516 = vmatmul.bf16.vlgmr.msra.gmra.mxu2 %v783_v25 }
  0x2d   : > { %535 = vmatmul.bf16.vlgmr.msra.gmra.mxu1 %v771_v26  ;;  %545 = vmatmul.bf16.vlgmr.msra.gmra.mxu3 %v787_v27 }
  0x3c   : > { %511 = vmatmul.bf16.gmra.mxu0 %v775_v36  ;;  %521 = vmatmul.bf16.gmra.mxu2 %v791_v37 }
  0x3d   : > { %540 = vmatmul.bf16.gmra.mxu1 %v779_v38  ;;  %550 = vmatmul.bf16.gmra.mxu3 %v795_v39 }
  0xa9   : > { %v507_v40 = vpop.f32.mrf.mxu0 }
  0xaa   : > { %v536_v41 = vpop.f32.mrf.mxu1 }
  0xab   : > { %v537_v42 = vadd.f32 %v536_v41, %v507_v40 }
  0xad   : > { %v587_v48 = vmul.f32 %v951_v43, %v537_v42 }
  0xaf   : > { %v517_v44 = vpop.f32.mrf.mxu2  ;;  %v599_v53 = vadd.f32 %v952_v49, %v587_v48 }
  0xb0   : > { %v546_v45 = vpop.f32.mrf.mxu3 }
  0xb1   : > { %v509_v46 = vpop.f32.mrf.mxu0  ;;  %v547_v51 = vadd.f32 %v546_v45, %v517_v44 }
  0xb2   : > { %v538_v47 = vpop.f32.mrf.mxu1 }
  0xb3   : > { %v539_v50 = vadd.f32 %v538_v47, %v509_v46  ;;  %v591_v57 = vmul.f32 %v951_v43, %v547_v51 }
  0xb5   : > { %v588_v52 = vmul.f32 %v951_v43, %v539_v50  ;;  %v603_v63 = vadd.f32 %v952_v49, %v591_v57 }
  0xb7   : > { %v600_v54 = vadd.f32 %v952_v49, %v588_v52  ;;  %v519_v55 = vpop.f32.mrf.mxu2 }
  0xb8   : > { %v548_v56 = vpop.f32.mrf.mxu3 }
  0xb9   : > { %v891_v58 = vpack.c.bf16 %v600_v54, %v599_v53  ;;  %v549_v59 = vadd.f32 %v548_v56, %v519_v55  ;;  %v512_v60 = vpop.f32.mrf.mxu0 }
  0xba   : > { %v541_v61 = vpop.f32.mrf.mxu1 }
  0xbb   : > { %892 = vst [vmem:[%s1106_s14] sm:$0xff] %v891_v58   ;;  %v592_v62 = vmul.f32 %v951_v43, %v549_v59  ;;  %v542_v2 = vadd.f32 %v541_v61, %v512_v60 }
  0xbd   : > { %v604_v0 = vadd.f32 %v952_v49, %v592_v62  ;;  %v589_v7 = vmul.f32 %v951_v43, %v542_v2 }
  0xbf   : > { %v901_v1 = vpack.c.bf16 %v604_v0, %v603_v63  ;;  %v522_v3 = vpop.f32.mrf.mxu2  ;;  %v601_v11 = vadd.f32 %v952_v49, %v589_v7 }
  0xc0   : > { %v551_v4 = vpop.f32.mrf.mxu3 }
  0xc1   : > { %909 = vst [vmem:[%s1106_s14 + $0x10] sm:$0xff] %v901_v1   ;;  %v514_v5 = vpop.f32.mrf.mxu0  ;;  %v552_v9 = vadd.f32 %v551_v4, %v522_v3 }
  0xc2   : > { %v543_v6 = vpop.f32.mrf.mxu1 }
  0xc3   : > { %v544_v8 = vadd.f32 %v543_v6, %v514_v5  ;;  %v593_v15 = vmul.f32 %v951_v43, %v552_v9 }
  0xc5   : > { %v590_v10 = vmul.f32 %v951_v43, %v544_v8  ;;  %v605_v19 = vadd.f32 %v952_v49, %v593_v15 }
  0xc7   : > { %v602_v12 = vadd.f32 %v952_v49, %v590_v10  ;;  %v524_v13 = vpop.f32.mrf.mxu2 }
  0xc8   : > { %v553_v14 = vpop.f32.mrf.mxu3 }
  0xc9   : > { %v896_v16 = vpack.c.bf16 %v602_v12, %v601_v11  ;;  %v554_v17 = vadd.f32 %v553_v14, %v524_v13 }
  0xcb   : > { %908 = vst [vmem:[%s1106_s14 + $0x8] sm:$0xff] %v896_v16   ;;  %v594_v18 = vmul.f32 %v951_v43, %v554_v17 }
  0xcd   : > { %v606_v20 = vadd.f32 %v952_v49, %v594_v18 }
  0xcf   : > { %v906_v21 = vpack.c.bf16 %v606_v20, %v605_v19 }
  0xd1   : > { %910 = vst [vmem:[%s1106_s14 + $0x18] sm:$0xff] %v906_v21  }
  0xd2 PF: > { %s14_s17 = sadd.s32 1, %s975_s17   ;;  %s1126_s15 = smov %s971_s16 }
  0xd3   : > { %p11_p5 = scmp.ge.s32.totalorder %s14_s17, 4   ;;  %s1127_s16 = smov %s1129_s18 }
  0xd5   :  { %13 = sbr.rel (!%p11_p5) target bundleno = 2 (0x2), region = 83 }

// kernel: udarknet_forward.14
= control target key start
LH: loop header
LB: loop body
LE: loop exit
PB: predicated region body
PF: predicated region fallthrough
CT: control target
= control target key end

     0   :  { %s2228_s12 = smov 0   ;;  %s2230_s13 = smov 0   ;;  %s2603_s0 = inlined_call_operand.vmem [shape: bf16[2,4,4,128], index: 0, kind: input, shape index: {}]   ;;  %s2604_s1 = inlined_call_operand.vmem [shape: bf16[9,128,128], index: 1, kind: input, shape index: {}]   ;;  %s2605_s2 = inlined_call_operand.vmem [shape: f32[1,128], index: 2, kind: input, shape index: {}]   ;;  %s2606_s3 = inlined_call_operand.vmem [shape: bf16[2,4,16,128], index: 3, kind: output, shape index: {}]  }
   0x1   :  { %s2232_s14 = smov 0  }
   0x2 LB: > { %s32_s15 = sadd.s32 1, %s2202_s13  ;;  %p1639_p0 = scmp.ge.s32.totalorder %s2206_s14, 1  ;;  %s2206_s14 = sphi %s2232_s14, %s13_s14   ;;  %s2202_s13 = sphi %s2230_s13, %s2616_s13   ;;  %s2198_s12 = sphi %s2228_s12, %s2615_s12  }
   0x3   : > { %p34_p1 = scmp.ge.s32.totalorder %s32_s15, 2  ;;  %p187_p2 = scmp.lt.s32.totalorder %s2206_s14, 3 }
   0x5   : > { %s2618_s15 = smov (%p34_p1, %s32_s15), 0  ;;  %p188_p3 = pnand %p1639_p0, %p187_p2 }
   0x6   : > { %p228_p4 = scmp.lt.s32.totalorder (!%p188_p3), %s2198_s12, 1 }
   0x7   : > { %191 = sbr.rel (%p188_p3) target bundleno = 272 (0x110), region = 32 }
   0xc   : > { %v2071_v0 = vld [vmem:[%s2604_s1 + $0x38] sm:$0xff]  ;;  %v2070_v2 = vld [vmem:[%s2604_s1 + $0x30] sm:$0xff]  ;;  %v2069_v8 = vld [vmem:[%s2604_s1 + $0x28] sm:$0xff]  ;;  %s2620_s12 = smov (!%p228_p4, %s2198_s12), 1  ;;  %vm269_vm0 = vcmask 1042432   ;;  %vm513_vm3 = vcmask 1041408  }
   0xd   : > { %v2087_v1 = vld [vmem:[%s2604_s1 + $0xb8] sm:$0xff]  ;;  %378 = vmatpush.bf16.msra.mxu0 %v2071_v0  ;;  %v2086_v5 = vld [vmem:[%s2604_s1 + $0xb0] sm:$0xff]  ;;  %v2085_v9 = vld [vmem:[%s2604_s1 + $0xa8] sm:$0xff]  ;;  %s2062_s19 = sshll.u32 %s2620_s12, 3  ;;  %vm270_vm1 = vsmask.f32 2304 }
   0xe   : > { %v2095_v3 = vld [vmem:[%s2604_s1 + $0xf8] sm:$0xff]  ;;  %676 = vmatpush.bf16.msra.mxu2 %v2087_v1  ;;  %v2094_v6 = vld [vmem:[%s2604_s1 + $0xf0] sm:$0xff]  ;;  %v2093_v10 = vld [vmem:[%s2604_s1 + $0xe8] sm:$0xff]  ;;  %s235_s28 = scalar_lea.vmem %s2603_s0, %s2062_s19  ;;  %vm517_vm4 = vcmask 1043458   ;;  %vm539_vm5 = vsmask.f32 1280 }
   0xf   : > { %v2079_v4 = vld [vmem:[%s2604_s1 + $0x78] sm:$0xff]  ;;  %779 = vmatpush.bf16.msra.mxu3 %v2095_v3  ;;  %v2078_v7 = vld [vmem:[%s2604_s1 + $0x70] sm:$0xff]  ;;  %v2077_v11 = vld [vmem:[%s2604_s1 + $0x68] sm:$0xff]  ;;  %vm540_vm6 = vsmask.f32 3336 }
  0x10   : > { %481 = vmatpush.bf16.msra.mxu1 %v2079_v4  ;;  %v2068_v12 = vld [vmem:[%s2604_s1 + $0x20] sm:$0xff]  ;;  %vm2300_vm2 = vmand %vm269_vm0, %vm270_vm1  ;;  %v272_v17 = vld [vmem:[#allocation2] sm:$0x7]  ;;  %vm542_vm7 = vsmask.f32 5392 }
  0x11   : > { %379 = vmatpush.bf16.msra.mxu0 %v2070_v2  ;;  %v2084_v13 = vld [vmem:[%s2604_s1 + $0xa0] sm:$0xff]  ;;  %v275_v18 = vld [vmem:[#allocation2 + $0x4] sm:$0x7]  ;;  %v2067_v19 = vld [vmem:[%s2604_s1 + $0x18] sm:$0xff]  ;;  %v273_v21 = vsel %vm2300_vm2, 0, %v272_v17 }
  0x12   : > { %677 = vmatpush.bf16.msra.mxu2 %v2086_v5  ;;  %v2092_v14 = vld [vmem:[%s2604_s1 + $0xe0] sm:$0xff]  ;;  %v2083_v20 = vld [vmem:[%s2604_s1 + $0x98] sm:$0xff]  ;;  %v276_v22 = vsel %vm2300_vm2, 0, %v275_v18  ;;  %v278_v23 = vld [vmem:[#allocation2 + $0x8] sm:$0x7] }
  0x13   : > { %780 = vmatpush.bf16.msra.mxu3 %v2094_v6  ;;  %v2076_v15 = vld [vmem:[%s2604_s1 + $0x60] sm:$0xff]  ;;  %v2091_v24 = vld [vmem:[%s2604_s1 + $0xd8] sm:$0xff]  ;;  %274 = vst [vmem:[#allocation2] sm:$0x7] %v273_v21  ;;  %v279_v25 = vsel %vm2300_vm2, 0, %v278_v23  ;;  %v2066_v31 = vld [vmem:[%s2604_s1 + $0x10] sm:$0xff] }
  0x14   : > { %482 = vmatpush.bf16.msra.mxu1 %v2078_v7  ;;  %v281_v26 = vld [vmem:[#allocation2 + $0xc] sm:$0x7]  ;;  %v2075_v27 = vld [vmem:[%s2604_s1 + $0x58] sm:$0xff]  ;;  %277 = vst [vmem:[#allocation2 + $0x4] sm:$0x7] %v276_v22  ;;  %v2065_v37 = vld [vmem:[%s2604_s1 + $0x8] sm:$0xff] }
  0x15   : > { %380 = vmatpush.bf16.msra.mxu0 %v2069_v8  ;;  %v282_v28 = vsel %vm2300_vm2, 0, %v281_v26  ;;  %v287_v29 = vld [vmem:[%s235_s28] sm:$0x3]  ;;  %280 = vst [vmem:[#allocation2 + $0x8] sm:$0x7] %v279_v25  ;;  %v2082_v33 = vld [vmem:[%s2604_s1 + $0x90] sm:$0xff]  ;;  %vm2409_vm9 = vmor %vm539_vm5, %vm540_vm6 }
  0x16   : > { %678 = vmatpush.bf16.msra.mxu2 %v2085_v9  ;;  %v288_v30 = vld [vmem:[%s235_s28 + $0x2] sm:$0x3]  ;;  %283 = vst [vmem:[#allocation2 + $0xc] sm:$0x7] %v282_v28  ;;  %v289_v32 = vld [vmem:[%s235_s28 + $0x4] sm:$0x3]  ;;  %vm2419_vm10 = vmor %vm2409_vm9, %vm542_vm7 }
  0x17   : > { %781 = vmatpush.bf16.msra.mxu3 %v2093_v10  ;;  %v290_v34 = vld [vmem:[%s235_s28 + $0x6] sm:$0x3]  ;;  %291 = vst [vmem:[#allocation2] sm:$0x3] %v287_v29  ;;  %v2090_v35 = vld [vmem:[%s2604_s1 + $0xd0] sm:$0xff]  ;;  %v2081_v38 = vld [vmem:[%s2604_s1 + $0x88] sm:$0xff] }
  0x18   : > { %483 = vmatpush.bf16.msra.mxu1 %v2077_v11  ;;  %v2074_v36 = vld [vmem:[%s2604_s1 + $0x50] sm:$0xff]  ;;  %292 = vst [vmem:[#allocation2 + $0x4] sm:$0x3] %v288_v30  ;;  %v2089_v39 = vld [vmem:[%s2604_s1 + $0xc8] sm:$0xff]  ;;  %v2064_v41 = vld [vmem:[%s2604_s1] sm:$0xff]  ;;  %s2063_s28 = sshll.u32 %s2620_s12, 5 }
  0x19   : > { %381 = vmatpush.bf16.msra.mxu0 %v2068_v12  ;;  %293 = vst [vmem:[#allocation2 + $0x8] sm:$0x3] %v289_v32  ;;  %v2073_v40 = vld [vmem:[%s2604_s1 + $0x48] sm:$0xff]  ;;  %v2103_v42 = vld [vmem:[%s2604_s1 + $0x138] sm:$0xff]  ;;  %v2080_v43 = vld [vmem:[%s2604_s1 + $0x80] sm:$0xff]  ;;  %s2588_s4 = scalar_lea.vmem %s2606_s3, %s2063_s28 }
  0x1a   : > { %679 = vmatpush.bf16.msra.mxu2 %v2084_v13  ;;  %294 = vst [vmem:[#allocation2 + $0xc] sm:$0x3] %v290_v34  ;;  %v2119_v44 = vld [vmem:[%s2604_s1 + $0x1b8] sm:$0xff]  ;;  %v2088_v46 = vld [vmem:[%s2604_s1 + $0xc0] sm:$0xff]  ;;  %v2102_v51 = vld [vmem:[%s2604_s1 + $0x130] sm:$0xff] }
  0x1b   : > { %782 = vmatpush.bf16.msra.mxu3 %v2092_v14  ;;  %v2072_v47 = vld [vmem:[%s2604_s1 + $0x40] sm:$0xff]  ;;  %v2127_v52 = vld [vmem:[%s2604_s1 + $0x1f8] sm:$0xff]  ;;  %v2118_v57 = vld [vmem:[%s2604_s1 + $0x1b0] sm:$0xff]  ;;  %vm544_vm8 = vsmask.f32 7448 }
  0x1c   : > { %484 = vmatpush.bf16.msra.mxu1 %v2076_v15  ;;  %v2111_v53 = vld [vmem:[%s2604_s1 + $0x178] sm:$0xff]  ;;  %v2101_v62 = vld [vmem:[%s2604_s1 + $0x128] sm:$0xff]  ;;  %v2126_v63 = vld [vmem:[%s2604_s1 + $0x1f0] sm:$0xff] }
  0x1d   : > { %382 = vmatpush.bf16.msra.mxu0 %v2067_v19  ;;  %v2117_v3 = vld [vmem:[%s2604_s1 + $0x1a8] sm:$0xff]  ;;  %v2110_v4 = vld [vmem:[%s2604_s1 + $0x170] sm:$0xff]  ;;  %v2100_v22 = vld [vmem:[%s2604_s1 + $0x120] sm:$0xff] }
  0x1e   : > { %680 = vmatpush.bf16.msra.mxu2 %v2083_v20  ;;  %v295_v45 = vld [vmem:[#allocation2] sm:$0x3]  ;;  %vm2435_vm11 = vmor %vm2419_vm10, %vm544_vm8  ;;  %v2098_v16 = vld [vmem:[%s2604_s1 + $0x110] sm:$0xff] }
  0x1f   : > { %783 = vmatpush.bf16.msra.mxu3 %v2091_v24  ;;  %v296_v48 = vld [vmem:[#allocation2 + $0x4] sm:$0x3]  ;;  %318 = vst [vmem:[#allocation1] ss:$4 sm:$0xff] %v295_v45  ;;  %v499_v50 = vld [vmem:[#allocation2] sm:$0x7] }
  0x20   : > { %485 = vmatpush.bf16.msra.mxu1 %v2075_v27  ;;  %v297_v49 = vld [vmem:[#allocation2 + $0x8] sm:$0x3]  ;;  %321 = vst [vmem:[#allocation1 + $0x1] ss:$4 sm:$0xff] %v296_v48  ;;  %v500_v55 = vld [vmem:[#allocation2 + $0x4] sm:$0x7] }
  0x21   : > { %383 = vmatpush.bf16.msra.mxu0 %v2066_v31  ;;  %v298_v54 = vld [vmem:[#allocation2 + $0xc] sm:$0x3]  ;;  %324 = vst [vmem:[#allocation1 + $0x2] ss:$4 sm:$0xff] %v297_v49  ;;  %v501_v56 = vld [vmem:[#allocation2 + $0x8] sm:$0x7] }
  0x22   : > { %681 = vmatpush.bf16.msra.mxu2 %v2082_v33  ;;  %327 = vst [vmem:[#allocation1 + $0x3] ss:$4 sm:$0xff] %v298_v54  ;;  %v502_v58 = vld [vmem:[#allocation2 + $0xc] sm:$0x7]  ;;  %v509_v59 = vrot.slane %v499_v50, 2  ;;  %v510_v60 = vrot.slane %v500_v55, 2 }
  0x23   : > { %784 = vmatpush.bf16.msra.mxu3 %v2090_v35  ;;  %v511_v61 = vrot.slane %v501_v56, 2  ;;  %v512_v0 = vrot.slane %v502_v58, 2  ;;  %v396_v5 = vld [vmem:[#allocation2] sm:$0x3]  ;;  %v397_v11 = vld [vmem:[#allocation2 + $0x4] sm:$0x3] }
  0x24   : > { %486 = vmatpush.bf16.msra.mxu1 %v2074_v36  ;;  %v516_v1 = vsel %vm513_vm3, %v499_v50, %v509_v59  ;;  %v518_v2 = vsel %vm517_vm4, %v499_v50, %v509_v59  ;;  %v523_v7 = vsel %vm513_vm3, %v500_v55, %v510_v60  ;;  %v524_v8 = vsel %vm517_vm4, %v500_v55, %v510_v60  ;;  %v2125_v10 = vld [vmem:[%s2604_s1 + $0x1e8] sm:$0xff]  ;;  %v398_v12 = vld [vmem:[#allocation2 + $0x8] sm:$0x3]  ;;  %v399_v18 = vld [vmem:[#allocation2 + $0xc] sm:$0x3] }
  0x25   : > { %384 = vmatpush.bf16.msra.mxu0 %v2065_v37  ;;  %v520_v6 = vrot.slane %v518_v2, 2  ;;  %v530_v9 = vsel %vm517_vm4, %v501_v56, %v511_v61  ;;  %v526_v13 = vrot.slane %v524_v8, 2  ;;  %v529_v14 = vsel %vm513_vm3, %v501_v56, %v511_v61  ;;  %v2109_v17 = vld [vmem:[%s2604_s1 + $0x168] sm:$0xff]  ;;  %v284_v37 = vld [vmem:[#allocation2 + $0x10] sm:$0x7]  ;;  %v2124_v48 = vld [vmem:[%s2604_s1 + $0x1e0] sm:$0xff] }
  0x26   : > { %682 = vmatpush.bf16.msra.mxu2 %v2081_v38  ;;  %v536_v15 = vsel %vm517_vm4, %v502_v58, %v512_v0  ;;  %v532_v19 = vrot.slane %v530_v9, 2  ;;  %v546_v20 = vshrl.u32 %v516_v1, 16  ;;  %v549_v21 = vshll.u32 %v516_v1, 16  ;;  %v2116_v38 = vld [vmem:[%s2604_s1 + $0x1a0] sm:$0xff]  ;;  %v2115_v60 = vld [vmem:[%s2604_s1 + $0x198] sm:$0xff]  ;;  %v2114_v8 = vld [vmem:[%s2604_s1 + $0x190] sm:$0xff] }
  0x27   : > { %785 = vmatpush.bf16.msra.mxu3 %v2089_v39  ;;  %v535_v24 = vsel %vm513_vm3, %v502_v58, %v512_v0  ;;  %v538_v25 = vrot.slane %v536_v15, 2  ;;  %v559_v27 = vshrl.u32 %v523_v7, 16  ;;  %v562_v28 = vshll.u32 %v523_v7, 16  ;;  %v2123_v1 = vld [vmem:[%s2604_s1 + $0x1d8] sm:$0xff]  ;;  %v696_v26 = vld [vmem:[#allocation2 + $0x8] sm:$0x3] }
  0x28   : > { %487 = vmatpush.bf16.msra.mxu1 %v2073_v40  ;;  %v548_v29 = vrot.slane %v546_v20, 6  ;;  %v551_v30 = vrot.slane %v549_v21, 7  ;;  %v555_v31 = vshll.u32 %v520_v6, 16  ;;  %v572_v32 = vshrl.u32 %v529_v14, 16  ;;  %v2135_v20 = vld [vmem:[%s2604_s1 + $0x238] sm:$0xff] }
  0x29   : > { %385 = vmatpush.bf16.msra.mxu0 %v2064_v41  ;;  %v328_v23 = vld.sshfl [vmem:[#allocation1] sm:$0xff pattern:$0x73625140]  ;;  %v561_v33 = vrot.slane %v559_v27, 6  ;;  %v564_v34 = vrot.slane %v562_v28, 7  ;;  %v568_v35 = vshll.u32 %v526_v13, 16 }
  0x2a   : > { %683 = vmatpush.bf16.msra.mxu2 %v2080_v43  ;;  %421 = vst [vmem:[#allocation1] ss:$4 sm:$0xff] %v396_v5  ;;  %v575_v36 = vshll.u32 %v529_v14, 16  ;;  %v552_v40 = vor.u32 %v551_v30, %v548_v29  ;;  %v574_v41 = vrot.slane %v572_v32, 6  ;;  %v585_v43 = vshrl.u32 %v535_v24, 16  ;;  %v2097_v13 = vld [vmem:[%s2604_s1 + $0x108] sm:$0xff] }
  0x2b   : > { %786 = vmatpush.bf16.msra.mxu3 %v2088_v46  ;;  %424 = vst [vmem:[#allocation1 + $0x1] ss:$4 sm:$0xff] %v397_v11  ;;  %v588_v46 = vshll.u32 %v535_v24, 16  ;;  %v557_v50 = vrot.slane %v555_v31, 7  ;;  %v570_v56 = vrot.slane %v568_v35, 7  ;;  %v285_v61 = vsel %vm2300_vm2, 0, %v284_v37 }
  0x2c   : > { %488 = vmatpush.bf16.msra.mxu1 %v2072_v47  ;;  %386 = vmatmul.bf16.vlgmr.msra.gmra.mxu0 %v328_v23  ;;  %427 = vst [vmem:[#allocation1 + $0x2] ss:$4 sm:$0xff] %v398_v12  ;;  %v577_v45 = vrot.slane %v575_v36, 7  ;;  %v594_v47 = vshll.u32 %v538_v25, 16  ;;  %v553_v49 = vrot.slane %v552_v40, 2  ;;  %v2122_v11 = vld [vmem:[%s2604_s1 + $0x1d0] sm:$0xff] }
  0x2d   : > { %882 = vmatpush.bf16.msrb.mxu0 %v2103_v42  ;;  %v581_v42 = vshll.u32 %v532_v19, 16  ;;  %430 = vst [vmem:[#allocation1 + $0x3] ss:$4 sm:$0xff] %v399_v18  ;;  %v590_v58 = vrot.slane %v588_v46, 7  ;;  %v2106_v12 = vld [vmem:[%s2604_s1 + $0x150] sm:$0xff]  ;;  %v2113_v14 = vld [vmem:[%s2604_s1 + $0x188] sm:$0xff] }
  0x2e   : > { %1171 = vmatpush.bf16.msrb.mxu2 %v2119_v44  ;;  %v565_v44 = vor.u32 %v564_v34, %v561_v33  ;;  %v596_v0 = vrot.slane %v594_v47, 7  ;;  %286 = vst [vmem:[#allocation2 + $0x10] sm:$0x7] %v285_v61  ;;  %v558_v2 = vsel %vm2435_vm11, %v553_v49, %v557_v50  ;;  %v2105_v18 = vld [vmem:[%s2604_s1 + $0x148] sm:$0xff]  ;;  %v2096_v19 = vld [vmem:[%s2604_s1 + $0x100] sm:$0xff]  ;;  %v2134_v33 = vld [vmem:[%s2604_s1 + $0x230] sm:$0xff] }
  0x2f   : > { %1273 = vmatpush.bf16.msrb.mxu3 %v2127_v52  ;;  %v2108_v52 = vld [vmem:[%s2604_s1 + $0x160] sm:$0xff]  ;;  %v583_v59 = vrot.slane %v581_v42, 7  ;;  %v1004_v24 = vld [vmem:[#allocation2 + $0x4] sm:$0x7]  ;;  %v1005_v27 = vld [vmem:[#allocation2 + $0x8] sm:$0x7] }
  0x30   : > { %985 = vmatpush.bf16.msrb.mxu1 %v2111_v53  ;;  %v2099_v53 = vld [vmem:[%s2604_s1 + $0x118] sm:$0xff]  ;;  %v566_v55 = vrot.slane %v565_v44, 2  ;;  %v2112_v23 = vld [vmem:[%s2604_s1 + $0x180] sm:$0xff]  ;;  %v695_v25 = vld [vmem:[#allocation2 + $0x4] sm:$0x3]  ;;  %v1014_v34 = vrot.slane %v1004_v24, 2 }
  0x31   : > { %883 = vmatpush.bf16.msrb.mxu0 %v2102_v51  ;;  %v587_v51 = vrot.slane %v585_v43, 6  ;;  %v697_v32 = vld [vmem:[#allocation2 + $0xc] sm:$0x3]  ;;  %v1015_v36 = vrot.slane %v1005_v27, 2 }
  0x32   : > { %1172 = vmatpush.bf16.msrb.mxu2 %v2118_v57  ;;  %v578_v57 = vor.u32 %v577_v45, %v574_v41  ;;  %v1006_v35 = vld [vmem:[#allocation2 + $0xc] sm:$0x7]  ;;  %v2133_v41 = vld [vmem:[%s2604_s1 + $0x228] sm:$0xff]  ;;  %v1025_v43 = vsel %vm513_vm3, %v1004_v24, %v1014_v34 }
  0x33   : > { %1274 = vmatpush.bf16.msrb.mxu3 %v2126_v63  ;;  %v591_v63 = vor.u32 %v590_v58, %v587_v51  ;;  %v1016_v42 = vrot.slane %v1006_v35, 2  ;;  %v1032_v44 = vsel %vm517_vm4, %v1005_v27, %v1015_v36  ;;  %v1031_v46 = vsel %vm513_vm3, %v1005_v27, %v1015_v36 }
  0x34   : > { %986 = vmatpush.bf16.msrb.mxu1 %v2110_v4  ;;  %v571_v4 = vsel %vm2435_vm11, %v566_v55, %v570_v56  ;;  %v431_v6 = vld.sshfl [vmem:[#allocation1] sm:$0xff pattern:$0x73625140]  ;;  %v1034_v49 = vrot.slane %v1032_v44, 2  ;;  %v800_v55 = vld [vmem:[#allocation2 + $0xc] sm:$0x3] }
  0x35   : > { %884 = vmatpush.bf16.msrb.mxu0 %v2101_v62  ;;  %v579_v62 = vrot.slane %v578_v57, 2  ;;  %v592_v5 = vrot.slane %v591_v63, 2  ;;  %616 = vst [vmem:[#allocation1] ss:$4 sm:$0xff] %v558_v2  ;;  %489 = vmatmul.bf16.vlgmr.msra.gmra.mxu1 %v431_v6  ;;  %v1038_v50 = vsel %vm517_vm4, %v1006_v35, %v1016_v42  ;;  %v2132_v56 = vld [vmem:[%s2604_s1 + $0x220] sm:$0xff]  ;;  %v1037_v57 = vsel %vm513_vm3, %v1006_v35, %v1016_v42 }
  0x36   : > { %1173 = vmatpush.bf16.msrb.mxu2 %v2117_v3  ;;  %v2107_v3 = vld [vmem:[%s2604_s1 + $0x158] sm:$0xff]  ;;  %619 = vst [vmem:[#allocation1 + $0x1] ss:$4 sm:$0xff] %v571_v4  ;;  %v1057_v58 = vshll.u32 %v1025_v43, 16  ;;  %v1067_v61 = vshrl.u32 %v1031_v46, 16  ;;  %v1080_v4 = vshrl.u32 %v1037_v57, 16 }
  0x37   : > { %1275 = vmatpush.bf16.msrb.mxu3 %v2125_v10  ;;  %v584_v7 = vsel %vm2435_vm11, %v579_v62, %v583_v59  ;;  %v597_v9 = vsel %vm2435_vm11, %v592_v5, %v596_v0  ;;  %v1003_v10 = vld [vmem:[#allocation2] sm:$0x7]  ;;  %v801_v59 = vld [vmem:[#allocation2 + $0x10] sm:$0x3]  ;;  %v1070_v62 = vshll.u32 %v1031_v46, 16  ;;  %v1040_v0 = vrot.slane %v1038_v50, 2 }
  0x38   : > { %987 = vmatpush.bf16.msrb.mxu1 %v2109_v17  ;;  %622 = vst [vmem:[#allocation1 + $0x2] ss:$4 sm:$0xff] %v584_v7  ;;  %v1013_v15 = vrot.slane %v1003_v10, 2  ;;  %v2121_v17 = vld [vmem:[%s2604_s1 + $0x1c8] sm:$0xff]  ;;  %v1059_v5 = vrot.slane %v1057_v58, 7  ;;  %v2120_v6 = vld [vmem:[%s2604_s1 + $0x1c0] sm:$0xff] }
  0x39   : > { %885 = vmatpush.bf16.msrb.mxu0 %v2100_v22  ;;  %625 = vst [vmem:[#allocation1 + $0x3] ss:$4 sm:$0xff] %v597_v9  ;;  %v694_v22 = vld [vmem:[#allocation2] sm:$0x3]  ;;  %v2104_v7 = vld [vmem:[%s2604_s1 + $0x140] sm:$0xff] }
  0x3a   : > { %1174 = vmatpush.bf16.msrb.mxu2 %v2116_v38  ;;  %v1019_v21 = vsel %vm513_vm3, %v1003_v10, %v1013_v15  ;;  %v1020_v29 = vsel %vm517_vm4, %v1003_v10, %v1013_v15  ;;  %v1026_v38 = vsel %vm517_vm4, %v1004_v24, %v1014_v34  ;;  %v2529_v10 = vrot.slane %v1067_v61, 6  ;;  %v1293_v15 = vld [vmem:[#allocation2 + $0xc] sm:$0x7]  ;;  %v902_v34 = vld [vmem:[#allocation2 + $0x8] sm:$0x3] }
  0x3b   : > { %1276 = vmatpush.bf16.msrb.mxu3 %v2124_v48  ;;  %v1041_v30 = vshrl.u32 %v1019_v21, 16  ;;  %v1044_v31 = vshll.u32 %v1019_v21, 16  ;;  %v1022_v37 = vrot.slane %v1020_v29, 2  ;;  %v1028_v45 = vrot.slane %v1026_v38, 2  ;;  %v798_v48 = vld [vmem:[#allocation2 + $0x4] sm:$0x3] }
  0x3c   : > { %988 = vmatpush.bf16.msrb.mxu1 %v2108_v52  ;;  %v1054_v52 = vshrl.u32 %v1025_v43, 16  ;;  %v2534_v21 = vrot.slane %v1080_v4, 6 }
  0x3d   : > { %886 = vmatpush.bf16.msrb.mxu0 %v2099_v53  ;;  %v1043_v39 = vrot.slane %v1041_v30, 6  ;;  %v1046_v40 = vrot.slane %v1044_v31, 7  ;;  %v2503_v47 = vshll.u32 %v1022_v37, 16  ;;  %v799_v53 = vld [vmem:[#allocation2 + $0x8] sm:$0x3] }
  0x3e   : > { %1175 = vmatpush.bf16.msrb.mxu2 %v2115_v60  ;;  %v2510_v60 = vshll.u32 %v1028_v45, 16 }
  0x3f   : > { %1277 = vmatpush.bf16.msrb.mxu3 %v2123_v1  ;;  %v1047_v51 = vor.u32 %v1046_v40, %v1043_v39  ;;  %v1052_v1 = vrot.slane %v2503_v47, 7  ;;  %v903_v39 = vld [vmem:[#allocation2 + $0xc] sm:$0x3] }
  0x40   : > { %989 = vmatpush.bf16.msrb.mxu1 %v2107_v3  ;;  %v626_v28 = vld.sshfl [vmem:[#allocation1] sm:$0xff pattern:$0x73625140]  ;;  %v2515_v3 = vrot.slane %v1054_v52, 6  ;;  %v1065_v9 = vrot.slane %v2510_v60, 7 }
  0x41   : > { %887 = vmatpush.bf16.msrb.mxu0 %v2098_v16  ;;  %684 = vmatmul.bf16.vlgmr.msra.gmra.mxu2 %v626_v28  ;;  %719 = vst [vmem:[#allocation1] ss:$4 sm:$0xff] %v694_v22  ;;  %v2513_v2 = vrot.slane %v1047_v51, 2  ;;  %v2517_v16 = vshll.u32 %v1034_v49, 16  ;;  %v2536_v22 = vshll.u32 %v1040_v0, 16 }
  0x42   : > { %1176 = vmatpush.bf16.msrb.mxu2 %v2114_v8  ;;  %722 = vst [vmem:[#allocation1 + $0x1] ss:$4 sm:$0xff] %v695_v25  ;;  %v2131_v8 = vld [vmem:[%s2604_s1 + $0x218] sm:$0xff] }
  0x43   : > { %1278 = vmatpush.bf16.msrb.mxu3 %v2122_v11  ;;  %725 = vst [vmem:[#allocation1 + $0x2] ss:$4 sm:$0xff] %v696_v26  ;;  %v2531_v11 = vrot.slane %v1070_v62, 7 }
  0x44   : > { %990 = vmatpush.bf16.msrb.mxu1 %v2106_v12  ;;  %728 = vst [vmem:[#allocation1 + $0x3] ss:$4 sm:$0xff] %v697_v32  ;;  %v1083_v12 = vshll.u32 %v1037_v57, 16  ;;  %v900_v32 = vld [vmem:[#allocation2] sm:$0x3] }
  0x45   : > { %888 = vmatpush.bf16.msrb.mxu0 %v2097_v13  ;;  %v1291_v13 = vld [vmem:[#allocation2 + $0x4] sm:$0x7]  ;;  %v1073_v24 = vor.u32 %v2531_v11, %v2529_v10 }
  0x46   : > { %1177 = vmatpush.bf16.msrb.mxu2 %v2113_v14  ;;  %v1292_v14 = vld [vmem:[#allocation2 + $0x8] sm:$0x7]  ;;  %v1085_v25 = vrot.slane %v1083_v12, 7  ;;  %v2129_v12 = vld [vmem:[%s2604_s1 + $0x208] sm:$0xff] }
  0x47   : > { %1279 = vmatpush.bf16.msrb.mxu3 %v2121_v17  ;;  %v1294_v17 = vld [vmem:[#allocation2 + $0x10] sm:$0x7] }
  0x48   : > { %991 = vmatpush.bf16.msrb.mxu1 %v2105_v18  ;;  %v1301_v18 = vrot.slane %v1291_v13, 2  ;;  %v1304_v26 = vrot.slane %v1294_v17, 2 }
  0x49   : > { %889 = vmatpush.bf16.msrb.mxu0 %v2096_v19  ;;  %v1302_v19 = vrot.slane %v1292_v14, 2 }
  0x4a   : > { %1178 = vmatpush.bf16.msrb.mxu2 %v2112_v23  ;;  %v1303_v23 = vrot.slane %v1293_v15, 2  ;;  %v1307_v27 = vsel %vm513_vm3, %v1291_v13, %v1301_v18  ;;  %v1308_v35 = vsel %vm517_vm4, %v1291_v13, %v1301_v18  ;;  %v1326_v38 = vsel %vm517_vm4, %v1294_v17, %v1304_v26 }
  0x4b   : > { %v729_v63 = vld.sshfl [vmem:[#allocation1] sm:$0xff pattern:$0x73625140]  ;;  %1280 = vmatpush.bf16.msrb.mxu3 %v2120_v6  ;;  %v1313_v28 = vsel %vm513_vm3, %v1292_v14, %v1302_v19  ;;  %v1329_v30 = vshrl.u32 %v1307_v27, 16  ;;  %v1332_v31 = vshll.u32 %v1307_v27, 16  ;;  %v1314_v36 = vsel %vm517_vm4, %v1292_v14, %v1302_v19 }
  0x4c   : > { %787 = vmatmul.bf16.vlgmr.msra.gmra.mxu3 %v729_v63  ;;  %822 = vst [vmem:[#allocation1] ss:$4 sm:$0xff] %v798_v48  ;;  %992 = vmatpush.bf16.msrb.mxu1 %v2104_v7  ;;  %v1319_v29 = vsel %vm513_vm3, %v1293_v15, %v1303_v23  ;;  %v1320_v37 = vsel %vm517_vm4, %v1293_v15, %v1303_v23  ;;  %v1310_v40 = vrot.slane %v1308_v35, 2  ;;  %v1328_v43 = vrot.slane %v1326_v38, 2  ;;  %v2128_v27 = vld [vmem:[%s2604_s1 + $0x200] sm:$0xff] }
  0x4d   : > { %1459 = vmatpush.bf16.msra.mxu0 %v2135_v20  ;;  %825 = vst [vmem:[#allocation1 + $0x1] ss:$4 sm:$0xff] %v799_v53  ;;  %v1060_v20 = vor.u32 %v1059_v5, %v2515_v3  ;;  %v1322_v42 = vrot.slane %v1320_v37, 2  ;;  %v1325_v45 = vsel %vm513_vm3, %v1294_v17, %v1304_v26  ;;  %v1331_v46 = vrot.slane %v1329_v30, 6  ;;  %v1192_v35 = vld [vmem:[#allocation2 + $0x10] sm:$0x3] }
  0x4e   : > { %828 = vst [vmem:[#allocation1 + $0x2] ss:$4 sm:$0xff] %v800_v55  ;;  %v1334_v48 = vrot.slane %v1332_v31, 7  ;;  %v1342_v49 = vshrl.u32 %v1313_v28, 16  ;;  %v1338_v50 = vshll.u32 %v1310_v40, 16  ;;  %v1345_v51 = vshll.u32 %v1313_v28, 16 }
  0x4f   : > { %831 = vst [vmem:[#allocation1 + $0x3] ss:$4 sm:$0xff] %v801_v59  ;;  %v1355_v53 = vshrl.u32 %v1319_v29, 16  ;;  %v1358_v57 = vshll.u32 %v1319_v29, 16  ;;  %v1364_v58 = vshll.u32 %v1322_v42, 16  ;;  %v2130_v59 = vld [vmem:[%s2604_s1 + $0x210] sm:$0xff]  ;;  %v1086_v3 = vor.u32 %v1085_v25, %v2534_v21 }
  0x50   : > { %v1335_v55 = vor.u32 %v1334_v48, %v1331_v46  ;;  %v1061_v61 = vrot.slane %v1060_v20, 2  ;;  %v1340_v62 = vrot.slane %v1338_v50, 7  ;;  %v1347_v63 = vrot.slane %v1345_v51, 7  ;;  %v2183_v38 = vld [vmem:[%s2605_s2] ss:$0 sm:$0xff] }
  0x51   : > { %1460 = vmatpush.bf16.msra.mxu0 %v2134_v33  ;;  %v901_v33 = vld [vmem:[#allocation2 + $0x4] sm:$0x3]  ;;  %v1357_v0 = vrot.slane %v1355_v53, 6  ;;  %v1360_v5 = vrot.slane %v1358_v57, 7  ;;  %v1368_v6 = vshrl.u32 %v1325_v45, 16  ;;  %v1371_v10 = vshll.u32 %v1325_v45, 16 }
  0x52   : > { %v1336_v4 = vrot.slane %v1335_v55, 2  ;;  %v1377_v11 = vshll.u32 %v1328_v43, 16  ;;  %v1366_v15 = vrot.slane %v1364_v58, 7  ;;  %v1074_v18 = vrot.slane %v1073_v24, 2 }
  0x53   : > { %v1361_v14 = vor.u32 %v1360_v5, %v1357_v0  ;;  %v1370_v17 = vrot.slane %v1368_v6, 6  ;;  %v1078_v19 = vrot.slane %v2517_v16, 7  ;;  %v1373_v21 = vrot.slane %v1371_v10, 7 }
  0x54   : > { %v1341_v13 = vsel %vm2435_vm11, %v1336_v4, %v1340_v62  ;;  %v1087_v23 = vrot.slane %v1086_v3, 2  ;;  %v1091_v25 = vrot.slane %v2536_v22, 7  ;;  %v1053_v28 = vsel %vm2435_vm11, %v2513_v2, %v1052_v1  ;;  %v1189_v2 = vld [vmem:[#allocation2 + $0x4] sm:$0x3] }
  0x55   : > { %1461 = vmatpush.bf16.msra.mxu0 %v2133_v41  ;;  %v1316_v41 = vrot.slane %v1314_v36, 2  ;;  %v1362_v26 = vrot.slane %v1361_v14, 2  ;;  %v1374_v24 = vor.u32 %v1373_v21, %v1370_v17  ;;  %v1379_v29 = vrot.slane %v1377_v11, 7 }
  0x56   : > { %v832_v44 = vld.sshfl [vmem:[#allocation1] sm:$0xff pattern:$0x73625140]  ;;  %v1066_v22 = vsel %vm2435_vm11, %v1061_v61, %v1065_v9  ;;  %v1079_v47 = vsel %vm2435_vm11, %v1074_v18, %v1078_v19  ;;  %v1092_v1 = vsel %vm2435_vm11, %v1087_v23, %v1091_v25  ;;  %v1190_v9 = vld [vmem:[#allocation2 + $0x8] sm:$0x3] }
  0x57   : > { %890 = vmatmul.bf16.vlgmr.msrb.gmra.mxu0 %v832_v44  ;;  %925 = vst [vmem:[#allocation1] ss:$4 sm:$0xff] %v900_v32  ;;  %v1351_v52 = vshll.u32 %v1316_v41, 16  ;;  %v1367_v30 = vsel %vm2435_vm11, %v1362_v26, %v1366_v15  ;;  %v1375_v32 = vrot.slane %v1374_v24, 2 }
  0x58   : > { %928 = vst [vmem:[#allocation1 + $0x1] ss:$4 sm:$0xff] %v901_v33 }
  0x59   : > { %1462 = vmatpush.bf16.msra.mxu0 %v2132_v56  ;;  %v1344_v56 = vrot.slane %v1342_v49, 6  ;;  %931 = vst [vmem:[#allocation1 + $0x2] ss:$4 sm:$0xff] %v902_v34  ;;  %v1380_v60 = vsel %vm2435_vm11, %v1375_v32, %v1379_v29  ;;  %v1191_v34 = vld [vmem:[#allocation2 + $0xc] sm:$0x3] }
  0x5a   : > { %934 = vst [vmem:[#allocation1 + $0x3] ss:$4 sm:$0xff] %v903_v39 }
  0x5b   : > { %v1348_v7 = vor.u32 %v1347_v63, %v1344_v56 }
  0x5d   : > { %1463 = vmatpush.bf16.msra.mxu0 %v2131_v8  ;;  %v1353_v8 = vrot.slane %v1351_v52, 7  ;;  %v1349_v20 = vrot.slane %v1348_v7, 2 }
  0x5f   : > { %v1354_v16 = vsel %vm2435_vm11, %v1349_v20, %v1353_v8 }
  0x61   : > { %1464 = vmatpush.bf16.msra.mxu0 %v2130_v59  ;;  %v935_v31 = vld.sshfl [vmem:[#allocation1] sm:$0xff pattern:$0x73625140] }
  0x62   : > { %1111 = vst [vmem:[#allocation1] ss:$4 sm:$0xff] %v1053_v28  ;;  %993 = vmatmul.bf16.vlgmr.msrb.gmra.mxu1 %v935_v31 }
  0x63   : > { %1114 = vst [vmem:[#allocation1 + $0x1] ss:$4 sm:$0xff] %v1066_v22 }
  0x64   : > { %1117 = vst [vmem:[#allocation1 + $0x2] ss:$4 sm:$0xff] %v1079_v47 }
  0x65   : > { %1465 = vmatpush.bf16.msra.mxu0 %v2129_v12  ;;  %1120 = vst [vmem:[#allocation1 + $0x3] ss:$4 sm:$0xff] %v1092_v1 }
  0x69   : > { %1466 = vmatpush.bf16.msra.mxu0 %v2128_v27 }
  0x6c   : > { %v1121_v33 = vld.sshfl [vmem:[#allocation1] sm:$0xff pattern:$0x73625140] }
  0x6d   : > { %1179 = vmatmul.bf16.vlgmr.msrb.gmra.mxu2 %v1121_v33  ;;  %1213 = vst [vmem:[#allocation1] ss:$4 sm:$0xff] %v1189_v2 }
  0x6e   : > { %1216 = vst [vmem:[#allocation1 + $0x1] ss:$4 sm:$0xff] %v1190_v9 }
  0x6f   : > { %1219 = vst [vmem:[#allocation1 + $0x2] ss:$4 sm:$0xff] %v1191_v34 }
  0x70   : > { %1222 = vst [vmem:[#allocation1 + $0x3] ss:$4 sm:$0xff] %v1192_v35 }
  0x77   : > { %v1223_v36 = vld.sshfl [vmem:[#allocation1] sm:$0xff pattern:$0x73625140] }
  0x78   : > { %1281 = vmatmul.bf16.vlgmr.msrb.gmra.mxu3 %v1223_v36  ;;  %1399 = vst [vmem:[#allocation1] ss:$4 sm:$0xff] %v1341_v13 }
  0x79   : > { %1402 = vst [vmem:[#allocation1 + $0x1] ss:$4 sm:$0xff] %v1354_v16 }
  0x7a   : > { %1405 = vst [vmem:[#allocation1 + $0x2] ss:$4 sm:$0xff] %v1367_v30 }
  0x7b   : > { %1408 = vst [vmem:[#allocation1 + $0x3] ss:$4 sm:$0xff] %v1380_v60 }
  0x82   : > { %v1409_v54 = vld.sshfl [vmem:[#allocation1] sm:$0xff pattern:$0x73625140] }
  0x83   : > { %1467 = vmatmul.bf16.vlgmr.msra.gmra.mxu0 %v1409_v54 }
  0xa9   : > { %v387_v37 = vpop.f32.mrf.mxu0 }
  0xaa   : > { %v1492_v39 = vadd.f32 %v2183_v38, %v387_v37 }
  0xb1   : > { %v389_v40 = vpop.f32.mrf.mxu0 }
  0xb2   : > { %v1493_v41 = vadd.f32 %v2183_v38, %v389_v40  ;;  %v490_v43 = vpop.f32.mrf.mxu1 }
  0xb4   : > { %v2139_v42 = vpack.c.bf16 %v1493_v41, %v1492_v39 }
  0xb6   : > { %2140 = vst [vmem:[%s2588_s4] sm:$0xff] %v2139_v42  }
  0xba   : > { %v492_v46 = vpop.f32.mrf.mxu1 }
  0xc4   : > { %v685_v44 = vpop.f32.mrf.mxu2 }
  0xc5   : > { %v690_v45 = vadd.f32 %v685_v44, %v490_v43 }
  0xc7   : > { %v1494_v49 = vadd.f32 %v2183_v38, %v690_v45 }
  0xcc   : > { %v687_v48 = vpop.f32.mrf.mxu2 }
  0xcd   : > { %v691_v50 = vadd.f32 %v687_v48, %v492_v46 }
  0xcf   : > { %v1495_v51 = vadd.f32 %v2183_v38, %v691_v50  ;;  %v788_v52 = vpop.f32.mrf.mxu3 }
  0xd1   : > { %v2144_v53 = vpack.c.bf16 %v1495_v51, %v1494_v49 }
  0xd3   : > { %2156 = vst [vmem:[%s2588_s4 + $0x8] sm:$0xff] %v2144_v53  }
  0xd4   : > { %v891_v55 = vpop.f32.mrf.mxu0 }
  0xd5   : > { %v896_v56 = vadd.f32 %v891_v55, %v788_v52 }
  0xd7   : > { %v790_v57 = vpop.f32.mrf.mxu3  ;;  %v1496_v59 = vadd.f32 %v2183_v38, %v896_v56 }
  0xdc   : > { %v893_v58 = vpop.f32.mrf.mxu0 }
  0xdd   : > { %v897_v61 = vadd.f32 %v893_v58, %v790_v57 }
  0xdf   : > { %v1497_v62 = vadd.f32 %v2183_v38, %v897_v61  ;;  %v994_v0 = vpop.f32.mrf.mxu1 }
  0xe1   : > { %v2149_v63 = vpack.c.bf16 %v1497_v62, %v1496_v59 }
  0xe3   : > { %2157 = vst [vmem:[%s2588_s4 + $0x10] sm:$0xff] %v2149_v63  }
  0xe7   : > { %v996_v7 = vpop.f32.mrf.mxu1 }
  0xf0   : > { %v1180_v3 = vpop.f32.mrf.mxu2 }
  0xf1   : > { %v1185_v5 = vadd.f32 %v1180_v3, %v994_v0 }
  0xf8   : > { %v1182_v8 = vpop.f32.mrf.mxu2 }
  0xf9   : > { %v1186_v12 = vadd.f32 %v1182_v8, %v996_v7 }
  0xfb   : > { %v1282_v4 = vpop.f32.mrf.mxu3 }
  0xfc   : > { %v1287_v10 = vadd.f32 %v1282_v4, %v1185_v5 }
 0x100   : > { %v1468_v6 = vpop.f32.mrf.mxu0 }
 0x101   : > { %v1473_v13 = vadd.f32 %v1468_v6, %v1287_v10 }
 0x103   : > { %v1284_v11 = vpop.f32.mrf.mxu3  ;;  %v1498_v18 = vadd.f32 %v2183_v38, %v1473_v13 }
 0x104   : > { %v1288_v14 = vadd.f32 %v1284_v11, %v1186_v12 }
 0x108   : > { %v1470_v15 = vpop.f32.mrf.mxu0 }
 0x109   : > { %v1474_v17 = vadd.f32 %v1470_v15, %v1288_v14 }
 0x10b   : > { %v1499_v19 = vadd.f32 %v2183_v38, %v1474_v17 }
 0x10d   : > { %v2154_v20 = vpack.c.bf16 %v1499_v19, %v1498_v18 }
 0x10f   : > { %2158 = vst [vmem:[%s2588_s4 + $0x18] sm:$0xff] %v2154_v20  }
 0x110 PF: > { %s13_s14 = sadd.s32 1, %s2206_s14   ;;  %s2615_s12 = smov %s2202_s13 }
 0x111   : > { %p10_p5 = scmp.ge.s32.totalorder %s13_s14, 4   ;;  %s2616_s13 = smov %s2618_s15 }
 0x113   :  { %12 = sbr.rel (!%p10_p5) target bundleno = 2 (0x2), region = 115 }

// kernel: udarknet_forward.17
= control target key start
LH: loop header
LB: loop body
LE: loop exit
PB: predicated region body
PF: predicated region fallthrough
CT: control target
= control target key end

     0   :  { %s1532_s15 = smov 0   ;;  %s1534_s16 = smov 0   ;;  %s1710_s0 = inlined_call_operand.vmem [shape: bf16[2,16,16,128], index: 0, kind: input, shape index: {}]   ;;  %s1711_s1 = inlined_call_operand.vmem [shape: bf16[1,128,128], index: 1, kind: input, shape index: {}]   ;;  %s1712_s2 = inlined_call_operand.vmem [shape: f32[1,128], index: 2, kind: input, shape index: {}]   ;;  %s1713_s3 = inlined_call_operand.vmem [shape: f32[1,128], index: 3, kind: input, shape index: {}]   ;;  %s1714_s4 = inlined_call_operand.vmem [shape: bf16[2,256,128], index: 4, kind: output, shape index: {}]  }
   0x1   :  { %s1536_s17 = smov 0  }
   0x2 LB: > { %s33_s18 = sadd.s32 1, %s1501_s16  ;;  %p1145_p0 = scmp.ge.s32.totalorder %s1505_s17, 1  ;;  %s1505_s17 = sphi %s1536_s17, %s14_s17   ;;  %s1501_s16 = sphi %s1534_s16, %s1716_s16   ;;  %s1497_s15 = sphi %s1532_s15, %s1715_s15  }
   0x3   : > { %p35_p1 = scmp.ge.s32.totalorder %s33_s18, 2  ;;  %p220_p2 = scmp.lt.s32.totalorder %s1505_s17, 3 }
   0x5   : > { %s1718_s18 = smov (%p35_p1, %s33_s18), 0  ;;  %p221_p3 = pnand %p1145_p0, %p220_p2 }
   0x6   : > { %p266_p4 = scmp.lt.s32.totalorder (!%p221_p3), %s1497_s15, 1 }
   0x7   : > { %224 = sbr.rel (%p221_p3) target bundleno = 254 (0xfe), region = 36 }
   0xc   : > { %v1273_v0 = vld [vmem:[%s1711_s1 + $0x38] sm:$0xff]  ;;  %v1272_v1 = vld [vmem:[%s1711_s1 + $0x30] sm:$0xff]  ;;  %v1271_v2 = vld [vmem:[%s1711_s1 + $0x28] sm:$0xff]  ;;  %s1720_s15 = smov (!%p266_p4, %s1497_s15), 1 }
   0xd   : > { %557 = vmatpush.bf16.msra.mxu0 %v1273_v0  ;;  %1369 = vmatpush.bf16.msra.mxu1 %v1273_v0  ;;  %v1270_v3 = vld [vmem:[%s1711_s1 + $0x20] sm:$0xff]  ;;  %v1269_v4 = vld [vmem:[%s1711_s1 + $0x18] sm:$0xff]  ;;  %v1268_v5 = vld [vmem:[%s1711_s1 + $0x10] sm:$0xff]  ;;  %s1248_s7 = sshll.u32 %s1720_s15, 7 }
   0xe   : > { %1370 = vmatpush.bf16.msra.mxu2 %v1273_v0  ;;  %1371 = vmatpush.bf16.msra.mxu3 %v1273_v0  ;;  %v1267_v6 = vld [vmem:[%s1711_s1 + $0x8] sm:$0xff]  ;;  %v1266_v7 = vld [vmem:[%s1711_s1] sm:$0xff]  ;;  %s1586_s12 = scalar_lea.vmem %s1710_s0, %s1248_s7  ;;  %s1642_s23 = scalar_lea.vmem %s1714_s4, %s1248_s7 }
   0xf   : > { %v1250_v8 = vld [vmem:[%s1586_s12] sm:$0xff]  ;;  %v1251_v12 = vld [vmem:[%s1586_s12 + $0x8] sm:$0xff]  ;;  %v1252_v16 = vld [vmem:[%s1586_s12 + $0x10] sm:$0xff] }
  0x10   : > { %v1254_v9 = vld [vmem:[%s1586_s12 + $0x20] sm:$0xff]  ;;  %v1255_v13 = vld [vmem:[%s1586_s12 + $0x28] sm:$0xff]  ;;  %v1256_v17 = vld [vmem:[%s1586_s12 + $0x30] sm:$0xff] }
  0x11   : > { %558 = vmatpush.bf16.msra.mxu0 %v1272_v1  ;;  %1372 = vmatpush.bf16.msra.mxu1 %v1272_v1  ;;  %v1258_v10 = vld [vmem:[%s1586_s12 + $0x40] sm:$0xff]  ;;  %v1259_v14 = vld [vmem:[%s1586_s12 + $0x48] sm:$0xff]  ;;  %v1260_v18 = vld [vmem:[%s1586_s12 + $0x50] sm:$0xff] }
  0x12   : > { %1373 = vmatpush.bf16.msra.mxu2 %v1272_v1  ;;  %1374 = vmatpush.bf16.msra.mxu3 %v1272_v1  ;;  %v1262_v11 = vld [vmem:[%s1586_s12 + $0x60] sm:$0xff]  ;;  %v1263_v15 = vld [vmem:[%s1586_s12 + $0x68] sm:$0xff]  ;;  %v1264_v19 = vld [vmem:[%s1586_s12 + $0x70] sm:$0xff] }
  0x13   : > { %v1253_v20 = vld [vmem:[%s1586_s12 + $0x18] sm:$0xff]  ;;  %v1607_v24 = vld [vmem:[%s1712_s2] ss:$0 sm:$0xff] }
  0x14   : > { %v1257_v21 = vld [vmem:[%s1586_s12 + $0x38] sm:$0xff]  ;;  %v1612_v25 = vld [vmem:[%s1713_s3] ss:$0 sm:$0xff] }
  0x15   : > { %559 = vmatpush.bf16.msra.mxu0 %v1271_v2  ;;  %1375 = vmatpush.bf16.msra.mxu1 %v1271_v2  ;;  %v1261_v22 = vld [vmem:[%s1586_s12 + $0x58] sm:$0xff] }
  0x16   : > { %1376 = vmatpush.bf16.msra.mxu2 %v1271_v2  ;;  %1377 = vmatpush.bf16.msra.mxu3 %v1271_v2  ;;  %v1265_v23 = vld [vmem:[%s1586_s12 + $0x78] sm:$0xff] }
  0x19   : > { %560 = vmatpush.bf16.msra.mxu0 %v1270_v3  ;;  %1378 = vmatpush.bf16.msra.mxu1 %v1270_v3 }
  0x1a   : > { %1379 = vmatpush.bf16.msra.mxu2 %v1270_v3  ;;  %1380 = vmatpush.bf16.msra.mxu3 %v1270_v3 }
  0x1d   : > { %561 = vmatpush.bf16.msra.mxu0 %v1269_v4  ;;  %1381 = vmatpush.bf16.msra.mxu1 %v1269_v4 }
  0x1e   : > { %1382 = vmatpush.bf16.msra.mxu2 %v1269_v4  ;;  %1383 = vmatpush.bf16.msra.mxu3 %v1269_v4 }
  0x21   : > { %562 = vmatpush.bf16.msra.mxu0 %v1268_v5  ;;  %1384 = vmatpush.bf16.msra.mxu1 %v1268_v5 }
  0x22   : > { %1385 = vmatpush.bf16.msra.mxu2 %v1268_v5  ;;  %1386 = vmatpush.bf16.msra.mxu3 %v1268_v5 }
  0x25   : > { %563 = vmatpush.bf16.msra.mxu0 %v1267_v6  ;;  %1387 = vmatpush.bf16.msra.mxu1 %v1267_v6 }
  0x26   : > { %1388 = vmatpush.bf16.msra.mxu2 %v1267_v6  ;;  %1389 = vmatpush.bf16.msra.mxu3 %v1267_v6 }
  0x29   : > { %564 = vmatpush.bf16.msra.mxu0 %v1266_v7  ;;  %1390 = vmatpush.bf16.msra.mxu1 %v1266_v7 }
  0x2a   : > { %1391 = vmatpush.bf16.msra.mxu2 %v1266_v7  ;;  %1392 = vmatpush.bf16.msra.mxu3 %v1266_v7 }
  0x2c   : > { %565 = vmatmul.bf16.vlgmr.msra.gmra.mxu0 %v1250_v8  ;;  %585 = vmatmul.bf16.vlgmr.msra.gmra.mxu1 %v1254_v9 }
  0x2d   : > { %605 = vmatmul.bf16.vlgmr.msra.gmra.mxu2 %v1258_v10  ;;  %625 = vmatmul.bf16.vlgmr.msra.gmra.mxu3 %v1262_v11 }
  0x3c   : > { %570 = vmatmul.bf16.gmra.mxu0 %v1251_v12  ;;  %590 = vmatmul.bf16.gmra.mxu1 %v1255_v13 }
  0x3d   : > { %610 = vmatmul.bf16.gmra.mxu2 %v1259_v14  ;;  %630 = vmatmul.bf16.gmra.mxu3 %v1263_v15 }
  0x4c   : > { %575 = vmatmul.bf16.gmra.mxu0 %v1252_v16  ;;  %595 = vmatmul.bf16.gmra.mxu1 %v1256_v17 }
  0x4d   : > { %615 = vmatmul.bf16.gmra.mxu2 %v1260_v18  ;;  %635 = vmatmul.bf16.gmra.mxu3 %v1264_v19 }
  0x5c   : > { %580 = vmatmul.bf16.gmra.mxu0 %v1253_v20  ;;  %600 = vmatmul.bf16.gmra.mxu1 %v1257_v21 }
  0x5d   : > { %620 = vmatmul.bf16.gmra.mxu2 %v1261_v22  ;;  %640 = vmatmul.bf16.gmra.mxu3 %v1265_v23 }
  0xa9   : > { %v566_v26 = vpop.f32.mrf.mxu0  ;;  %v586_v27 = vpop.f32.mrf.mxu1 }
  0xaa   : > { %v749_v28 = vmul.f32 %v1607_v24, %v566_v26  ;;  %v757_v29 = vmul.f32 %v1607_v24, %v586_v27 }
  0xac   : > { %v785_v30 = vadd.f32 %v1612_v25, %v749_v28  ;;  %v793_v31 = vadd.f32 %v1612_v25, %v757_v29 }
  0xae   : > { %v817_v32 = vmul.f32 0.5, %v785_v30  ;;  %v825_v33 = vmul.f32 0.5, %v793_v31 }
  0xb0   : > { %v606_v34 = vpop.f32.mrf.mxu2  ;;  %v626_v35 = vpop.f32.mrf.mxu3  ;;  %1419 = vtanh.f32 %v817_v32 }
  0xb1   : > { %v765_v36 = vmul.f32 %v1607_v24, %v606_v34  ;;  %v773_v37 = vmul.f32 %v1607_v24, %v626_v35  ;;  %v568_v38 = vpop.f32.mrf.mxu0  ;;  %v588_v39 = vpop.f32.mrf.mxu1  ;;  %1421 = vtanh.f32 %v825_v33 }
  0xb2   : > { %v750_v40 = vmul.f32 %v1607_v24, %v568_v38  ;;  %v758_v41 = vmul.f32 %v1607_v24, %v588_v39 }
  0xb3   : > { %v801_v42 = vadd.f32 %v1612_v25, %v765_v36  ;;  %v809_v43 = vadd.f32 %v1612_v25, %v773_v37 }
  0xb4   : > { %v786_v44 = vadd.f32 %v1612_v25, %v750_v40  ;;  %v794_v45 = vadd.f32 %v1612_v25, %v758_v41 }
  0xb5   : > { %v833_v46 = vmul.f32 0.5, %v801_v42  ;;  %v841_v49 = vmul.f32 0.5, %v809_v43 }
  0xb6   : > { %v818_v47 = vmul.f32 0.5, %v786_v44  ;;  %v826_v48 = vmul.f32 0.5, %v794_v45  ;;  %v1420_v52 = vpop.eup %1419 }
  0xb7   : > { %1423 = vtanh.f32 %v833_v46  ;;  %v1422_v57 = vpop.eup %1421  ;;  %v881_v0 = vadd.f32 1.0, %v1420_v52 }
  0xb8   : > { %v608_v50 = vpop.f32.mrf.mxu2  ;;  %v628_v51 = vpop.f32.mrf.mxu3  ;;  %1425 = vtanh.f32 %v818_v47  ;;  %v889_v1 = vadd.f32 1.0, %v1422_v57 }
  0xb9   : > { %v766_v53 = vmul.f32 %v1607_v24, %v608_v50  ;;  %v774_v54 = vmul.f32 %v1607_v24, %v628_v51  ;;  %v571_v55 = vpop.f32.mrf.mxu0  ;;  %v591_v56 = vpop.f32.mrf.mxu1  ;;  %1427 = vtanh.f32 %v826_v48  ;;  %v913_v12 = vmul.f32 0.5, %v881_v0 }
  0xba   : > { %v751_v58 = vmul.f32 %v1607_v24, %v571_v55  ;;  %v759_v59 = vmul.f32 %v1607_v24, %v591_v56  ;;  %1429 = vtanh.f32 %v841_v49  ;;  %v921_v13 = vmul.f32 0.5, %v889_v1 }
  0xbb   : > { %v802_v60 = vadd.f32 %v1612_v25, %v766_v53  ;;  %v810_v61 = vadd.f32 %v1612_v25, %v774_v54 }
  0xbc   : > { %v787_v62 = vadd.f32 %v1612_v25, %v751_v58  ;;  %v795_v63 = vadd.f32 %v1612_v25, %v759_v59 }
  0xbd   : > { %v834_v2 = vmul.f32 0.5, %v802_v60  ;;  %v842_v3 = vmul.f32 0.5, %v810_v61  ;;  %v1424_v4 = vpop.eup %1423 }
  0xbe   : > { %v1426_v5 = vpop.eup %1425  ;;  %v819_v6 = vmul.f32 0.5, %v787_v62  ;;  %v827_v9 = vmul.f32 0.5, %v795_v63  ;;  %v897_v19 = vadd.f32 1.0, %v1424_v4 }
  0xbf   : > { %1431 = vtanh.f32 %v834_v2  ;;  %v1428_v7 = vpop.eup %1427  ;;  %v882_v8 = vadd.f32 1.0, %v1426_v5 }
  0xc0   : > { %1433 = vtanh.f32 %v842_v3  ;;  %v611_v10 = vpop.f32.mrf.mxu2  ;;  %v631_v11 = vpop.f32.mrf.mxu3  ;;  %v890_v14 = vadd.f32 1.0, %v1428_v7  ;;  %v929_v41 = vmul.f32 0.5, %v897_v19 }
  0xc1   : > { %v767_v15 = vmul.f32 %v1607_v24, %v611_v10  ;;  %v573_v16 = vpop.f32.mrf.mxu0  ;;  %v593_v17 = vpop.f32.mrf.mxu1  ;;  %v914_v20 = vmul.f32 0.5, %v882_v8  ;;  %v775_v21 = vmul.f32 %v1607_v24, %v631_v11  ;;  %1435 = vtanh.f32 %v819_v6 }
  0xc2   : > { %v1430_v18 = vpop.eup %1429  ;;  %v752_v22 = vmul.f32 %v1607_v24, %v573_v16  ;;  %v922_v23 = vmul.f32 0.5, %v890_v14  ;;  %v760_v27 = vmul.f32 %v1607_v24, %v593_v17  ;;  %1437 = vtanh.f32 %v827_v9 }
  0xc3   : > { %v803_v26 = vadd.f32 %v1612_v25, %v767_v15  ;;  %v1277_v28 = vpack.c.bf16 %v914_v20, %v913_v12  ;;  %v811_v29 = vadd.f32 %v1612_v25, %v775_v21  ;;  %v905_v32 = vadd.f32 1.0, %v1430_v18 }
  0xc4   : > { %v788_v30 = vadd.f32 %v1612_v25, %v752_v22  ;;  %v1297_v33 = vpack.c.bf16 %v922_v23, %v921_v13  ;;  %v796_v35 = vadd.f32 %v1612_v25, %v760_v27 }
  0xc5   : > { %v1432_v31 = vpop.eup %1431  ;;  %v835_v34 = vmul.f32 0.5, %v803_v26  ;;  %1278 = vst [vmem:[%s1642_s23] sm:$0xff] %v1277_v28   ;;  %v843_v43 = vmul.f32 0.5, %v811_v29  ;;  %v937_v47 = vmul.f32 0.5, %v905_v32 }
  0xc6   : > { %v1434_v36 = vpop.eup %1433  ;;  %v898_v37 = vadd.f32 1.0, %v1432_v31  ;;  %v820_v38 = vmul.f32 0.5, %v788_v30  ;;  %1357 = vst [vmem:[%s1642_s23 + $0x20] sm:$0xff] %v1297_v33   ;;  %v828_v40 = vmul.f32 0.5, %v796_v35 }
  0xc7   : > { %v906_v39 = vadd.f32 1.0, %v1434_v36  ;;  %1439 = vtanh.f32 %v835_v34  ;;  %v1436_v46 = vpop.eup %1435 }
  0xc8   : > { %v930_v42 = vmul.f32 0.5, %v898_v37  ;;  %v613_v44 = vpop.f32.mrf.mxu2  ;;  %v633_v45 = vpop.f32.mrf.mxu3  ;;  %1441 = vtanh.f32 %v820_v38  ;;  %v883_v60 = vadd.f32 1.0, %v1436_v46 }
  0xc9   : > { %v938_v48 = vmul.f32 0.5, %v906_v39  ;;  %v768_v49 = vmul.f32 %v1607_v24, %v613_v44  ;;  %v576_v50 = vpop.f32.mrf.mxu0  ;;  %v596_v51 = vpop.f32.mrf.mxu1  ;;  %1443 = vtanh.f32 %v828_v40  ;;  %v776_v54 = vmul.f32 %v1607_v24, %v633_v45 }
  0xca   : > { %v1438_v52 = vpop.eup %1437  ;;  %v1317_v53 = vpack.c.bf16 %v930_v42, %v929_v41  ;;  %v753_v57 = vmul.f32 %v1607_v24, %v576_v50  ;;  %1445 = vtanh.f32 %v843_v43  ;;  %v761_v59 = vmul.f32 %v1607_v24, %v596_v51 }
  0xcb   : > { %v1337_v55 = vpack.c.bf16 %v938_v48, %v937_v47  ;;  %v804_v56 = vadd.f32 %v1612_v25, %v768_v49  ;;  %v812_v58 = vadd.f32 %v1612_v25, %v776_v54  ;;  %v891_v61 = vadd.f32 1.0, %v1438_v52 }
  0xcc   : > { %1361 = vst [vmem:[%s1642_s23 + $0x40] sm:$0xff] %v1317_v53   ;;  %v789_v63 = vadd.f32 %v1612_v25, %v753_v57  ;;  %v797_v2 = vadd.f32 %v1612_v25, %v761_v59  ;;  %v915_v9 = vmul.f32 0.5, %v883_v60 }
  0xcd   : > { %1365 = vst [vmem:[%s1642_s23 + $0x60] sm:$0xff] %v1337_v55   ;;  %v836_v62 = vmul.f32 0.5, %v804_v56  ;;  %v1440_v0 = vpop.eup %1439  ;;  %v844_v1 = vmul.f32 0.5, %v812_v58  ;;  %v923_v10 = vmul.f32 0.5, %v891_v61 }
  0xce   : > { %v1442_v3 = vpop.eup %1441  ;;  %v821_v6 = vmul.f32 0.5, %v789_v63  ;;  %v829_v17 = vmul.f32 0.5, %v797_v2  ;;  %v899_v20 = vadd.f32 1.0, %v1440_v0 }
  0xcf   : > { %1447 = vtanh.f32 %v836_v62  ;;  %v1444_v4 = vpop.eup %1443  ;;  %v884_v5 = vadd.f32 1.0, %v1442_v3 }
  0xd0   : > { %1449 = vtanh.f32 %v844_v1  ;;  %v616_v7 = vpop.f32.mrf.mxu2  ;;  %v636_v8 = vpop.f32.mrf.mxu3  ;;  %v892_v11 = vadd.f32 1.0, %v1444_v4  ;;  %v931_v39 = vmul.f32 0.5, %v899_v20 }
  0xd1   : > { %v769_v12 = vmul.f32 %v1607_v24, %v616_v7  ;;  %v578_v13 = vpop.f32.mrf.mxu0  ;;  %v598_v14 = vpop.f32.mrf.mxu1  ;;  %v916_v16 = vmul.f32 0.5, %v884_v5  ;;  %v777_v18 = vmul.f32 %v1607_v24, %v636_v8  ;;  %1451 = vtanh.f32 %v821_v6 }
  0xd2   : > { %v1446_v15 = vpop.eup %1445  ;;  %v754_v19 = vmul.f32 %v1607_v24, %v578_v13  ;;  %v924_v21 = vmul.f32 0.5, %v892_v11  ;;  %v762_v23 = vmul.f32 %v1607_v24, %v598_v14  ;;  %1453 = vtanh.f32 %v829_v17 }
  0xd3   : > { %v805_v22 = vadd.f32 %v1612_v25, %v769_v12  ;;  %v1282_v26 = vpack.c.bf16 %v916_v16, %v915_v9  ;;  %v813_v27 = vadd.f32 %v1612_v25, %v777_v18  ;;  %v907_v30 = vadd.f32 1.0, %v1446_v15 }
  0xd4   : > { %v790_v28 = vadd.f32 %v1612_v25, %v754_v19  ;;  %v1302_v31 = vpack.c.bf16 %v924_v21, %v923_v10  ;;  %v798_v32 = vadd.f32 %v1612_v25, %v762_v23 }
  0xd5   : > { %v1448_v29 = vpop.eup %1447  ;;  %1354 = vst [vmem:[%s1642_s23 + $0x8] sm:$0xff] %v1282_v26   ;;  %v837_v37 = vmul.f32 0.5, %v805_v22  ;;  %v845_v41 = vmul.f32 0.5, %v813_v27  ;;  %v939_v44 = vmul.f32 0.5, %v907_v30 }
  0xd6   : > { %v1450_v33 = vpop.eup %1449  ;;  %v900_v34 = vadd.f32 1.0, %v1448_v29  ;;  %v822_v35 = vmul.f32 0.5, %v790_v28  ;;  %1358 = vst [vmem:[%s1642_s23 + $0x28] sm:$0xff] %v1302_v31   ;;  %v830_v38 = vmul.f32 0.5, %v798_v32 }
  0xd7   : > { %v908_v36 = vadd.f32 1.0, %v1450_v33  ;;  %v1452_v49 = vpop.eup %1451 }
  0xd8   : > { %v932_v40 = vmul.f32 0.5, %v900_v34  ;;  %v618_v42 = vpop.f32.mrf.mxu2  ;;  %v638_v43 = vpop.f32.mrf.mxu3  ;;  %1455 = vtanh.f32 %v822_v35  ;;  %v885_v58 = vadd.f32 1.0, %v1452_v49 }
  0xd9   : > { %v940_v45 = vmul.f32 0.5, %v908_v36  ;;  %v770_v46 = vmul.f32 %v1607_v24, %v618_v42  ;;  %v581_v47 = vpop.f32.mrf.mxu0  ;;  %v601_v48 = vpop.f32.mrf.mxu1  ;;  %1457 = vtanh.f32 %v830_v38  ;;  %v778_v51 = vmul.f32 %v1607_v24, %v638_v43 }
  0xda   : > { %v1322_v50 = vpack.c.bf16 %v932_v40, %v931_v39  ;;  %1459 = vtanh.f32 %v837_v37  ;;  %v755_v54 = vmul.f32 %v1607_v24, %v581_v47  ;;  %v1454_v55 = vpop.eup %1453  ;;  %v763_v57 = vmul.f32 %v1607_v24, %v601_v48 }
  0xdb   : > { %v1342_v52 = vpack.c.bf16 %v940_v45, %v939_v44  ;;  %v806_v53 = vadd.f32 %v1612_v25, %v770_v46  ;;  %1461 = vtanh.f32 %v845_v41  ;;  %v814_v56 = vadd.f32 %v1612_v25, %v778_v51 }
  0xdc   : > { %1362 = vst [vmem:[%s1642_s23 + $0x48] sm:$0xff] %v1322_v50   ;;  %v791_v60 = vadd.f32 %v1612_v25, %v755_v54  ;;  %v799_v62 = vadd.f32 %v1612_v25, %v763_v57  ;;  %v893_v0 = vadd.f32 1.0, %v1454_v55  ;;  %v917_v6 = vmul.f32 0.5, %v885_v58 }
  0xdd   : > { %1366 = vst [vmem:[%s1642_s23 + $0x68] sm:$0xff] %v1342_v52   ;;  %v838_v59 = vmul.f32 0.5, %v806_v53  ;;  %v846_v61 = vmul.f32 0.5, %v814_v56 }
  0xde   : > { %v1456_v63 = vpop.eup %1455  ;;  %v823_v8 = vmul.f32 0.5, %v791_v60  ;;  %v831_v14 = vmul.f32 0.5, %v799_v62  ;;  %v925_v17 = vmul.f32 0.5, %v893_v0 }
  0xdf   : > { %1463 = vtanh.f32 %v838_v59  ;;  %v1458_v1 = vpop.eup %1457  ;;  %v886_v2 = vadd.f32 1.0, %v1456_v63 }
  0xe0   : > { %1465 = vtanh.f32 %v846_v61  ;;  %v621_v3 = vpop.f32.mrf.mxu2  ;;  %v641_v4 = vpop.f32.mrf.mxu3  ;;  %v894_v7 = vadd.f32 1.0, %v1458_v1 }
  0xe1   : > { %v1460_v5 = vpop.eup %1459  ;;  %v771_v9 = vmul.f32 %v1607_v24, %v621_v3  ;;  %v583_v10 = vpop.f32.mrf.mxu0  ;;  %v918_v13 = vmul.f32 0.5, %v886_v2  ;;  %v779_v15 = vmul.f32 %v1607_v24, %v641_v4  ;;  %1467 = vtanh.f32 %v823_v8 }
  0xe2   : > { %v603_v11 = vpop.f32.mrf.mxu1  ;;  %v1462_v12 = vpop.eup %1461  ;;  %v756_v16 = vmul.f32 %v1607_v24, %v583_v10  ;;  %v926_v18 = vmul.f32 0.5, %v894_v7  ;;  %v901_v21 = vadd.f32 1.0, %v1460_v5  ;;  %1469 = vtanh.f32 %v831_v14 }
  0xe3   : > { %v807_v19 = vadd.f32 %v1612_v25, %v771_v9  ;;  %v764_v20 = vmul.f32 %v1607_v24, %v603_v11  ;;  %v1287_v22 = vpack.c.bf16 %v918_v13, %v917_v6  ;;  %v815_v23 = vadd.f32 %v1612_v25, %v779_v15 }
  0xe4   : > { %v792_v26 = vadd.f32 %v1612_v25, %v756_v16  ;;  %v909_v28 = vadd.f32 1.0, %v1462_v12  ;;  %v1307_v29 = vpack.c.bf16 %v926_v18, %v925_v17  ;;  %v933_v37 = vmul.f32 0.5, %v901_v21 }
  0xe5   : > { %v1464_v27 = vpop.eup %1463  ;;  %v800_v30 = vadd.f32 %v1612_v25, %v764_v20  ;;  %1355 = vst [vmem:[%s1642_s23 + $0x10] sm:$0xff] %v1287_v22   ;;  %v839_v35 = vmul.f32 0.5, %v807_v19  ;;  %v847_v39 = vmul.f32 0.5, %v815_v23 }
  0xe6   : > { %v1466_v31 = vpop.eup %1465  ;;  %v902_v32 = vadd.f32 1.0, %v1464_v27  ;;  %v824_v33 = vmul.f32 0.5, %v792_v26  ;;  %1359 = vst [vmem:[%s1642_s23 + $0x30] sm:$0xff] %v1307_v29   ;;  %v941_v42 = vmul.f32 0.5, %v909_v28 }
  0xe7   : > { %v910_v34 = vadd.f32 1.0, %v1466_v31  ;;  %v832_v36 = vmul.f32 0.5, %v800_v30  ;;  %v1468_v47 = vpop.eup %1467 }
  0xe8   : > { %v934_v38 = vmul.f32 0.5, %v902_v32  ;;  %v623_v40 = vpop.f32.mrf.mxu2  ;;  %v643_v41 = vpop.f32.mrf.mxu3  ;;  %1471 = vtanh.f32 %v824_v33  ;;  %v887_v53 = vadd.f32 1.0, %v1468_v47 }
  0xe9   : > { %v942_v43 = vmul.f32 0.5, %v910_v34  ;;  %v772_v44 = vmul.f32 %v1607_v24, %v623_v40  ;;  %1473 = vtanh.f32 %v832_v36  ;;  %v780_v46 = vmul.f32 %v1607_v24, %v643_v41  ;;  %v1470_v50 = vpop.eup %1469 }
  0xea   : > { %v1327_v45 = vpack.c.bf16 %v934_v38, %v933_v37  ;;  %1475 = vtanh.f32 %v839_v35  ;;  %v895_v56 = vadd.f32 1.0, %v1470_v50  ;;  %v919_v61 = vmul.f32 0.5, %v887_v53 }
  0xeb   : > { %v1347_v48 = vpack.c.bf16 %v942_v43, %v941_v42  ;;  %v808_v49 = vadd.f32 %v1612_v25, %v772_v44  ;;  %1477 = vtanh.f32 %v847_v39  ;;  %v816_v51 = vadd.f32 %v1612_v25, %v780_v46 }
  0xec   : > { %1363 = vst [vmem:[%s1642_s23 + $0x50] sm:$0xff] %v1327_v45   ;;  %v927_v63 = vmul.f32 0.5, %v895_v56 }
  0xed   : > { %1367 = vst [vmem:[%s1642_s23 + $0x70] sm:$0xff] %v1347_v48   ;;  %v840_v52 = vmul.f32 0.5, %v808_v49  ;;  %v848_v54 = vmul.f32 0.5, %v816_v51 }
  0xee   : > { %v1472_v55 = vpop.eup %1471 }
  0xef   : > { %1479 = vtanh.f32 %v840_v52  ;;  %v1474_v57 = vpop.eup %1473  ;;  %v888_v24 = vadd.f32 1.0, %v1472_v55 }
  0xf0   : > { %1481 = vtanh.f32 %v848_v54  ;;  %v1476_v58 = vpop.eup %1475  ;;  %v896_v59 = vadd.f32 1.0, %v1474_v57 }
  0xf1   : > { %v1478_v60 = vpop.eup %1477  ;;  %v920_v62 = vmul.f32 0.5, %v888_v24  ;;  %v903_v25 = vadd.f32 1.0, %v1476_v58 }
  0xf2   : > { %v928_v0 = vmul.f32 0.5, %v896_v59  ;;  %v911_v3 = vadd.f32 1.0, %v1478_v60 }
  0xf3   : > { %v1292_v1 = vpack.c.bf16 %v920_v62, %v919_v61  ;;  %v935_v8 = vmul.f32 0.5, %v903_v25 }
  0xf4   : > { %v1312_v4 = vpack.c.bf16 %v928_v0, %v927_v63  ;;  %v943_v10 = vmul.f32 0.5, %v911_v3 }
  0xf5   : > { %v1480_v2 = vpop.eup %1479  ;;  %1356 = vst [vmem:[%s1642_s23 + $0x18] sm:$0xff] %v1292_v1  }
  0xf6   : > { %v1482_v5 = vpop.eup %1481  ;;  %v904_v6 = vadd.f32 1.0, %v1480_v2  ;;  %1360 = vst [vmem:[%s1642_s23 + $0x38] sm:$0xff] %v1312_v4  }
  0xf7   : > { %v912_v7 = vadd.f32 1.0, %v1482_v5 }
  0xf8   : > { %v936_v9 = vmul.f32 0.5, %v904_v6 }
  0xf9   : > { %v944_v11 = vmul.f32 0.5, %v912_v7 }
  0xfa   : > { %v1332_v12 = vpack.c.bf16 %v936_v9, %v935_v8 }
  0xfb   : > { %v1352_v13 = vpack.c.bf16 %v944_v11, %v943_v10 }
  0xfc   : > { %1364 = vst [vmem:[%s1642_s23 + $0x58] sm:$0xff] %v1332_v12  }
  0xfd   : > { %1368 = vst [vmem:[%s1642_s23 + $0x78] sm:$0xff] %v1352_v13  }
  0xfe PF: > { %s14_s17 = sadd.s32 1, %s1505_s17   ;;  %s1715_s15 = smov %s1501_s16 }
  0xff   : > { %p11_p5 = scmp.ge.s32.totalorder %s14_s17, 4   ;;  %s1716_s16 = smov %s1718_s18 }
 0x101   :  { %13 = sbr.rel (!%p11_p5) target bundleno = 2 (0x2), region = 83 }

// kernel: udarknet_forward.16
= control target key start
LH: loop header
LB: loop body
LE: loop exit
PB: predicated region body
PF: predicated region fallthrough
CT: control target
= control target key end

     0   :  { %s3097_s12 = smov 0   ;;  %s3099_s13 = smov 0   ;;  %s3491_s0 = inlined_call_operand.vmem [shape: bf16[2,8,8,128], index: 0, kind: input, shape index: {}]   ;;  %s3492_s1 = inlined_call_operand.vmem [shape: bf16[9,128,128], index: 1, kind: input, shape index: {}]   ;;  %s3493_s2 = inlined_call_operand.vmem [shape: f32[1,128], index: 2, kind: input, shape index: {}]   ;;  %s3494_s3 = inlined_call_operand.vmem [shape: bf16[2,4,64,128], index: 3, kind: output, shape index: {}]  }
   0x1   :  { %s3101_s14 = smov 0  }
   0x2 LB: > { %s32_s15 = sadd.s32 1, %s3070_s13  ;;  %p2298_p0 = scmp.ge.s32.totalorder %s3074_s14, 1  ;;  %s3074_s14 = sphi %s3101_s14, %s13_s14   ;;  %s3070_s13 = sphi %s3099_s13, %s3500_s13   ;;  %s3066_s12 = sphi %s3097_s12, %s3499_s12  }
   0x3   : > { %p34_p1 = scmp.ge.s32.totalorder %s32_s15, 2  ;;  %p187_p2 = scmp.lt.s32.totalorder %s3074_s14, 3 }
   0x5   : > { %s3502_s15 = smov (%p34_p1, %s32_s15), 0  ;;  %p188_p3 = pnand %p2298_p0, %p187_p2 }
   0x6   : > { %p228_p4 = scmp.lt.s32.totalorder (!%p188_p3), %s3066_s12, 1 }
   0x7   : > { %191 = sbr.rel (%p188_p3) target bundleno = 333 (0x14d), region = 32 }
   0xc   : > { %v2830_v0 = vld [vmem:[%s3492_s1 + $0x38] sm:$0xff]  ;;  %v3076_v2 = vmov 0   ;;  %v2829_v3 = vld [vmem:[%s3492_s1 + $0x30] sm:$0xff]  ;;  %s3504_s12 = smov (!%p228_p4, %s3066_s12), 1  ;;  %v2828_v6 = vld [vmem:[%s3492_s1 + $0x28] sm:$0xff]  ;;  %vm294_vm0 = vcmask 1040384  }
   0xd   : > { %v2850_v1 = vld [vmem:[%s3492_s1 + $0xb8] sm:$0xff]  ;;  %293 = vst [vmem:[#allocation2] sm:$0xf] %v3076_v2  ;;  %452 = vmatpush.bf16.msra.mxu0 %v2830_v0  ;;  %3010 = vmatpush.bf16.msra.mxu1 %v2830_v0  ;;  %v2849_v4 = vld [vmem:[%s3492_s1 + $0xb0] sm:$0xff]  ;;  %s2817_s26 = sshll.u32 %s3504_s12, 5  ;;  %v2848_v10 = vld [vmem:[%s3492_s1 + $0xa8] sm:$0xff] }
   0xe   : > { %300 = vst [vmem:[#allocation2 + $0x8] sm:$0xf] %v3076_v2  ;;  %868 = vmatpush.bf16.msra.mxu2 %v2850_v1  ;;  %v2862_v5 = vld [vmem:[%s3492_s1 + $0xf8] sm:$0xff]  ;;  %v2861_v7 = vld [vmem:[%s3492_s1 + $0xf0] sm:$0xff]  ;;  %s3142_s6 = scalar_lea.vmem %s3491_s0, %s2817_s26  ;;  %v2827_v11 = vld [vmem:[%s3492_s1 + $0x20] sm:$0xff]  ;;  %s2818_s28 = sshll.u32 %s3504_s12, 7 }
   0xf   : > { %304 = vst [vmem:[#allocation2 + $0x10] sm:$0xf] %v3076_v2  ;;  %1019 = vmatpush.bf16.msra.mxu3 %v2862_v5  ;;  %v332_v8 = vld [vmem:[%s3142_s6] sm:$0xf]  ;;  %v333_v9 = vld [vmem:[%s3142_s6 + $0x4] sm:$0xf]  ;;  %s3436_s4 = scalar_lea.vmem %s3494_s3, %s2818_s28 }
  0x10   : > { %308 = vst [vmem:[#allocation2 + $0x18] sm:$0xf] %v3076_v2  ;;  %v2847_v12 = vld [vmem:[%s3492_s1 + $0xa0] sm:$0xff]  ;;  %v2860_v13 = vld [vmem:[%s3492_s1 + $0xe8] sm:$0xff]  ;;  %v336_v14 = vld [vmem:[%s3142_s6 + $0x10] sm:$0xf] }
  0x11   : > { %453 = vmatpush.bf16.msra.mxu0 %v2829_v3  ;;  %3011 = vmatpush.bf16.msra.mxu1 %v2829_v3  ;;  %312 = vst [vmem:[#allocation2 + $0x20] sm:$0xf] %v3076_v2  ;;  %v337_v15 = vld [vmem:[%s3142_s6 + $0x14] sm:$0xf]  ;;  %vm295_vm1 = vsmask.f32 256 }
  0x12   : > { %869 = vmatpush.bf16.msra.mxu2 %v2849_v4  ;;  %340 = vst [vmem:[#allocation2] sm:$0xf] %v332_v8  ;;  %vm3160_vm2 = vmand %vm294_vm0, %vm295_vm1  ;;  %v297_v17 = vld [vmem:[#allocation2 + $0x4] sm:$0x1]  ;;  %v301_v18 = vld [vmem:[#allocation2 + $0xc] sm:$0x1] }
  0x13   : > { %341 = vst [vmem:[#allocation2 + $0x8] sm:$0xf] %v333_v9  ;;  %1020 = vmatpush.bf16.msra.mxu3 %v2861_v7  ;;  %v298_v19 = vsel %vm3160_vm2, 0, %v297_v17  ;;  %v2859_v20 = vld [vmem:[%s3492_s1 + $0xe0] sm:$0xff]  ;;  %v302_v21 = vsel %vm3160_vm2, 0, %v301_v18  ;;  %v2826_v22 = vld [vmem:[%s3492_s1 + $0x18] sm:$0xff] }
  0x14   : > { %316 = vst [vmem:[#allocation2 + $0x28] sm:$0xf] %v3076_v2  ;;  %v2846_v24 = vld [vmem:[%s3492_s1 + $0x98] sm:$0xff]  ;;  %vm672_vm3 = vsmask.f32 3328  ;;  %v2825_v31 = vld [vmem:[%s3492_s1 + $0x10] sm:$0xff] }
  0x15   : > { %454 = vmatpush.bf16.msra.mxu0 %v2828_v6  ;;  %3012 = vmatpush.bf16.msra.mxu1 %v2828_v6  ;;  %320 = vst [vmem:[#allocation2 + $0x30] sm:$0xf] %v3076_v2  ;;  %v2858_v29 = vld [vmem:[%s3492_s1 + $0xd8] sm:$0xff]  ;;  %v334_v35 = vld [vmem:[%s3142_s6 + $0x8] sm:$0xf]  ;;  %v2845_v36 = vld [vmem:[%s3492_s1 + $0x90] sm:$0xff] }
  0x16   : > { %870 = vmatpush.bf16.msra.mxu2 %v2848_v10  ;;  %324 = vst [vmem:[#allocation2 + $0x38] sm:$0xf] %v3076_v2  ;;  %v335_v38 = vld [vmem:[%s3142_s6 + $0xc] sm:$0xf]  ;;  %vm673_vm4 = vsmask.f32 7440 }
  0x17   : > { %328 = vst [vmem:[#allocation2 + $0x40] sm:$0xf] %v3076_v2  ;;  %1021 = vmatpush.bf16.msra.mxu3 %v2860_v13  ;;  %v338_v40 = vld [vmem:[%s3142_s6 + $0x18] sm:$0xf]  ;;  %v2857_v42 = vld [vmem:[%s3492_s1 + $0xd0] sm:$0xff]  ;;  %v2824_v44 = vld [vmem:[%s3492_s1 + $0x8] sm:$0xff] }
  0x18   : > { %344 = vst [vmem:[#allocation2 + $0x20] sm:$0xf] %v336_v14  ;;  %v339_v43 = vld [vmem:[%s3142_s6 + $0x1c] sm:$0xf]  ;;  %v2844_v45 = vld [vmem:[%s3492_s1 + $0x88] sm:$0xff]  ;;  %vm3201_vm5 = vmor %vm672_vm3, %vm673_vm4 }
  0x19   : > { %455 = vmatpush.bf16.msra.mxu0 %v2827_v11  ;;  %3013 = vmatpush.bf16.msra.mxu1 %v2827_v11  ;;  %345 = vst [vmem:[#allocation2 + $0x28] sm:$0xf] %v337_v15  ;;  %v648_v23 = vld [vmem:[#allocation2] sm:$0xf]  ;;  %v2856_v58 = vld [vmem:[%s3492_s1 + $0xc8] sm:$0xff]  ;;  %v2842_v1 = vld [vmem:[%s3492_s1 + $0x78] sm:$0xff] }
  0x1a   : > { %871 = vmatpush.bf16.msra.mxu2 %v2847_v12  ;;  %299 = vst [vmem:[#allocation2 + $0x4] sm:$0x1] %v298_v19  ;;  %v650_v25 = vld [vmem:[#allocation2 + $0x8] sm:$0xf]  ;;  %v676_v26 = vshrl.u32 %v648_v23, 16  ;;  %v679_v27 = vshll.u32 %v648_v23, 16 }
  0x1b   : > { %303 = vst [vmem:[#allocation2 + $0xc] sm:$0x1] %v302_v21  ;;  %v690_v28 = vshrl.u32 %v650_v25, 16  ;;  %1022 = vmatpush.bf16.msra.mxu3 %v2859_v20  ;;  %v693_v30 = vshll.u32 %v650_v25, 16  ;;  %v2305_v47 = vld [vmem:[#allocation2] sm:$0xf] }
  0x1c   : > { %v678_v32 = vrot.slane %v676_v26, 4  ;;  %v681_v33 = vrot.slane %v679_v27, 5  ;;  %342 = vst [vmem:[#allocation2 + $0x10] sm:$0xf] %v334_v35  ;;  %v2819_v48 = vld [vmem:[#allocation2 + $0x4] sm:$0xf0] }
  0x1d   : > { %456 = vmatpush.bf16.msra.mxu0 %v2826_v22  ;;  %3014 = vmatpush.bf16.msra.mxu1 %v2826_v22  ;;  %v692_v34 = vrot.slane %v690_v28, 4  ;;  %v695_v37 = vrot.slane %v693_v30, 5  ;;  %343 = vst [vmem:[#allocation2 + $0x18] sm:$0xf] %v335_v38  ;;  %v305_v59 = vld [vmem:[#allocation2 + $0x14] sm:$0x1]  ;;  %v2306_v5 = vor.u32 %v2819_v48, %v2305_v47 }
  0x1e   : > { %872 = vmatpush.bf16.msra.mxu2 %v2846_v24  ;;  %v682_v39 = vor.u32 %v681_v33, %v678_v32  ;;  %346 = vst [vmem:[#allocation2 + $0x30] sm:$0xf] %v338_v40  ;;  %v309_v60 = vld [vmem:[#allocation2 + $0x1c] sm:$0x1]  ;;  %v2823_v61 = vld [vmem:[%s3492_s1] sm:$0xff]  ;;  %v306_v63 = vsel %vm3160_vm2, 0, %v305_v59 }
  0x1f   : > { %1023 = vmatpush.bf16.msra.mxu3 %v2858_v29  ;;  %v696_v41 = vor.u32 %v695_v37, %v692_v34  ;;  %347 = vst [vmem:[#allocation2 + $0x38] sm:$0xf] %v339_v43  ;;  %v2313_v52 = vld [vmem:[#allocation2 + $0x20] sm:$0xf]  ;;  %v310_v0 = vsel %vm3160_vm2, 0, %v309_v60  ;;  %v2874_v2 = vld [vmem:[%s3492_s1 + $0x138] sm:$0xff] }
  0x20   : > { %v683_v50 = vrot.slane %v682_v39, 4  ;;  %v2821_v53 = vld [vmem:[#allocation2 + $0x24] sm:$0xf0]  ;;  %307 = vst [vmem:[#allocation2 + $0x14] sm:$0x1] %v306_v63  ;;  %v2843_v7 = vld [vmem:[%s3492_s1 + $0x80] sm:$0xff] }
  0x21   : > { %457 = vmatpush.bf16.msra.mxu0 %v2825_v31  ;;  %3015 = vmatpush.bf16.msra.mxu1 %v2825_v31  ;;  %v649_v46 = vld [vmem:[#allocation2 + $0x4] sm:$0x1]  ;;  %v697_v55 = vrot.slane %v696_v41, 4  ;;  %v2314_v6 = vor.u32 %v2821_v53, %v2313_v52  ;;  %311 = vst [vmem:[#allocation2 + $0x1c] sm:$0x1] %v310_v0  ;;  %v2894_v12 = vld [vmem:[%s3492_s1 + $0x1b8] sm:$0xff] }
  0x22   : > { %873 = vmatpush.bf16.msra.mxu2 %v2845_v36  ;;  %v651_v49 = vld [vmem:[#allocation2 + $0xc] sm:$0x1]  ;;  %v685_v51 = vshll.u32 %v649_v46, 16  ;;  %v2855_v17 = vld [vmem:[%s3492_s1 + $0xc0] sm:$0xff]  ;;  %v2851_v19 = vld [vmem:[#allocation2 + $0x4] sm:$0xf0] }
  0x23   : > { %v699_v56 = vshll.u32 %v651_v49, 16  ;;  %1024 = vmatpush.bf16.msra.mxu3 %v2857_v42  ;;  %v652_v4 = vld [vmem:[#allocation2 + $0x10] sm:$0xf]  ;;  %v2481_v18 = vld [vmem:[#allocation2] sm:$0xf]  ;;  %v2906_v28 = vld [vmem:[%s3492_s1 + $0x1f8] sm:$0xff] }
  0x24   : > { %v687_v57 = vrot.slane %v685_v51, 5  ;;  %v654_v10 = vld [vmem:[#allocation2 + $0x18] sm:$0xf]  ;;  %v704_v13 = vshrl.u32 %v652_v4, 16  ;;  %v707_v14 = vshll.u32 %v652_v4, 16  ;;  %v2841_v21 = vld [vmem:[%s3492_s1 + $0x70] sm:$0xff]  ;;  %v2482_v30 = vor.u32 %v2851_v19, %v2481_v18 }
  0x25   : > { %458 = vmatpush.bf16.msra.mxu0 %v2824_v44  ;;  %3016 = vmatpush.bf16.msra.mxu1 %v2824_v44  ;;  %v701_v62 = vrot.slane %v699_v56, 5  ;;  %v718_v15 = vshrl.u32 %v654_v10, 16  ;;  %v721_v20 = vshll.u32 %v654_v10, 16  ;;  %v2873_v22 = vld [vmem:[%s3492_s1 + $0x130] sm:$0xff]  ;;  %v2840_v29 = vld [vmem:[%s3492_s1 + $0x68] sm:$0xff]  ;;  %v2871_v52 = vld [vmem:[%s3492_s1 + $0x120] sm:$0xff] }
  0x26   : > { %874 = vmatpush.bf16.msra.mxu2 %v2844_v45  ;;  %v688_v3 = vsel %vm3201_vm5, %v683_v50, %v687_v57  ;;  %v706_v23 = vrot.slane %v704_v13, 4  ;;  %v709_v24 = vrot.slane %v707_v14, 5  ;;  %v2872_v32 = vld [vmem:[%s3492_s1 + $0x128] sm:$0xff]  ;;  %v2893_v35 = vld [vmem:[%s3492_s1 + $0x1b0] sm:$0xff]  ;;  %v313_v39 = vld [vmem:[#allocation2 + $0x24] sm:$0x1] }
  0x27   : > { %v702_v8 = vsel %vm3201_vm5, %v697_v55, %v701_v62  ;;  %v804_v9 = vunpack.c.l.b16 %v688_v3  ;;  %1025 = vmatpush.bf16.msra.mxu3 %v2856_v58  ;;  %v720_v25 = vrot.slane %v718_v15, 4  ;;  %v723_v27 = vrot.slane %v721_v20, 5  ;;  %v653_v33 = vld [vmem:[#allocation2 + $0x14] sm:$0x1]  ;;  %v317_v44 = vld [vmem:[#allocation2 + $0x2c] sm:$0x1] }
  0x28   : > { %v805_v11 = vunpack.c.l.b16 %v702_v8  ;;  %v710_v31 = vor.u32 %v709_v24, %v706_v23  ;;  %v655_v36 = vld [vmem:[#allocation2 + $0x1c] sm:$0x1]  ;;  %v713_v37 = vshll.u32 %v653_v33, 16  ;;  %v2905_v38 = vld [vmem:[%s3492_s1 + $0x1f0] sm:$0xff]  ;;  %v314_v43 = vsel %vm3160_vm2, 0, %v313_v39  ;;  %v2839_v45 = vld [vmem:[%s3492_s1 + $0x60] sm:$0xff] }
  0x29   : > { %459 = vmatpush.bf16.msra.mxu0 %v2823_v61  ;;  %3017 = vmatpush.bf16.msra.mxu1 %v2823_v61  ;;  %v724_v34 = vor.u32 %v723_v27, %v720_v25  ;;  %v727_v42 = vshll.u32 %v655_v36, 16  ;;  %315 = vst [vmem:[#allocation2 + $0x24] sm:$0x1] %v314_v43  ;;  %v318_v47 = vsel %vm3160_vm2, 0, %v317_v44  ;;  %v656_v48 = vld [vmem:[#allocation2 + $0x20] sm:$0xf] }
  0x2a   : > { %875 = vmatpush.bf16.msra.mxu2 %v2843_v7  ;;  %v812_v26 = vpack.c.b16 %v805_v11, %v804_v9  ;;  %v711_v40 = vrot.slane %v710_v31, 4  ;;  %v715_v46 = vrot.slane %v713_v37, 5  ;;  %v2892_v50 = vld [vmem:[%s3492_s1 + $0x1a8] sm:$0xff]  ;;  %319 = vst [vmem:[#allocation2 + $0x2c] sm:$0x1] %v318_v47  ;;  %v732_v59 = vshrl.u32 %v656_v48, 16 }
  0x2b   : > { %1026 = vmatpush.bf16.msra.mxu3 %v2855_v17  ;;  %v725_v41 = vrot.slane %v724_v34, 4  ;;  %v729_v49 = vrot.slane %v727_v42, 5  ;;  %v658_v51 = vld [vmem:[#allocation2 + $0x28] sm:$0xf]  ;;  %v2309_v53 = vld [vmem:[#allocation2 + $0x10] sm:$0xf] }
  0x2c   : > { %460 = vmatmul.bf16.vlgmr.msra.gmra.mxu0 %v2306_v5  ;;  %470 = vmatmul.bf16.vlgmr.msra.gmra.mxu1 %v2314_v6  ;;  %v2820_v55 = vld [vmem:[#allocation2 + $0x14] sm:$0xf0]  ;;  %v2317_v56 = vld [vmem:[#allocation2 + $0x30] sm:$0xf]  ;;  %v716_v58 = vsel %vm3201_vm5, %v711_v40, %v715_v46  ;;  %v2904_v60 = vld [vmem:[%s3492_s1 + $0x1e8] sm:$0xff]  ;;  %v735_v62 = vshll.u32 %v656_v48, 16 }
  0x2d   : > { %603 = vmatpush.bf16.msrb.mxu1 %v2842_v1  ;;  %1170 = vmatpush.bf16.msrb.mxu0 %v2874_v2  ;;  %v2822_v57 = vld [vmem:[#allocation2 + $0x34] sm:$0xf0]  ;;  %v730_v61 = vsel %vm3201_vm5, %v725_v41, %v729_v49  ;;  %v746_v63 = vshrl.u32 %v658_v51, 16  ;;  %v749_v0 = vshll.u32 %v658_v51, 16  ;;  %v321_v1 = vld [vmem:[#allocation2 + $0x34] sm:$0x1]  ;;  %v2310_v5 = vor.u32 %v2820_v55, %v2309_v53 }
  0x2e   : > { %1583 = vmatpush.bf16.msrb.mxu2 %v2894_v12  ;;  %1027 = vmatmul.bf16.vlgmr.msra.gmra.mxu3 %v2482_v30  ;;  %v2891_v2 = vld [vmem:[%s3492_s1 + $0x1a0] sm:$0xff]  ;;  %v322_v3 = vsel %vm3160_vm2, 0, %v321_v1  ;;  %v325_v4 = vld [vmem:[#allocation2 + $0x3c] sm:$0x1]  ;;  %v2318_v8 = vor.u32 %v2822_v57, %v2317_v56  ;;  %v806_v9 = vunpack.c.l.b16 %v716_v58  ;;  %v807_v10 = vunpack.c.l.b16 %v730_v61  ;;  %v2485_v11 = vld [vmem:[#allocation2 + $0x10] sm:$0xf] }
  0x2f   : > { %876 = vmatmul.bf16.vlgmr.msra.gmra.mxu2 %v812_v26  ;;  %1733 = vmatpush.bf16.msrb.mxu3 %v2906_v28  ;;  %v2838_v6 = vld [vmem:[%s3492_s1 + $0x58] sm:$0xff]  ;;  %323 = vst [vmem:[#allocation2 + $0x34] sm:$0x1] %v322_v3  ;;  %v326_v12 = vsel %vm3160_vm2, 0, %v325_v4  ;;  %v734_v14 = vrot.slane %v732_v59, 4  ;;  %v737_v15 = vrot.slane %v735_v62, 5 }
  0x30   : > { %v2870_v7 = vld [vmem:[%s3492_s1 + $0x118] sm:$0xff]  ;;  %v748_v17 = vrot.slane %v746_v63, 4  ;;  %v751_v18 = vrot.slane %v749_v0, 5  ;;  %v657_v19 = vld [vmem:[#allocation2 + $0x24] sm:$0x1]  ;;  %v2869_v23 = vld [vmem:[%s3492_s1 + $0x110] sm:$0xff]  ;;  %v813_v24 = vpack.c.b16 %v807_v10, %v806_v9 }
  0x31   : > { %604 = vmatpush.bf16.msrb.mxu1 %v2841_v21  ;;  %1171 = vmatpush.bf16.msrb.mxu0 %v2873_v22  ;;  %v2852_v13 = vld [vmem:[#allocation2 + $0x14] sm:$0xf0]  ;;  %v659_v20 = vld [vmem:[#allocation2 + $0x2c] sm:$0x1]  ;;  %v2837_v22 = vld [vmem:[%s3492_s1 + $0x50] sm:$0xff]  ;;  %v738_v26 = vor.u32 %v737_v15, %v734_v14  ;;  %v741_v27 = vshll.u32 %v657_v19, 16 }
  0x32   : > { %1584 = vmatpush.bf16.msrb.mxu2 %v2893_v35  ;;  %v2890_v21 = vld [vmem:[%s3492_s1 + $0x198] sm:$0xff]  ;;  %327 = vst [vmem:[#allocation2 + $0x3c] sm:$0x1] %v326_v12  ;;  %v2486_v25 = vor.u32 %v2852_v13, %v2485_v11  ;;  %v752_v28 = vor.u32 %v751_v18, %v748_v17  ;;  %v2903_v30 = vld [vmem:[%s3492_s1 + $0x1e0] sm:$0xff]  ;;  %v2836_v31 = vld [vmem:[%s3492_s1 + $0x48] sm:$0xff] }
  0x33   : > { %1734 = vmatpush.bf16.msrb.mxu3 %v2905_v38  ;;  %v2889_v33 = vld [vmem:[%s3492_s1 + $0x190] sm:$0xff]  ;;  %v2902_v34 = vld [vmem:[%s3492_s1 + $0x1d8] sm:$0xff]  ;;  %v739_v35 = vrot.slane %v738_v26, 4  ;;  %v743_v36 = vrot.slane %v741_v27, 5  ;;  %v2888_v41 = vld [vmem:[%s3492_s1 + $0x188] sm:$0xff] }
  0x34   : > { %v753_v37 = vrot.slane %v752_v28, 4  ;;  %v660_v39 = vld [vmem:[#allocation2 + $0x30] sm:$0xf]  ;;  %v662_v40 = vld [vmem:[#allocation2 + $0x38] sm:$0xf]  ;;  %v2835_v42 = vld [vmem:[%s3492_s1 + $0x40] sm:$0xff] }
  0x35   : > { %605 = vmatpush.bf16.msrb.mxu1 %v2840_v29  ;;  %1172 = vmatpush.bf16.msrb.mxu0 %v2872_v32  ;;  %v755_v29 = vshll.u32 %v659_v20, 16  ;;  %v2868_v32 = vld [vmem:[%s3492_s1 + $0x108] sm:$0xff]  ;;  %v2867_v43 = vld [vmem:[%s3492_s1 + $0x100] sm:$0xff]  ;;  %v2886_v44 = vld [vmem:[%s3492_s1 + $0x178] sm:$0xff]  ;;  %v760_v46 = vshrl.u32 %v660_v39, 16  ;;  %v763_v47 = vshll.u32 %v660_v39, 16  ;;  %v744_v49 = vsel %vm3201_vm5, %v739_v35, %v743_v36 }
  0x36   : > { %1585 = vmatpush.bf16.msrb.mxu2 %v2892_v50  ;;  %v2369_v48 = vld [vmem:[#allocation2] sm:$0xf]  ;;  %v774_v51 = vshrl.u32 %v662_v40, 16  ;;  %v2831_v53 = vld [vmem:[#allocation2 + $0x4] sm:$0xf0]  ;;  %v808_v57 = vunpack.c.l.b16 %v744_v49  ;;  %v2885_v59 = vld [vmem:[%s3492_s1 + $0x170] sm:$0xff] }
  0x37   : > { %1735 = vmatpush.bf16.msrb.mxu3 %v2904_v60  ;;  %v757_v38 = vrot.slane %v755_v29, 5  ;;  %v2545_v55 = vld [vmem:[#allocation2 + $0x8] sm:$0xf]  ;;  %v2863_v56 = vld [vmem:[#allocation2 + $0xc] sm:$0xf0]  ;;  %v762_v60 = vrot.slane %v760_v46, 4  ;;  %v2370_v63 = vor.u32 %v2831_v53, %v2369_v48 }
  0x38   : > { %v765_v61 = vrot.slane %v763_v47, 5  ;;  %v2913_v62 = vld [vmem:[%s3492_s1 + $0x230] sm:$0xff]  ;;  %v2546_v0 = vor.u32 %v2863_v56, %v2545_v55  ;;  %v2489_v1 = vld [vmem:[#allocation2 + $0x20] sm:$0xf]  ;;  %v2853_v4 = vld [vmem:[#allocation2 + $0x24] sm:$0xf0] }
  0x39   : > { %606 = vmatpush.bf16.msrb.mxu1 %v2839_v45  ;;  %1173 = vmatpush.bf16.msrb.mxu0 %v2871_v52  ;;  %v2914_v45 = vld [vmem:[%s3492_s1 + $0x238] sm:$0xff]  ;;  %v758_v50 = vsel %vm3201_vm5, %v753_v37, %v757_v38  ;;  %v777_v52 = vshll.u32 %v662_v40, 16  ;;  %v2490_v10 = vor.u32 %v2853_v4, %v2489_v1  ;;  %v2887_v14 = vld [vmem:[%s3492_s1 + $0x180] sm:$0xff]  ;;  %v2901_v15 = vld [vmem:[%s3492_s1 + $0x1d0] sm:$0xff] }
  0x3a   : > { %1586 = vmatpush.bf16.msrb.mxu2 %v2891_v2  ;;  %v809_v58 = vunpack.c.l.b16 %v758_v50  ;;  %v776_v2 = vrot.slane %v774_v51, 4  ;;  %v766_v9 = vor.u32 %v765_v61, %v762_v60  ;;  %v2912_v17 = vld [vmem:[%s3492_s1 + $0x228] sm:$0xff]  ;;  %v2883_v18 = vld [vmem:[%s3492_s1 + $0x160] sm:$0xff]  ;;  %v2832_v35 = vld [vmem:[#allocation2 + $0x14] sm:$0xf0] }
  0x3b   : > { %1736 = vmatpush.bf16.msrb.mxu3 %v2903_v30  ;;  %v779_v3 = vrot.slane %v777_v52, 5  ;;  %v1366_v19 = vld [vmem:[#allocation2] sm:$0xf]  ;;  %v1368_v20 = vld [vmem:[#allocation2 + $0x8] sm:$0xf]  ;;  %v2881_v46 = vld [vmem:[%s3492_s1 + $0x150] sm:$0xff] }
  0x3c   : > { %465 = vmatmul.bf16.gmra.mxu0 %v2310_v5  ;;  %475 = vmatmul.bf16.gmra.mxu1 %v2318_v8  ;;  %v661_v5 = vld [vmem:[#allocation2 + $0x34] sm:$0x1]  ;;  %v2884_v8 = vld [vmem:[%s3492_s1 + $0x168] sm:$0xff]  ;;  %v1391_v27 = vshrl.u32 %v1366_v19, 16  ;;  %v1394_v28 = vshll.u32 %v1366_v19, 16  ;;  %v1405_v29 = vshrl.u32 %v1368_v20, 16 }
  0x3d   : > { %607 = vmatpush.bf16.msrb.mxu1 %v2838_v6  ;;  %1174 = vmatpush.bf16.msrb.mxu0 %v2870_v7  ;;  %v663_v6 = vld [vmem:[#allocation2 + $0x3c] sm:$0x1]  ;;  %v814_v7 = vpack.c.b16 %v809_v58, %v808_v57  ;;  %v769_v11 = vshll.u32 %v661_v5, 16  ;;  %v780_v12 = vor.u32 %v779_v3, %v776_v2  ;;  %v2900_v26 = vld [vmem:[%s3492_s1 + $0x1c8] sm:$0xff]  ;;  %v1408_v30 = vshll.u32 %v1368_v20, 16  ;;  %v2899_v57 = vld [vmem:[%s3492_s1 + $0x1c0] sm:$0xff] }
  0x3e   : > { %1587 = vmatpush.bf16.msrb.mxu2 %v2890_v21  ;;  %1032 = vmatmul.bf16.gmra.mxu3 %v2486_v25  ;;  %v783_v13 = vshll.u32 %v663_v6, 16  ;;  %v767_v21 = vrot.slane %v766_v9, 4  ;;  %v2911_v25 = vld [vmem:[%s3492_s1 + $0x220] sm:$0xff]  ;;  %v2549_v36 = vld [vmem:[#allocation2 + $0x18] sm:$0xf]  ;;  %v1393_v38 = vrot.slane %v1391_v27, 4 }
  0x3f   : > { %881 = vmatmul.bf16.gmra.mxu2 %v813_v24  ;;  %1737 = vmatpush.bf16.msrb.mxu3 %v2902_v34  ;;  %v2864_v37 = vld [vmem:[#allocation2 + $0x1c] sm:$0xf0]  ;;  %v1396_v39 = vrot.slane %v1394_v28, 5  ;;  %v1407_v40 = vrot.slane %v1405_v29, 4  ;;  %v2493_v49 = vld [vmem:[#allocation2 + $0x30] sm:$0xf] }
  0x40   : > { %v785_v24 = vrot.slane %v783_v13, 5  ;;  %v2550_v48 = vor.u32 %v2864_v37, %v2549_v36  ;;  %v2854_v50 = vld [vmem:[#allocation2 + $0x34] sm:$0xf0]  ;;  %v2879_v1 = vld [vmem:[%s3492_s1 + $0x140] sm:$0xff]  ;;  %v1370_v2 = vld [vmem:[#allocation2 + $0x10] sm:$0xf] }
  0x41   : > { %608 = vmatpush.bf16.msrb.mxu1 %v2837_v22  ;;  %1175 = vmatpush.bf16.msrb.mxu0 %v2869_v23  ;;  %v771_v22 = vrot.slane %v769_v11, 5  ;;  %v781_v23 = vrot.slane %v780_v12, 4  ;;  %v1397_v51 = vor.u32 %v1396_v39, %v1393_v38  ;;  %v2494_v58 = vor.u32 %v2854_v50, %v2493_v49  ;;  %v2910_v60 = vld [vmem:[%s3492_s1 + $0x218] sm:$0xff]  ;;  %v2909_v4 = vld [vmem:[%s3492_s1 + $0x210] sm:$0xff]  ;;  %v2377_v11 = vld [vmem:[#allocation2 + $0x20] sm:$0xf] }
  0x42   : > { %1588 = vmatpush.bf16.msrb.mxu2 %v2889_v33  ;;  %v1372_v3 = vld [vmem:[#allocation2 + $0x18] sm:$0xf]  ;;  %v2908_v12 = vld [vmem:[%s3492_s1 + $0x208] sm:$0xff]  ;;  %v2895_v28 = vld [vmem:[#allocation2 + $0xc] sm:$0xf0] }
  0x43   : > { %1738 = vmatpush.bf16.msrb.mxu3 %v2901_v15  ;;  %v772_v33 = vsel %vm3201_vm5, %v767_v21, %v771_v22  ;;  %v786_v34 = vsel %vm3201_vm5, %v781_v23, %v785_v24  ;;  %v1398_v61 = vrot.slane %v1397_v51, 4  ;;  %v1433_v9 = vshrl.u32 %v1372_v3, 16  ;;  %v2833_v13 = vld [vmem:[#allocation2 + $0x24] sm:$0xf0]  ;;  %v2865_v15 = vld [vmem:[#allocation2 + $0x2c] sm:$0xf0] }
  0x44   : > { %v2378_v23 = vor.u32 %v2833_v13, %v2377_v11  ;;  %v2721_v27 = vld [vmem:[#allocation2 + $0x8] sm:$0xf]  ;;  %v1780_v37 = vld [vmem:[#allocation2 + $0x10] sm:$0xf]  ;;  %v1374_v38 = vld [vmem:[#allocation2 + $0x20] sm:$0xf] }
  0x45   : > { %609 = vmatpush.bf16.msrb.mxu1 %v2836_v31  ;;  %1176 = vmatpush.bf16.msrb.mxu0 %v2868_v32  ;;  %v2882_v31 = vld [vmem:[%s3492_s1 + $0x158] sm:$0xff]  ;;  %v2373_v32 = vld [vmem:[#allocation2 + $0x10] sm:$0xf]  ;;  %v1435_v21 = vrot.slane %v1433_v9, 4  ;;  %v1778_v36 = vld [vmem:[#allocation2 + $0x8] sm:$0xf] }
  0x46   : > { %1589 = vmatpush.bf16.msrb.mxu2 %v2888_v41  ;;  %v1410_v41 = vrot.slane %v1408_v30, 5  ;;  %v2374_v47 = vor.u32 %v2832_v35, %v2373_v32  ;;  %v2722_v35 = vor.u32 %v2895_v28, %v2721_v27  ;;  %v1450_v49 = vshll.u32 %v1374_v38, 16  ;;  %v1377_v9 = vld [vmem:[#allocation2 + $0x2c] sm:$0x1]  ;;  %v2875_v16 = vld [vmem:[#allocation2 + $0x4] sm:$0xf0] }
  0x47   : > { %1739 = vmatpush.bf16.msrb.mxu3 %v2900_v26  ;;  %v1373_v26 = vld [vmem:[#allocation2 + $0x1c] sm:$0x1] }
  0x48   : > { %v1411_v53 = vor.u32 %v1410_v41, %v1407_v40 }
  0x49   : > { %610 = vmatpush.bf16.msrb.mxu1 %v2835_v42  ;;  %1177 = vmatpush.bf16.msrb.mxu0 %v2867_v43  ;;  %v810_v42 = vunpack.c.l.b16 %v772_v33  ;;  %v811_v43 = vunpack.c.l.b16 %v786_v34  ;;  %v1442_v33 = vshll.u32 %v1373_v26, 16  ;;  %v2907_v34 = vld [vmem:[%s3492_s1 + $0x200] sm:$0xff] }
  0x4a   : > { %1590 = vmatpush.bf16.msrb.mxu2 %v2887_v14  ;;  %v2553_v14 = vld [vmem:[#allocation2 + $0x28] sm:$0xf] }
  0x4b   : > { %v815_v56 = vpack.c.b16 %v811_v43, %v810_v42  ;;  %1740 = vmatpush.bf16.msrb.mxu3 %v2899_v57  ;;  %v2554_v24 = vor.u32 %v2865_v15, %v2553_v14  ;;  %v1444_v42 = vrot.slane %v1442_v33, 5  ;;  %v1376_v43 = vld [vmem:[#allocation2 + $0x28] sm:$0xf]  ;;  %v2557_v57 = vld [vmem:[#allocation2 + $0x38] sm:$0xf] }
  0x4c   : > { %611 = vmatmul.bf16.vlgmr.msrb.gmra.mxu1 %v2370_v63  ;;  %1178 = vmatmul.bf16.vlgmr.msrb.gmra.mxu0 %v2546_v0  ;;  %v1412_v63 = vrot.slane %v1411_v53, 4  ;;  %v1461_v50 = vshrl.u32 %v1376_v43, 16  ;;  %v1464_v51 = vshll.u32 %v1376_v43, 16  ;;  %v2834_v53 = vld [vmem:[#allocation2 + $0x34] sm:$0xf0] }
  0x4d   : > { %1321 = vmatpush.bf16.msra.mxu1 %v2886_v44  ;;  %1995 = vmatpush.bf16.msra.mxu0 %v2914_v45  ;;  %v1367_v44 = vld [vmem:[#allocation2 + $0x4] sm:$0x1]  ;;  %v2725_v14 = vld [vmem:[#allocation2 + $0x18] sm:$0xf]  ;;  %v2896_v15 = vld [vmem:[#allocation2 + $0x1c] sm:$0xf0] }
  0x4e   : > { %1037 = vmatmul.bf16.gmra.mxu3 %v2490_v10  ;;  %3018 = vmatpush.bf16.msra.mxu2 %v2914_v45  ;;  %v1369_v45 = vld [vmem:[#allocation2 + $0xc] sm:$0x1]  ;;  %v1400_v52 = vshll.u32 %v1367_v44, 16  ;;  %v1436_v10 = vshll.u32 %v1372_v3, 16  ;;  %v1803_v44 = vshrl.u32 %v1778_v36, 16  ;;  %v1463_v3 = vrot.slane %v1461_v50, 4 }
  0x4f   : > { %886 = vmatmul.bf16.gmra.mxu2 %v814_v7  ;;  %v1414_v55 = vshll.u32 %v1369_v45, 16  ;;  %v1419_v7 = vshrl.u32 %v1370_v2, 16  ;;  %v1806_v45 = vshll.u32 %v1778_v36, 16 }
  0x50   : > { %v1438_v22 = vrot.slane %v1436_v10, 5 }
  0x51   : > { %1322 = vmatpush.bf16.msra.mxu1 %v2885_v59  ;;  %1996 = vmatpush.bf16.msra.mxu0 %v2913_v62  ;;  %v2880_v59 = vld [vmem:[%s3492_s1 + $0x148] sm:$0xff]  ;;  %v1416_v0 = vrot.slane %v1414_v55, 5  ;;  %v1421_v19 = vrot.slane %v1419_v7, 4 }
  0x52   : > { %3019 = vmatpush.bf16.msra.mxu2 %v2913_v62  ;;  %v1402_v62 = vrot.slane %v1400_v52, 5  ;;  %v1439_v32 = vor.u32 %v1438_v22, %v1435_v21  ;;  %v2381_v52 = vld [vmem:[#allocation2 + $0x30] sm:$0xf]  ;;  %v1470_v21 = vshll.u32 %v1377_v9, 16  ;;  %v1782_v22 = vld [vmem:[#allocation2 + $0x18] sm:$0xf] }
  0x53   : > { %v1417_v6 = vsel %vm3201_vm5, %v1412_v63, %v1416_v0  ;;  %v1779_v63 = vld [vmem:[#allocation2 + $0xc] sm:$0x1]  ;;  %v1381_v9 = vld [vmem:[#allocation2 + $0x3c] sm:$0x1] }
  0x54   : > { %v1403_v5 = vsel %vm3201_vm5, %v1398_v61, %v1402_v62  ;;  %v1440_v41 = vrot.slane %v1439_v32, 4  ;;  %v2866_v62 = vld [vmem:[#allocation2 + $0x3c] sm:$0xf0]  ;;  %v1834_v32 = vshll.u32 %v1782_v22, 16 }
  0x55   : > { %1323 = vmatpush.bf16.msra.mxu1 %v2884_v8  ;;  %1997 = vmatpush.bf16.msra.mxu0 %v2912_v17  ;;  %v1422_v8 = vshll.u32 %v1370_v2, 16  ;;  %v1781_v2 = vld [vmem:[#allocation2 + $0x14] sm:$0x1]  ;;  %v2558_v10 = vor.u32 %v2866_v62, %v2557_v57 }
  0x56   : > { %3020 = vmatpush.bf16.msra.mxu2 %v2912_v17  ;;  %v1519_v17 = vunpack.c.l.b16 %v1403_v5  ;;  %v2382_v5 = vor.u32 %v2834_v53, %v2381_v52 }
  0x57   : > { %v1424_v20 = vrot.slane %v1422_v8, 5  ;;  %v1375_v8 = vld [vmem:[#allocation2 + $0x24] sm:$0x1] }
  0x59   : > { %1324 = vmatpush.bf16.msra.mxu1 %v2883_v18  ;;  %1998 = vmatpush.bf16.msra.mxu0 %v2911_v25  ;;  %v1520_v18 = vunpack.c.l.b16 %v1417_v6  ;;  %v1425_v30 = vor.u32 %v1424_v20, %v1421_v19  ;;  %v1456_v19 = vshll.u32 %v1375_v8, 16 }
  0x5a   : > { %3021 = vmatpush.bf16.msra.mxu2 %v2911_v25  ;;  %v1371_v25 = vld [vmem:[#allocation2 + $0x14] sm:$0x1] }
  0x5b   : > { %v1527_v29 = vpack.c.b16 %v1520_v18, %v1519_v17  ;;  %v1426_v39 = vrot.slane %v1425_v30, 4  ;;  %v1826_v17 = vshll.u32 %v1781_v2, 16  ;;  %v1458_v33 = vrot.slane %v1456_v19, 5 }
  0x5c   : > { %616 = vmatmul.bf16.gmra.mxu1 %v2374_v47  ;;  %1183 = vmatmul.bf16.gmra.mxu0 %v2550_v48  ;;  %v1820_v47 = vshll.u32 %v1780_v37, 16  ;;  %v1447_v48 = vshrl.u32 %v1374_v38, 16  ;;  %v1378_v38 = vld [vmem:[#allocation2 + $0x30] sm:$0xf] }
  0x5d   : > { %1325 = vmatpush.bf16.msra.mxu1 %v2882_v31  ;;  %1999 = vmatpush.bf16.msra.mxu0 %v2910_v60  ;;  %v1428_v31 = vshll.u32 %v1371_v25, 16  ;;  %v2726_v25 = vor.u32 %v2896_v15, %v2725_v14  ;;  %v1475_v50 = vshrl.u32 %v1378_v38, 16  ;;  %v1478_v53 = vshll.u32 %v1378_v38, 16 }
  0x5e   : > { %1042 = vmatmul.bf16.gmra.mxu3 %v2494_v58  ;;  %3022 = vmatpush.bf16.msra.mxu2 %v2910_v60  ;;  %v1805_v58 = vrot.slane %v1803_v44, 4  ;;  %v1822_v61 = vrot.slane %v1820_v47, 5  ;;  %v1449_v0 = vrot.slane %v1447_v48, 4  ;;  %v1836_v44 = vrot.slane %v1834_v32, 5  ;;  %v1783_v48 = vld [vmem:[#allocation2 + $0x1c] sm:$0x1] }
  0x5f   : > { %891 = vmatmul.bf16.gmra.mxu2 %v815_v56  ;;  %v1430_v40 = vrot.slane %v1428_v31, 5  ;;  %v1445_v56 = vsel %vm3201_vm5, %v1440_v41, %v1444_v42  ;;  %v1831_v31 = vshrl.u32 %v1782_v22, 16  ;;  %v329_v41 = vld [vmem:[#allocation2 + $0x44] sm:$0x1] }
  0x60   : > { %v1522_v7 = vunpack.c.l.b16 %v1445_v56 }
  0x61   : > { %1326 = vmatpush.bf16.msra.mxu1 %v2881_v46  ;;  %2000 = vmatpush.bf16.msra.mxu0 %v2909_v4  ;;  %v1817_v46 = vshrl.u32 %v1780_v37, 16  ;;  %v1431_v55 = vsel %vm3201_vm5, %v1426_v39, %v1430_v40  ;;  %v1380_v40 = vld [vmem:[#allocation2 + $0x38] sm:$0xf]  ;;  %v1833_v43 = vrot.slane %v1831_v31, 4 }
  0x62   : > { %3023 = vmatpush.bf16.msra.mxu2 %v2909_v4  ;;  %v1466_v4 = vrot.slane %v1464_v51, 5  ;;  %v1521_v6 = vunpack.c.l.b16 %v1431_v55  ;;  %v1785_v51 = vld [vmem:[#allocation2 + $0x24] sm:$0x1]  ;;  %v1489_v55 = vshrl.u32 %v1380_v40, 16  ;;  %v1492_v56 = vshll.u32 %v1380_v40, 16 }
  0x63   : > { %v1819_v60 = vrot.slane %v1817_v46, 4  ;;  %v1837_v62 = vor.u32 %v1836_v44, %v1833_v43  ;;  %v2876_v40 = vld [vmem:[#allocation2 + $0x14] sm:$0xf0]  ;;  %v1787_v43 = vld [vmem:[#allocation2 + $0x2c] sm:$0x1] }
  0x64   : > { %v1467_v20 = vor.u32 %v1466_v4, %v1463_v3  ;;  %v1379_v3 = vld [vmem:[#allocation2 + $0x34] sm:$0x1]  ;;  %v1480_v4 = vrot.slane %v1478_v53, 5 }
  0x65   : > { %1327 = vmatpush.bf16.msra.mxu1 %v2880_v59  ;;  %2001 = vmatpush.bf16.msra.mxu0 %v2908_v12  ;;  %v1808_v59 = vrot.slane %v1806_v45, 5  ;;  %v1823_v13 = vor.u32 %v1822_v61, %v1819_v60  ;;  %v330_v45 = vsel %vm3160_vm2, 0, %v329_v41  ;;  %v1789_v44 = vld [vmem:[#allocation2 + $0x34] sm:$0x1] }
  0x66   : > { %3024 = vmatpush.bf16.msra.mxu2 %v2908_v12  ;;  %v1812_v12 = vshll.u32 %v1779_v63, 16  ;;  %331 = vst [vmem:[#allocation2 + $0x44] sm:$0x1] %v330_v45  ;;  %v1840_v63 = vshll.u32 %v1783_v48, 16 }
  0x67   : > { %v1809_v11 = vor.u32 %v1808_v59, %v1805_v58  ;;  %v1824_v28 = vrot.slane %v1823_v13, 4  ;;  %v2609_v59 = vld [vmem:[#allocation2] sm:$0xf]  ;;  %v1838_v13 = vrot.slane %v1837_v62, 4 }
  0x68   : > { %v1814_v27 = vrot.slane %v1812_v12, 5  ;;  %v2897_v12 = vld [vmem:[#allocation2 + $0x2c] sm:$0xf0]  ;;  %v1842_v14 = vrot.slane %v1840_v63, 5 }
  0x69   : > { %1328 = vmatpush.bf16.msra.mxu1 %v2879_v1  ;;  %2002 = vmatpush.bf16.msra.mxu0 %v2907_v34  ;;  %v1452_v1 = vrot.slane %v1450_v49, 5  ;;  %v1810_v26 = vrot.slane %v1809_v11, 4  ;;  %v2729_v11 = vld [vmem:[#allocation2 + $0x28] sm:$0xf] }
  0x6a   : > { %3025 = vmatpush.bf16.msra.mxu2 %v2907_v34  ;;  %v1468_v34 = vrot.slane %v1467_v20, 4  ;;  %v2730_v22 = vor.u32 %v2897_v12, %v2729_v11 }
  0x6b   : > { %v1453_v18 = vor.u32 %v1452_v1, %v1449_v0  ;;  %v1815_v39 = vsel %vm3201_vm5, %v1810_v26, %v1814_v27  ;;  %v1854_v0 = vshll.u32 %v1785_v51, 16  ;;  %v1477_v1 = vrot.slane %v1475_v50, 4  ;;  %v1788_v26 = vld [vmem:[#allocation2 + $0x30] sm:$0xf] }
  0x6c   : > { %621 = vmatmul.bf16.gmra.mxu1 %v2378_v23  ;;  %1188 = vmatmul.bf16.gmra.mxu0 %v2554_v24  ;;  %v1528_v23 = vpack.c.b16 %v1522_v7, %v1521_v6  ;;  %v1784_v24 = vld [vmem:[#allocation2 + $0x20] sm:$0xf]  ;;  %v1931_v57 = vunpack.c.l.b16 %v1815_v39  ;;  %v1494_v6 = vrot.slane %v1492_v56, 5  ;;  %v2610_v7 = vor.u32 %v2875_v16, %v2609_v59  ;;  %v2613_v39 = vld [vmem:[#allocation2 + $0x10] sm:$0xf] }
  0x6d   : > { %v1454_v30 = vrot.slane %v1453_v18, 4  ;;  %v1845_v36 = vshrl.u32 %v1784_v24, 16  ;;  %v1848_v37 = vshll.u32 %v1784_v24, 16  ;;  %v1856_v15 = vrot.slane %v1854_v0, 5  ;;  %v1791_v16 = vld [vmem:[#allocation2 + $0x3c] sm:$0x1] }
  0x6e   : > { %1741 = vmatmul.bf16.vlgmr.msrb.gmra.mxu3 %v2722_v35  ;;  %v1472_v35 = vrot.slane %v1470_v21, 5  ;;  %v1481_v19 = vor.u32 %v1480_v4, %v1477_v1  ;;  %v1498_v21 = vshll.u32 %v1381_v9, 16  ;;  %v1843_v24 = vsel %vm3201_vm5, %v1838_v13, %v1842_v14  ;;  %v2733_v0 = vld [vmem:[#allocation2 + $0x38] sm:$0xf]  ;;  %v2898_v1 = vld [vmem:[#allocation2 + $0x3c] sm:$0xf0] }
  0x6f   : > { %1591 = vmatmul.bf16.vlgmr.msrb.gmra.mxu2 %v1527_v29  ;;  %v1828_v29 = vrot.slane %v1826_v17, 5  ;;  %v1459_v46 = vsel %vm3201_vm5, %v1454_v30, %v1458_v33  ;;  %v1847_v49 = vrot.slane %v1845_v36, 4  ;;  %v1850_v52 = vrot.slane %v1848_v37, 5  ;;  %v1792_v36 = vld [vmem:[#allocation2 + $0x40] sm:$0xf] }
  0x70   : > { %v1473_v47 = vsel %vm3201_vm5, %v1468_v34, %v1472_v35  ;;  %v1523_v60 = vunpack.c.l.b16 %v1459_v46  ;;  %v1484_v17 = vshll.u32 %v1379_v3, 16  ;;  %v1500_v30 = vrot.slane %v1498_v21, 5  ;;  %v1790_v35 = vld [vmem:[#allocation2 + $0x38] sm:$0xf]  ;;  %v1793_v4 = vld [vmem:[#allocation2 + $0x44] sm:$0x1] }
  0x71   : > { %v1829_v42 = vsel %vm3201_vm5, %v1824_v28, %v1828_v29  ;;  %v1524_v61 = vunpack.c.l.b16 %v1473_v47  ;;  %v1851_v2 = vor.u32 %v1850_v52, %v1847_v49  ;;  %v1482_v28 = vrot.slane %v1481_v19, 4 }
  0x72   : > { %v1932_v58 = vunpack.c.l.b16 %v1829_v42  ;;  %v1873_v33 = vshrl.u32 %v1788_v26, 16  ;;  %v1876_v34 = vshll.u32 %v1788_v26, 16  ;;  %v1933_v37 = vunpack.c.l.b16 %v1843_v24  ;;  %v2617_v26 = vld [vmem:[#allocation2 + $0x20] sm:$0xf] }
  0x73   : > { %v1852_v18 = vrot.slane %v1851_v2, 4  ;;  %v1887_v45 = vshrl.u32 %v1790_v35, 16  ;;  %v1890_v46 = vshll.u32 %v1790_v35, 16  ;;  %v1901_v47 = vshrl.u32 %v1792_v36, 16  ;;  %v3426_v35 = vld [vmem:[%s3493_s2] ss:$0 sm:$0xff] }
  0x74   : > { %v1939_v8 = vpack.c.b16 %v1932_v58, %v1931_v57  ;;  %v1904_v48 = vshll.u32 %v1792_v36, 16  ;;  %v1875_v51 = vrot.slane %v1873_v33, 4  ;;  %v1878_v52 = vrot.slane %v1876_v34, 5 }
  0x75   : > { %v1857_v27 = vsel %vm3201_vm5, %v1852_v18, %v1856_v15  ;;  %v2614_v53 = vor.u32 %v2876_v40, %v2613_v39  ;;  %v1868_v58 = vshll.u32 %v1787_v43, 16  ;;  %v1882_v59 = vshll.u32 %v1789_v44, 16 }
  0x76   : > { %v1934_v38 = vunpack.c.l.b16 %v1857_v27  ;;  %v1903_v62 = vrot.slane %v1901_v47, 4  ;;  %v1906_v63 = vrot.slane %v1904_v48, 5  ;;  %v1879_v3 = vor.u32 %v1878_v52, %v1875_v51  ;;  %v2877_v27 = vld [vmem:[#allocation2 + $0x24] sm:$0xf0] }
  0x77   : > { %v1870_v12 = vrot.slane %v1868_v58, 5  ;;  %v1884_v14 = vrot.slane %v1882_v59, 5 }
  0x78   : > { %v1907_v9 = vor.u32 %v1906_v63, %v1903_v62  ;;  %v1880_v13 = vrot.slane %v1879_v3, 4 }
  0x7a   : > { %v1908_v18 = vrot.slane %v1907_v9, 4  ;;  %v1885_v21 = vsel %vm3201_vm5, %v1880_v13, %v1884_v14 }
  0x7c   : > { %626 = vmatmul.bf16.gmra.mxu1 %v2382_v5  ;;  %1193 = vmatmul.bf16.gmra.mxu0 %v2558_v10  ;;  %v1491_v5 = vrot.slane %v1489_v55, 4  ;;  %v1529_v10 = vpack.c.b16 %v1524_v61, %v1523_v60  ;;  %v1940_v55 = vpack.c.b16 %v1934_v38, %v1933_v37  ;;  %v1889_v60 = vrot.slane %v1887_v45, 4  ;;  %v2621_v45 = vld [vmem:[#allocation2 + $0x30] sm:$0xf] }
  0x7d   : > { %v1892_v61 = vrot.slane %v1890_v46, 5  ;;  %v2878_v46 = vld [vmem:[#allocation2 + $0x34] sm:$0xf0] }
  0x7e   : > { %1746 = vmatmul.bf16.gmra.mxu3 %v2726_v25  ;;  %v1495_v20 = vor.u32 %v1494_v6, %v1491_v5  ;;  %v1486_v25 = vrot.slane %v1484_v17, 5  ;;  %v1896_v6 = vshll.u32 %v1791_v16, 16  ;;  %v2622_v47 = vor.u32 %v2878_v46, %v2621_v45 }
  0x7f   : > { %1596 = vmatmul.bf16.gmra.mxu2 %v1528_v23  ;;  %v1786_v23 = vld [vmem:[#allocation2 + $0x28] sm:$0xf] }
  0x80   : > { %v1496_v29 = vrot.slane %v1495_v20, 4  ;;  %v1859_v31 = vshrl.u32 %v1786_v23, 16  ;;  %v1862_v32 = vshll.u32 %v1786_v23, 16  ;;  %v1487_v41 = vsel %vm3201_vm5, %v1482_v28, %v1486_v25 }
  0x81   : > { %v1525_v56 = vunpack.c.l.b16 %v1487_v41  ;;  %v1898_v17 = vrot.slane %v1896_v6, 5  ;;  %v1936_v23 = vunpack.c.l.b16 %v1885_v21 }
  0x82   : > { %v1501_v42 = vsel %vm3201_vm5, %v1496_v29, %v1500_v30  ;;  %v1861_v49 = vrot.slane %v1859_v31, 4  ;;  %v1864_v50 = vrot.slane %v1862_v32, 5  ;;  %v2618_v30 = vor.u32 %v2877_v27, %v2617_v26 }
  0x83   : > { %v1526_v57 = vunpack.c.l.b16 %v1501_v42 }
  0x84   : > { %v1865_v2 = vor.u32 %v1864_v50, %v1861_v49 }
  0x85   : > { %v1530_v5 = vpack.c.b16 %v1526_v57, %v1525_v56 }
  0x86   : > { %v1866_v11 = vrot.slane %v1865_v2, 4 }
  0x88   : > { %v1871_v20 = vsel %vm3201_vm5, %v1866_v11, %v1870_v12 }
  0x8c   : > { %1329 = vmatmul.bf16.vlgmr.msra.gmra.mxu1 %v2610_v7  ;;  %2003 = vmatmul.bf16.vlgmr.msra.gmra.mxu0 %v1939_v8  ;;  %v2734_v7 = vor.u32 %v2898_v1, %v2733_v0  ;;  %v1893_v8 = vor.u32 %v1892_v61, %v1889_v60 }
  0x8e   : > { %1751 = vmatmul.bf16.gmra.mxu3 %v2730_v22  ;;  %v1894_v15 = vrot.slane %v1893_v8, 4  ;;  %v1935_v22 = vunpack.c.l.b16 %v1871_v20 }
  0x8f   : > { %1601 = vmatmul.bf16.gmra.mxu2 %v1529_v10  ;;  %v1910_v10 = vshll.u32 %v1793_v4, 16 }
  0x90   : > { %v1899_v24 = vsel %vm3201_vm5, %v1894_v15, %v1898_v17  ;;  %v1941_v31 = vpack.c.b16 %v1936_v23, %v1935_v22 }
  0x91   : > { %v1912_v19 = vrot.slane %v1910_v10, 5  ;;  %v1937_v28 = vunpack.c.l.b16 %v1899_v24 }
  0x93   : > { %v1913_v25 = vsel %vm3201_vm5, %v1908_v18, %v1912_v19 }
  0x94   : > { %v1938_v29 = vunpack.c.l.b16 %v1913_v25 }
  0x96   : > { %v1942_v34 = vpack.c.b16 %v1938_v29, %v1937_v28 }
  0x9c   : > { %1334 = vmatmul.bf16.gmra.mxu1 %v2614_v53  ;;  %2008 = vmatmul.bf16.gmra.mxu0 %v1940_v55 }
  0x9e   : > { %1756 = vmatmul.bf16.gmra.mxu3 %v2734_v7 }
  0x9f   : > { %1606 = vmatmul.bf16.gmra.mxu2 %v1530_v5 }
  0xa9   : > { %v461_v32 = vpop.f32.mrf.mxu0  ;;  %v471_v33 = vpop.f32.mrf.mxu1 }
  0xaa   : > { %v2079_v54 = vadd.f32 %v3426_v35, %v461_v32  ;;  %v2083_v38 = vadd.f32 %v3426_v35, %v471_v33 }
  0xac   : > { %1339 = vmatmul.bf16.gmra.mxu1 %v2618_v30  ;;  %2013 = vmatmul.bf16.gmra.mxu0 %v1941_v31 }
  0xaf   : > { %2018 = vmatmul.bf16.vlgmr.msra.gmra.mxu2 %v1942_v34 }
  0xb1   : > { %v463_v36 = vpop.f32.mrf.mxu0  ;;  %v473_v37 = vpop.f32.mrf.mxu1 }
  0xb2   : > { %v2080_v39 = vadd.f32 %v3426_v35, %v463_v36  ;;  %v2084_v40 = vadd.f32 %v3426_v35, %v473_v37  ;;  %v877_v41 = vpop.f32.mrf.mxu2  ;;  %v1028_v42 = vpop.f32.mrf.mxu3 }
  0xb4   : > { %v2918_v43 = vpack.c.bf16 %v2080_v39, %v2079_v54  ;;  %v2928_v44 = vpack.c.bf16 %v2084_v40, %v2083_v38 }
  0xb6   : > { %2919 = vst [vmem:[%s3436_s4] sm:$0xff] %v2918_v43  }
  0xb7   : > { %2996 = vst [vmem:[%s3436_s4 + $0x10] sm:$0xff] %v2928_v44  }
  0xb9   : > { %v466_v48 = vpop.f32.mrf.mxu0  ;;  %v476_v49 = vpop.f32.mrf.mxu1 }
  0xba   : > { %v879_v50 = vpop.f32.mrf.mxu2  ;;  %v1030_v51 = vpop.f32.mrf.mxu3  ;;  %v2081_v52 = vadd.f32 %v3426_v35, %v466_v48  ;;  %v2085_v56 = vadd.f32 %v3426_v35, %v476_v49 }
  0xbc   : > { %1344 = vmatmul.bf16.gmra.mxu1 %v2622_v47 }
  0xc1   : > { %v468_v53 = vpop.f32.mrf.mxu0  ;;  %v478_v55 = vpop.f32.mrf.mxu1 }
  0xc2   : > { %v2082_v57 = vadd.f32 %v3426_v35, %v468_v53  ;;  %v2086_v58 = vadd.f32 %v3426_v35, %v478_v55  ;;  %v882_v59 = vpop.f32.mrf.mxu2  ;;  %v1033_v16 = vpop.f32.mrf.mxu3 }
  0xc4   : > { %v2923_v60 = vpack.c.bf16 %v2082_v57, %v2081_v52  ;;  %v2933_v61 = vpack.c.bf16 %v2086_v58, %v2085_v56 }
  0xc6   : > { %2995 = vst [vmem:[%s3436_s4 + $0x8] sm:$0xff] %v2923_v60  }
  0xc7   : > { %2997 = vst [vmem:[%s3436_s4 + $0x18] sm:$0xff] %v2933_v61  }
  0xc9   : > { %v612_v62 = vpop.f32.mrf.mxu1  ;;  %v1179_v63 = vpop.f32.mrf.mxu0 }
  0xca   : > { %v884_v0 = vpop.f32.mrf.mxu2  ;;  %v1035_v1 = vpop.f32.mrf.mxu3  ;;  %v897_v2 = vadd.f32 %v877_v41, %v612_v62  ;;  %v1199_v3 = vadd.f32 %v1179_v63, %v1028_v42 }
  0xcc   : > { %v2087_v9 = vadd.f32 %v3426_v35, %v897_v2  ;;  %v2095_v10 = vadd.f32 %v3426_v35, %v1199_v3 }
  0xd1   : > { %v614_v4 = vpop.f32.mrf.mxu1  ;;  %v1181_v5 = vpop.f32.mrf.mxu0 }
  0xd2   : > { %v898_v6 = vadd.f32 %v879_v50, %v614_v4  ;;  %v1200_v7 = vadd.f32 %v1181_v5, %v1030_v51  ;;  %v887_v8 = vpop.f32.mrf.mxu2  ;;  %v1038_v13 = vpop.f32.mrf.mxu3 }
  0xd4   : > { %v2088_v11 = vadd.f32 %v3426_v35, %v898_v6  ;;  %v2096_v12 = vadd.f32 %v3426_v35, %v1200_v7 }
  0xd6   : > { %v2938_v14 = vpack.c.bf16 %v2088_v11, %v2087_v9  ;;  %v2958_v15 = vpack.c.bf16 %v2096_v12, %v2095_v10 }
  0xd8   : > { %2998 = vst [vmem:[%s3436_s4 + $0x20] sm:$0xff] %v2938_v14  }
  0xd9   : > { %3002 = vst [vmem:[%s3436_s4 + $0x40] sm:$0xff] %v2958_v15   ;;  %v617_v17 = vpop.f32.mrf.mxu1  ;;  %v1184_v18 = vpop.f32.mrf.mxu0 }
  0xda   : > { %v889_v19 = vpop.f32.mrf.mxu2  ;;  %v1040_v20 = vpop.f32.mrf.mxu3  ;;  %v899_v21 = vadd.f32 %v882_v59, %v617_v17  ;;  %v1201_v22 = vadd.f32 %v1184_v18, %v1033_v16 }
  0xdc   : > { %v2089_v28 = vadd.f32 %v3426_v35, %v899_v21  ;;  %v2097_v29 = vadd.f32 %v3426_v35, %v1201_v22 }
  0xe1   : > { %v619_v23 = vpop.f32.mrf.mxu1  ;;  %v1186_v24 = vpop.f32.mrf.mxu0 }
  0xe2   : > { %v900_v25 = vadd.f32 %v884_v0, %v619_v23  ;;  %v1202_v26 = vadd.f32 %v1186_v24, %v1035_v1  ;;  %v892_v27 = vpop.f32.mrf.mxu2  ;;  %v1043_v34 = vpop.f32.mrf.mxu3 }
  0xe4   : > { %v2090_v30 = vadd.f32 %v3426_v35, %v900_v25  ;;  %v2098_v31 = vadd.f32 %v3426_v35, %v1202_v26 }
  0xe6   : > { %v2943_v32 = vpack.c.bf16 %v2090_v30, %v2089_v28  ;;  %v2963_v33 = vpack.c.bf16 %v2098_v31, %v2097_v29 }
  0xe8   : > { %2999 = vst [vmem:[%s3436_s4 + $0x28] sm:$0xff] %v2943_v32  }
  0xe9   : > { %3003 = vst [vmem:[%s3436_s4 + $0x48] sm:$0xff] %v2963_v33   ;;  %v622_v54 = vpop.f32.mrf.mxu1  ;;  %v1189_v36 = vpop.f32.mrf.mxu0 }
  0xea   : > { %v894_v37 = vpop.f32.mrf.mxu2  ;;  %v901_v38 = vadd.f32 %v887_v8, %v622_v54  ;;  %v1203_v39 = vadd.f32 %v1189_v36, %v1038_v13  ;;  %v1045_v45 = vpop.f32.mrf.mxu3 }
  0xec   : > { %v2091_v46 = vadd.f32 %v3426_v35, %v901_v38  ;;  %v2099_v47 = vadd.f32 %v3426_v35, %v1203_v39 }
  0xf1   : > { %v624_v40 = vpop.f32.mrf.mxu1  ;;  %v1191_v41 = vpop.f32.mrf.mxu0 }
  0xf2   : > { %v902_v42 = vadd.f32 %v889_v19, %v624_v40  ;;  %v1204_v43 = vadd.f32 %v1191_v41, %v1040_v20  ;;  %v1592_v44 = vpop.f32.mrf.mxu2  ;;  %v1742_v56 = vpop.f32.mrf.mxu3 }
  0xf4   : > { %v2092_v48 = vadd.f32 %v3426_v35, %v902_v42  ;;  %v2100_v49 = vadd.f32 %v3426_v35, %v1204_v43 }
  0xf6   : > { %v2948_v50 = vpack.c.bf16 %v2092_v48, %v2091_v46  ;;  %v2968_v51 = vpack.c.bf16 %v2100_v49, %v2099_v47 }
  0xf8   : > { %3000 = vst [vmem:[%s3436_s4 + $0x30] sm:$0xff] %v2948_v50  }
  0xf9   : > { %3004 = vst [vmem:[%s3436_s4 + $0x50] sm:$0xff] %v2968_v51   ;;  %v627_v52 = vpop.f32.mrf.mxu1  ;;  %v1194_v53 = vpop.f32.mrf.mxu0 }
  0xfa   : > { %v1594_v55 = vpop.f32.mrf.mxu2  ;;  %v903_v57 = vadd.f32 %v892_v27, %v627_v52  ;;  %v1205_v58 = vadd.f32 %v1194_v53, %v1043_v34  ;;  %v1744_v5 = vpop.f32.mrf.mxu3 }
  0xfc   : > { %v2093_v63 = vadd.f32 %v3426_v35, %v903_v57  ;;  %v2101_v0 = vadd.f32 %v3426_v35, %v1205_v58 }
 0x101   : > { %v629_v59 = vpop.f32.mrf.mxu1  ;;  %v1196_v16 = vpop.f32.mrf.mxu0 }
 0x102   : > { %v904_v60 = vadd.f32 %v894_v37, %v629_v59  ;;  %v1206_v61 = vadd.f32 %v1196_v16, %v1045_v45  ;;  %v1597_v62 = vpop.f32.mrf.mxu2  ;;  %v1747_v11 = vpop.f32.mrf.mxu3 }
 0x104   : > { %v2094_v1 = vadd.f32 %v3426_v35, %v904_v60  ;;  %v2102_v2 = vadd.f32 %v3426_v35, %v1206_v61 }
 0x106   : > { %v2953_v3 = vpack.c.bf16 %v2094_v1, %v2093_v63  ;;  %v2973_v4 = vpack.c.bf16 %v2102_v2, %v2101_v0 }
 0x108   : > { %3001 = vst [vmem:[%s3436_s4 + $0x38] sm:$0xff] %v2953_v3  }
 0x109   : > { %3005 = vst [vmem:[%s3436_s4 + $0x58] sm:$0xff] %v2973_v4   ;;  %v1330_v6 = vpop.f32.mrf.mxu1  ;;  %v2004_v7 = vpop.f32.mrf.mxu0 }
 0x10a   : > { %v1599_v8 = vpop.f32.mrf.mxu2  ;;  %v1612_v9 = vadd.f32 %v1592_v44, %v1330_v6  ;;  %v1749_v25 = vpop.f32.mrf.mxu3 }
 0x10c   : > { %v1762_v10 = vadd.f32 %v1742_v56, %v1612_v9 }
 0x10e   : > { %v2024_v17 = vadd.f32 %v2004_v7, %v1762_v10 }
 0x110   : > { %v2103_v20 = vadd.f32 %v3426_v35, %v2024_v17 }
 0x111   : > { %v1332_v12 = vpop.f32.mrf.mxu1  ;;  %v2006_v13 = vpop.f32.mrf.mxu0 }
 0x112   : > { %v1613_v14 = vadd.f32 %v1594_v55, %v1332_v12  ;;  %v1602_v15 = vpop.f32.mrf.mxu2  ;;  %v1752_v34 = vpop.f32.mrf.mxu3 }
 0x114   : > { %v1763_v18 = vadd.f32 %v1744_v5, %v1613_v14 }
 0x116   : > { %v2025_v19 = vadd.f32 %v2006_v13, %v1763_v18 }
 0x118   : > { %v2104_v21 = vadd.f32 %v3426_v35, %v2025_v19 }
 0x119   : > { %v1335_v22 = vpop.f32.mrf.mxu1  ;;  %v2009_v23 = vpop.f32.mrf.mxu0 }
 0x11a   : > { %v2978_v24 = vpack.c.bf16 %v2104_v21, %v2103_v20  ;;  %v1614_v26 = vadd.f32 %v1597_v62, %v1335_v22  ;;  %v1604_v27 = vpop.f32.mrf.mxu2  ;;  %v1754_v43 = vpop.f32.mrf.mxu3 }
 0x11c   : > { %3006 = vst [vmem:[%s3436_s4 + $0x60] sm:$0xff] %v2978_v24   ;;  %v1764_v28 = vadd.f32 %v1747_v11, %v1614_v26 }
 0x11e   : > { %v2026_v32 = vadd.f32 %v2009_v23, %v1764_v28 }
 0x120   : > { %v2105_v37 = vadd.f32 %v3426_v35, %v2026_v32 }
 0x121   : > { %v1337_v29 = vpop.f32.mrf.mxu1  ;;  %v2011_v30 = vpop.f32.mrf.mxu0 }
 0x122   : > { %v1615_v31 = vadd.f32 %v1599_v8, %v1337_v29  ;;  %v1607_v36 = vpop.f32.mrf.mxu2  ;;  %v1757_v55 = vpop.f32.mrf.mxu3 }
 0x124   : > { %v1765_v33 = vadd.f32 %v1749_v25, %v1615_v31 }
 0x126   : > { %v2027_v54 = vadd.f32 %v2011_v30, %v1765_v33 }
 0x128   : > { %v2106_v38 = vadd.f32 %v3426_v35, %v2027_v54 }
 0x129   : > { %v1340_v39 = vpop.f32.mrf.mxu1  ;;  %v2014_v40 = vpop.f32.mrf.mxu0 }
 0x12a   : > { %v2983_v41 = vpack.c.bf16 %v2106_v38, %v2105_v37  ;;  %v1616_v42 = vadd.f32 %v1602_v15, %v1340_v39  ;;  %v1609_v45 = vpop.f32.mrf.mxu2  ;;  %v1759_v62 = vpop.f32.mrf.mxu3 }
 0x12c   : > { %3007 = vst [vmem:[%s3436_s4 + $0x68] sm:$0xff] %v2983_v41   ;;  %v1766_v44 = vadd.f32 %v1752_v34, %v1616_v42 }
 0x12e   : > { %v2028_v49 = vadd.f32 %v2014_v40, %v1766_v44 }
 0x130   : > { %v2107_v52 = vadd.f32 %v3426_v35, %v2028_v49 }
 0x131   : > { %v1342_v46 = vpop.f32.mrf.mxu1  ;;  %v2016_v48 = vpop.f32.mrf.mxu0 }
 0x132   : > { %v1617_v47 = vadd.f32 %v1604_v27, %v1342_v46  ;;  %v2019_v58 = vpop.f32.mrf.mxu2 }
 0x134   : > { %v1767_v50 = vadd.f32 %v1754_v43, %v1617_v47 }
 0x136   : > { %v2029_v51 = vadd.f32 %v2016_v48, %v1767_v50 }
 0x138   : > { %v2108_v53 = vadd.f32 %v3426_v35, %v2029_v51 }
 0x139   : > { %v1345_v56 = vpop.f32.mrf.mxu1 }
 0x13a   : > { %v2988_v57 = vpack.c.bf16 %v2108_v53, %v2107_v52  ;;  %v1618_v59 = vadd.f32 %v1607_v36, %v1345_v56  ;;  %v2021_v1 = vpop.f32.mrf.mxu2 }
 0x13c   : > { %3008 = vst [vmem:[%s3436_s4 + $0x70] sm:$0xff] %v2988_v57   ;;  %v1768_v16 = vadd.f32 %v1757_v55, %v1618_v59 }
 0x13e   : > { %v2030_v63 = vadd.f32 %v2019_v58, %v1768_v16 }
 0x140   : > { %v2109_v3 = vadd.f32 %v3426_v35, %v2030_v63 }
 0x141   : > { %v1347_v60 = vpop.f32.mrf.mxu1 }
 0x142   : > { %v1619_v61 = vadd.f32 %v1609_v45, %v1347_v60 }
 0x144   : > { %v1769_v0 = vadd.f32 %v1759_v62, %v1619_v61 }
 0x146   : > { %v2031_v2 = vadd.f32 %v2021_v1, %v1769_v0 }
 0x148   : > { %v2110_v4 = vadd.f32 %v3426_v35, %v2031_v2 }
 0x14a   : > { %v2993_v5 = vpack.c.bf16 %v2110_v4, %v2109_v3 }
 0x14c   : > { %3009 = vst [vmem:[%s3436_s4 + $0x78] sm:$0xff] %v2993_v5  }
 0x14d PF: > { %s13_s14 = sadd.s32 1, %s3074_s14   ;;  %s3499_s12 = smov %s3070_s13 }
 0x14e   : > { %p10_p5 = scmp.ge.s32.totalorder %s13_s14, 4   ;;  %s3500_s13 = smov %s3502_s15 }
 0x150   :  { %12 = sbr.rel (!%p10_p5) target bundleno = 2 (0x2), region = 88 }

</bundles_post_ra>
